<compile_context>
chip_gen: v7x
topology: tpu7x:2x2x1
jax: 0.10.0
libtpu: 0.0.40
codegen_flags: <defaults>
</compile_context>

<pallas_src>
import jax
import jax.numpy as jnp
from jax.experimental import pallas as pl
from jax.experimental.pallas import tpu as pltpu

_SMEM = pltpu.MemorySpace.SMEM


def _vmem_limit_bytes():
    """Generation-dependent scoped-VMEM limit.

    ~100 MiB on 128-MiB parts (v5e/v6e), ~44 MiB on 64-MiB parts (v7x) leaving
    headroom for compiler scratch and BlockSpec double-buffers.
    """
    try:
        cap = pltpu.get_tpu_info().vmem_capacity_bytes
    except Exception:
        cap = 64 * 1024 * 1024
    if cap >= 120 * 1024 * 1024:
        return 100 * 1024 * 1024
    return 44 * 1024 * 1024


def _pick_tile(total, candidates):
    for c in candidates:
        if c <= total and total % c == 0:
            return c
    return total  # falls back to the full dim (always a legal block)


# ---------------------------------------------------------------------------
# Kernel 1: per-layer input projection (both directions), tiled over
# (T*B rows) x (4H gate columns).  gates = X @ W_ih + b, emitted bf16.
# ---------------------------------------------------------------------------
def _make_input_proj_kernel(shared_input, out_dtype):
    def kernel(x_ref, w_ref, b_ref, g_ref):
        if shared_input:                       # layer 0: fwd/bwd share input
            x0 = x_ref[...].astype(jnp.bfloat16)
            x1 = x0
        else:
            x0 = x_ref[0].astype(jnp.bfloat16)
            x1 = x_ref[1].astype(jnp.bfloat16)
        g0 = jnp.dot(x0, w_ref[0], preferred_element_type=jnp.float32) + b_ref[0]
        g1 = jnp.dot(x1, w_ref[1], preferred_element_type=jnp.float32) + b_ref[1]
        g_ref[0] = g0.astype(out_dtype)
        g_ref[1] = g1.astype(out_dtype)
    return kernel


def input_projection(x, w_ih, b, *, shared_input, vmem_limit,
                     gate_dtype=jnp.bfloat16):
    """x: (T,B,P) if shared_input else (2,T,B,P).  Returns gates (2,T,B,4H)."""
    if shared_input:
        T, B, P = x.shape
        x2 = x.reshape(T * B, P)
    else:
        _, T, B, P = x.shape
        x2 = x.reshape(2, T * B, P)
    rows = T * B
    H4 = w_ih.shape[2]
    tm = _pick_tile(rows, (512, 256, 128, 64, 32, 16))   # row tile
    tn = _pick_tile(H4, (512, 256, 128))                 # gate-column tile
    if shared_input:
        x_spec = pl.BlockSpec((tm, P), lambda i, j: (i, 0))
    else:
        x_spec = pl.BlockSpec((2, tm, P), lambda i, j: (0, i, 0))
    gates = pl.pallas_call(
        _make_input_proj_kernel(shared_input, gate_dtype),
        out_shape=jax.ShapeDtypeStruct((2, rows, H4), gate_dtype),
        grid=(rows // tm, H4 // tn),
        in_specs=[x_spec,
                  pl.BlockSpec((2, P, tn), lambda i, j: (0, 0, j)),
                  pl.BlockSpec((2, 1, tn), lambda i, j: (0, 0, j))],
        out_specs=pl.BlockSpec((2, tm, tn), lambda i, j: (0, i, j)),
        compiler_params=pltpu.CompilerParams(
            dimension_semantics=("parallel", "parallel"),
            vmem_limit_bytes=vmem_limit),
    )(x2, w_ih, b)
    return gates.reshape(2, T, B, H4)


# ---------------------------------------------------------------------------
# Kernel 2: fused bidirectional LSTM-with-projection recurrence.
# grid=(2,) over directions ("parallel" -> one TC per direction on v7x);
# gates streamed from HBM with a manual per-timestep double buffer.
# ---------------------------------------------------------------------------
def _make_bilstm_kernel(T, B, P, H, add_residual, cell_clip, proj_clip):
    def kernel(*refs):
        if add_residual:
            gates_hbm, whh_ref, wp_ref, x_ref, out_ref, gbuf, sem = refs
        else:
            gates_hbm, whh_ref, wp_ref, out_ref, gbuf, sem = refs
            x_ref = None

        d = pl.program_id(0)                   # 0 = forward, 1 = backward

        def t_src(t):                          # forward-layout time index
            return jnp.where(d == 0, t, T - 1 - t)

        def fetch(t, slot):
            pltpu.make_async_copy(gates_hbm.at[d, t_src(t)], gbuf.at[slot],
                                  sem.at[slot]).start()

        def wait(slot):
            pltpu.make_async_copy(gates_hbm.at[0, 0], gbuf.at[slot],
                                  sem.at[slot]).wait()

        # Per-direction weights resident across the whole time loop (halves
        # per-core weight VMEM when the directions shard across TensorCores).
        whh = whh_ref[...]                     # (P, 4H) bf16
        wp = wp_ref[...]                       # (H, P)  bf16

        fetch(0, 0)                            # prime the double buffer

        def step(t, carry):
            h, c = carry
            slot = t % 2
            wait(slot)

            @pl.when(t + 1 < T)
            def _():
                fetch(t + 1, 1 - slot)         # prefetch next timestep's slab

            # Only the recurrent h @ W_hh matmul remains in the serial loop.
            g = (gbuf[slot].astype(jnp.float32)
                 + jnp.dot(h.astype(jnp.bfloat16), whh,
                           preferred_element_type=jnp.float32))
            # Gate column order [i, f, o | g]: one sigmoid over a contiguous
            # 3H slice + one tanh over the trailing H slice (H is a multiple
            # of 128 -> all slices lane-aligned).
            sig = jax.nn.sigmoid(g[:, :3 * H])
            i_g = sig[:, 0 * H:1 * H]
            f_g = sig[:, 1 * H:2 * H]
            o_g = sig[:, 2 * H:3 * H]
            g_g = jnp.tanh(g[:, 3 * H:])
            c = f_g * c + i_g * g_g
            c = jnp.clip(c, -cell_clip, cell_clip)      # memory_cell_clip
            ht = o_g * jnp.tanh(c)
            h = jnp.dot(ht.astype(jnp.bfloat16), wp,
                        preferred_element_type=jnp.float32)
            h = jnp.clip(h, -proj_clip, proj_clip)      # state_projection_clip

            o = h
            if add_residual:                   # ElmoLstm skip (layers > 0)
                o = o + x_ref[t_src(t)]
            out_ref[t_src(t)] = o
            return h, c

        h0 = jnp.zeros((B, P), jnp.float32)
        c0 = jnp.zeros((B, H), jnp.float32)
        # Full unroll only at toy T; partial unroll keeps LLO cross-step
        # overlap without the instruction / vreg-pressure blowup at real T.
        unroll = True if T <= 16 else 4
        jax.lax.fori_loop(0, T, step, (h0, c0), unroll=unroll)

    return kernel


def bilstm_layer(gates, x_prev, w_hh, w_proj, *, add_residual, cell_clip,
                 proj_clip, vmem_limit):
    """gates: (2,T,B,4H) (HBM-resident); x_prev: (2,T,B,P) residual input.

    Returns the direction-stacked layer output (2, T, B, P) f32.
    """
    _, T, B, H4 = gates.shape
    H = H4 // 4
    P = w_hh.shape[1]
    inputs = [gates, w_hh, w_proj]
    in_specs = [
        pl.BlockSpec(memory_space=pl.ANY),                     # gates in HBM
        pl.BlockSpec((None, P, H4), lambda d: (d, 0, 0)),      # W_hh[d]
        pl.BlockSpec((None, H, P), lambda d: (d, 0, 0)),       # W_proj[d]
    ]
    if add_residual:
        inputs.append(x_prev)
        in_specs.append(pl.BlockSpec((None, T, B, P), lambda d: (d, 0, 0, 0)))
    return pl.pallas_call(
        _make_bilstm_kernel(T, B, P, H, add_residual, cell_clip, proj_clip),
        out_shape=jax.ShapeDtypeStruct((2, T, B, P), jnp.float32),
        grid=(2,),
        in_specs=in_specs,
        out_specs=pl.BlockSpec((None, T, B, P), lambda d: (d, 0, 0, 0)),
        scratch_shapes=[pltpu.VMEM((2, B, H4), gates.dtype),   # gate dbl-buf
                        pltpu.SemaphoreType.DMA((2,))],
        compiler_params=pltpu.CompilerParams(
            dimension_semantics=("parallel",),                 # 1 dir / TC
            vmem_limit_bytes=vmem_limit),
    )(*inputs)


# ---------------------------------------------------------------------------
# Kernel 3: ScalarMix  gamma * sum_k softmax(s)_k * layer_k, writing the
# concatenated (fwd | bwd) representation already batch-major (B, T, 2P).
# ---------------------------------------------------------------------------
def _make_scalar_mix_kernel(n_layers):
    def kernel(w_ref, emb_ref, *refs):
        reps = refs[:n_layers]                 # each (2, tt, B, P)
        out_ref = refs[n_layers]               # (B, tt, 2P)
        e = emb_ref[...]                       # layer-0 rep (both halves)
        m_f = w_ref[0] * e
        m_b = w_ref[0] * e
        for k in range(n_layers):
            m_f = m_f + w_ref[k + 1] * reps[k][0]
            m_b = m_b + w_ref[k + 1] * reps[k][1]
        gamma = w_ref[n_layers + 1]
        mixed = gamma * jnp.concatenate([m_f, m_b], axis=-1)   # (tt, B, 2P)
        # Fused (T,B,2P) -> (B,T,2P) transpose rides the layout/XLU path.
        out_ref[...] = pltpu.einshape("tbd->btd", mixed)
    return kernel


def scalar_mix(emb, layer_reps, norm_w, gamma, *, vmem_limit):
    """emb: (T,B,P); layer_reps: list of (2,T,B,P).  Returns (B, T, 2P)."""
    n_layers = len(layer_reps)
    T, B, P = emb.shape
    w = jnp.concatenate([norm_w.astype(jnp.float32),
                         jnp.reshape(gamma, (1,)).astype(jnp.float32)])
    # Time tile from an ~8 MiB live-block budget (x2 for double buffering).
    per_t_bytes = (1 + 2 * n_layers + 2) * B * P * 4 * 2
    cap = max(8, (8 * 1024 * 1024) // per_t_bytes)
    tt = T if T <= cap else (cap // 8) * 8
    emb_spec = pl.BlockSpec((tt, B, P), lambda i: (i, 0, 0))
    rep_spec = pl.BlockSpec((2, tt, B, P), lambda i: (0, i, 0, 0))
    return pl.pallas_call(
        _make_scalar_mix_kernel(n_layers),
        out_shape=jax.ShapeDtypeStruct((B, T, 2 * P), jnp.float32),
        grid=(pl.cdiv(T, tt),),
        in_specs=[pl.BlockSpec(memory_space=_SMEM), emb_spec]
                 + [rep_spec] * n_layers,
        out_specs=pl.BlockSpec((B, tt, 2 * P), lambda i: (0, i, 0)),
        compiler_params=pltpu.CompilerParams(
            dimension_semantics=("parallel",),
            vmem_limit_bytes=vmem_limit),
    )(w, emb, *layer_reps)


# ---------------------------------------------------------------------------
# ElmoEmbedding equivalent (synthetic, deterministic parameters)
# ---------------------------------------------------------------------------
class ElmoEmbeddingPallas:
    """Forward-pass equivalent of ElmoEmbedding with synthetic parameters.

    The char-CNN + highway + projection stack is represented by its cached
    per-vocab-word output (the vocab_to_cache path) -> an embedding table.
    """

    def __init__(self, key, vocab_size=50, proj_dim=128, lstm_hidden=128,
                 num_layers=2, cell_clip=3.0, proj_clip=3.0):
        self.P = proj_dim
        self.H = lstm_hidden
        self.num_layers = num_layers
        self.cell_clip = cell_clip
        self.proj_clip = proj_clip
        self.vmem_limit = _vmem_limit_bytes()

        keys = jax.random.split(key, 2 + num_layers * 8)
        kit = iter(keys)

        def init(shape, scale=0.1, dtype=jnp.float32):
            v = scale * jax.random.normal(next(kit), shape, dtype=jnp.float32)
            return v.astype(dtype)

        # Cached word embedding (stand-in for char-CNN + highway + proj).
        self.embedding = init((vocab_size, proj_dim), scale=1.0)

        # Per layer: direction-stacked weights (0 = fwd, 1 = bwd), bf16 for
        # the MXU.  Gate column order here is [i, f, o, g]; real ELMo weights
        # (allennlp order [i, f, g, o]) need a column permutation when loaded.
        # TODO(synk): weight-loading permutation for pretrained ELMo weights.
        self.layers = []
        for _ in range(num_layers):
            self.layers.append(dict(
                w_ih=init((2, proj_dim, 4 * lstm_hidden), dtype=jnp.bfloat16),
                w_hh=init((2, proj_dim, 4 * lstm_hidden), dtype=jnp.bfloat16),
                b=init((2, 1, 4 * lstm_hidden)),
                w_proj=init((2, lstm_hidden, proj_dim), dtype=jnp.bfloat16),
            ))

        # ScalarMix over num_layers + 1 = 3 layer representations.
        s = init((num_layers + 1,), scale=0.5)
        self.norm_w = jax.nn.softmax(s)
        self.gamma = jnp.float32(1.0)

    def __call__(self, word_ids):
        # dropout=0, requires_grad=False -> deterministic forward.
        # TODO(synk): allennlp adds <S>/</S> boundary tokens and applies the
        # sequence mask (also inside ScalarMix); omitted - all tokens valid.
        B_in, T = word_ids.shape
        pad = (-B_in) % 8
        if pad:
            # Pad batch to a sublane multiple: fills MXU rows of the serial
            # recurrent matmuls and keeps per-step stores sublane-aligned.
            word_ids = jnp.pad(word_ids, ((0, pad), (0, 0)))

        # TODO(synk): the embedding gather could be fused into the first
        # input-projection kernel via scalar-prefetched ids + pl.Element.
        emb = jnp.take(self.embedding, word_ids.T, axis=0)    # (T, Bp, P) f32

        layer_reps = []                       # stacked (2, T, Bp, P) per layer
        x = None
        for li, p in enumerate(self.layers):
            gates = input_projection(
                emb if li == 0 else x, p["w_ih"], p["b"],
                shared_input=(li == 0), vmem_limit=self.vmem_limit)
            x = bilstm_layer(
                gates, x, p["w_hh"], p["w_proj"],
                add_residual=(li > 0),
                cell_clip=self.cell_clip, proj_clip=self.proj_clip,
                vmem_limit=self.vmem_limit)
            layer_reps.append(x)

        mixed = scalar_mix(emb, layer_reps, self.norm_w, self.gamma,
                           vmem_limit=self.vmem_limit)         # (Bp, T, 2P)
        return mixed[:B_in]                                    # (B, T, 2P)


if __name__ == "__main__":
    key = jax.random.PRNGKey(0)
    k_model, k_ids = jax.random.split(key)

    # Small, lane-aligned demo shapes (P and H multiples of 128 keep every
    # gate slice / store lane-dense; real ELMo uses P=512, H=4096).
    B, T, V = 2, 8, 50
    model = ElmoEmbeddingPallas(k_model, vocab_size=V, proj_dim=128,
                                lstm_hidden=128, num_layers=2)
    word_ids = jax.random.randint(k_ids, (B, T), 0, V, dtype=jnp.int32)

    forward = jax.jit(model.__call__)
    out = jax.block_until_ready(forward(word_ids))

    assert out.shape == (B, T, 2 * model.P), out.shape
    assert bool(jnp.all(jnp.isfinite(out)))
    print("KERNEL_OK")
</pallas_src>

<mosaic_0001>
module attributes {stable_mosaic.version = 11 : i64} {
  func.func @kernel(%arg0: i32, %arg1: i32, %arg2: memref<64x128xf32, #tpu.memory_space<vmem>>, %arg3: memref<2x128x512xbf16, #tpu.memory_space<vmem>>, %arg4: memref<2x1x512xf32, #tpu.memory_space<vmem>>, %arg5: memref<2x64x512xbf16, #tpu.memory_space<vmem>>) attributes {dimension_semantics = [#tpu.dimension_semantics<parallel>, #tpu.dimension_semantics<parallel>], iteration_bounds = array<i64: 1, 1>, scalar_prefetch = 0 : i64, scratch_operands = 0 : i64, tpu.core_type = #tpu.core_type<tc>, window_params = [{transform_indices = @transform_0, window_bounds = array<i64: 64, 128>}, {transform_indices = @transform_1, window_bounds = array<i64: 2, 128, 512>}, {transform_indices = @transform_2, window_bounds = array<i64: 2, 1, 512>}, {transform_indices = @transform_3, window_bounds = array<i64: 2, 64, 512>}]} {
    %c0 = arith.constant 0 : index
    %c0_0 = arith.constant 0 : index
    %0 = vector.load %arg2[%c0, %c0_0] : memref<64x128xf32, #tpu.memory_space<vmem>>, vector<64x128xf32>
    %1 = arith.truncf %0 : vector<64x128xf32> to vector<64x128xbf16>
    %c0_1 = arith.constant 0 : index
    %c0_2 = arith.constant 0 : index
    %c0_3 = arith.constant 0 : index
    %2 = vector.load %arg3[%c0_1, %c0_2, %c0_3] : memref<2x128x512xbf16, #tpu.memory_space<vmem>>, vector<1x128x512xbf16>
    %3 = vector.shape_cast %2 : vector<1x128x512xbf16> to vector<128x512xbf16>
    %cst = arith.constant dense<0.000000e+00> : vector<64x512xf32>
    %4 = tpu.matmul %1, %3, %cst {dimension_numbers = #tpu.dot_dimension_numbers<[1], [0], [0], [1], [0, 0, 1, 1], [], []>} : vector<64x128xbf16>, vector<128x512xbf16>, vector<64x512xf32> -> vector<64x512xf32>
    %c0_4 = arith.constant 0 : index
    %c0_5 = arith.constant 0 : index
    %c0_6 = arith.constant 0 : index
    %5 = vector.load %arg4[%c0_4, %c0_5, %c0_6] : memref<2x1x512xf32, #tpu.memory_space<vmem>>, vector<1x1x512xf32>
    %6 = vector.shape_cast %5 : vector<1x1x512xf32> to vector<1x512xf32>
    %7 = vector.broadcast %6 : vector<1x512xf32> to vector<64x512xf32>
    %8 = arith.addf %4, %7 : vector<64x512xf32>
    %c1 = arith.constant 1 : index
    %c0_7 = arith.constant 0 : index
    %c0_8 = arith.constant 0 : index
    %9 = vector.load %arg3[%c1, %c0_7, %c0_8] : memref<2x128x512xbf16, #tpu.memory_space<vmem>>, vector<1x128x512xbf16>
    %10 = vector.shape_cast %9 : vector<1x128x512xbf16> to vector<128x512xbf16>
    %cst_9 = arith.constant dense<0.000000e+00> : vector<64x512xf32>
    %11 = tpu.matmul %1, %10, %cst_9 {dimension_numbers = #tpu.dot_dimension_numbers<[1], [0], [0], [1], [0, 0, 1, 1], [], []>} : vector<64x128xbf16>, vector<128x512xbf16>, vector<64x512xf32> -> vector<64x512xf32>
    %c1_10 = arith.constant 1 : index
    %c0_11 = arith.constant 0 : index
    %c0_12 = arith.constant 0 : index
    %12 = vector.load %arg4[%c1_10, %c0_11, %c0_12] : memref<2x1x512xf32, #tpu.memory_space<vmem>>, vector<1x1x512xf32>
    %13 = vector.shape_cast %12 : vector<1x1x512xf32> to vector<1x512xf32>
    %14 = vector.broadcast %13 : vector<1x512xf32> to vector<64x512xf32>
    %15 = arith.addf %11, %14 : vector<64x512xf32>
    %16 = arith.truncf %8 : vector<64x512xf32> to vector<64x512xbf16>
    %c0_13 = arith.constant 0 : index
    %c0_14 = arith.constant 0 : index
    %c0_15 = arith.constant 0 : index
    %17 = vector.load %arg5[%c0_13, %c0_14, %c0_15] : memref<2x64x512xbf16, #tpu.memory_space<vmem>>, vector<1x64x512xbf16>
    %18 = vector.shape_cast %17 : vector<1x64x512xbf16> to vector<64x512xbf16>
    %19 = vector.shape_cast %16 : vector<64x512xbf16> to vector<1x64x512xbf16>
    tpu.vector_store %arg5[%c0_13, %c0_14, %c0_15], %19 {strides = array<i32>} : memref<2x64x512xbf16, #tpu.memory_space<vmem>>, vector<1x64x512xbf16>,
    %20 = arith.truncf %15 : vector<64x512xf32> to vector<64x512xbf16>
    %c1_16 = arith.constant 1 : index
    %c0_17 = arith.constant 0 : index
    %c0_18 = arith.constant 0 : index
    %21 = vector.load %arg5[%c1_16, %c0_17, %c0_18] : memref<2x64x512xbf16, #tpu.memory_space<vmem>>, vector<1x64x512xbf16>
    %22 = vector.shape_cast %21 : vector<1x64x512xbf16> to vector<64x512xbf16>
    %23 = vector.shape_cast %20 : vector<64x512xbf16> to vector<1x64x512xbf16>
    tpu.vector_store %arg5[%c1_16, %c0_17, %c0_18], %23 {strides = array<i32>} : memref<2x64x512xbf16, #tpu.memory_space<vmem>>, vector<1x64x512xbf16>,
    return
  }
  func.func @transform_0(%arg0: i32, %arg1: i32) -> (i32, i32) {
    %c0_i32 = arith.constant 0 : i32
    %c0_i32_0 = arith.constant 0 : i32
    return %arg0, %c0_i32 : i32, i32
  }
  func.func @transform_1(%arg0: i32, %arg1: i32) -> (i32, i32, i32) {
    %c0_i32 = arith.constant 0 : i32
    %c0_i32_0 = arith.constant 0 : i32
    %c0_i32_1 = arith.constant 0 : i32
    return %c0_i32, %c0_i32_0, %arg1 : i32, i32, i32
  }
  func.func @transform_2(%arg0: i32, %arg1: i32) -> (i32, i32, i32) {
    %c0_i32 = arith.constant 0 : i32
    %c0_i32_0 = arith.constant 0 : i32
    %c0_i32_1 = arith.constant 0 : i32
    return %c0_i32, %c0_i32_0, %arg1 : i32, i32, i32
  }
  func.func @transform_3(%arg0: i32, %arg1: i32) -> (i32, i32, i32) {
    %c0_i32 = arith.constant 0 : i32
    %c0_i32_0 = arith.constant 0 : i32
    return %c0_i32, %arg0, %arg1 : i32, i32, i32
  }
}

module attributes {stable_mosaic.version = 11 : i64} {
  func.func @kernel(%arg0: i32, %arg1: i32, %arg2: memref<2x64x128xf32, #tpu.memory_space<vmem>>, %arg3: memref<2x128x512xbf16, #tpu.memory_space<vmem>>, %arg4: memref<2x1x512xf32, #tpu.memory_space<vmem>>, %arg5: memref<2x64x512xbf16, #tpu.memory_space<vmem>>) attributes {dimension_semantics = [#tpu.dimension_semantics<parallel>, #tpu.dimension_semantics<parallel>], iteration_bounds = array<i64: 1, 1>, scalar_prefetch = 0 : i64, scratch_operands = 0 : i64, tpu.core_type = #tpu.core_type<tc>, window_params = [{transform_indices = @transform_0, window_bounds = array<i64: 2, 64, 128>}, {transform_indices = @transform_1, window_bounds = array<i64: 2, 128, 512>}, {transform_indices = @transform_2, window_bounds = array<i64: 2, 1, 512>}, {transform_indices = @transform_3, window_bounds = array<i64: 2, 64, 512>}]} {
    %c0 = arith.constant 0 : index
    %c0_0 = arith.constant 0 : index
    %c0_1 = arith.constant 0 : index
    %0 = vector.load %arg2[%c0, %c0_0, %c0_1] : memref<2x64x128xf32, #tpu.memory_space<vmem>>, vector<1x64x128xf32>
    %1 = vector.shape_cast %0 : vector<1x64x128xf32> to vector<64x128xf32>
    %2 = arith.truncf %1 : vector<64x128xf32> to vector<64x128xbf16>
    %c1 = arith.constant 1 : index
    %c0_2 = arith.constant 0 : index
    %c0_3 = arith.constant 0 : index
    %3 = vector.load %arg2[%c1, %c0_2, %c0_3] : memref<2x64x128xf32, #tpu.memory_space<vmem>>, vector<1x64x128xf32>
    %4 = vector.shape_cast %3 : vector<1x64x128xf32> to vector<64x128xf32>
    %5 = arith.truncf %4 : vector<64x128xf32> to vector<64x128xbf16>
    %c0_4 = arith.constant 0 : index
    %c0_5 = arith.constant 0 : index
    %c0_6 = arith.constant 0 : index
    %6 = vector.load %arg3[%c0_4, %c0_5, %c0_6] : memref<2x128x512xbf16, #tpu.memory_space<vmem>>, vector<1x128x512xbf16>
    %7 = vector.shape_cast %6 : vector<1x128x512xbf16> to vector<128x512xbf16>
    %cst = arith.constant dense<0.000000e+00> : vector<64x512xf32>
    %8 = tpu.matmul %2, %7, %cst {dimension_numbers = #tpu.dot_dimension_numbers<[1], [0], [0], [1], [0, 0, 1, 1], [], []>} : vector<64x128xbf16>, vector<128x512xbf16>, vector<64x512xf32> -> vector<64x512xf32>
    %c0_7 = arith.constant 0 : index
    %c0_8 = arith.constant 0 : index
    %c0_9 = arith.constant 0 : index
    %9 = vector.load %arg4[%c0_7, %c0_8, %c0_9] : memref<2x1x512xf32, #tpu.memory_space<vmem>>, vector<1x1x512xf32>
    %10 = vector.shape_cast %9 : vector<1x1x512xf32> to vector<1x512xf32>
    %11 = vector.broadcast %10 : vector<1x512xf32> to vector<64x512xf32>
    %12 = arith.addf %8, %11 : vector<64x512xf32>
    %c1_10 = arith.constant 1 : index
    %c0_11 = arith.constant 0 : index
    %c0_12 = arith.constant 0 : index
    %13 = vector.load %arg3[%c1_10, %c0_11, %c0_12] : memref<2x128x512xbf16, #tpu.memory_space<vmem>>, vector<1x128x512xbf16>
    %14 = vector.shape_cast %13 : vector<1x128x512xbf16> to vector<128x512xbf16>
    %cst_13 = arith.constant dense<0.000000e+00> : vector<64x512xf32>
    %15 = tpu.matmul %5, %14, %cst_13 {dimension_numbers = #tpu.dot_dimension_numbers<[1], [0], [0], [1], [0, 0, 1, 1], [], []>} : vector<64x128xbf16>, vector<128x512xbf16>, vector<64x512xf32> -> vector<64x512xf32>
    %c1_14 = arith.constant 1 : index
    %c0_15 = arith.constant 0 : index
    %c0_16 = arith.constant 0 : index
    %16 = vector.load %arg4[%c1_14, %c0_15, %c0_16] : memref<2x1x512xf32, #tpu.memory_space<vmem>>, vector<1x1x512xf32>
    %17 = vector.shape_cast %16 : vector<1x1x512xf32> to vector<1x512xf32>
    %18 = vector.broadcast %17 : vector<1x512xf32> to vector<64x512xf32>
    %19 = arith.addf %15, %18 : vector<64x512xf32>
    %20 = arith.truncf %12 : vector<64x512xf32> to vector<64x512xbf16>
    %c0_17 = arith.constant 0 : index
    %c0_18 = arith.constant 0 : index
    %c0_19 = arith.constant 0 : index
    %21 = vector.load %arg5[%c0_17, %c0_18, %c0_19] : memref<2x64x512xbf16, #tpu.memory_space<vmem>>, vector<1x64x512xbf16>
    %22 = vector.shape_cast %21 : vector<1x64x512xbf16> to vector<64x512xbf16>
    %23 = vector.shape_cast %20 : vector<64x512xbf16> to vector<1x64x512xbf16>
    tpu.vector_store %arg5[%c0_17, %c0_18, %c0_19], %23 {strides = array<i32>} : memref<2x64x512xbf16, #tpu.memory_space<vmem>>, vector<1x64x512xbf16>,
    %24 = arith.truncf %19 : vector<64x512xf32> to vector<64x512xbf16>
    %c1_20 = arith.constant 1 : index
    %c0_21 = arith.constant 0 : index
    %c0_22 = arith.constant 0 : index
    %25 = vector.load %arg5[%c1_20, %c0_21, %c0_22] : memref<2x64x512xbf16, #tpu.memory_space<vmem>>, vector<1x64x512xbf16>
    %26 = vector.shape_cast %25 : vector<1x64x512xbf16> to vector<64x512xbf16>
    %27 = vector.shape_cast %24 : vector<64x512xbf16> to vector<1x64x512xbf16>
    tpu.vector_store %arg5[%c1_20, %c0_21, %c0_22], %27 {strides = array<i32>} : memref<2x64x512xbf16, #tpu.memory_space<vmem>>, vector<1x64x512xbf16>,
    return
  }
  func.func @transform_0(%arg0: i32, %arg1: i32) -> (i32, i32, i32) {
    %c0_i32 = arith.constant 0 : i32
    %c0_i32_0 = arith.constant 0 : i32
    %c0_i32_1 = arith.constant 0 : i32
    return %c0_i32, %arg0, %c0_i32_0 : i32, i32, i32
  }
  func.func @transform_1(%arg0: i32, %arg1: i32) -> (i32, i32, i32) {
    %c0_i32 = arith.constant 0 : i32
    %c0_i32_0 = arith.constant 0 : i32
    %c0_i32_1 = arith.constant 0 : i32
    return %c0_i32, %c0_i32_0, %arg1 : i32, i32, i32
  }
  func.func @transform_2(%arg0: i32, %arg1: i32) -> (i32, i32, i32) {
    %c0_i32 = arith.constant 0 : i32
    %c0_i32_0 = arith.constant 0 : i32
    %c0_i32_1 = arith.constant 0 : i32
    return %c0_i32, %c0_i32_0, %arg1 : i32, i32, i32
  }
  func.func @transform_3(%arg0: i32, %arg1: i32) -> (i32, i32, i32) {
    %c0_i32 = arith.constant 0 : i32
    %c0_i32_0 = arith.constant 0 : i32
    return %c0_i32, %arg0, %arg1 : i32, i32, i32
  }
}

module attributes {stable_mosaic.version = 11 : i64} {
  func.func @kernel(%arg0: i32, %arg1: memref<2x8x8x512xbf16, #tpu.memory_space<any>>, %arg2: memref<1x128x512xbf16, #tpu.memory_space<vmem>>, %arg3: memref<1x128x128xbf16, #tpu.memory_space<vmem>>, %arg4: memref<1x8x8x128xf32, #tpu.memory_space<vmem>>, %arg5: memref<2x8x512xbf16, #tpu.memory_space<vmem>>, %arg6: memref<2x!tpu.dma_semaphore, #tpu.memory_space<semaphore_mem>>) attributes {dimension_semantics = [#tpu.dimension_semantics<parallel>], iteration_bounds = array<i64: 2>, scalar_prefetch = 0 : i64, scratch_operands = 2 : i64, tpu.core_type = #tpu.core_type<tc>, window_params = [{}, {transform_indices = @transform_1, window_bounds = array<i64: 1, 128, 512>}, {transform_indices = @transform_2, window_bounds = array<i64: 1, 128, 128>}, {transform_indices = @transform_3, window_bounds = array<i64: 1, 8, 8, 128>}]} {
    %c0 = arith.constant 0 : index
    %c0_0 = arith.constant 0 : index
    %c0_1 = arith.constant 0 : index
    %0 = vector.load %arg2[%c0, %c0_0, %c0_1] : memref<1x128x512xbf16, #tpu.memory_space<vmem>>, vector<1x128x512xbf16>
    %1 = vector.shape_cast %0 : vector<1x128x512xbf16> to vector<128x512xbf16>
    %c0_2 = arith.constant 0 : index
    %c0_3 = arith.constant 0 : index
    %c0_4 = arith.constant 0 : index
    %2 = vector.load %arg3[%c0_2, %c0_3, %c0_4] : memref<1x128x128xbf16, #tpu.memory_space<vmem>>, vector<1x128x128xbf16>
    %3 = vector.shape_cast %2 : vector<1x128x128xbf16> to vector<128x128xbf16>
    %c0_i32 = arith.constant 0 : i32
    %4 = arith.cmpi eq, %arg0, %c0_i32 : i32
    %c0_i32_5 = arith.constant 0 : i32
    %c7_i32 = arith.constant 7 : i32
    %5 = arith.select %4, %c0_i32_5, %c7_i32 : i32
    %c0_i32_6 = arith.constant 0 : i32
    %c0_i32_7 = arith.constant 0 : i32
    %c0_i32_8 = arith.constant 0 : i32
    %c0_i32_9 = arith.constant 0 : i32
    %6 = tpu.memref_slice %arg1[%arg0, %5, %c0_i32_8, %c0_i32_9] : memref<2x8x8x512xbf16, #tpu.memory_space<any>> -> memref<1x1x8x512xbf16, #tpu.memory_space<any>>
    %7 = tpu.memref_squeeze %6 : memref<1x1x8x512xbf16, #tpu.memory_space<any>> -> memref<8x512xbf16, #tpu.memory_space<any>>
    %c0_i32_10 = arith.constant 0 : i32
    %c0_i32_11 = arith.constant 0 : i32
    %8 = tpu.memref_slice %arg5[%c0_i32_6, %c0_i32_10, %c0_i32_11] : memref<2x8x512xbf16, #tpu.memory_space<vmem>> -> memref<1x8x512xbf16, #tpu.memory_space<vmem>>
    %9 = tpu.memref_squeeze %8 : memref<1x8x512xbf16, #tpu.memory_space<vmem>> -> memref<8x512xbf16, #tpu.memory_space<vmem>>
    %10 = tpu.memref_slice %arg6[%c0_i32_7] : memref<2x!tpu.dma_semaphore, #tpu.memory_space<semaphore_mem>> -> memref<1x!tpu.dma_semaphore, #tpu.memory_space<semaphore_mem>>
    %11 = tpu.memref_squeeze %10 : memref<1x!tpu.dma_semaphore, #tpu.memory_space<semaphore_mem>> -> memref<!tpu.dma_semaphore, #tpu.memory_space<semaphore_mem>>
    tpu.enqueue_dma source(%7 : memref<8x512xbf16, #tpu.memory_space<any>>) target(%9 : memref<8x512xbf16, #tpu.memory_space<vmem>>) target_semaphore(%11 : memref<!tpu.dma_semaphore, #tpu.memory_space<semaphore_mem>>)
    %cst = arith.constant 0.000000e+00 : f32
    %12 = vector.broadcast %cst : f32 to vector<8x128xf32>
    %cst_12 = arith.constant 0.000000e+00 : f32
    %13 = vector.broadcast %cst_12 : f32 to vector<8x128xf32>
    %c0_i32_13 = arith.constant 0 : i32
    %c2_i32 = arith.constant 2 : i32
    %c0_i32_14 = arith.constant 0 : i32
    %14 = arith.cmpi eq, %c2_i32, %c0_i32_14 : i32
    %c1_i32 = arith.constant 1 : i32
    %15 = arith.select %14, %c1_i32, %c2_i32 : i32
    %16 = arith.remsi %c0_i32_13, %15 : i32
    %c0_i32_15 = arith.constant 0 : i32
    %17 = arith.cmpi ne, %16, %c0_i32_15 : i32
    %c0_i32_16 = arith.constant 0 : i32
    %18 = arith.cmpi slt, %16, %c0_i32_16 : i32
    %c0_i32_17 = arith.constant 0 : i32
    %19 = arith.cmpi slt, %15, %c0_i32_17 : i32
    %20 = arith.xori %18, %19 : i1
    %21 = arith.andi %20, %17 : i1
    %22 = arith.addi %16, %15 : i32
    %23 = arith.select %21, %22, %16 : i32
    %c0_i32_18 = arith.constant 0 : i32
    %c0_i32_19 = arith.constant 0 : i32
    %c0_i32_20 = arith.constant 0 : i32
    %c0_i32_21 = arith.constant 0 : i32
    %24 = tpu.memref_slice %arg1[%c0_i32_18, %c0_i32_19, %c0_i32_20, %c0_i32_21] : memref<2x8x8x512xbf16, #tpu.memory_space<any>> -> memref<1x1x8x512xbf16, #tpu.memory_space<any>>
    %25 = tpu.memref_squeeze %24 : memref<1x1x8x512xbf16, #tpu.memory_space<any>> -> memref<8x512xbf16, #tpu.memory_space<any>>
    %c0_i32_22 = arith.constant 0 : i32
    %c0_i32_23 = arith.constant 0 : i32
    %26 = tpu.memref_slice %arg5[%23, %c0_i32_22, %c0_i32_23] : memref<2x8x512xbf16, #tpu.memory_space<vmem>> -> memref<1x8x512xbf16, #tpu.memory_space<vmem>>
    %27 = tpu.memref_squeeze %26 : memref<1x8x512xbf16, #tpu.memory_space<vmem>> -> memref<8x512xbf16, #tpu.memory_space<vmem>>
    %28 = tpu.memref_slice %arg6[%23] : memref<2x!tpu.dma_semaphore, #tpu.memory_space<semaphore_mem>> -> memref<1x!tpu.dma_semaphore, #tpu.memory_space<semaphore_mem>>
    %29 = tpu.memref_squeeze %28 : memref<1x!tpu.dma_semaphore, #tpu.memory_space<semaphore_mem>> -> memref<!tpu.dma_semaphore, #tpu.memory_space<semaphore_mem>>
    tpu.wait_dma2 semaphore(%29 : memref<!tpu.dma_semaphore, #tpu.memory_space<semaphore_mem>>) src(%25 : memref<8x512xbf16, #tpu.memory_space<any>>) dst(%27 : memref<8x512xbf16, #tpu.memory_space<vmem>>)
    %c1_i32_24 = arith.constant 1 : i32
    %30 = arith.addi %c0_i32_13, %c1_i32_24 : i32
    %c8_i32 = arith.constant 8 : i32
    %31 = arith.cmpi slt, %30, %c8_i32 : i32
    %32 = arith.extui %31 : i1 to i32
    %c0_i32_25 = arith.constant 0 : i32
    %33 = arith.cmpi ne, %32, %c0_i32_25 : i32
    scf.if %33 {
      %c1_i32_247 = arith.constant 1 : i32
      %494 = arith.addi %c0_i32_13, %c1_i32_247 : i32
      %c1_i32_248 = arith.constant 1 : i32
      %495 = arith.subi %c1_i32_248, %23 : i32
      %c0_i32_249 = arith.constant 0 : i32
      %496 = arith.cmpi eq, %arg0, %c0_i32_249 : i32
      %c7_i32_250 = arith.constant 7 : i32
      %497 = arith.subi %c7_i32_250, %494 : i32
      %498 = arith.select %496, %494, %497 : i32
      %c0_i32_251 = arith.constant 0 : i32
      %c0_i32_252 = arith.constant 0 : i32
      %499 = tpu.memref_slice %arg1[%arg0, %498, %c0_i32_251, %c0_i32_252] : memref<2x8x8x512xbf16, #tpu.memory_space<any>> -> memref<1x1x8x512xbf16, #tpu.memory_space<any>>
      %500 = tpu.memref_squeeze %499 : memref<1x1x8x512xbf16, #tpu.memory_space<any>> -> memref<8x512xbf16, #tpu.memory_space<any>>
      %c0_i32_253 = arith.constant 0 : i32
      %c0_i32_254 = arith.constant 0 : i32
      %501 = tpu.memref_slice %arg5[%495, %c0_i32_253, %c0_i32_254] : memref<2x8x512xbf16, #tpu.memory_space<vmem>> -> memref<1x8x512xbf16, #tpu.memory_space<vmem>>
      %502 = tpu.memref_squeeze %501 : memref<1x8x512xbf16, #tpu.memory_space<vmem>> -> memref<8x512xbf16, #tpu.memory_space<vmem>>
      %503 = tpu.memref_slice %arg6[%495] : memref<2x!tpu.dma_semaphore, #tpu.memory_space<semaphore_mem>> -> memref<1x!tpu.dma_semaphore, #tpu.memory_space<semaphore_mem>>
      %504 = tpu.memref_squeeze %503 : memref<1x!tpu.dma_semaphore, #tpu.memory_space<semaphore_mem>> -> memref<!tpu.dma_semaphore, #tpu.memory_space<semaphore_mem>>
      tpu.enqueue_dma source(%500 : memref<8x512xbf16, #tpu.memory_space<any>>) target(%502 : memref<8x512xbf16, #tpu.memory_space<vmem>>) target_semaphore(%504 : memref<!tpu.dma_semaphore, #tpu.memory_space<semaphore_mem>>)
    } else {
    }
    %34 = arith.index_cast %23 : i32 to index
    %c0_26 = arith.constant 0 : index
    %c0_27 = arith.constant 0 : index
    %35 = vector.load %arg5[%34, %c0_26, %c0_27] : memref<2x8x512xbf16, #tpu.memory_space<vmem>>, vector<1x8x512xbf16>
    %36 = vector.shape_cast %35 : vector<1x8x512xbf16> to vector<8x512xbf16>
    %37 = arith.extf %36 : vector<8x512xbf16> to vector<8x512xf32>
    %38 = arith.truncf %12 : vector<8x128xf32> to vector<8x128xbf16>
    %cst_28 = arith.constant dense<0.000000e+00> : vector<8x512xf32>
    %39 = tpu.matmul %38, %1, %cst_28 {dimension_numbers = #tpu.dot_dimension_numbers<[1], [0], [0], [1], [0, 0, 1, 1], [], []>} : vector<8x128xbf16>, vector<128x512xbf16>, vector<8x512xf32> -> vector<8x512xf32>
    %40 = arith.addf %37, %39 : vector<8x512xf32>
    %41 = vector.extract_strided_slice %40 {offsets = [0, 0], sizes = [8, 384], strides = [1, 1]} : vector<8x512xf32> to vector<8x384xf32>
    %42 = arith.negf %41 : vector<8x384xf32>
    %43 = math.exp %42 : vector<8x384xf32>
    %cst_29 = arith.constant 1.000000e+00 : f32
    %44 = vector.broadcast %cst_29 : f32 to vector<8x384xf32>
    %45 = arith.addf %44, %43 : vector<8x384xf32>
    %46 = arith.divf %44, %45 : vector<8x384xf32>
    %47 = vector.extract_strided_slice %46 {offsets = [0, 0], sizes = [8, 128], strides = [1, 1]} : vector<8x384xf32> to vector<8x128xf32>
    %48 = vector.extract_strided_slice %46 {offsets = [0, 128], sizes = [8, 128], strides = [1, 1]} : vector<8x384xf32> to vector<8x128xf32>
    %49 = vector.extract_strided_slice %46 {offsets = [0, 256], sizes = [8, 128], strides = [1, 1]} : vector<8x384xf32> to vector<8x128xf32>
    %50 = vector.extract_strided_slice %40 {offsets = [0, 384], sizes = [8, 128], strides = [1, 1]} : vector<8x512xf32> to vector<8x128xf32>
    %51 = math.tanh %50 : vector<8x128xf32>
    %52 = arith.mulf %48, %13 : vector<8x128xf32>
    %53 = arith.mulf %47, %51 : vector<8x128xf32>
    %54 = arith.addf %52, %53 : vector<8x128xf32>
    %cst_30 = arith.constant -3.000000e+00 : f32
    %cst_31 = arith.constant 3.000000e+00 : f32
    %55 = vector.broadcast %cst_30 : f32 to vector<8x128xf32>
    %56 = arith.maximumf %55, %54 : vector<8x128xf32>
    %57 = vector.broadcast %cst_31 : f32 to vector<8x128xf32>
    %58 = arith.minimumf %57, %56 : vector<8x128xf32>
    %59 = math.tanh %58 : vector<8x128xf32>
    %60 = arith.mulf %49, %59 : vector<8x128xf32>
    %61 = arith.truncf %60 : vector<8x128xf32> to vector<8x128xbf16>
    %cst_32 = arith.constant dense<0.000000e+00> : vector<8x128xf32>
    %62 = tpu.matmul %61, %3, %cst_32 {dimension_numbers = #tpu.dot_dimension_numbers<[1], [0], [0], [1], [0, 0, 1, 1], [], []>} : vector<8x128xbf16>, vector<128x128xbf16>, vector<8x128xf32> -> vector<8x128xf32>
    %cst_33 = arith.constant -3.000000e+00 : f32
    %cst_34 = arith.constant 3.000000e+00 : f32
    %63 = vector.broadcast %cst_33 : f32 to vector<8x128xf32>
    %64 = arith.maximumf %63, %62 : vector<8x128xf32>
    %65 = vector.broadcast %cst_34 : f32 to vector<8x128xf32>
    %66 = arith.minimumf %65, %64 : vector<8x128xf32>
    %c0_i32_35 = arith.constant 0 : i32
    %67 = arith.cmpi eq, %arg0, %c0_i32_35 : i32
    %c7_i32_36 = arith.constant 7 : i32
    %68 = arith.subi %c7_i32_36, %c0_i32_13 : i32
    %69 = arith.select %67, %c0_i32_13, %68 : i32
    %c0_37 = arith.constant 0 : index
    %70 = arith.index_cast %69 : i32 to index
    %c0_38 = arith.constant 0 : index
    %c0_39 = arith.constant 0 : index
    %71 = vector.load %arg4[%c0_37, %70, %c0_38, %c0_39] : memref<1x8x8x128xf32, #tpu.memory_space<vmem>>, vector<1x1x8x128xf32>
    %72 = vector.shape_cast %71 : vector<1x1x8x128xf32> to vector<8x128xf32>
    %73 = vector.shape_cast %66 : vector<8x128xf32> to vector<1x1x8x128xf32>
    tpu.vector_store %arg4[%c0_37, %70, %c0_38, %c0_39], %73 {strides = array<i32>} : memref<1x8x8x128xf32, #tpu.memory_space<vmem>>, vector<1x1x8x128xf32>,
    %c1_i32_40 = arith.constant 1 : i32
    %c2_i32_41 = arith.constant 2 : i32
    %c0_i32_42 = arith.constant 0 : i32
    %74 = arith.cmpi eq, %c2_i32_41, %c0_i32_42 : i32
    %c1_i32_43 = arith.constant 1 : i32
    %75 = arith.select %74, %c1_i32_43, %c2_i32_41 : i32
    %76 = arith.remsi %c1_i32_40, %75 : i32
    %c0_i32_44 = arith.constant 0 : i32
    %77 = arith.cmpi ne, %76, %c0_i32_44 : i32
    %c0_i32_45 = arith.constant 0 : i32
    %78 = arith.cmpi slt, %76, %c0_i32_45 : i32
    %c0_i32_46 = arith.constant 0 : i32
    %79 = arith.cmpi slt, %75, %c0_i32_46 : i32
    %80 = arith.xori %78, %79 : i1
    %81 = arith.andi %80, %77 : i1
    %82 = arith.addi %76, %75 : i32
    %83 = arith.select %81, %82, %76 : i32
    %c0_i32_47 = arith.constant 0 : i32
    %c0_i32_48 = arith.constant 0 : i32
    %c0_i32_49 = arith.constant 0 : i32
    %c0_i32_50 = arith.constant 0 : i32
    %84 = tpu.memref_slice %arg1[%c0_i32_47, %c0_i32_48, %c0_i32_49, %c0_i32_50] : memref<2x8x8x512xbf16, #tpu.memory_space<any>> -> memref<1x1x8x512xbf16, #tpu.memory_space<any>>
    %85 = tpu.memref_squeeze %84 : memref<1x1x8x512xbf16, #tpu.memory_space<any>> -> memref<8x512xbf16, #tpu.memory_space<any>>
    %c0_i32_51 = arith.constant 0 : i32
    %c0_i32_52 = arith.constant 0 : i32
    %86 = tpu.memref_slice %arg5[%83, %c0_i32_51, %c0_i32_52] : memref<2x8x512xbf16, #tpu.memory_space<vmem>> -> memref<1x8x512xbf16, #tpu.memory_space<vmem>>
    %87 = tpu.memref_squeeze %86 : memref<1x8x512xbf16, #tpu.memory_space<vmem>> -> memref<8x512xbf16, #tpu.memory_space<vmem>>
    %88 = tpu.memref_slice %arg6[%83] : memref<2x!tpu.dma_semaphore, #tpu.memory_space<semaphore_mem>> -> memref<1x!tpu.dma_semaphore, #tpu.memory_space<semaphore_mem>>
    %89 = tpu.memref_squeeze %88 : memref<1x!tpu.dma_semaphore, #tpu.memory_space<semaphore_mem>> -> memref<!tpu.dma_semaphore, #tpu.memory_space<semaphore_mem>>
    tpu.wait_dma2 semaphore(%89 : memref<!tpu.dma_semaphore, #tpu.memory_space<semaphore_mem>>) src(%85 : memref<8x512xbf16, #tpu.memory_space<any>>) dst(%87 : memref<8x512xbf16, #tpu.memory_space<vmem>>)
    %c1_i32_53 = arith.constant 1 : i32
    %90 = arith.addi %c1_i32_40, %c1_i32_53 : i32
    %c8_i32_54 = arith.constant 8 : i32
    %91 = arith.cmpi slt, %90, %c8_i32_54 : i32
    %92 = arith.extui %91 : i1 to i32
    %c0_i32_55 = arith.constant 0 : i32
    %93 = arith.cmpi ne, %92, %c0_i32_55 : i32
    scf.if %93 {
      %c1_i32_247 = arith.constant 1 : i32
      %494 = arith.addi %c1_i32_40, %c1_i32_247 : i32
      %c1_i32_248 = arith.constant 1 : i32
      %495 = arith.subi %c1_i32_248, %83 : i32
      %c0_i32_249 = arith.constant 0 : i32
      %496 = arith.cmpi eq, %arg0, %c0_i32_249 : i32
      %c7_i32_250 = arith.constant 7 : i32
      %497 = arith.subi %c7_i32_250, %494 : i32
      %498 = arith.select %496, %494, %497 : i32
      %c0_i32_251 = arith.constant 0 : i32
      %c0_i32_252 = arith.constant 0 : i32
      %499 = tpu.memref_slice %arg1[%arg0, %498, %c0_i32_251, %c0_i32_252] : memref<2x8x8x512xbf16, #tpu.memory_space<any>> -> memref<1x1x8x512xbf16, #tpu.memory_space<any>>
      %500 = tpu.memref_squeeze %499 : memref<1x1x8x512xbf16, #tpu.memory_space<any>> -> memref<8x512xbf16, #tpu.memory_space<any>>
      %c0_i32_253 = arith.constant 0 : i32
      %c0_i32_254 = arith.constant 0 : i32
      %501 = tpu.memref_slice %arg5[%495, %c0_i32_253, %c0_i32_254] : memref<2x8x512xbf16, #tpu.memory_space<vmem>> -> memref<1x8x512xbf16, #tpu.memory_space<vmem>>
      %502 = tpu.memref_squeeze %501 : memref<1x8x512xbf16, #tpu.memory_space<vmem>> -> memref<8x512xbf16, #tpu.memory_space<vmem>>
      %503 = tpu.memref_slice %arg6[%495] : memref<2x!tpu.dma_semaphore, #tpu.memory_space<semaphore_mem>> -> memref<1x!tpu.dma_semaphore, #tpu.memory_space<semaphore_mem>>
      %504 = tpu.memref_squeeze %503 : memref<1x!tpu.dma_semaphore, #tpu.memory_space<semaphore_mem>> -> memref<!tpu.dma_semaphore, #tpu.memory_space<semaphore_mem>>
      tpu.enqueue_dma source(%500 : memref<8x512xbf16, #tpu.memory_space<any>>) target(%502 : memref<8x512xbf16, #tpu.memory_space<vmem>>) target_semaphore(%504 : memref<!tpu.dma_semaphore, #tpu.memory_space<semaphore_mem>>)
    } else {
    }
    %94 = arith.index_cast %83 : i32 to index
    %c0_56 = arith.constant 0 : index
    %c0_57 = arith.constant 0 : index
    %95 = vector.load %arg5[%94, %c0_56, %c0_57] : memref<2x8x512xbf16, #tpu.memory_space<vmem>>, vector<1x8x512xbf16>
    %96 = vector.shape_cast %95 : vector<1x8x512xbf16> to vector<8x512xbf16>
    %97 = arith.extf %96 : vector<8x512xbf16> to vector<8x512xf32>
    %98 = arith.truncf %66 : vector<8x128xf32> to vector<8x128xbf16>
    %cst_58 = arith.constant dense<0.000000e+00> : vector<8x512xf32>
    %99 = tpu.matmul %98, %1, %cst_58 {dimension_numbers = #tpu.dot_dimension_numbers<[1], [0], [0], [1], [0, 0, 1, 1], [], []>} : vector<8x128xbf16>, vector<128x512xbf16>, vector<8x512xf32> -> vector<8x512xf32>
    %100 = arith.addf %97, %99 : vector<8x512xf32>
    %101 = vector.extract_strided_slice %100 {offsets = [0, 0], sizes = [8, 384], strides = [1, 1]} : vector<8x512xf32> to vector<8x384xf32>
    %102 = arith.negf %101 : vector<8x384xf32>
    %103 = math.exp %102 : vector<8x384xf32>
    %cst_59 = arith.constant 1.000000e+00 : f32
    %104 = vector.broadcast %cst_59 : f32 to vector<8x384xf32>
    %105 = arith.addf %104, %103 : vector<8x384xf32>
    %106 = arith.divf %104, %105 : vector<8x384xf32>
    %107 = vector.extract_strided_slice %106 {offsets = [0, 0], sizes = [8, 128], strides = [1, 1]} : vector<8x384xf32> to vector<8x128xf32>
    %108 = vector.extract_strided_slice %106 {offsets = [0, 128], sizes = [8, 128], strides = [1, 1]} : vector<8x384xf32> to vector<8x128xf32>
    %109 = vector.extract_strided_slice %106 {offsets = [0, 256], sizes = [8, 128], strides = [1, 1]} : vector<8x384xf32> to vector<8x128xf32>
    %110 = vector.extract_strided_slice %100 {offsets = [0, 384], sizes = [8, 128], strides = [1, 1]} : vector<8x512xf32> to vector<8x128xf32>
    %111 = math.tanh %110 : vector<8x128xf32>
    %112 = arith.mulf %108, %58 : vector<8x128xf32>
    %113 = arith.mulf %107, %111 : vector<8x128xf32>
    %114 = arith.addf %112, %113 : vector<8x128xf32>
    %cst_60 = arith.constant -3.000000e+00 : f32
    %cst_61 = arith.constant 3.000000e+00 : f32
    %115 = vector.broadcast %cst_60 : f32 to vector<8x128xf32>
    %116 = arith.maximumf %115, %114 : vector<8x128xf32>
    %117 = vector.broadcast %cst_61 : f32 to vector<8x128xf32>
    %118 = arith.minimumf %117, %116 : vector<8x128xf32>
    %119 = math.tanh %118 : vector<8x128xf32>
    %120 = arith.mulf %109, %119 : vector<8x128xf32>
    %121 = arith.truncf %120 : vector<8x128xf32> to vector<8x128xbf16>
    %cst_62 = arith.constant dense<0.000000e+00> : vector<8x128xf32>
    %122 = tpu.matmul %121, %3, %cst_62 {dimension_numbers = #tpu.dot_dimension_numbers<[1], [0], [0], [1], [0, 0, 1, 1], [], []>} : vector<8x128xbf16>, vector<128x128xbf16>, vector<8x128xf32> -> vector<8x128xf32>
    %cst_63 = arith.constant -3.000000e+00 : f32
    %cst_64 = arith.constant 3.000000e+00 : f32
    %123 = vector.broadcast %cst_63 : f32 to vector<8x128xf32>
    %124 = arith.maximumf %123, %122 : vector<8x128xf32>
    %125 = vector.broadcast %cst_64 : f32 to vector<8x128xf32>
    %126 = arith.minimumf %125, %124 : vector<8x128xf32>
    %c0_i32_65 = arith.constant 0 : i32
    %127 = arith.cmpi eq, %arg0, %c0_i32_65 : i32
    %c7_i32_66 = arith.constant 7 : i32
    %128 = arith.subi %c7_i32_66, %c1_i32_40 : i32
    %129 = arith.select %127, %c1_i32_40, %128 : i32
    %c0_67 = arith.constant 0 : index
    %130 = arith.index_cast %129 : i32 to index
    %c0_68 = arith.constant 0 : index
    %c0_69 = arith.constant 0 : index
    %131 = vector.load %arg4[%c0_67, %130, %c0_68, %c0_69] : memref<1x8x8x128xf32, #tpu.memory_space<vmem>>, vector<1x1x8x128xf32>
    %132 = vector.shape_cast %131 : vector<1x1x8x128xf32> to vector<8x128xf32>
    %133 = vector.shape_cast %126 : vector<8x128xf32> to vector<1x1x8x128xf32>
    tpu.vector_store %arg4[%c0_67, %130, %c0_68, %c0_69], %133 {strides = array<i32>} : memref<1x8x8x128xf32, #tpu.memory_space<vmem>>, vector<1x1x8x128xf32>,
    %c2_i32_70 = arith.constant 2 : i32
    %c2_i32_71 = arith.constant 2 : i32
    %c0_i32_72 = arith.constant 0 : i32
    %134 = arith.cmpi eq, %c2_i32_71, %c0_i32_72 : i32
    %c1_i32_73 = arith.constant 1 : i32
    %135 = arith.select %134, %c1_i32_73, %c2_i32_71 : i32
    %136 = arith.remsi %c2_i32_70, %135 : i32
    %c0_i32_74 = arith.constant 0 : i32
    %137 = arith.cmpi ne, %136, %c0_i32_74 : i32
    %c0_i32_75 = arith.constant 0 : i32
    %138 = arith.cmpi slt, %136, %c0_i32_75 : i32
    %c0_i32_76 = arith.constant 0 : i32
    %139 = arith.cmpi slt, %135, %c0_i32_76 : i32
    %140 = arith.xori %138, %139 : i1
    %141 = arith.andi %140, %137 : i1
    %142 = arith.addi %136, %135 : i32
    %143 = arith.select %141, %142, %136 : i32
    %c0_i32_77 = arith.constant 0 : i32
    %c0_i32_78 = arith.constant 0 : i32
    %c0_i32_79 = arith.constant 0 : i32
    %c0_i32_80 = arith.constant 0 : i32
    %144 = tpu.memref_slice %arg1[%c0_i32_77, %c0_i32_78, %c0_i32_79, %c0_i32_80] : memref<2x8x8x512xbf16, #tpu.memory_space<any>> -> memref<1x1x8x512xbf16, #tpu.memory_space<any>>
    %145 = tpu.memref_squeeze %144 : memref<1x1x8x512xbf16, #tpu.memory_space<any>> -> memref<8x512xbf16, #tpu.memory_space<any>>
    %c0_i32_81 = arith.constant 0 : i32
    %c0_i32_82 = arith.constant 0 : i32
    %146 = tpu.memref_slice %arg5[%143, %c0_i32_81, %c0_i32_82] : memref<2x8x512xbf16, #tpu.memory_space<vmem>> -> memref<1x8x512xbf16, #tpu.memory_space<vmem>>
    %147 = tpu.memref_squeeze %146 : memref<1x8x512xbf16, #tpu.memory_space<vmem>> -> memref<8x512xbf16, #tpu.memory_space<vmem>>
    %148 = tpu.memref_slice %arg6[%143] : memref<2x!tpu.dma_semaphore, #tpu.memory_space<semaphore_mem>> -> memref<1x!tpu.dma_semaphore, #tpu.memory_space<semaphore_mem>>
    %149 = tpu.memref_squeeze %148 : memref<1x!tpu.dma_semaphore, #tpu.memory_space<semaphore_mem>> -> memref<!tpu.dma_semaphore, #tpu.memory_space<semaphore_mem>>
    tpu.wait_dma2 semaphore(%149 : memref<!tpu.dma_semaphore, #tpu.memory_space<semaphore_mem>>) src(%145 : memref<8x512xbf16, #tpu.memory_space<any>>) dst(%147 : memref<8x512xbf16, #tpu.memory_space<vmem>>)
    %c1_i32_83 = arith.constant 1 : i32
    %150 = arith.addi %c2_i32_70, %c1_i32_83 : i32
    %c8_i32_84 = arith.constant 8 : i32
    %151 = arith.cmpi slt, %150, %c8_i32_84 : i32
    %152 = arith.extui %151 : i1 to i32
    %c0_i32_85 = arith.constant 0 : i32
    %153 = arith.cmpi ne, %152, %c0_i32_85 : i32
    scf.if %153 {
      %c1_i32_247 = arith.constant 1 : i32
      %494 = arith.addi %c2_i32_70, %c1_i32_247 : i32
      %c1_i32_248 = arith.constant 1 : i32
      %495 = arith.subi %c1_i32_248, %143 : i32
      %c0_i32_249 = arith.constant 0 : i32
      %496 = arith.cmpi eq, %arg0, %c0_i32_249 : i32
      %c7_i32_250 = arith.constant 7 : i32
      %497 = arith.subi %c7_i32_250, %494 : i32
      %498 = arith.select %496, %494, %497 : i32
      %c0_i32_251 = arith.constant 0 : i32
      %c0_i32_252 = arith.constant 0 : i32
      %499 = tpu.memref_slice %arg1[%arg0, %498, %c0_i32_251, %c0_i32_252] : memref<2x8x8x512xbf16, #tpu.memory_space<any>> -> memref<1x1x8x512xbf16, #tpu.memory_space<any>>
      %500 = tpu.memref_squeeze %499 : memref<1x1x8x512xbf16, #tpu.memory_space<any>> -> memref<8x512xbf16, #tpu.memory_space<any>>
      %c0_i32_253 = arith.constant 0 : i32
      %c0_i32_254 = arith.constant 0 : i32
      %501 = tpu.memref_slice %arg5[%495, %c0_i32_253, %c0_i32_254] : memref<2x8x512xbf16, #tpu.memory_space<vmem>> -> memref<1x8x512xbf16, #tpu.memory_space<vmem>>
      %502 = tpu.memref_squeeze %501 : memref<1x8x512xbf16, #tpu.memory_space<vmem>> -> memref<8x512xbf16, #tpu.memory_space<vmem>>
      %503 = tpu.memref_slice %arg6[%495] : memref<2x!tpu.dma_semaphore, #tpu.memory_space<semaphore_mem>> -> memref<1x!tpu.dma_semaphore, #tpu.memory_space<semaphore_mem>>
      %504 = tpu.memref_squeeze %503 : memref<1x!tpu.dma_semaphore, #tpu.memory_space<semaphore_mem>> -> memref<!tpu.dma_semaphore, #tpu.memory_space<semaphore_mem>>
      tpu.enqueue_dma source(%500 : memref<8x512xbf16, #tpu.memory_space<any>>) target(%502 : memref<8x512xbf16, #tpu.memory_space<vmem>>) target_semaphore(%504 : memref<!tpu.dma_semaphore, #tpu.memory_space<semaphore_mem>>)
    } else {
    }
    %154 = arith.index_cast %143 : i32 to index
    %c0_86 = arith.constant 0 : index
    %c0_87 = arith.constant 0 : index
    %155 = vector.load %arg5[%154, %c0_86, %c0_87] : memref<2x8x512xbf16, #tpu.memory_space<vmem>>, vector<1x8x512xbf16>
    %156 = vector.shape_cast %155 : vector<1x8x512xbf16> to vector<8x512xbf16>
    %157 = arith.extf %156 : vector<8x512xbf16> to vector<8x512xf32>
    %158 = arith.truncf %126 : vector<8x128xf32> to vector<8x128xbf16>
    %cst_88 = arith.constant dense<0.000000e+00> : vector<8x512xf32>
    %159 = tpu.matmul %158, %1, %cst_88 {dimension_numbers = #tpu.dot_dimension_numbers<[1], [0], [0], [1], [0, 0, 1, 1], [], []>} : vector<8x128xbf16>, vector<128x512xbf16>, vector<8x512xf32> -> vector<8x512xf32>
    %160 = arith.addf %157, %159 : vector<8x512xf32>
    %161 = vector.extract_strided_slice %160 {offsets = [0, 0], sizes = [8, 384], strides = [1, 1]} : vector<8x512xf32> to vector<8x384xf32>
    %162 = arith.negf %161 : vector<8x384xf32>
    %163 = math.exp %162 : vector<8x384xf32>
    %cst_89 = arith.constant 1.000000e+00 : f32
    %164 = vector.broadcast %cst_89 : f32 to vector<8x384xf32>
    %165 = arith.addf %164, %163 : vector<8x384xf32>
    %166 = arith.divf %164, %165 : vector<8x384xf32>
    %167 = vector.extract_strided_slice %166 {offsets = [0, 0], sizes = [8, 128], strides = [1, 1]} : vector<8x384xf32> to vector<8x128xf32>
    %168 = vector.extract_strided_slice %166 {offsets = [0, 128], sizes = [8, 128], strides = [1, 1]} : vector<8x384xf32> to vector<8x128xf32>
    %169 = vector.extract_strided_slice %166 {offsets = [0, 256], sizes = [8, 128], strides = [1, 1]} : vector<8x384xf32> to vector<8x128xf32>
    %170 = vector.extract_strided_slice %160 {offsets = [0, 384], sizes = [8, 128], strides = [1, 1]} : vector<8x512xf32> to vector<8x128xf32>
    %171 = math.tanh %170 : vector<8x128xf32>
    %172 = arith.mulf %168, %118 : vector<8x128xf32>
    %173 = arith.mulf %167, %171 : vector<8x128xf32>
    %174 = arith.addf %172, %173 : vector<8x128xf32>
    %cst_90 = arith.constant -3.000000e+00 : f32
    %cst_91 = arith.constant 3.000000e+00 : f32
    %175 = vector.broadcast %cst_90 : f32 to vector<8x128xf32>
    %176 = arith.maximumf %175, %174 : vector<8x128xf32>
    %177 = vector.broadcast %cst_91 : f32 to vector<8x128xf32>
    %178 = arith.minimumf %177, %176 : vector<8x128xf32>
    %179 = math.tanh %178 : vector<8x128xf32>
    %180 = arith.mulf %169, %179 : vector<8x128xf32>
    %181 = arith.truncf %180 : vector<8x128xf32> to vector<8x128xbf16>
    %cst_92 = arith.constant dense<0.000000e+00> : vector<8x128xf32>
    %182 = tpu.matmul %181, %3, %cst_92 {dimension_numbers = #tpu.dot_dimension_numbers<[1], [0], [0], [1], [0, 0, 1, 1], [], []>} : vector<8x128xbf16>, vector<128x128xbf16>, vector<8x128xf32> -> vector<8x128xf32>
    %cst_93 = arith.constant -3.000000e+00 : f32
    %cst_94 = arith.constant 3.000000e+00 : f32
    %183 = vector.broadcast %cst_93 : f32 to vector<8x128xf32>
    %184 = arith.maximumf %183, %182 : vector<8x128xf32>
    %185 = vector.broadcast %cst_94 : f32 to vector<8x128xf32>
    %186 = arith.minimumf %185, %184 : vector<8x128xf32>
    %c0_i32_95 = arith.constant 0 : i32
    %187 = arith.cmpi eq, %arg0, %c0_i32_95 : i32
    %c7_i32_96 = arith.constant 7 : i32
    %188 = arith.subi %c7_i32_96, %c2_i32_70 : i32
    %189 = arith.select %187, %c2_i32_70, %188 : i32
    %c0_97 = arith.constant 0 : index
    %190 = arith.index_cast %189 : i32 to index
    %c0_98 = arith.constant 0 : index
    %c0_99 = arith.constant 0 : index
    %191 = vector.load %arg4[%c0_97, %190, %c0_98, %c0_99] : memref<1x8x8x128xf32, #tpu.memory_space<vmem>>, vector<1x1x8x128xf32>
    %192 = vector.shape_cast %191 : vector<1x1x8x128xf32> to vector<8x128xf32>
    %193 = vector.shape_cast %186 : vector<8x128xf32> to vector<1x1x8x128xf32>
    tpu.vector_store %arg4[%c0_97, %190, %c0_98, %c0_99], %193 {strides = array<i32>} : memref<1x8x8x128xf32, #tpu.memory_space<vmem>>, vector<1x1x8x128xf32>,
    %c3_i32 = arith.constant 3 : i32
    %c2_i32_100 = arith.constant 2 : i32
    %c0_i32_101 = arith.constant 0 : i32
    %194 = arith.cmpi eq, %c2_i32_100, %c0_i32_101 : i32
    %c1_i32_102 = arith.constant 1 : i32
    %195 = arith.select %194, %c1_i32_102, %c2_i32_100 : i32
    %196 = arith.remsi %c3_i32, %195 : i32
    %c0_i32_103 = arith.constant 0 : i32
    %197 = arith.cmpi ne, %196, %c0_i32_103 : i32
    %c0_i32_104 = arith.constant 0 : i32
    %198 = arith.cmpi slt, %196, %c0_i32_104 : i32
    %c0_i32_105 = arith.constant 0 : i32
    %199 = arith.cmpi slt, %195, %c0_i32_105 : i32
    %200 = arith.xori %198, %199 : i1
    %201 = arith.andi %200, %197 : i1
    %202 = arith.addi %196, %195 : i32
    %203 = arith.select %201, %202, %196 : i32
    %c0_i32_106 = arith.constant 0 : i32
    %c0_i32_107 = arith.constant 0 : i32
    %c0_i32_108 = arith.constant 0 : i32
    %c0_i32_109 = arith.constant 0 : i32
    %204 = tpu.memref_slice %arg1[%c0_i32_106, %c0_i32_107, %c0_i32_108, %c0_i32_109] : memref<2x8x8x512xbf16, #tpu.memory_space<any>> -> memref<1x1x8x512xbf16, #tpu.memory_space<any>>
    %205 = tpu.memref_squeeze %204 : memref<1x1x8x512xbf16, #tpu.memory_space<any>> -> memref<8x512xbf16, #tpu.memory_space<any>>
    %c0_i32_110 = arith.constant 0 : i32
    %c0_i32_111 = arith.constant 0 : i32
    %206 = tpu.memref_slice %arg5[%203, %c0_i32_110, %c0_i32_111] : memref<2x8x512xbf16, #tpu.memory_space<vmem>> -> memref<1x8x512xbf16, #tpu.memory_space<vmem>>
    %207 = tpu.memref_squeeze %206 : memref<1x8x512xbf16, #tpu.memory_space<vmem>> -> memref<8x512xbf16, #tpu.memory_space<vmem>>
    %208 = tpu.memref_slice %arg6[%203] : memref<2x!tpu.dma_semaphore, #tpu.memory_space<semaphore_mem>> -> memref<1x!tpu.dma_semaphore, #tpu.memory_space<semaphore_mem>>
    %209 = tpu.memref_squeeze %208 : memref<1x!tpu.dma_semaphore, #tpu.memory_space<semaphore_mem>> -> memref<!tpu.dma_semaphore, #tpu.memory_space<semaphore_mem>>
    tpu.wait_dma2 semaphore(%209 : memref<!tpu.dma_semaphore, #tpu.memory_space<semaphore_mem>>) src(%205 : memref<8x512xbf16, #tpu.memory_space<any>>) dst(%207 : memref<8x512xbf16, #tpu.memory_space<vmem>>)
    %c1_i32_112 = arith.constant 1 : i32
    %210 = arith.addi %c3_i32, %c1_i32_112 : i32
    %c8_i32_113 = arith.constant 8 : i32
    %211 = arith.cmpi slt, %210, %c8_i32_113 : i32
    %212 = arith.extui %211 : i1 to i32
    %c0_i32_114 = arith.constant 0 : i32
    %213 = arith.cmpi ne, %212, %c0_i32_114 : i32
    scf.if %213 {
      %c1_i32_247 = arith.constant 1 : i32
      %494 = arith.addi %c3_i32, %c1_i32_247 : i32
      %c1_i32_248 = arith.constant 1 : i32
      %495 = arith.subi %c1_i32_248, %203 : i32
      %c0_i32_249 = arith.constant 0 : i32
      %496 = arith.cmpi eq, %arg0, %c0_i32_249 : i32
      %c7_i32_250 = arith.constant 7 : i32
      %497 = arith.subi %c7_i32_250, %494 : i32
      %498 = arith.select %496, %494, %497 : i32
      %c0_i32_251 = arith.constant 0 : i32
      %c0_i32_252 = arith.constant 0 : i32
      %499 = tpu.memref_slice %arg1[%arg0, %498, %c0_i32_251, %c0_i32_252] : memref<2x8x8x512xbf16, #tpu.memory_space<any>> -> memref<1x1x8x512xbf16, #tpu.memory_space<any>>
      %500 = tpu.memref_squeeze %499 : memref<1x1x8x512xbf16, #tpu.memory_space<any>> -> memref<8x512xbf16, #tpu.memory_space<any>>
      %c0_i32_253 = arith.constant 0 : i32
      %c0_i32_254 = arith.constant 0 : i32
      %501 = tpu.memref_slice %arg5[%495, %c0_i32_253, %c0_i32_254] : memref<2x8x512xbf16, #tpu.memory_space<vmem>> -> memref<1x8x512xbf16, #tpu.memory_space<vmem>>
      %502 = tpu.memref_squeeze %501 : memref<1x8x512xbf16, #tpu.memory_space<vmem>> -> memref<8x512xbf16, #tpu.memory_space<vmem>>
      %503 = tpu.memref_slice %arg6[%495] : memref<2x!tpu.dma_semaphore, #tpu.memory_space<semaphore_mem>> -> memref<1x!tpu.dma_semaphore, #tpu.memory_space<semaphore_mem>>
      %504 = tpu.memref_squeeze %503 : memref<1x!tpu.dma_semaphore, #tpu.memory_space<semaphore_mem>> -> memref<!tpu.dma_semaphore, #tpu.memory_space<semaphore_mem>>
      tpu.enqueue_dma source(%500 : memref<8x512xbf16, #tpu.memory_space<any>>) target(%502 : memref<8x512xbf16, #tpu.memory_space<vmem>>) target_semaphore(%504 : memref<!tpu.dma_semaphore, #tpu.memory_space<semaphore_mem>>)
    } else {
    }
    %214 = arith.index_cast %203 : i32 to index
    %c0_115 = arith.constant 0 : index
    %c0_116 = arith.constant 0 : index
    %215 = vector.load %arg5[%214, %c0_115, %c0_116] : memref<2x8x512xbf16, #tpu.memory_space<vmem>>, vector<1x8x512xbf16>
    %216 = vector.shape_cast %215 : vector<1x8x512xbf16> to vector<8x512xbf16>
    %217 = arith.extf %216 : vector<8x512xbf16> to vector<8x512xf32>
    %218 = arith.truncf %186 : vector<8x128xf32> to vector<8x128xbf16>
    %cst_117 = arith.constant dense<0.000000e+00> : vector<8x512xf32>
    %219 = tpu.matmul %218, %1, %cst_117 {dimension_numbers = #tpu.dot_dimension_numbers<[1], [0], [0], [1], [0, 0, 1, 1], [], []>} : vector<8x128xbf16>, vector<128x512xbf16>, vector<8x512xf32> -> vector<8x512xf32>
    %220 = arith.addf %217, %219 : vector<8x512xf32>
    %221 = vector.extract_strided_slice %220 {offsets = [0, 0], sizes = [8, 384], strides = [1, 1]} : vector<8x512xf32> to vector<8x384xf32>
    %222 = arith.negf %221 : vector<8x384xf32>
    %223 = math.exp %222 : vector<8x384xf32>
    %cst_118 = arith.constant 1.000000e+00 : f32
    %224 = vector.broadcast %cst_118 : f32 to vector<8x384xf32>
    %225 = arith.addf %224, %223 : vector<8x384xf32>
    %226 = arith.divf %224, %225 : vector<8x384xf32>
    %227 = vector.extract_strided_slice %226 {offsets = [0, 0], sizes = [8, 128], strides = [1, 1]} : vector<8x384xf32> to vector<8x128xf32>
    %228 = vector.extract_strided_slice %226 {offsets = [0, 128], sizes = [8, 128], strides = [1, 1]} : vector<8x384xf32> to vector<8x128xf32>
    %229 = vector.extract_strided_slice %226 {offsets = [0, 256], sizes = [8, 128], strides = [1, 1]} : vector<8x384xf32> to vector<8x128xf32>
    %230 = vector.extract_strided_slice %220 {offsets = [0, 384], sizes = [8, 128], strides = [1, 1]} : vector<8x512xf32> to vector<8x128xf32>
    %231 = math.tanh %230 : vector<8x128xf32>
    %232 = arith.mulf %228, %178 : vector<8x128xf32>
    %233 = arith.mulf %227, %231 : vector<8x128xf32>
    %234 = arith.addf %232, %233 : vector<8x128xf32>
    %cst_119 = arith.constant -3.000000e+00 : f32
    %cst_120 = arith.constant 3.000000e+00 : f32
    %235 = vector.broadcast %cst_119 : f32 to vector<8x128xf32>
    %236 = arith.maximumf %235, %234 : vector<8x128xf32>
    %237 = vector.broadcast %cst_120 : f32 to vector<8x128xf32>
    %238 = arith.minimumf %237, %236 : vector<8x128xf32>
    %239 = math.tanh %238 : vector<8x128xf32>
    %240 = arith.mulf %229, %239 : vector<8x128xf32>
    %241 = arith.truncf %240 : vector<8x128xf32> to vector<8x128xbf16>
    %cst_121 = arith.constant dense<0.000000e+00> : vector<8x128xf32>
    %242 = tpu.matmul %241, %3, %cst_121 {dimension_numbers = #tpu.dot_dimension_numbers<[1], [0], [0], [1], [0, 0, 1, 1], [], []>} : vector<8x128xbf16>, vector<128x128xbf16>, vector<8x128xf32> -> vector<8x128xf32>
    %cst_122 = arith.constant -3.000000e+00 : f32
    %cst_123 = arith.constant 3.000000e+00 : f32
    %243 = vector.broadcast %cst_122 : f32 to vector<8x128xf32>
    %244 = arith.maximumf %243, %242 : vector<8x128xf32>
    %245 = vector.broadcast %cst_123 : f32 to vector<8x128xf32>
    %246 = arith.minimumf %245, %244 : vector<8x128xf32>
    %c0_i32_124 = arith.constant 0 : i32
    %247 = arith.cmpi eq, %arg0, %c0_i32_124 : i32
    %c7_i32_125 = arith.constant 7 : i32
    %248 = arith.subi %c7_i32_125, %c3_i32 : i32
    %249 = arith.select %247, %c3_i32, %248 : i32
    %c0_126 = arith.constant 0 : index
    %250 = arith.index_cast %249 : i32 to index
    %c0_127 = arith.constant 0 : index
    %c0_128 = arith.constant 0 : index
    %251 = vector.load %arg4[%c0_126, %250, %c0_127, %c0_128] : memref<1x8x8x128xf32, #tpu.memory_space<vmem>>, vector<1x1x8x128xf32>
    %252 = vector.shape_cast %251 : vector<1x1x8x128xf32> to vector<8x128xf32>
    %253 = vector.shape_cast %246 : vector<8x128xf32> to vector<1x1x8x128xf32>
    tpu.vector_store %arg4[%c0_126, %250, %c0_127, %c0_128], %253 {strides = array<i32>} : memref<1x8x8x128xf32, #tpu.memory_space<vmem>>, vector<1x1x8x128xf32>,
    %c4_i32 = arith.constant 4 : i32
    %c2_i32_129 = arith.constant 2 : i32
    %c0_i32_130 = arith.constant 0 : i32
    %254 = arith.cmpi eq, %c2_i32_129, %c0_i32_130 : i32
    %c1_i32_131 = arith.constant 1 : i32
    %255 = arith.select %254, %c1_i32_131, %c2_i32_129 : i32
    %256 = arith.remsi %c4_i32, %255 : i32
    %c0_i32_132 = arith.constant 0 : i32
    %257 = arith.cmpi ne, %256, %c0_i32_132 : i32
    %c0_i32_133 = arith.constant 0 : i32
    %258 = arith.cmpi slt, %256, %c0_i32_133 : i32
    %c0_i32_134 = arith.constant 0 : i32
    %259 = arith.cmpi slt, %255, %c0_i32_134 : i32
    %260 = arith.xori %258, %259 : i1
    %261 = arith.andi %260, %257 : i1
    %262 = arith.addi %256, %255 : i32
    %263 = arith.select %261, %262, %256 : i32
    %c0_i32_135 = arith.constant 0 : i32
    %c0_i32_136 = arith.constant 0 : i32
    %c0_i32_137 = arith.constant 0 : i32
    %c0_i32_138 = arith.constant 0 : i32
    %264 = tpu.memref_slice %arg1[%c0_i32_135, %c0_i32_136, %c0_i32_137, %c0_i32_138] : memref<2x8x8x512xbf16, #tpu.memory_space<any>> -> memref<1x1x8x512xbf16, #tpu.memory_space<any>>
    %265 = tpu.memref_squeeze %264 : memref<1x1x8x512xbf16, #tpu.memory_space<any>> -> memref<8x512xbf16, #tpu.memory_space<any>>
    %c0_i32_139 = arith.constant 0 : i32
    %c0_i32_140 = arith.constant 0 : i32
    %266 = tpu.memref_slice %arg5[%263, %c0_i32_139, %c0_i32_140] : memref<2x8x512xbf16, #tpu.memory_space<vmem>> -> memref<1x8x512xbf16, #tpu.memory_space<vmem>>
    %267 = tpu.memref_squeeze %266 : memref<1x8x512xbf16, #tpu.memory_space<vmem>> -> memref<8x512xbf16, #tpu.memory_space<vmem>>
    %268 = tpu.memref_slice %arg6[%263] : memref<2x!tpu.dma_semaphore, #tpu.memory_space<semaphore_mem>> -> memref<1x!tpu.dma_semaphore, #tpu.memory_space<semaphore_mem>>
    %269 = tpu.memref_squeeze %268 : memref<1x!tpu.dma_semaphore, #tpu.memory_space<semaphore_mem>> -> memref<!tpu.dma_semaphore, #tpu.memory_space<semaphore_mem>>
    tpu.wait_dma2 semaphore(%269 : memref<!tpu.dma_semaphore, #tpu.memory_space<semaphore_mem>>) src(%265 : memref<8x512xbf16, #tpu.memory_space<any>>) dst(%267 : memref<8x512xbf16, #tpu.memory_space<vmem>>)
    %c1_i32_141 = arith.constant 1 : i32
    %270 = arith.addi %c4_i32, %c1_i32_141 : i32
    %c8_i32_142 = arith.constant 8 : i32
    %271 = arith.cmpi slt, %270, %c8_i32_142 : i32
    %272 = arith.extui %271 : i1 to i32
    %c0_i32_143 = arith.constant 0 : i32
    %273 = arith.cmpi ne, %272, %c0_i32_143 : i32
    scf.if %273 {
      %c1_i32_247 = arith.constant 1 : i32
      %494 = arith.addi %c4_i32, %c1_i32_247 : i32
      %c1_i32_248 = arith.constant 1 : i32
      %495 = arith.subi %c1_i32_248, %263 : i32
      %c0_i32_249 = arith.constant 0 : i32
      %496 = arith.cmpi eq, %arg0, %c0_i32_249 : i32
      %c7_i32_250 = arith.constant 7 : i32
      %497 = arith.subi %c7_i32_250, %494 : i32
      %498 = arith.select %496, %494, %497 : i32
      %c0_i32_251 = arith.constant 0 : i32
      %c0_i32_252 = arith.constant 0 : i32
      %499 = tpu.memref_slice %arg1[%arg0, %498, %c0_i32_251, %c0_i32_252] : memref<2x8x8x512xbf16, #tpu.memory_space<any>> -> memref<1x1x8x512xbf16, #tpu.memory_space<any>>
      %500 = tpu.memref_squeeze %499 : memref<1x1x8x512xbf16, #tpu.memory_space<any>> -> memref<8x512xbf16, #tpu.memory_space<any>>
      %c0_i32_253 = arith.constant 0 : i32
      %c0_i32_254 = arith.constant 0 : i32
      %501 = tpu.memref_slice %arg5[%495, %c0_i32_253, %c0_i32_254] : memref<2x8x512xbf16, #tpu.memory_space<vmem>> -> memref<1x8x512xbf16, #tpu.memory_space<vmem>>
      %502 = tpu.memref_squeeze %501 : memref<1x8x512xbf16, #tpu.memory_space<vmem>> -> memref<8x512xbf16, #tpu.memory_space<vmem>>
      %503 = tpu.memref_slice %arg6[%495] : memref<2x!tpu.dma_semaphore, #tpu.memory_space<semaphore_mem>> -> memref<1x!tpu.dma_semaphore, #tpu.memory_space<semaphore_mem>>
      %504 = tpu.memref_squeeze %503 : memref<1x!tpu.dma_semaphore, #tpu.memory_space<semaphore_mem>> -> memref<!tpu.dma_semaphore, #tpu.memory_space<semaphore_mem>>
      tpu.enqueue_dma source(%500 : memref<8x512xbf16, #tpu.memory_space<any>>) target(%502 : memref<8x512xbf16, #tpu.memory_space<vmem>>) target_semaphore(%504 : memref<!tpu.dma_semaphore, #tpu.memory_space<semaphore_mem>>)
    } else {
    }
    %274 = arith.index_cast %263 : i32 to index
    %c0_144 = arith.constant 0 : index
    %c0_145 = arith.constant 0 : index
    %275 = vector.load %arg5[%274, %c0_144, %c0_145] : memref<2x8x512xbf16, #tpu.memory_space<vmem>>, vector<1x8x512xbf16>
    %276 = vector.shape_cast %275 : vector<1x8x512xbf16> to vector<8x512xbf16>
    %277 = arith.extf %276 : vector<8x512xbf16> to vector<8x512xf32>
    %278 = arith.truncf %246 : vector<8x128xf32> to vector<8x128xbf16>
    %cst_146 = arith.constant dense<0.000000e+00> : vector<8x512xf32>
    %279 = tpu.matmul %278, %1, %cst_146 {dimension_numbers = #tpu.dot_dimension_numbers<[1], [0], [0], [1], [0, 0, 1, 1], [], []>} : vector<8x128xbf16>, vector<128x512xbf16>, vector<8x512xf32> -> vector<8x512xf32>
    %280 = arith.addf %277, %279 : vector<8x512xf32>
    %281 = vector.extract_strided_slice %280 {offsets = [0, 0], sizes = [8, 384], strides = [1, 1]} : vector<8x512xf32> to vector<8x384xf32>
    %282 = arith.negf %281 : vector<8x384xf32>
    %283 = math.exp %282 : vector<8x384xf32>
    %cst_147 = arith.constant 1.000000e+00 : f32
    %284 = vector.broadcast %cst_147 : f32 to vector<8x384xf32>
    %285 = arith.addf %284, %283 : vector<8x384xf32>
    %286 = arith.divf %284, %285 : vector<8x384xf32>
    %287 = vector.extract_strided_slice %286 {offsets = [0, 0], sizes = [8, 128], strides = [1, 1]} : vector<8x384xf32> to vector<8x128xf32>
    %288 = vector.extract_strided_slice %286 {offsets = [0, 128], sizes = [8, 128], strides = [1, 1]} : vector<8x384xf32> to vector<8x128xf32>
    %289 = vector.extract_strided_slice %286 {offsets = [0, 256], sizes = [8, 128], strides = [1, 1]} : vector<8x384xf32> to vector<8x128xf32>
    %290 = vector.extract_strided_slice %280 {offsets = [0, 384], sizes = [8, 128], strides = [1, 1]} : vector<8x512xf32> to vector<8x128xf32>
    %291 = math.tanh %290 : vector<8x128xf32>
    %292 = arith.mulf %288, %238 : vector<8x128xf32>
    %293 = arith.mulf %287, %291 : vector<8x128xf32>
    %294 = arith.addf %292, %293 : vector<8x128xf32>
    %cst_148 = arith.constant -3.000000e+00 : f32
    %cst_149 = arith.constant 3.000000e+00 : f32
    %295 = vector.broadcast %cst_148 : f32 to vector<8x128xf32>
    %296 = arith.maximumf %295, %294 : vector<8x128xf32>
    %297 = vector.broadcast %cst_149 : f32 to vector<8x128xf32>
    %298 = arith.minimumf %297, %296 : vector<8x128xf32>
    %299 = math.tanh %298 : vector<8x128xf32>
    %300 = arith.mulf %289, %299 : vector<8x128xf32>
    %301 = arith.truncf %300 : vector<8x128xf32> to vector<8x128xbf16>
    %cst_150 = arith.constant dense<0.000000e+00> : vector<8x128xf32>
    %302 = tpu.matmul %301, %3, %cst_150 {dimension_numbers = #tpu.dot_dimension_numbers<[1], [0], [0], [1], [0, 0, 1, 1], [], []>} : vector<8x128xbf16>, vector<128x128xbf16>, vector<8x128xf32> -> vector<8x128xf32>
    %cst_151 = arith.constant -3.000000e+00 : f32
    %cst_152 = arith.constant 3.000000e+00 : f32
    %303 = vector.broadcast %cst_151 : f32 to vector<8x128xf32>
    %304 = arith.maximumf %303, %302 : vector<8x128xf32>
    %305 = vector.broadcast %cst_152 : f32 to vector<8x128xf32>
    %306 = arith.minimumf %305, %304 : vector<8x128xf32>
    %c0_i32_153 = arith.constant 0 : i32
    %307 = arith.cmpi eq, %arg0, %c0_i32_153 : i32
    %c7_i32_154 = arith.constant 7 : i32
    %308 = arith.subi %c7_i32_154, %c4_i32 : i32
    %309 = arith.select %307, %c4_i32, %308 : i32
    %c0_155 = arith.constant 0 : index
    %310 = arith.index_cast %309 : i32 to index
    %c0_156 = arith.constant 0 : index
    %c0_157 = arith.constant 0 : index
    %311 = vector.load %arg4[%c0_155, %310, %c0_156, %c0_157] : memref<1x8x8x128xf32, #tpu.memory_space<vmem>>, vector<1x1x8x128xf32>
    %312 = vector.shape_cast %311 : vector<1x1x8x128xf32> to vector<8x128xf32>
    %313 = vector.shape_cast %306 : vector<8x128xf32> to vector<1x1x8x128xf32>
    tpu.vector_store %arg4[%c0_155, %310, %c0_156, %c0_157], %313 {strides = array<i32>} : memref<1x8x8x128xf32, #tpu.memory_space<vmem>>, vector<1x1x8x128xf32>,
    %c5_i32 = arith.constant 5 : i32
    %c2_i32_158 = arith.constant 2 : i32
    %c0_i32_159 = arith.constant 0 : i32
    %314 = arith.cmpi eq, %c2_i32_158, %c0_i32_159 : i32
    %c1_i32_160 = arith.constant 1 : i32
    %315 = arith.select %314, %c1_i32_160, %c2_i32_158 : i32
    %316 = arith.remsi %c5_i32, %315 : i32
    %c0_i32_161 = arith.constant 0 : i32
    %317 = arith.cmpi ne, %316, %c0_i32_161 : i32
    %c0_i32_162 = arith.constant 0 : i32
    %318 = arith.cmpi slt, %316, %c0_i32_162 : i32
    %c0_i32_163 = arith.constant 0 : i32
    %319 = arith.cmpi slt, %315, %c0_i32_163 : i32
    %320 = arith.xori %318, %319 : i1
    %321 = arith.andi %320, %317 : i1
    %322 = arith.addi %316, %315 : i32
    %323 = arith.select %321, %322, %316 : i32
    %c0_i32_164 = arith.constant 0 : i32
    %c0_i32_165 = arith.constant 0 : i32
    %c0_i32_166 = arith.constant 0 : i32
    %c0_i32_167 = arith.constant 0 : i32
    %324 = tpu.memref_slice %arg1[%c0_i32_164, %c0_i32_165, %c0_i32_166, %c0_i32_167] : memref<2x8x8x512xbf16, #tpu.memory_space<any>> -> memref<1x1x8x512xbf16, #tpu.memory_space<any>>
    %325 = tpu.memref_squeeze %324 : memref<1x1x8x512xbf16, #tpu.memory_space<any>> -> memref<8x512xbf16, #tpu.memory_space<any>>
    %c0_i32_168 = arith.constant 0 : i32
    %c0_i32_169 = arith.constant 0 : i32
    %326 = tpu.memref_slice %arg5[%323, %c0_i32_168, %c0_i32_169] : memref<2x8x512xbf16, #tpu.memory_space<vmem>> -> memref<1x8x512xbf16, #tpu.memory_space<vmem>>
    %327 = tpu.memref_squeeze %326 : memref<1x8x512xbf16, #tpu.memory_space<vmem>> -> memref<8x512xbf16, #tpu.memory_space<vmem>>
    %328 = tpu.memref_slice %arg6[%323] : memref<2x!tpu.dma_semaphore, #tpu.memory_space<semaphore_mem>> -> memref<1x!tpu.dma_semaphore, #tpu.memory_space<semaphore_mem>>
    %329 = tpu.memref_squeeze %328 : memref<1x!tpu.dma_semaphore, #tpu.memory_space<semaphore_mem>> -> memref<!tpu.dma_semaphore, #tpu.memory_space<semaphore_mem>>
    tpu.wait_dma2 semaphore(%329 : memref<!tpu.dma_semaphore, #tpu.memory_space<semaphore_mem>>) src(%325 : memref<8x512xbf16, #tpu.memory_space<any>>) dst(%327 : memref<8x512xbf16, #tpu.memory_space<vmem>>)
    %c1_i32_170 = arith.constant 1 : i32
    %330 = arith.addi %c5_i32, %c1_i32_170 : i32
    %c8_i32_171 = arith.constant 8 : i32
    %331 = arith.cmpi slt, %330, %c8_i32_171 : i32
    %332 = arith.extui %331 : i1 to i32
    %c0_i32_172 = arith.constant 0 : i32
    %333 = arith.cmpi ne, %332, %c0_i32_172 : i32
    scf.if %333 {
      %c1_i32_247 = arith.constant 1 : i32
      %494 = arith.addi %c5_i32, %c1_i32_247 : i32
      %c1_i32_248 = arith.constant 1 : i32
      %495 = arith.subi %c1_i32_248, %323 : i32
      %c0_i32_249 = arith.constant 0 : i32
      %496 = arith.cmpi eq, %arg0, %c0_i32_249 : i32
      %c7_i32_250 = arith.constant 7 : i32
      %497 = arith.subi %c7_i32_250, %494 : i32
      %498 = arith.select %496, %494, %497 : i32
      %c0_i32_251 = arith.constant 0 : i32
      %c0_i32_252 = arith.constant 0 : i32
      %499 = tpu.memref_slice %arg1[%arg0, %498, %c0_i32_251, %c0_i32_252] : memref<2x8x8x512xbf16, #tpu.memory_space<any>> -> memref<1x1x8x512xbf16, #tpu.memory_space<any>>
      %500 = tpu.memref_squeeze %499 : memref<1x1x8x512xbf16, #tpu.memory_space<any>> -> memref<8x512xbf16, #tpu.memory_space<any>>
      %c0_i32_253 = arith.constant 0 : i32
      %c0_i32_254 = arith.constant 0 : i32
      %501 = tpu.memref_slice %arg5[%495, %c0_i32_253, %c0_i32_254] : memref<2x8x512xbf16, #tpu.memory_space<vmem>> -> memref<1x8x512xbf16, #tpu.memory_space<vmem>>
      %502 = tpu.memref_squeeze %501 : memref<1x8x512xbf16, #tpu.memory_space<vmem>> -> memref<8x512xbf16, #tpu.memory_space<vmem>>
      %503 = tpu.memref_slice %arg6[%495] : memref<2x!tpu.dma_semaphore, #tpu.memory_space<semaphore_mem>> -> memref<1x!tpu.dma_semaphore, #tpu.memory_space<semaphore_mem>>
      %504 = tpu.memref_squeeze %503 : memref<1x!tpu.dma_semaphore, #tpu.memory_space<semaphore_mem>> -> memref<!tpu.dma_semaphore, #tpu.memory_space<semaphore_mem>>
      tpu.enqueue_dma source(%500 : memref<8x512xbf16, #tpu.memory_space<any>>) target(%502 : memref<8x512xbf16, #tpu.memory_space<vmem>>) target_semaphore(%504 : memref<!tpu.dma_semaphore, #tpu.memory_space<semaphore_mem>>)
    } else {
    }
    %334 = arith.index_cast %323 : i32 to index
    %c0_173 = arith.constant 0 : index
    %c0_174 = arith.constant 0 : index
    %335 = vector.load %arg5[%334, %c0_173, %c0_174] : memref<2x8x512xbf16, #tpu.memory_space<vmem>>, vector<1x8x512xbf16>
    %336 = vector.shape_cast %335 : vector<1x8x512xbf16> to vector<8x512xbf16>
    %337 = arith.extf %336 : vector<8x512xbf16> to vector<8x512xf32>
    %338 = arith.truncf %306 : vector<8x128xf32> to vector<8x128xbf16>
    %cst_175 = arith.constant dense<0.000000e+00> : vector<8x512xf32>
    %339 = tpu.matmul %338, %1, %cst_175 {dimension_numbers = #tpu.dot_dimension_numbers<[1], [0], [0], [1], [0, 0, 1, 1], [], []>} : vector<8x128xbf16>, vector<128x512xbf16>, vector<8x512xf32> -> vector<8x512xf32>
    %340 = arith.addf %337, %339 : vector<8x512xf32>
    %341 = vector.extract_strided_slice %340 {offsets = [0, 0], sizes = [8, 384], strides = [1, 1]} : vector<8x512xf32> to vector<8x384xf32>
    %342 = arith.negf %341 : vector<8x384xf32>
    %343 = math.exp %342 : vector<8x384xf32>
    %cst_176 = arith.constant 1.000000e+00 : f32
    %344 = vector.broadcast %cst_176 : f32 to vector<8x384xf32>
    %345 = arith.addf %344, %343 : vector<8x384xf32>
    %346 = arith.divf %344, %345 : vector<8x384xf32>
    %347 = vector.extract_strided_slice %346 {offsets = [0, 0], sizes = [8, 128], strides = [1, 1]} : vector<8x384xf32> to vector<8x128xf32>
    %348 = vector.extract_strided_slice %346 {offsets = [0, 128], sizes = [8, 128], strides = [1, 1]} : vector<8x384xf32> to vector<8x128xf32>
    %349 = vector.extract_strided_slice %346 {offsets = [0, 256], sizes = [8, 128], strides = [1, 1]} : vector<8x384xf32> to vector<8x128xf32>
    %350 = vector.extract_strided_slice %340 {offsets = [0, 384], sizes = [8, 128], strides = [1, 1]} : vector<8x512xf32> to vector<8x128xf32>
    %351 = math.tanh %350 : vector<8x128xf32>
    %352 = arith.mulf %348, %298 : vector<8x128xf32>
    %353 = arith.mulf %347, %351 : vector<8x128xf32>
    %354 = arith.addf %352, %353 : vector<8x128xf32>
    %cst_177 = arith.constant -3.000000e+00 : f32
    %cst_178 = arith.constant 3.000000e+00 : f32
    %355 = vector.broadcast %cst_177 : f32 to vector<8x128xf32>
    %356 = arith.maximumf %355, %354 : vector<8x128xf32>
    %357 = vector.broadcast %cst_178 : f32 to vector<8x128xf32>
    %358 = arith.minimumf %357, %356 : vector<8x128xf32>
    %359 = math.tanh %358 : vector<8x128xf32>
    %360 = arith.mulf %349, %359 : vector<8x128xf32>
    %361 = arith.truncf %360 : vector<8x128xf32> to vector<8x128xbf16>
    %cst_179 = arith.constant dense<0.000000e+00> : vector<8x128xf32>
    %362 = tpu.matmul %361, %3, %cst_179 {dimension_numbers = #tpu.dot_dimension_numbers<[1], [0], [0], [1], [0, 0, 1, 1], [], []>} : vector<8x128xbf16>, vector<128x128xbf16>, vector<8x128xf32> -> vector<8x128xf32>
    %cst_180 = arith.constant -3.000000e+00 : f32
    %cst_181 = arith.constant 3.000000e+00 : f32
    %363 = vector.broadcast %cst_180 : f32 to vector<8x128xf32>
    %364 = arith.maximumf %363, %362 : vector<8x128xf32>
    %365 = vector.broadcast %cst_181 : f32 to vector<8x128xf32>
    %366 = arith.minimumf %365, %364 : vector<8x128xf32>
    %c0_i32_182 = arith.constant 0 : i32
    %367 = arith.cmpi eq, %arg0, %c0_i32_182 : i32
    %c7_i32_183 = arith.constant 7 : i32
    %368 = arith.subi %c7_i32_183, %c5_i32 : i32
    %369 = arith.select %367, %c5_i32, %368 : i32
    %c0_184 = arith.constant 0 : index
    %370 = arith.index_cast %369 : i32 to index
    %c0_185 = arith.constant 0 : index
    %c0_186 = arith.constant 0 : index
    %371 = vector.load %arg4[%c0_184, %370, %c0_185, %c0_186] : memref<1x8x8x128xf32, #tpu.memory_space<vmem>>, vector<1x1x8x128xf32>
    %372 = vector.shape_cast %371 : vector<1x1x8x128xf32> to vector<8x128xf32>
    %373 = vector.shape_cast %366 : vector<8x128xf32> to vector<1x1x8x128xf32>
    tpu.vector_store %arg4[%c0_184, %370, %c0_185, %c0_186], %373 {strides = array<i32>} : memref<1x8x8x128xf32, #tpu.memory_space<vmem>>, vector<1x1x8x128xf32>,
    %c6_i32 = arith.constant 6 : i32
    %c2_i32_187 = arith.constant 2 : i32
    %c0_i32_188 = arith.constant 0 : i32
    %374 = arith.cmpi eq, %c2_i32_187, %c0_i32_188 : i32
    %c1_i32_189 = arith.constant 1 : i32
    %375 = arith.select %374, %c1_i32_189, %c2_i32_187 : i32
    %376 = arith.remsi %c6_i32, %375 : i32
    %c0_i32_190 = arith.constant 0 : i32
    %377 = arith.cmpi ne, %376, %c0_i32_190 : i32
    %c0_i32_191 = arith.constant 0 : i32
    %378 = arith.cmpi slt, %376, %c0_i32_191 : i32
    %c0_i32_192 = arith.constant 0 : i32
    %379 = arith.cmpi slt, %375, %c0_i32_192 : i32
    %380 = arith.xori %378, %379 : i1
    %381 = arith.andi %380, %377 : i1
    %382 = arith.addi %376, %375 : i32
    %383 = arith.select %381, %382, %376 : i32
    %c0_i32_193 = arith.constant 0 : i32
    %c0_i32_194 = arith.constant 0 : i32
    %c0_i32_195 = arith.constant 0 : i32
    %c0_i32_196 = arith.constant 0 : i32
    %384 = tpu.memref_slice %arg1[%c0_i32_193, %c0_i32_194, %c0_i32_195, %c0_i32_196] : memref<2x8x8x512xbf16, #tpu.memory_space<any>> -> memref<1x1x8x512xbf16, #tpu.memory_space<any>>
    %385 = tpu.memref_squeeze %384 : memref<1x1x8x512xbf16, #tpu.memory_space<any>> -> memref<8x512xbf16, #tpu.memory_space<any>>
    %c0_i32_197 = arith.constant 0 : i32
    %c0_i32_198 = arith.constant 0 : i32
    %386 = tpu.memref_slice %arg5[%383, %c0_i32_197, %c0_i32_198] : memref<2x8x512xbf16, #tpu.memory_space<vmem>> -> memref<1x8x512xbf16, #tpu.memory_space<vmem>>
    %387 = tpu.memref_squeeze %386 : memref<1x8x512xbf16, #tpu.memory_space<vmem>> -> memref<8x512xbf16, #tpu.memory_space<vmem>>
    %388 = tpu.memref_slice %arg6[%383] : memref<2x!tpu.dma_semaphore, #tpu.memory_space<semaphore_mem>> -> memref<1x!tpu.dma_semaphore, #tpu.memory_space<semaphore_mem>>
    %389 = tpu.memref_squeeze %388 : memref<1x!tpu.dma_semaphore, #tpu.memory_space<semaphore_mem>> -> memref<!tpu.dma_semaphore, #tpu.memory_space<semaphore_mem>>
    tpu.wait_dma2 semaphore(%389 : memref<!tpu.dma_semaphore, #tpu.memory_space<semaphore_mem>>) src(%385 : memref<8x512xbf16, #tpu.memory_space<any>>) dst(%387 : memref<8x512xbf16, #tpu.memory_space<vmem>>)
    %c1_i32_199 = arith.constant 1 : i32
    %390 = arith.addi %c6_i32, %c1_i32_199 : i32
    %c8_i32_200 = arith.constant 8 : i32
    %391 = arith.cmpi slt, %390, %c8_i32_200 : i32
    %392 = arith.extui %391 : i1 to i32
    %c0_i32_201 = arith.constant 0 : i32
    %393 = arith.cmpi ne, %392, %c0_i32_201 : i32
    scf.if %393 {
      %c1_i32_247 = arith.constant 1 : i32
      %494 = arith.addi %c6_i32, %c1_i32_247 : i32
      %c1_i32_248 = arith.constant 1 : i32
      %495 = arith.subi %c1_i32_248, %383 : i32
      %c0_i32_249 = arith.constant 0 : i32
      %496 = arith.cmpi eq, %arg0, %c0_i32_249 : i32
      %c7_i32_250 = arith.constant 7 : i32
      %497 = arith.subi %c7_i32_250, %494 : i32
      %498 = arith.select %496, %494, %497 : i32
      %c0_i32_251 = arith.constant 0 : i32
      %c0_i32_252 = arith.constant 0 : i32
      %499 = tpu.memref_slice %arg1[%arg0, %498, %c0_i32_251, %c0_i32_252] : memref<2x8x8x512xbf16, #tpu.memory_space<any>> -> memref<1x1x8x512xbf16, #tpu.memory_space<any>>
      %500 = tpu.memref_squeeze %499 : memref<1x1x8x512xbf16, #tpu.memory_space<any>> -> memref<8x512xbf16, #tpu.memory_space<any>>
      %c0_i32_253 = arith.constant 0 : i32
      %c0_i32_254 = arith.constant 0 : i32
      %501 = tpu.memref_slice %arg5[%495, %c0_i32_253, %c0_i32_254] : memref<2x8x512xbf16, #tpu.memory_space<vmem>> -> memref<1x8x512xbf16, #tpu.memory_space<vmem>>
      %502 = tpu.memref_squeeze %501 : memref<1x8x512xbf16, #tpu.memory_space<vmem>> -> memref<8x512xbf16, #tpu.memory_space<vmem>>
      %503 = tpu.memref_slice %arg6[%495] : memref<2x!tpu.dma_semaphore, #tpu.memory_space<semaphore_mem>> -> memref<1x!tpu.dma_semaphore, #tpu.memory_space<semaphore_mem>>
      %504 = tpu.memref_squeeze %503 : memref<1x!tpu.dma_semaphore, #tpu.memory_space<semaphore_mem>> -> memref<!tpu.dma_semaphore, #tpu.memory_space<semaphore_mem>>
      tpu.enqueue_dma source(%500 : memref<8x512xbf16, #tpu.memory_space<any>>) target(%502 : memref<8x512xbf16, #tpu.memory_space<vmem>>) target_semaphore(%504 : memref<!tpu.dma_semaphore, #tpu.memory_space<semaphore_mem>>)
    } else {
    }
    %394 = arith.index_cast %383 : i32 to index
    %c0_202 = arith.constant 0 : index
    %c0_203 = arith.constant 0 : index
    %395 = vector.load %arg5[%394, %c0_202, %c0_203] : memref<2x8x512xbf16, #tpu.memory_space<vmem>>, vector<1x8x512xbf16>
    %396 = vector.shape_cast %395 : vector<1x8x512xbf16> to vector<8x512xbf16>
    %397 = arith.extf %396 : vector<8x512xbf16> to vector<8x512xf32>
    %398 = arith.truncf %366 : vector<8x128xf32> to vector<8x128xbf16>
    %cst_204 = arith.constant dense<0.000000e+00> : vector<8x512xf32>
    %399 = tpu.matmul %398, %1, %cst_204 {dimension_numbers = #tpu.dot_dimension_numbers<[1], [0], [0], [1], [0, 0, 1, 1], [], []>} : vector<8x128xbf16>, vector<128x512xbf16>, vector<8x512xf32> -> vector<8x512xf32>
    %400 = arith.addf %397, %399 : vector<8x512xf32>
    %401 = vector.extract_strided_slice %400 {offsets = [0, 0], sizes = [8, 384], strides = [1, 1]} : vector<8x512xf32> to vector<8x384xf32>
    %402 = arith.negf %401 : vector<8x384xf32>
    %403 = math.exp %402 : vector<8x384xf32>
    %cst_205 = arith.constant 1.000000e+00 : f32
    %404 = vector.broadcast %cst_205 : f32 to vector<8x384xf32>
    %405 = arith.addf %404, %403 : vector<8x384xf32>
    %406 = arith.divf %404, %405 : vector<8x384xf32>
    %407 = vector.extract_strided_slice %406 {offsets = [0, 0], sizes = [8, 128], strides = [1, 1]} : vector<8x384xf32> to vector<8x128xf32>
    %408 = vector.extract_strided_slice %406 {offsets = [0, 128], sizes = [8, 128], strides = [1, 1]} : vector<8x384xf32> to vector<8x128xf32>
    %409 = vector.extract_strided_slice %406 {offsets = [0, 256], sizes = [8, 128], strides = [1, 1]} : vector<8x384xf32> to vector<8x128xf32>
    %410 = vector.extract_strided_slice %400 {offsets = [0, 384], sizes = [8, 128], strides = [1, 1]} : vector<8x512xf32> to vector<8x128xf32>
    %411 = math.tanh %410 : vector<8x128xf32>
    %412 = arith.mulf %408, %358 : vector<8x128xf32>
    %413 = arith.mulf %407, %411 : vector<8x128xf32>
    %414 = arith.addf %412, %413 : vector<8x128xf32>
    %cst_206 = arith.constant -3.000000e+00 : f32
    %cst_207 = arith.constant 3.000000e+00 : f32
    %415 = vector.broadcast %cst_206 : f32 to vector<8x128xf32>
    %416 = arith.maximumf %415, %414 : vector<8x128xf32>
    %417 = vector.broadcast %cst_207 : f32 to vector<8x128xf32>
    %418 = arith.minimumf %417, %416 : vector<8x128xf32>
    %419 = math.tanh %418 : vector<8x128xf32>
    %420 = arith.mulf %409, %419 : vector<8x128xf32>
    %421 = arith.truncf %420 : vector<8x128xf32> to vector<8x128xbf16>
    %cst_208 = arith.constant dense<0.000000e+00> : vector<8x128xf32>
    %422 = tpu.matmul %421, %3, %cst_208 {dimension_numbers = #tpu.dot_dimension_numbers<[1], [0], [0], [1], [0, 0, 1, 1], [], []>} : vector<8x128xbf16>, vector<128x128xbf16>, vector<8x128xf32> -> vector<8x128xf32>
    %cst_209 = arith.constant -3.000000e+00 : f32
    %cst_210 = arith.constant 3.000000e+00 : f32
    %423 = vector.broadcast %cst_209 : f32 to vector<8x128xf32>
    %424 = arith.maximumf %423, %422 : vector<8x128xf32>
    %425 = vector.broadcast %cst_210 : f32 to vector<8x128xf32>
    %426 = arith.minimumf %425, %424 : vector<8x128xf32>
    %c0_i32_211 = arith.constant 0 : i32
    %427 = arith.cmpi eq, %arg0, %c0_i32_211 : i32
    %c7_i32_212 = arith.constant 7 : i32
    %428 = arith.subi %c7_i32_212, %c6_i32 : i32
    %429 = arith.select %427, %c6_i32, %428 : i32
    %c0_213 = arith.constant 0 : index
    %430 = arith.index_cast %429 : i32 to index
    %c0_214 = arith.constant 0 : index
    %c0_215 = arith.constant 0 : index
    %431 = vector.load %arg4[%c0_213, %430, %c0_214, %c0_215] : memref<1x8x8x128xf32, #tpu.memory_space<vmem>>, vector<1x1x8x128xf32>
    %432 = vector.shape_cast %431 : vector<1x1x8x128xf32> to vector<8x128xf32>
    %433 = vector.shape_cast %426 : vector<8x128xf32> to vector<1x1x8x128xf32>
    tpu.vector_store %arg4[%c0_213, %430, %c0_214, %c0_215], %433 {strides = array<i32>} : memref<1x8x8x128xf32, #tpu.memory_space<vmem>>, vector<1x1x8x128xf32>,
    %c7_i32_216 = arith.constant 7 : i32
    %c2_i32_217 = arith.constant 2 : i32
    %c0_i32_218 = arith.constant 0 : i32
    %434 = arith.cmpi eq, %c2_i32_217, %c0_i32_218 : i32
    %c1_i32_219 = arith.constant 1 : i32
    %435 = arith.select %434, %c1_i32_219, %c2_i32_217 : i32
    %436 = arith.remsi %c7_i32_216, %435 : i32
    %c0_i32_220 = arith.constant 0 : i32
    %437 = arith.cmpi ne, %436, %c0_i32_220 : i32
    %c0_i32_221 = arith.constant 0 : i32
    %438 = arith.cmpi slt, %436, %c0_i32_221 : i32
    %c0_i32_222 = arith.constant 0 : i32
    %439 = arith.cmpi slt, %435, %c0_i32_222 : i32
    %440 = arith.xori %438, %439 : i1
    %441 = arith.andi %440, %437 : i1
    %442 = arith.addi %436, %435 : i32
    %443 = arith.select %441, %442, %436 : i32
    %c0_i32_223 = arith.constant 0 : i32
    %c0_i32_224 = arith.constant 0 : i32
    %c0_i32_225 = arith.constant 0 : i32
    %c0_i32_226 = arith.constant 0 : i32
    %444 = tpu.memref_slice %arg1[%c0_i32_223, %c0_i32_224, %c0_i32_225, %c0_i32_226] : memref<2x8x8x512xbf16, #tpu.memory_space<any>> -> memref<1x1x8x512xbf16, #tpu.memory_space<any>>
    %445 = tpu.memref_squeeze %444 : memref<1x1x8x512xbf16, #tpu.memory_space<any>> -> memref<8x512xbf16, #tpu.memory_space<any>>
    %c0_i32_227 = arith.constant 0 : i32
    %c0_i32_228 = arith.constant 0 : i32
    %446 = tpu.memref_slice %arg5[%443, %c0_i32_227, %c0_i32_228] : memref<2x8x512xbf16, #tpu.memory_space<vmem>> -> memref<1x8x512xbf16, #tpu.memory_space<vmem>>
    %447 = tpu.memref_squeeze %446 : memref<1x8x512xbf16, #tpu.memory_space<vmem>> -> memref<8x512xbf16, #tpu.memory_space<vmem>>
    %448 = tpu.memref_slice %arg6[%443] : memref<2x!tpu.dma_semaphore, #tpu.memory_space<semaphore_mem>> -> memref<1x!tpu.dma_semaphore, #tpu.memory_space<semaphore_mem>>
    %449 = tpu.memref_squeeze %448 : memref<1x!tpu.dma_semaphore, #tpu.memory_space<semaphore_mem>> -> memref<!tpu.dma_semaphore, #tpu.memory_space<semaphore_mem>>
    tpu.wait_dma2 semaphore(%449 : memref<!tpu.dma_semaphore, #tpu.memory_space<semaphore_mem>>) src(%445 : memref<8x512xbf16, #tpu.memory_space<any>>) dst(%447 : memref<8x512xbf16, #tpu.memory_space<vmem>>)
    %c1_i32_229 = arith.constant 1 : i32
    %450 = arith.addi %c7_i32_216, %c1_i32_229 : i32
    %c8_i32_230 = arith.constant 8 : i32
    %451 = arith.cmpi slt, %450, %c8_i32_230 : i32
    %452 = arith.extui %451 : i1 to i32
    %c0_i32_231 = arith.constant 0 : i32
    %453 = arith.cmpi ne, %452, %c0_i32_231 : i32
    scf.if %453 {
      %c1_i32_247 = arith.constant 1 : i32
      %494 = arith.addi %c7_i32_216, %c1_i32_247 : i32
      %c1_i32_248 = arith.constant 1 : i32
      %495 = arith.subi %c1_i32_248, %443 : i32
      %c0_i32_249 = arith.constant 0 : i32
      %496 = arith.cmpi eq, %arg0, %c0_i32_249 : i32
      %c7_i32_250 = arith.constant 7 : i32
      %497 = arith.subi %c7_i32_250, %494 : i32
      %498 = arith.select %496, %494, %497 : i32
      %c0_i32_251 = arith.constant 0 : i32
      %c0_i32_252 = arith.constant 0 : i32
      %499 = tpu.memref_slice %arg1[%arg0, %498, %c0_i32_251, %c0_i32_252] : memref<2x8x8x512xbf16, #tpu.memory_space<any>> -> memref<1x1x8x512xbf16, #tpu.memory_space<any>>
      %500 = tpu.memref_squeeze %499 : memref<1x1x8x512xbf16, #tpu.memory_space<any>> -> memref<8x512xbf16, #tpu.memory_space<any>>
      %c0_i32_253 = arith.constant 0 : i32
      %c0_i32_254 = arith.constant 0 : i32
      %501 = tpu.memref_slice %arg5[%495, %c0_i32_253, %c0_i32_254] : memref<2x8x512xbf16, #tpu.memory_space<vmem>> -> memref<1x8x512xbf16, #tpu.memory_space<vmem>>
      %502 = tpu.memref_squeeze %501 : memref<1x8x512xbf16, #tpu.memory_space<vmem>> -> memref<8x512xbf16, #tpu.memory_space<vmem>>
      %503 = tpu.memref_slice %arg6[%495] : memref<2x!tpu.dma_semaphore, #tpu.memory_space<semaphore_mem>> -> memref<1x!tpu.dma_semaphore, #tpu.memory_space<semaphore_mem>>
      %504 = tpu.memref_squeeze %503 : memref<1x!tpu.dma_semaphore, #tpu.memory_space<semaphore_mem>> -> memref<!tpu.dma_semaphore, #tpu.memory_space<semaphore_mem>>
      tpu.enqueue_dma source(%500 : memref<8x512xbf16, #tpu.memory_space<any>>) target(%502 : memref<8x512xbf16, #tpu.memory_space<vmem>>) target_semaphore(%504 : memref<!tpu.dma_semaphore, #tpu.memory_space<semaphore_mem>>)
    } else {
    }
    %454 = arith.index_cast %443 : i32 to index
    %c0_232 = arith.constant 0 : index
    %c0_233 = arith.constant 0 : index
    %455 = vector.load %arg5[%454, %c0_232, %c0_233] : memref<2x8x512xbf16, #tpu.memory_space<vmem>>, vector<1x8x512xbf16>
    %456 = vector.shape_cast %455 : vector<1x8x512xbf16> to vector<8x512xbf16>
    %457 = arith.extf %456 : vector<8x512xbf16> to vector<8x512xf32>
    %458 = arith.truncf %426 : vector<8x128xf32> to vector<8x128xbf16>
    %cst_234 = arith.constant dense<0.000000e+00> : vector<8x512xf32>
    %459 = tpu.matmul %458, %1, %cst_234 {dimension_numbers = #tpu.dot_dimension_numbers<[1], [0], [0], [1], [0, 0, 1, 1], [], []>} : vector<8x128xbf16>, vector<128x512xbf16>, vector<8x512xf32> -> vector<8x512xf32>
    %460 = arith.addf %457, %459 : vector<8x512xf32>
    %461 = vector.extract_strided_slice %460 {offsets = [0, 0], sizes = [8, 384], strides = [1, 1]} : vector<8x512xf32> to vector<8x384xf32>
    %462 = arith.negf %461 : vector<8x384xf32>
    %463 = math.exp %462 : vector<8x384xf32>
    %cst_235 = arith.constant 1.000000e+00 : f32
    %464 = vector.broadcast %cst_235 : f32 to vector<8x384xf32>
    %465 = arith.addf %464, %463 : vector<8x384xf32>
    %466 = arith.divf %464, %465 : vector<8x384xf32>
    %467 = vector.extract_strided_slice %466 {offsets = [0, 0], sizes = [8, 128], strides = [1, 1]} : vector<8x384xf32> to vector<8x128xf32>
    %468 = vector.extract_strided_slice %466 {offsets = [0, 128], sizes = [8, 128], strides = [1, 1]} : vector<8x384xf32> to vector<8x128xf32>
    %469 = vector.extract_strided_slice %466 {offsets = [0, 256], sizes = [8, 128], strides = [1, 1]} : vector<8x384xf32> to vector<8x128xf32>
    %470 = vector.extract_strided_slice %460 {offsets = [0, 384], sizes = [8, 128], strides = [1, 1]} : vector<8x512xf32> to vector<8x128xf32>
    %471 = math.tanh %470 : vector<8x128xf32>
    %472 = arith.mulf %468, %418 : vector<8x128xf32>
    %473 = arith.mulf %467, %471 : vector<8x128xf32>
    %474 = arith.addf %472, %473 : vector<8x128xf32>
    %cst_236 = arith.constant -3.000000e+00 : f32
    %cst_237 = arith.constant 3.000000e+00 : f32
    %475 = vector.broadcast %cst_236 : f32 to vector<8x128xf32>
    %476 = arith.maximumf %475, %474 : vector<8x128xf32>
    %477 = vector.broadcast %cst_237 : f32 to vector<8x128xf32>
    %478 = arith.minimumf %477, %476 : vector<8x128xf32>
    %479 = math.tanh %478 : vector<8x128xf32>
    %480 = arith.mulf %469, %479 : vector<8x128xf32>
    %481 = arith.truncf %480 : vector<8x128xf32> to vector<8x128xbf16>
    %cst_238 = arith.constant dense<0.000000e+00> : vector<8x128xf32>
    %482 = tpu.matmul %481, %3, %cst_238 {dimension_numbers = #tpu.dot_dimension_numbers<[1], [0], [0], [1], [0, 0, 1, 1], [], []>} : vector<8x128xbf16>, vector<128x128xbf16>, vector<8x128xf32> -> vector<8x128xf32>
    %cst_239 = arith.constant -3.000000e+00 : f32
    %cst_240 = arith.constant 3.000000e+00 : f32
    %483 = vector.broadcast %cst_239 : f32 to vector<8x128xf32>
    %484 = arith.maximumf %483, %482 : vector<8x128xf32>
    %485 = vector.broadcast %cst_240 : f32 to vector<8x128xf32>
    %486 = arith.minimumf %485, %484 : vector<8x128xf32>
    %c0_i32_241 = arith.constant 0 : i32
    %487 = arith.cmpi eq, %arg0, %c0_i32_241 : i32
    %c7_i32_242 = arith.constant 7 : i32
    %488 = arith.subi %c7_i32_242, %c7_i32_216 : i32
    %489 = arith.select %487, %c7_i32_216, %488 : i32
    %c0_243 = arith.constant 0 : index
    %490 = arith.index_cast %489 : i32 to index
    %c0_244 = arith.constant 0 : index
    %c0_245 = arith.constant 0 : index
    %491 = vector.load %arg4[%c0_243, %490, %c0_244, %c0_245] : memref<1x8x8x128xf32, #tpu.memory_space<vmem>>, vector<1x1x8x128xf32>
    %492 = vector.shape_cast %491 : vector<1x1x8x128xf32> to vector<8x128xf32>
    %493 = vector.shape_cast %486 : vector<8x128xf32> to vector<1x1x8x128xf32>
    tpu.vector_store %arg4[%c0_243, %490, %c0_244, %c0_245], %493 {strides = array<i32>} : memref<1x8x8x128xf32, #tpu.memory_space<vmem>>, vector<1x1x8x128xf32>,
    %c8_i32_246 = arith.constant 8 : i32
    return
  }
  func.func @transform_1(%arg0: i32) -> (i32, i32, i32) {
    %c0_i32 = arith.constant 0 : i32
    %c0_i32_0 = arith.constant 0 : i32
    %c0_i32_1 = arith.constant 0 : i32
    return %arg0, %c0_i32, %c0_i32_0 : i32, i32, i32
  }
  func.func @transform_2(%arg0: i32) -> (i32, i32, i32) {
    %c0_i32 = arith.constant 0 : i32
    %c0_i32_0 = arith.constant 0 : i32
    %c0_i32_1 = arith.constant 0 : i32
    return %arg0, %c0_i32, %c0_i32_0 : i32, i32, i32
  }
  func.func @transform_3(%arg0: i32) -> (i32, i32, i32, i32) {
    %c0_i32 = arith.constant 0 : i32
    %c0_i32_0 = arith.constant 0 : i32
    %c0_i32_1 = arith.constant 0 : i32
    %c0_i32_2 = arith.constant 0 : i32
    return %arg0, %c0_i32, %c0_i32_0, %c0_i32_1 : i32, i32, i32, i32
  }
}

module attributes {stable_mosaic.version = 11 : i64} {
  func.func @kernel(%arg0: i32, %arg1: memref<2x8x8x512xbf16, #tpu.memory_space<any>>, %arg2: memref<1x128x512xbf16, #tpu.memory_space<vmem>>, %arg3: memref<1x128x128xbf16, #tpu.memory_space<vmem>>, %arg4: memref<1x8x8x128xf32, #tpu.memory_space<vmem>>, %arg5: memref<1x8x8x128xf32, #tpu.memory_space<vmem>>, %arg6: memref<2x8x512xbf16, #tpu.memory_space<vmem>>, %arg7: memref<2x!tpu.dma_semaphore, #tpu.memory_space<semaphore_mem>>) attributes {dimension_semantics = [#tpu.dimension_semantics<parallel>], iteration_bounds = array<i64: 2>, scalar_prefetch = 0 : i64, scratch_operands = 2 : i64, tpu.core_type = #tpu.core_type<tc>, window_params = [{}, {transform_indices = @transform_1, window_bounds = array<i64: 1, 128, 512>}, {transform_indices = @transform_2, window_bounds = array<i64: 1, 128, 128>}, {transform_indices = @transform_3, window_bounds = array<i64: 1, 8, 8, 128>}, {transform_indices = @transform_4, window_bounds = array<i64: 1, 8, 8, 128>}]} {
    %c0 = arith.constant 0 : index
    %c0_0 = arith.constant 0 : index
    %c0_1 = arith.constant 0 : index
    %0 = vector.load %arg2[%c0, %c0_0, %c0_1] : memref<1x128x512xbf16, #tpu.memory_space<vmem>>, vector<1x128x512xbf16>
    %1 = vector.shape_cast %0 : vector<1x128x512xbf16> to vector<128x512xbf16>
    %c0_2 = arith.constant 0 : index
    %c0_3 = arith.constant 0 : index
    %c0_4 = arith.constant 0 : index
    %2 = vector.load %arg3[%c0_2, %c0_3, %c0_4] : memref<1x128x128xbf16, #tpu.memory_space<vmem>>, vector<1x128x128xbf16>
    %3 = vector.shape_cast %2 : vector<1x128x128xbf16> to vector<128x128xbf16>
    %c0_i32 = arith.constant 0 : i32
    %4 = arith.cmpi eq, %arg0, %c0_i32 : i32
    %c0_i32_5 = arith.constant 0 : i32
    %c7_i32 = arith.constant 7 : i32
    %5 = arith.select %4, %c0_i32_5, %c7_i32 : i32
    %c0_i32_6 = arith.constant 0 : i32
    %c0_i32_7 = arith.constant 0 : i32
    %c0_i32_8 = arith.constant 0 : i32
    %c0_i32_9 = arith.constant 0 : i32
    %6 = tpu.memref_slice %arg1[%arg0, %5, %c0_i32_8, %c0_i32_9] : memref<2x8x8x512xbf16, #tpu.memory_space<any>> -> memref<1x1x8x512xbf16, #tpu.memory_space<any>>
    %7 = tpu.memref_squeeze %6 : memref<1x1x8x512xbf16, #tpu.memory_space<any>> -> memref<8x512xbf16, #tpu.memory_space<any>>
    %c0_i32_10 = arith.constant 0 : i32
    %c0_i32_11 = arith.constant 0 : i32
    %8 = tpu.memref_slice %arg6[%c0_i32_6, %c0_i32_10, %c0_i32_11] : memref<2x8x512xbf16, #tpu.memory_space<vmem>> -> memref<1x8x512xbf16, #tpu.memory_space<vmem>>
    %9 = tpu.memref_squeeze %8 : memref<1x8x512xbf16, #tpu.memory_space<vmem>> -> memref<8x512xbf16, #tpu.memory_space<vmem>>
    %10 = tpu.memref_slice %arg7[%c0_i32_7] : memref<2x!tpu.dma_semaphore, #tpu.memory_space<semaphore_mem>> -> memref<1x!tpu.dma_semaphore, #tpu.memory_space<semaphore_mem>>
    %11 = tpu.memref_squeeze %10 : memref<1x!tpu.dma_semaphore, #tpu.memory_space<semaphore_mem>> -> memref<!tpu.dma_semaphore, #tpu.memory_space<semaphore_mem>>
    tpu.enqueue_dma source(%7 : memref<8x512xbf16, #tpu.memory_space<any>>) target(%9 : memref<8x512xbf16, #tpu.memory_space<vmem>>) target_semaphore(%11 : memref<!tpu.dma_semaphore, #tpu.memory_space<semaphore_mem>>)
    %cst = arith.constant 0.000000e+00 : f32
    %12 = vector.broadcast %cst : f32 to vector<8x128xf32>
    %cst_12 = arith.constant 0.000000e+00 : f32
    %13 = vector.broadcast %cst_12 : f32 to vector<8x128xf32>
    %c0_i32_13 = arith.constant 0 : i32
    %c2_i32 = arith.constant 2 : i32
    %c0_i32_14 = arith.constant 0 : i32
    %14 = arith.cmpi eq, %c2_i32, %c0_i32_14 : i32
    %c1_i32 = arith.constant 1 : i32
    %15 = arith.select %14, %c1_i32, %c2_i32 : i32
    %16 = arith.remsi %c0_i32_13, %15 : i32
    %c0_i32_15 = arith.constant 0 : i32
    %17 = arith.cmpi ne, %16, %c0_i32_15 : i32
    %c0_i32_16 = arith.constant 0 : i32
    %18 = arith.cmpi slt, %16, %c0_i32_16 : i32
    %c0_i32_17 = arith.constant 0 : i32
    %19 = arith.cmpi slt, %15, %c0_i32_17 : i32
    %20 = arith.xori %18, %19 : i1
    %21 = arith.andi %20, %17 : i1
    %22 = arith.addi %16, %15 : i32
    %23 = arith.select %21, %22, %16 : i32
    %c0_i32_18 = arith.constant 0 : i32
    %c0_i32_19 = arith.constant 0 : i32
    %c0_i32_20 = arith.constant 0 : i32
    %c0_i32_21 = arith.constant 0 : i32
    %24 = tpu.memref_slice %arg1[%c0_i32_18, %c0_i32_19, %c0_i32_20, %c0_i32_21] : memref<2x8x8x512xbf16, #tpu.memory_space<any>> -> memref<1x1x8x512xbf16, #tpu.memory_space<any>>
    %25 = tpu.memref_squeeze %24 : memref<1x1x8x512xbf16, #tpu.memory_space<any>> -> memref<8x512xbf16, #tpu.memory_space<any>>
    %c0_i32_22 = arith.constant 0 : i32
    %c0_i32_23 = arith.constant 0 : i32
    %26 = tpu.memref_slice %arg6[%23, %c0_i32_22, %c0_i32_23] : memref<2x8x512xbf16, #tpu.memory_space<vmem>> -> memref<1x8x512xbf16, #tpu.memory_space<vmem>>
    %27 = tpu.memref_squeeze %26 : memref<1x8x512xbf16, #tpu.memory_space<vmem>> -> memref<8x512xbf16, #tpu.memory_space<vmem>>
    %28 = tpu.memref_slice %arg7[%23] : memref<2x!tpu.dma_semaphore, #tpu.memory_space<semaphore_mem>> -> memref<1x!tpu.dma_semaphore, #tpu.memory_space<semaphore_mem>>
    %29 = tpu.memref_squeeze %28 : memref<1x!tpu.dma_semaphore, #tpu.memory_space<semaphore_mem>> -> memref<!tpu.dma_semaphore, #tpu.memory_space<semaphore_mem>>
    tpu.wait_dma2 semaphore(%29 : memref<!tpu.dma_semaphore, #tpu.memory_space<semaphore_mem>>) src(%25 : memref<8x512xbf16, #tpu.memory_space<any>>) dst(%27 : memref<8x512xbf16, #tpu.memory_space<vmem>>)
    %c1_i32_24 = arith.constant 1 : i32
    %30 = arith.addi %c0_i32_13, %c1_i32_24 : i32
    %c8_i32 = arith.constant 8 : i32
    %31 = arith.cmpi slt, %30, %c8_i32 : i32
    %32 = arith.extui %31 : i1 to i32
    %c0_i32_25 = arith.constant 0 : i32
    %33 = arith.cmpi ne, %32, %c0_i32_25 : i32
    scf.if %33 {
      %c1_i32_287 = arith.constant 1 : i32
      %550 = arith.addi %c0_i32_13, %c1_i32_287 : i32
      %c1_i32_288 = arith.constant 1 : i32
      %551 = arith.subi %c1_i32_288, %23 : i32
      %c0_i32_289 = arith.constant 0 : i32
      %552 = arith.cmpi eq, %arg0, %c0_i32_289 : i32
      %c7_i32_290 = arith.constant 7 : i32
      %553 = arith.subi %c7_i32_290, %550 : i32
      %554 = arith.select %552, %550, %553 : i32
      %c0_i32_291 = arith.constant 0 : i32
      %c0_i32_292 = arith.constant 0 : i32
      %555 = tpu.memref_slice %arg1[%arg0, %554, %c0_i32_291, %c0_i32_292] : memref<2x8x8x512xbf16, #tpu.memory_space<any>> -> memref<1x1x8x512xbf16, #tpu.memory_space<any>>
      %556 = tpu.memref_squeeze %555 : memref<1x1x8x512xbf16, #tpu.memory_space<any>> -> memref<8x512xbf16, #tpu.memory_space<any>>
      %c0_i32_293 = arith.constant 0 : i32
      %c0_i32_294 = arith.constant 0 : i32
      %557 = tpu.memref_slice %arg6[%551, %c0_i32_293, %c0_i32_294] : memref<2x8x512xbf16, #tpu.memory_space<vmem>> -> memref<1x8x512xbf16, #tpu.memory_space<vmem>>
      %558 = tpu.memref_squeeze %557 : memref<1x8x512xbf16, #tpu.memory_space<vmem>> -> memref<8x512xbf16, #tpu.memory_space<vmem>>
      %559 = tpu.memref_slice %arg7[%551] : memref<2x!tpu.dma_semaphore, #tpu.memory_space<semaphore_mem>> -> memref<1x!tpu.dma_semaphore, #tpu.memory_space<semaphore_mem>>
      %560 = tpu.memref_squeeze %559 : memref<1x!tpu.dma_semaphore, #tpu.memory_space<semaphore_mem>> -> memref<!tpu.dma_semaphore, #tpu.memory_space<semaphore_mem>>
      tpu.enqueue_dma source(%556 : memref<8x512xbf16, #tpu.memory_space<any>>) target(%558 : memref<8x512xbf16, #tpu.memory_space<vmem>>) target_semaphore(%560 : memref<!tpu.dma_semaphore, #tpu.memory_space<semaphore_mem>>)
    } else {
    }
    %34 = arith.index_cast %23 : i32 to index
    %c0_26 = arith.constant 0 : index
    %c0_27 = arith.constant 0 : index
    %35 = vector.load %arg6[%34, %c0_26, %c0_27] : memref<2x8x512xbf16, #tpu.memory_space<vmem>>, vector<1x8x512xbf16>
    %36 = vector.shape_cast %35 : vector<1x8x512xbf16> to vector<8x512xbf16>
    %37 = arith.extf %36 : vector<8x512xbf16> to vector<8x512xf32>
    %38 = arith.truncf %12 : vector<8x128xf32> to vector<8x128xbf16>
    %cst_28 = arith.constant dense<0.000000e+00> : vector<8x512xf32>
    %39 = tpu.matmul %38, %1, %cst_28 {dimension_numbers = #tpu.dot_dimension_numbers<[1], [0], [0], [1], [0, 0, 1, 1], [], []>} : vector<8x128xbf16>, vector<128x512xbf16>, vector<8x512xf32> -> vector<8x512xf32>
    %40 = arith.addf %37, %39 : vector<8x512xf32>
    %41 = vector.extract_strided_slice %40 {offsets = [0, 0], sizes = [8, 384], strides = [1, 1]} : vector<8x512xf32> to vector<8x384xf32>
    %42 = arith.negf %41 : vector<8x384xf32>
    %43 = math.exp %42 : vector<8x384xf32>
    %cst_29 = arith.constant 1.000000e+00 : f32
    %44 = vector.broadcast %cst_29 : f32 to vector<8x384xf32>
    %45 = arith.addf %44, %43 : vector<8x384xf32>
    %46 = arith.divf %44, %45 : vector<8x384xf32>
    %47 = vector.extract_strided_slice %46 {offsets = [0, 0], sizes = [8, 128], strides = [1, 1]} : vector<8x384xf32> to vector<8x128xf32>
    %48 = vector.extract_strided_slice %46 {offsets = [0, 128], sizes = [8, 128], strides = [1, 1]} : vector<8x384xf32> to vector<8x128xf32>
    %49 = vector.extract_strided_slice %46 {offsets = [0, 256], sizes = [8, 128], strides = [1, 1]} : vector<8x384xf32> to vector<8x128xf32>
    %50 = vector.extract_strided_slice %40 {offsets = [0, 384], sizes = [8, 128], strides = [1, 1]} : vector<8x512xf32> to vector<8x128xf32>
    %51 = math.tanh %50 : vector<8x128xf32>
    %52 = arith.mulf %48, %13 : vector<8x128xf32>
    %53 = arith.mulf %47, %51 : vector<8x128xf32>
    %54 = arith.addf %52, %53 : vector<8x128xf32>
    %cst_30 = arith.constant -3.000000e+00 : f32
    %cst_31 = arith.constant 3.000000e+00 : f32
    %55 = vector.broadcast %cst_30 : f32 to vector<8x128xf32>
    %56 = arith.maximumf %55, %54 : vector<8x128xf32>
    %57 = vector.broadcast %cst_31 : f32 to vector<8x128xf32>
    %58 = arith.minimumf %57, %56 : vector<8x128xf32>
    %59 = math.tanh %58 : vector<8x128xf32>
    %60 = arith.mulf %49, %59 : vector<8x128xf32>
    %61 = arith.truncf %60 : vector<8x128xf32> to vector<8x128xbf16>
    %cst_32 = arith.constant dense<0.000000e+00> : vector<8x128xf32>
    %62 = tpu.matmul %61, %3, %cst_32 {dimension_numbers = #tpu.dot_dimension_numbers<[1], [0], [0], [1], [0, 0, 1, 1], [], []>} : vector<8x128xbf16>, vector<128x128xbf16>, vector<8x128xf32> -> vector<8x128xf32>
    %cst_33 = arith.constant -3.000000e+00 : f32
    %cst_34 = arith.constant 3.000000e+00 : f32
    %63 = vector.broadcast %cst_33 : f32 to vector<8x128xf32>
    %64 = arith.maximumf %63, %62 : vector<8x128xf32>
    %65 = vector.broadcast %cst_34 : f32 to vector<8x128xf32>
    %66 = arith.minimumf %65, %64 : vector<8x128xf32>
    %c0_i32_35 = arith.constant 0 : i32
    %67 = arith.cmpi eq, %arg0, %c0_i32_35 : i32
    %c7_i32_36 = arith.constant 7 : i32
    %68 = arith.subi %c7_i32_36, %c0_i32_13 : i32
    %69 = arith.select %67, %c0_i32_13, %68 : i32
    %c0_37 = arith.constant 0 : index
    %70 = arith.index_cast %69 : i32 to index
    %c0_38 = arith.constant 0 : index
    %c0_39 = arith.constant 0 : index
    %71 = vector.load %arg4[%c0_37, %70, %c0_38, %c0_39] : memref<1x8x8x128xf32, #tpu.memory_space<vmem>>, vector<1x1x8x128xf32>
    %72 = vector.shape_cast %71 : vector<1x1x8x128xf32> to vector<8x128xf32>
    %73 = arith.addf %66, %72 : vector<8x128xf32>
    %c0_i32_40 = arith.constant 0 : i32
    %74 = arith.cmpi eq, %arg0, %c0_i32_40 : i32
    %c7_i32_41 = arith.constant 7 : i32
    %75 = arith.subi %c7_i32_41, %c0_i32_13 : i32
    %76 = arith.select %74, %c0_i32_13, %75 : i32
    %c0_42 = arith.constant 0 : index
    %77 = arith.index_cast %76 : i32 to index
    %c0_43 = arith.constant 0 : index
    %c0_44 = arith.constant 0 : index
    %78 = vector.load %arg5[%c0_42, %77, %c0_43, %c0_44] : memref<1x8x8x128xf32, #tpu.memory_space<vmem>>, vector<1x1x8x128xf32>
    %79 = vector.shape_cast %78 : vector<1x1x8x128xf32> to vector<8x128xf32>
    %80 = vector.shape_cast %73 : vector<8x128xf32> to vector<1x1x8x128xf32>
    tpu.vector_store %arg5[%c0_42, %77, %c0_43, %c0_44], %80 {strides = array<i32>} : memref<1x8x8x128xf32, #tpu.memory_space<vmem>>, vector<1x1x8x128xf32>,
    %c1_i32_45 = arith.constant 1 : i32
    %c2_i32_46 = arith.constant 2 : i32
    %c0_i32_47 = arith.constant 0 : i32
    %81 = arith.cmpi eq, %c2_i32_46, %c0_i32_47 : i32
    %c1_i32_48 = arith.constant 1 : i32
    %82 = arith.select %81, %c1_i32_48, %c2_i32_46 : i32
    %83 = arith.remsi %c1_i32_45, %82 : i32
    %c0_i32_49 = arith.constant 0 : i32
    %84 = arith.cmpi ne, %83, %c0_i32_49 : i32
    %c0_i32_50 = arith.constant 0 : i32
    %85 = arith.cmpi slt, %83, %c0_i32_50 : i32
    %c0_i32_51 = arith.constant 0 : i32
    %86 = arith.cmpi slt, %82, %c0_i32_51 : i32
    %87 = arith.xori %85, %86 : i1
    %88 = arith.andi %87, %84 : i1
    %89 = arith.addi %83, %82 : i32
    %90 = arith.select %88, %89, %83 : i32
    %c0_i32_52 = arith.constant 0 : i32
    %c0_i32_53 = arith.constant 0 : i32
    %c0_i32_54 = arith.constant 0 : i32
    %c0_i32_55 = arith.constant 0 : i32
    %91 = tpu.memref_slice %arg1[%c0_i32_52, %c0_i32_53, %c0_i32_54, %c0_i32_55] : memref<2x8x8x512xbf16, #tpu.memory_space<any>> -> memref<1x1x8x512xbf16, #tpu.memory_space<any>>
    %92 = tpu.memref_squeeze %91 : memref<1x1x8x512xbf16, #tpu.memory_space<any>> -> memref<8x512xbf16, #tpu.memory_space<any>>
    %c0_i32_56 = arith.constant 0 : i32
    %c0_i32_57 = arith.constant 0 : i32
    %93 = tpu.memref_slice %arg6[%90, %c0_i32_56, %c0_i32_57] : memref<2x8x512xbf16, #tpu.memory_space<vmem>> -> memref<1x8x512xbf16, #tpu.memory_space<vmem>>
    %94 = tpu.memref_squeeze %93 : memref<1x8x512xbf16, #tpu.memory_space<vmem>> -> memref<8x512xbf16, #tpu.memory_space<vmem>>
    %95 = tpu.memref_slice %arg7[%90] : memref<2x!tpu.dma_semaphore, #tpu.memory_space<semaphore_mem>> -> memref<1x!tpu.dma_semaphore, #tpu.memory_space<semaphore_mem>>
    %96 = tpu.memref_squeeze %95 : memref<1x!tpu.dma_semaphore, #tpu.memory_space<semaphore_mem>> -> memref<!tpu.dma_semaphore, #tpu.memory_space<semaphore_mem>>
    tpu.wait_dma2 semaphore(%96 : memref<!tpu.dma_semaphore, #tpu.memory_space<semaphore_mem>>) src(%92 : memref<8x512xbf16, #tpu.memory_space<any>>) dst(%94 : memref<8x512xbf16, #tpu.memory_space<vmem>>)
    %c1_i32_58 = arith.constant 1 : i32
    %97 = arith.addi %c1_i32_45, %c1_i32_58 : i32
    %c8_i32_59 = arith.constant 8 : i32
    %98 = arith.cmpi slt, %97, %c8_i32_59 : i32
    %99 = arith.extui %98 : i1 to i32
    %c0_i32_60 = arith.constant 0 : i32
    %100 = arith.cmpi ne, %99, %c0_i32_60 : i32
    scf.if %100 {
      %c1_i32_287 = arith.constant 1 : i32
      %550 = arith.addi %c1_i32_45, %c1_i32_287 : i32
      %c1_i32_288 = arith.constant 1 : i32
      %551 = arith.subi %c1_i32_288, %90 : i32
      %c0_i32_289 = arith.constant 0 : i32
      %552 = arith.cmpi eq, %arg0, %c0_i32_289 : i32
      %c7_i32_290 = arith.constant 7 : i32
      %553 = arith.subi %c7_i32_290, %550 : i32
      %554 = arith.select %552, %550, %553 : i32
      %c0_i32_291 = arith.constant 0 : i32
      %c0_i32_292 = arith.constant 0 : i32
      %555 = tpu.memref_slice %arg1[%arg0, %554, %c0_i32_291, %c0_i32_292] : memref<2x8x8x512xbf16, #tpu.memory_space<any>> -> memref<1x1x8x512xbf16, #tpu.memory_space<any>>
      %556 = tpu.memref_squeeze %555 : memref<1x1x8x512xbf16, #tpu.memory_space<any>> -> memref<8x512xbf16, #tpu.memory_space<any>>
      %c0_i32_293 = arith.constant 0 : i32
      %c0_i32_294 = arith.constant 0 : i32
      %557 = tpu.memref_slice %arg6[%551, %c0_i32_293, %c0_i32_294] : memref<2x8x512xbf16, #tpu.memory_space<vmem>> -> memref<1x8x512xbf16, #tpu.memory_space<vmem>>
      %558 = tpu.memref_squeeze %557 : memref<1x8x512xbf16, #tpu.memory_space<vmem>> -> memref<8x512xbf16, #tpu.memory_space<vmem>>
      %559 = tpu.memref_slice %arg7[%551] : memref<2x!tpu.dma_semaphore, #tpu.memory_space<semaphore_mem>> -> memref<1x!tpu.dma_semaphore, #tpu.memory_space<semaphore_mem>>
      %560 = tpu.memref_squeeze %559 : memref<1x!tpu.dma_semaphore, #tpu.memory_space<semaphore_mem>> -> memref<!tpu.dma_semaphore, #tpu.memory_space<semaphore_mem>>
      tpu.enqueue_dma source(%556 : memref<8x512xbf16, #tpu.memory_space<any>>) target(%558 : memref<8x512xbf16, #tpu.memory_space<vmem>>) target_semaphore(%560 : memref<!tpu.dma_semaphore, #tpu.memory_space<semaphore_mem>>)
    } else {
    }
    %101 = arith.index_cast %90 : i32 to index
    %c0_61 = arith.constant 0 : index
    %c0_62 = arith.constant 0 : index
    %102 = vector.load %arg6[%101, %c0_61, %c0_62] : memref<2x8x512xbf16, #tpu.memory_space<vmem>>, vector<1x8x512xbf16>
    %103 = vector.shape_cast %102 : vector<1x8x512xbf16> to vector<8x512xbf16>
    %104 = arith.extf %103 : vector<8x512xbf16> to vector<8x512xf32>
    %105 = arith.truncf %66 : vector<8x128xf32> to vector<8x128xbf16>
    %cst_63 = arith.constant dense<0.000000e+00> : vector<8x512xf32>
    %106 = tpu.matmul %105, %1, %cst_63 {dimension_numbers = #tpu.dot_dimension_numbers<[1], [0], [0], [1], [0, 0, 1, 1], [], []>} : vector<8x128xbf16>, vector<128x512xbf16>, vector<8x512xf32> -> vector<8x512xf32>
    %107 = arith.addf %104, %106 : vector<8x512xf32>
    %108 = vector.extract_strided_slice %107 {offsets = [0, 0], sizes = [8, 384], strides = [1, 1]} : vector<8x512xf32> to vector<8x384xf32>
    %109 = arith.negf %108 : vector<8x384xf32>
    %110 = math.exp %109 : vector<8x384xf32>
    %cst_64 = arith.constant 1.000000e+00 : f32
    %111 = vector.broadcast %cst_64 : f32 to vector<8x384xf32>
    %112 = arith.addf %111, %110 : vector<8x384xf32>
    %113 = arith.divf %111, %112 : vector<8x384xf32>
    %114 = vector.extract_strided_slice %113 {offsets = [0, 0], sizes = [8, 128], strides = [1, 1]} : vector<8x384xf32> to vector<8x128xf32>
    %115 = vector.extract_strided_slice %113 {offsets = [0, 128], sizes = [8, 128], strides = [1, 1]} : vector<8x384xf32> to vector<8x128xf32>
    %116 = vector.extract_strided_slice %113 {offsets = [0, 256], sizes = [8, 128], strides = [1, 1]} : vector<8x384xf32> to vector<8x128xf32>
    %117 = vector.extract_strided_slice %107 {offsets = [0, 384], sizes = [8, 128], strides = [1, 1]} : vector<8x512xf32> to vector<8x128xf32>
    %118 = math.tanh %117 : vector<8x128xf32>
    %119 = arith.mulf %115, %58 : vector<8x128xf32>
    %120 = arith.mulf %114, %118 : vector<8x128xf32>
    %121 = arith.addf %119, %120 : vector<8x128xf32>
    %cst_65 = arith.constant -3.000000e+00 : f32
    %cst_66 = arith.constant 3.000000e+00 : f32
    %122 = vector.broadcast %cst_65 : f32 to vector<8x128xf32>
    %123 = arith.maximumf %122, %121 : vector<8x128xf32>
    %124 = vector.broadcast %cst_66 : f32 to vector<8x128xf32>
    %125 = arith.minimumf %124, %123 : vector<8x128xf32>
    %126 = math.tanh %125 : vector<8x128xf32>
    %127 = arith.mulf %116, %126 : vector<8x128xf32>
    %128 = arith.truncf %127 : vector<8x128xf32> to vector<8x128xbf16>
    %cst_67 = arith.constant dense<0.000000e+00> : vector<8x128xf32>
    %129 = tpu.matmul %128, %3, %cst_67 {dimension_numbers = #tpu.dot_dimension_numbers<[1], [0], [0], [1], [0, 0, 1, 1], [], []>} : vector<8x128xbf16>, vector<128x128xbf16>, vector<8x128xf32> -> vector<8x128xf32>
    %cst_68 = arith.constant -3.000000e+00 : f32
    %cst_69 = arith.constant 3.000000e+00 : f32
    %130 = vector.broadcast %cst_68 : f32 to vector<8x128xf32>
    %131 = arith.maximumf %130, %129 : vector<8x128xf32>
    %132 = vector.broadcast %cst_69 : f32 to vector<8x128xf32>
    %133 = arith.minimumf %132, %131 : vector<8x128xf32>
    %c0_i32_70 = arith.constant 0 : i32
    %134 = arith.cmpi eq, %arg0, %c0_i32_70 : i32
    %c7_i32_71 = arith.constant 7 : i32
    %135 = arith.subi %c7_i32_71, %c1_i32_45 : i32
    %136 = arith.select %134, %c1_i32_45, %135 : i32
    %c0_72 = arith.constant 0 : index
    %137 = arith.index_cast %136 : i32 to index
    %c0_73 = arith.constant 0 : index
    %c0_74 = arith.constant 0 : index
    %138 = vector.load %arg4[%c0_72, %137, %c0_73, %c0_74] : memref<1x8x8x128xf32, #tpu.memory_space<vmem>>, vector<1x1x8x128xf32>
    %139 = vector.shape_cast %138 : vector<1x1x8x128xf32> to vector<8x128xf32>
    %140 = arith.addf %133, %139 : vector<8x128xf32>
    %c0_i32_75 = arith.constant 0 : i32
    %141 = arith.cmpi eq, %arg0, %c0_i32_75 : i32
    %c7_i32_76 = arith.constant 7 : i32
    %142 = arith.subi %c7_i32_76, %c1_i32_45 : i32
    %143 = arith.select %141, %c1_i32_45, %142 : i32
    %c0_77 = arith.constant 0 : index
    %144 = arith.index_cast %143 : i32 to index
    %c0_78 = arith.constant 0 : index
    %c0_79 = arith.constant 0 : index
    %145 = vector.load %arg5[%c0_77, %144, %c0_78, %c0_79] : memref<1x8x8x128xf32, #tpu.memory_space<vmem>>, vector<1x1x8x128xf32>
    %146 = vector.shape_cast %145 : vector<1x1x8x128xf32> to vector<8x128xf32>
    %147 = vector.shape_cast %140 : vector<8x128xf32> to vector<1x1x8x128xf32>
    tpu.vector_store %arg5[%c0_77, %144, %c0_78, %c0_79], %147 {strides = array<i32>} : memref<1x8x8x128xf32, #tpu.memory_space<vmem>>, vector<1x1x8x128xf32>,
    %c2_i32_80 = arith.constant 2 : i32
    %c2_i32_81 = arith.constant 2 : i32
    %c0_i32_82 = arith.constant 0 : i32
    %148 = arith.cmpi eq, %c2_i32_81, %c0_i32_82 : i32
    %c1_i32_83 = arith.constant 1 : i32
    %149 = arith.select %148, %c1_i32_83, %c2_i32_81 : i32
    %150 = arith.remsi %c2_i32_80, %149 : i32
    %c0_i32_84 = arith.constant 0 : i32
    %151 = arith.cmpi ne, %150, %c0_i32_84 : i32
    %c0_i32_85 = arith.constant 0 : i32
    %152 = arith.cmpi slt, %150, %c0_i32_85 : i32
    %c0_i32_86 = arith.constant 0 : i32
    %153 = arith.cmpi slt, %149, %c0_i32_86 : i32
    %154 = arith.xori %152, %153 : i1
    %155 = arith.andi %154, %151 : i1
    %156 = arith.addi %150, %149 : i32
    %157 = arith.select %155, %156, %150 : i32
    %c0_i32_87 = arith.constant 0 : i32
    %c0_i32_88 = arith.constant 0 : i32
    %c0_i32_89 = arith.constant 0 : i32
    %c0_i32_90 = arith.constant 0 : i32
    %158 = tpu.memref_slice %arg1[%c0_i32_87, %c0_i32_88, %c0_i32_89, %c0_i32_90] : memref<2x8x8x512xbf16, #tpu.memory_space<any>> -> memref<1x1x8x512xbf16, #tpu.memory_space<any>>
    %159 = tpu.memref_squeeze %158 : memref<1x1x8x512xbf16, #tpu.memory_space<any>> -> memref<8x512xbf16, #tpu.memory_space<any>>
    %c0_i32_91 = arith.constant 0 : i32
    %c0_i32_92 = arith.constant 0 : i32
    %160 = tpu.memref_slice %arg6[%157, %c0_i32_91, %c0_i32_92] : memref<2x8x512xbf16, #tpu.memory_space<vmem>> -> memref<1x8x512xbf16, #tpu.memory_space<vmem>>
    %161 = tpu.memref_squeeze %160 : memref<1x8x512xbf16, #tpu.memory_space<vmem>> -> memref<8x512xbf16, #tpu.memory_space<vmem>>
    %162 = tpu.memref_slice %arg7[%157] : memref<2x!tpu.dma_semaphore, #tpu.memory_space<semaphore_mem>> -> memref<1x!tpu.dma_semaphore, #tpu.memory_space<semaphore_mem>>
    %163 = tpu.memref_squeeze %162 : memref<1x!tpu.dma_semaphore, #tpu.memory_space<semaphore_mem>> -> memref<!tpu.dma_semaphore, #tpu.memory_space<semaphore_mem>>
    tpu.wait_dma2 semaphore(%163 : memref<!tpu.dma_semaphore, #tpu.memory_space<semaphore_mem>>) src(%159 : memref<8x512xbf16, #tpu.memory_space<any>>) dst(%161 : memref<8x512xbf16, #tpu.memory_space<vmem>>)
    %c1_i32_93 = arith.constant 1 : i32
    %164 = arith.addi %c2_i32_80, %c1_i32_93 : i32
    %c8_i32_94 = arith.constant 8 : i32
    %165 = arith.cmpi slt, %164, %c8_i32_94 : i32
    %166 = arith.extui %165 : i1 to i32
    %c0_i32_95 = arith.constant 0 : i32
    %167 = arith.cmpi ne, %166, %c0_i32_95 : i32
    scf.if %167 {
      %c1_i32_287 = arith.constant 1 : i32
      %550 = arith.addi %c2_i32_80, %c1_i32_287 : i32
      %c1_i32_288 = arith.constant 1 : i32
      %551 = arith.subi %c1_i32_288, %157 : i32
      %c0_i32_289 = arith.constant 0 : i32
      %552 = arith.cmpi eq, %arg0, %c0_i32_289 : i32
      %c7_i32_290 = arith.constant 7 : i32
      %553 = arith.subi %c7_i32_290, %550 : i32
      %554 = arith.select %552, %550, %553 : i32
      %c0_i32_291 = arith.constant 0 : i32
      %c0_i32_292 = arith.constant 0 : i32
      %555 = tpu.memref_slice %arg1[%arg0, %554, %c0_i32_291, %c0_i32_292] : memref<2x8x8x512xbf16, #tpu.memory_space<any>> -> memref<1x1x8x512xbf16, #tpu.memory_space<any>>
      %556 = tpu.memref_squeeze %555 : memref<1x1x8x512xbf16, #tpu.memory_space<any>> -> memref<8x512xbf16, #tpu.memory_space<any>>
      %c0_i32_293 = arith.constant 0 : i32
      %c0_i32_294 = arith.constant 0 : i32
      %557 = tpu.memref_slice %arg6[%551, %c0_i32_293, %c0_i32_294] : memref<2x8x512xbf16, #tpu.memory_space<vmem>> -> memref<1x8x512xbf16, #tpu.memory_space<vmem>>
      %558 = tpu.memref_squeeze %557 : memref<1x8x512xbf16, #tpu.memory_space<vmem>> -> memref<8x512xbf16, #tpu.memory_space<vmem>>
      %559 = tpu.memref_slice %arg7[%551] : memref<2x!tpu.dma_semaphore, #tpu.memory_space<semaphore_mem>> -> memref<1x!tpu.dma_semaphore, #tpu.memory_space<semaphore_mem>>
      %560 = tpu.memref_squeeze %559 : memref<1x!tpu.dma_semaphore, #tpu.memory_space<semaphore_mem>> -> memref<!tpu.dma_semaphore, #tpu.memory_space<semaphore_mem>>
      tpu.enqueue_dma source(%556 : memref<8x512xbf16, #tpu.memory_space<any>>) target(%558 : memref<8x512xbf16, #tpu.memory_space<vmem>>) target_semaphore(%560 : memref<!tpu.dma_semaphore, #tpu.memory_space<semaphore_mem>>)
    } else {
    }
    %168 = arith.index_cast %157 : i32 to index
    %c0_96 = arith.constant 0 : index
    %c0_97 = arith.constant 0 : index
    %169 = vector.load %arg6[%168, %c0_96, %c0_97] : memref<2x8x512xbf16, #tpu.memory_space<vmem>>, vector<1x8x512xbf16>
    %170 = vector.shape_cast %169 : vector<1x8x512xbf16> to vector<8x512xbf16>
    %171 = arith.extf %170 : vector<8x512xbf16> to vector<8x512xf32>
    %172 = arith.truncf %133 : vector<8x128xf32> to vector<8x128xbf16>
    %cst_98 = arith.constant dense<0.000000e+00> : vector<8x512xf32>
    %173 = tpu.matmul %172, %1, %cst_98 {dimension_numbers = #tpu.dot_dimension_numbers<[1], [0], [0], [1], [0, 0, 1, 1], [], []>} : vector<8x128xbf16>, vector<128x512xbf16>, vector<8x512xf32> -> vector<8x512xf32>
    %174 = arith.addf %171, %173 : vector<8x512xf32>
    %175 = vector.extract_strided_slice %174 {offsets = [0, 0], sizes = [8, 384], strides = [1, 1]} : vector<8x512xf32> to vector<8x384xf32>
    %176 = arith.negf %175 : vector<8x384xf32>
    %177 = math.exp %176 : vector<8x384xf32>
    %cst_99 = arith.constant 1.000000e+00 : f32
    %178 = vector.broadcast %cst_99 : f32 to vector<8x384xf32>
    %179 = arith.addf %178, %177 : vector<8x384xf32>
    %180 = arith.divf %178, %179 : vector<8x384xf32>
    %181 = vector.extract_strided_slice %180 {offsets = [0, 0], sizes = [8, 128], strides = [1, 1]} : vector<8x384xf32> to vector<8x128xf32>
    %182 = vector.extract_strided_slice %180 {offsets = [0, 128], sizes = [8, 128], strides = [1, 1]} : vector<8x384xf32> to vector<8x128xf32>
    %183 = vector.extract_strided_slice %180 {offsets = [0, 256], sizes = [8, 128], strides = [1, 1]} : vector<8x384xf32> to vector<8x128xf32>
    %184 = vector.extract_strided_slice %174 {offsets = [0, 384], sizes = [8, 128], strides = [1, 1]} : vector<8x512xf32> to vector<8x128xf32>
    %185 = math.tanh %184 : vector<8x128xf32>
    %186 = arith.mulf %182, %125 : vector<8x128xf32>
    %187 = arith.mulf %181, %185 : vector<8x128xf32>
    %188 = arith.addf %186, %187 : vector<8x128xf32>
    %cst_100 = arith.constant -3.000000e+00 : f32
    %cst_101 = arith.constant 3.000000e+00 : f32
    %189 = vector.broadcast %cst_100 : f32 to vector<8x128xf32>
    %190 = arith.maximumf %189, %188 : vector<8x128xf32>
    %191 = vector.broadcast %cst_101 : f32 to vector<8x128xf32>
    %192 = arith.minimumf %191, %190 : vector<8x128xf32>
    %193 = math.tanh %192 : vector<8x128xf32>
    %194 = arith.mulf %183, %193 : vector<8x128xf32>
    %195 = arith.truncf %194 : vector<8x128xf32> to vector<8x128xbf16>
    %cst_102 = arith.constant dense<0.000000e+00> : vector<8x128xf32>
    %196 = tpu.matmul %195, %3, %cst_102 {dimension_numbers = #tpu.dot_dimension_numbers<[1], [0], [0], [1], [0, 0, 1, 1], [], []>} : vector<8x128xbf16>, vector<128x128xbf16>, vector<8x128xf32> -> vector<8x128xf32>
    %cst_103 = arith.constant -3.000000e+00 : f32
    %cst_104 = arith.constant 3.000000e+00 : f32
    %197 = vector.broadcast %cst_103 : f32 to vector<8x128xf32>
    %198 = arith.maximumf %197, %196 : vector<8x128xf32>
    %199 = vector.broadcast %cst_104 : f32 to vector<8x128xf32>
    %200 = arith.minimumf %199, %198 : vector<8x128xf32>
    %c0_i32_105 = arith.constant 0 : i32
    %201 = arith.cmpi eq, %arg0, %c0_i32_105 : i32
    %c7_i32_106 = arith.constant 7 : i32
    %202 = arith.subi %c7_i32_106, %c2_i32_80 : i32
    %203 = arith.select %201, %c2_i32_80, %202 : i32
    %c0_107 = arith.constant 0 : index
    %204 = arith.index_cast %203 : i32 to index
    %c0_108 = arith.constant 0 : index
    %c0_109 = arith.constant 0 : index
    %205 = vector.load %arg4[%c0_107, %204, %c0_108, %c0_109] : memref<1x8x8x128xf32, #tpu.memory_space<vmem>>, vector<1x1x8x128xf32>
    %206 = vector.shape_cast %205 : vector<1x1x8x128xf32> to vector<8x128xf32>
    %207 = arith.addf %200, %206 : vector<8x128xf32>
    %c0_i32_110 = arith.constant 0 : i32
    %208 = arith.cmpi eq, %arg0, %c0_i32_110 : i32
    %c7_i32_111 = arith.constant 7 : i32
    %209 = arith.subi %c7_i32_111, %c2_i32_80 : i32
    %210 = arith.select %208, %c2_i32_80, %209 : i32
    %c0_112 = arith.constant 0 : index
    %211 = arith.index_cast %210 : i32 to index
    %c0_113 = arith.constant 0 : index
    %c0_114 = arith.constant 0 : index
    %212 = vector.load %arg5[%c0_112, %211, %c0_113, %c0_114] : memref<1x8x8x128xf32, #tpu.memory_space<vmem>>, vector<1x1x8x128xf32>
    %213 = vector.shape_cast %212 : vector<1x1x8x128xf32> to vector<8x128xf32>
    %214 = vector.shape_cast %207 : vector<8x128xf32> to vector<1x1x8x128xf32>
    tpu.vector_store %arg5[%c0_112, %211, %c0_113, %c0_114], %214 {strides = array<i32>} : memref<1x8x8x128xf32, #tpu.memory_space<vmem>>, vector<1x1x8x128xf32>,
    %c3_i32 = arith.constant 3 : i32
    %c2_i32_115 = arith.constant 2 : i32
    %c0_i32_116 = arith.constant 0 : i32
    %215 = arith.cmpi eq, %c2_i32_115, %c0_i32_116 : i32
    %c1_i32_117 = arith.constant 1 : i32
    %216 = arith.select %215, %c1_i32_117, %c2_i32_115 : i32
    %217 = arith.remsi %c3_i32, %216 : i32
    %c0_i32_118 = arith.constant 0 : i32
    %218 = arith.cmpi ne, %217, %c0_i32_118 : i32
    %c0_i32_119 = arith.constant 0 : i32
    %219 = arith.cmpi slt, %217, %c0_i32_119 : i32
    %c0_i32_120 = arith.constant 0 : i32
    %220 = arith.cmpi slt, %216, %c0_i32_120 : i32
    %221 = arith.xori %219, %220 : i1
    %222 = arith.andi %221, %218 : i1
    %223 = arith.addi %217, %216 : i32
    %224 = arith.select %222, %223, %217 : i32
    %c0_i32_121 = arith.constant 0 : i32
    %c0_i32_122 = arith.constant 0 : i32
    %c0_i32_123 = arith.constant 0 : i32
    %c0_i32_124 = arith.constant 0 : i32
    %225 = tpu.memref_slice %arg1[%c0_i32_121, %c0_i32_122, %c0_i32_123, %c0_i32_124] : memref<2x8x8x512xbf16, #tpu.memory_space<any>> -> memref<1x1x8x512xbf16, #tpu.memory_space<any>>
    %226 = tpu.memref_squeeze %225 : memref<1x1x8x512xbf16, #tpu.memory_space<any>> -> memref<8x512xbf16, #tpu.memory_space<any>>
    %c0_i32_125 = arith.constant 0 : i32
    %c0_i32_126 = arith.constant 0 : i32
    %227 = tpu.memref_slice %arg6[%224, %c0_i32_125, %c0_i32_126] : memref<2x8x512xbf16, #tpu.memory_space<vmem>> -> memref<1x8x512xbf16, #tpu.memory_space<vmem>>
    %228 = tpu.memref_squeeze %227 : memref<1x8x512xbf16, #tpu.memory_space<vmem>> -> memref<8x512xbf16, #tpu.memory_space<vmem>>
    %229 = tpu.memref_slice %arg7[%224] : memref<2x!tpu.dma_semaphore, #tpu.memory_space<semaphore_mem>> -> memref<1x!tpu.dma_semaphore, #tpu.memory_space<semaphore_mem>>
    %230 = tpu.memref_squeeze %229 : memref<1x!tpu.dma_semaphore, #tpu.memory_space<semaphore_mem>> -> memref<!tpu.dma_semaphore, #tpu.memory_space<semaphore_mem>>
    tpu.wait_dma2 semaphore(%230 : memref<!tpu.dma_semaphore, #tpu.memory_space<semaphore_mem>>) src(%226 : memref<8x512xbf16, #tpu.memory_space<any>>) dst(%228 : memref<8x512xbf16, #tpu.memory_space<vmem>>)
    %c1_i32_127 = arith.constant 1 : i32
    %231 = arith.addi %c3_i32, %c1_i32_127 : i32
    %c8_i32_128 = arith.constant 8 : i32
    %232 = arith.cmpi slt, %231, %c8_i32_128 : i32
    %233 = arith.extui %232 : i1 to i32
    %c0_i32_129 = arith.constant 0 : i32
    %234 = arith.cmpi ne, %233, %c0_i32_129 : i32
    scf.if %234 {
      %c1_i32_287 = arith.constant 1 : i32
      %550 = arith.addi %c3_i32, %c1_i32_287 : i32
      %c1_i32_288 = arith.constant 1 : i32
      %551 = arith.subi %c1_i32_288, %224 : i32
      %c0_i32_289 = arith.constant 0 : i32
      %552 = arith.cmpi eq, %arg0, %c0_i32_289 : i32
      %c7_i32_290 = arith.constant 7 : i32
      %553 = arith.subi %c7_i32_290, %550 : i32
      %554 = arith.select %552, %550, %553 : i32
      %c0_i32_291 = arith.constant 0 : i32
      %c0_i32_292 = arith.constant 0 : i32
      %555 = tpu.memref_slice %arg1[%arg0, %554, %c0_i32_291, %c0_i32_292] : memref<2x8x8x512xbf16, #tpu.memory_space<any>> -> memref<1x1x8x512xbf16, #tpu.memory_space<any>>
      %556 = tpu.memref_squeeze %555 : memref<1x1x8x512xbf16, #tpu.memory_space<any>> -> memref<8x512xbf16, #tpu.memory_space<any>>
      %c0_i32_293 = arith.constant 0 : i32
      %c0_i32_294 = arith.constant 0 : i32
      %557 = tpu.memref_slice %arg6[%551, %c0_i32_293, %c0_i32_294] : memref<2x8x512xbf16, #tpu.memory_space<vmem>> -> memref<1x8x512xbf16, #tpu.memory_space<vmem>>
      %558 = tpu.memref_squeeze %557 : memref<1x8x512xbf16, #tpu.memory_space<vmem>> -> memref<8x512xbf16, #tpu.memory_space<vmem>>
      %559 = tpu.memref_slice %arg7[%551] : memref<2x!tpu.dma_semaphore, #tpu.memory_space<semaphore_mem>> -> memref<1x!tpu.dma_semaphore, #tpu.memory_space<semaphore_mem>>
      %560 = tpu.memref_squeeze %559 : memref<1x!tpu.dma_semaphore, #tpu.memory_space<semaphore_mem>> -> memref<!tpu.dma_semaphore, #tpu.memory_space<semaphore_mem>>
      tpu.enqueue_dma source(%556 : memref<8x512xbf16, #tpu.memory_space<any>>) target(%558 : memref<8x512xbf16, #tpu.memory_space<vmem>>) target_semaphore(%560 : memref<!tpu.dma_semaphore, #tpu.memory_space<semaphore_mem>>)
    } else {
    }
    %235 = arith.index_cast %224 : i32 to index
    %c0_130 = arith.constant 0 : index
    %c0_131 = arith.constant 0 : index
    %236 = vector.load %arg6[%235, %c0_130, %c0_131] : memref<2x8x512xbf16, #tpu.memory_space<vmem>>, vector<1x8x512xbf16>
    %237 = vector.shape_cast %236 : vector<1x8x512xbf16> to vector<8x512xbf16>
    %238 = arith.extf %237 : vector<8x512xbf16> to vector<8x512xf32>
    %239 = arith.truncf %200 : vector<8x128xf32> to vector<8x128xbf16>
    %cst_132 = arith.constant dense<0.000000e+00> : vector<8x512xf32>
    %240 = tpu.matmul %239, %1, %cst_132 {dimension_numbers = #tpu.dot_dimension_numbers<[1], [0], [0], [1], [0, 0, 1, 1], [], []>} : vector<8x128xbf16>, vector<128x512xbf16>, vector<8x512xf32> -> vector<8x512xf32>
    %241 = arith.addf %238, %240 : vector<8x512xf32>
    %242 = vector.extract_strided_slice %241 {offsets = [0, 0], sizes = [8, 384], strides = [1, 1]} : vector<8x512xf32> to vector<8x384xf32>
    %243 = arith.negf %242 : vector<8x384xf32>
    %244 = math.exp %243 : vector<8x384xf32>
    %cst_133 = arith.constant 1.000000e+00 : f32
    %245 = vector.broadcast %cst_133 : f32 to vector<8x384xf32>
    %246 = arith.addf %245, %244 : vector<8x384xf32>
    %247 = arith.divf %245, %246 : vector<8x384xf32>
    %248 = vector.extract_strided_slice %247 {offsets = [0, 0], sizes = [8, 128], strides = [1, 1]} : vector<8x384xf32> to vector<8x128xf32>
    %249 = vector.extract_strided_slice %247 {offsets = [0, 128], sizes = [8, 128], strides = [1, 1]} : vector<8x384xf32> to vector<8x128xf32>
    %250 = vector.extract_strided_slice %247 {offsets = [0, 256], sizes = [8, 128], strides = [1, 1]} : vector<8x384xf32> to vector<8x128xf32>
    %251 = vector.extract_strided_slice %241 {offsets = [0, 384], sizes = [8, 128], strides = [1, 1]} : vector<8x512xf32> to vector<8x128xf32>
    %252 = math.tanh %251 : vector<8x128xf32>
    %253 = arith.mulf %249, %192 : vector<8x128xf32>
    %254 = arith.mulf %248, %252 : vector<8x128xf32>
    %255 = arith.addf %253, %254 : vector<8x128xf32>
    %cst_134 = arith.constant -3.000000e+00 : f32
    %cst_135 = arith.constant 3.000000e+00 : f32
    %256 = vector.broadcast %cst_134 : f32 to vector<8x128xf32>
    %257 = arith.maximumf %256, %255 : vector<8x128xf32>
    %258 = vector.broadcast %cst_135 : f32 to vector<8x128xf32>
    %259 = arith.minimumf %258, %257 : vector<8x128xf32>
    %260 = math.tanh %259 : vector<8x128xf32>
    %261 = arith.mulf %250, %260 : vector<8x128xf32>
    %262 = arith.truncf %261 : vector<8x128xf32> to vector<8x128xbf16>
    %cst_136 = arith.constant dense<0.000000e+00> : vector<8x128xf32>
    %263 = tpu.matmul %262, %3, %cst_136 {dimension_numbers = #tpu.dot_dimension_numbers<[1], [0], [0], [1], [0, 0, 1, 1], [], []>} : vector<8x128xbf16>, vector<128x128xbf16>, vector<8x128xf32> -> vector<8x128xf32>
    %cst_137 = arith.constant -3.000000e+00 : f32
    %cst_138 = arith.constant 3.000000e+00 : f32
    %264 = vector.broadcast %cst_137 : f32 to vector<8x128xf32>
    %265 = arith.maximumf %264, %263 : vector<8x128xf32>
    %266 = vector.broadcast %cst_138 : f32 to vector<8x128xf32>
    %267 = arith.minimumf %266, %265 : vector<8x128xf32>
    %c0_i32_139 = arith.constant 0 : i32
    %268 = arith.cmpi eq, %arg0, %c0_i32_139 : i32
    %c7_i32_140 = arith.constant 7 : i32
    %269 = arith.subi %c7_i32_140, %c3_i32 : i32
    %270 = arith.select %268, %c3_i32, %269 : i32
    %c0_141 = arith.constant 0 : index
    %271 = arith.index_cast %270 : i32 to index
    %c0_142 = arith.constant 0 : index
    %c0_143 = arith.constant 0 : index
    %272 = vector.load %arg4[%c0_141, %271, %c0_142, %c0_143] : memref<1x8x8x128xf32, #tpu.memory_space<vmem>>, vector<1x1x8x128xf32>
    %273 = vector.shape_cast %272 : vector<1x1x8x128xf32> to vector<8x128xf32>
    %274 = arith.addf %267, %273 : vector<8x128xf32>
    %c0_i32_144 = arith.constant 0 : i32
    %275 = arith.cmpi eq, %arg0, %c0_i32_144 : i32
    %c7_i32_145 = arith.constant 7 : i32
    %276 = arith.subi %c7_i32_145, %c3_i32 : i32
    %277 = arith.select %275, %c3_i32, %276 : i32
    %c0_146 = arith.constant 0 : index
    %278 = arith.index_cast %277 : i32 to index
    %c0_147 = arith.constant 0 : index
    %c0_148 = arith.constant 0 : index
    %279 = vector.load %arg5[%c0_146, %278, %c0_147, %c0_148] : memref<1x8x8x128xf32, #tpu.memory_space<vmem>>, vector<1x1x8x128xf32>
    %280 = vector.shape_cast %279 : vector<1x1x8x128xf32> to vector<8x128xf32>
    %281 = vector.shape_cast %274 : vector<8x128xf32> to vector<1x1x8x128xf32>
    tpu.vector_store %arg5[%c0_146, %278, %c0_147, %c0_148], %281 {strides = array<i32>} : memref<1x8x8x128xf32, #tpu.memory_space<vmem>>, vector<1x1x8x128xf32>,
    %c4_i32 = arith.constant 4 : i32
    %c2_i32_149 = arith.constant 2 : i32
    %c0_i32_150 = arith.constant 0 : i32
    %282 = arith.cmpi eq, %c2_i32_149, %c0_i32_150 : i32
    %c1_i32_151 = arith.constant 1 : i32
    %283 = arith.select %282, %c1_i32_151, %c2_i32_149 : i32
    %284 = arith.remsi %c4_i32, %283 : i32
    %c0_i32_152 = arith.constant 0 : i32
    %285 = arith.cmpi ne, %284, %c0_i32_152 : i32
    %c0_i32_153 = arith.constant 0 : i32
    %286 = arith.cmpi slt, %284, %c0_i32_153 : i32
    %c0_i32_154 = arith.constant 0 : i32
    %287 = arith.cmpi slt, %283, %c0_i32_154 : i32
    %288 = arith.xori %286, %287 : i1
    %289 = arith.andi %288, %285 : i1
    %290 = arith.addi %284, %283 : i32
    %291 = arith.select %289, %290, %284 : i32
    %c0_i32_155 = arith.constant 0 : i32
    %c0_i32_156 = arith.constant 0 : i32
    %c0_i32_157 = arith.constant 0 : i32
    %c0_i32_158 = arith.constant 0 : i32
    %292 = tpu.memref_slice %arg1[%c0_i32_155, %c0_i32_156, %c0_i32_157, %c0_i32_158] : memref<2x8x8x512xbf16, #tpu.memory_space<any>> -> memref<1x1x8x512xbf16, #tpu.memory_space<any>>
    %293 = tpu.memref_squeeze %292 : memref<1x1x8x512xbf16, #tpu.memory_space<any>> -> memref<8x512xbf16, #tpu.memory_space<any>>
    %c0_i32_159 = arith.constant 0 : i32
    %c0_i32_160 = arith.constant 0 : i32
    %294 = tpu.memref_slice %arg6[%291, %c0_i32_159, %c0_i32_160] : memref<2x8x512xbf16, #tpu.memory_space<vmem>> -> memref<1x8x512xbf16, #tpu.memory_space<vmem>>
    %295 = tpu.memref_squeeze %294 : memref<1x8x512xbf16, #tpu.memory_space<vmem>> -> memref<8x512xbf16, #tpu.memory_space<vmem>>
    %296 = tpu.memref_slice %arg7[%291] : memref<2x!tpu.dma_semaphore, #tpu.memory_space<semaphore_mem>> -> memref<1x!tpu.dma_semaphore, #tpu.memory_space<semaphore_mem>>
    %297 = tpu.memref_squeeze %296 : memref<1x!tpu.dma_semaphore, #tpu.memory_space<semaphore_mem>> -> memref<!tpu.dma_semaphore, #tpu.memory_space<semaphore_mem>>
    tpu.wait_dma2 semaphore(%297 : memref<!tpu.dma_semaphore, #tpu.memory_space<semaphore_mem>>) src(%293 : memref<8x512xbf16, #tpu.memory_space<any>>) dst(%295 : memref<8x512xbf16, #tpu.memory_space<vmem>>)
    %c1_i32_161 = arith.constant 1 : i32
    %298 = arith.addi %c4_i32, %c1_i32_161 : i32
    %c8_i32_162 = arith.constant 8 : i32
    %299 = arith.cmpi slt, %298, %c8_i32_162 : i32
    %300 = arith.extui %299 : i1 to i32
    %c0_i32_163 = arith.constant 0 : i32
    %301 = arith.cmpi ne, %300, %c0_i32_163 : i32
    scf.if %301 {
      %c1_i32_287 = arith.constant 1 : i32
      %550 = arith.addi %c4_i32, %c1_i32_287 : i32
      %c1_i32_288 = arith.constant 1 : i32
      %551 = arith.subi %c1_i32_288, %291 : i32
      %c0_i32_289 = arith.constant 0 : i32
      %552 = arith.cmpi eq, %arg0, %c0_i32_289 : i32
      %c7_i32_290 = arith.constant 7 : i32
      %553 = arith.subi %c7_i32_290, %550 : i32
      %554 = arith.select %552, %550, %553 : i32
      %c0_i32_291 = arith.constant 0 : i32
      %c0_i32_292 = arith.constant 0 : i32
      %555 = tpu.memref_slice %arg1[%arg0, %554, %c0_i32_291, %c0_i32_292] : memref<2x8x8x512xbf16, #tpu.memory_space<any>> -> memref<1x1x8x512xbf16, #tpu.memory_space<any>>
      %556 = tpu.memref_squeeze %555 : memref<1x1x8x512xbf16, #tpu.memory_space<any>> -> memref<8x512xbf16, #tpu.memory_space<any>>
      %c0_i32_293 = arith.constant 0 : i32
      %c0_i32_294 = arith.constant 0 : i32
      %557 = tpu.memref_slice %arg6[%551, %c0_i32_293, %c0_i32_294] : memref<2x8x512xbf16, #tpu.memory_space<vmem>> -> memref<1x8x512xbf16, #tpu.memory_space<vmem>>
      %558 = tpu.memref_squeeze %557 : memref<1x8x512xbf16, #tpu.memory_space<vmem>> -> memref<8x512xbf16, #tpu.memory_space<vmem>>
      %559 = tpu.memref_slice %arg7[%551] : memref<2x!tpu.dma_semaphore, #tpu.memory_space<semaphore_mem>> -> memref<1x!tpu.dma_semaphore, #tpu.memory_space<semaphore_mem>>
      %560 = tpu.memref_squeeze %559 : memref<1x!tpu.dma_semaphore, #tpu.memory_space<semaphore_mem>> -> memref<!tpu.dma_semaphore, #tpu.memory_space<semaphore_mem>>
      tpu.enqueue_dma source(%556 : memref<8x512xbf16, #tpu.memory_space<any>>) target(%558 : memref<8x512xbf16, #tpu.memory_space<vmem>>) target_semaphore(%560 : memref<!tpu.dma_semaphore, #tpu.memory_space<semaphore_mem>>)
    } else {
    }
    %302 = arith.index_cast %291 : i32 to index
    %c0_164 = arith.constant 0 : index
    %c0_165 = arith.constant 0 : index
    %303 = vector.load %arg6[%302, %c0_164, %c0_165] : memref<2x8x512xbf16, #tpu.memory_space<vmem>>, vector<1x8x512xbf16>
    %304 = vector.shape_cast %303 : vector<1x8x512xbf16> to vector<8x512xbf16>
    %305 = arith.extf %304 : vector<8x512xbf16> to vector<8x512xf32>
    %306 = arith.truncf %267 : vector<8x128xf32> to vector<8x128xbf16>
    %cst_166 = arith.constant dense<0.000000e+00> : vector<8x512xf32>
    %307 = tpu.matmul %306, %1, %cst_166 {dimension_numbers = #tpu.dot_dimension_numbers<[1], [0], [0], [1], [0, 0, 1, 1], [], []>} : vector<8x128xbf16>, vector<128x512xbf16>, vector<8x512xf32> -> vector<8x512xf32>
    %308 = arith.addf %305, %307 : vector<8x512xf32>
    %309 = vector.extract_strided_slice %308 {offsets = [0, 0], sizes = [8, 384], strides = [1, 1]} : vector<8x512xf32> to vector<8x384xf32>
    %310 = arith.negf %309 : vector<8x384xf32>
    %311 = math.exp %310 : vector<8x384xf32>
    %cst_167 = arith.constant 1.000000e+00 : f32
    %312 = vector.broadcast %cst_167 : f32 to vector<8x384xf32>
    %313 = arith.addf %312, %311 : vector<8x384xf32>
    %314 = arith.divf %312, %313 : vector<8x384xf32>
    %315 = vector.extract_strided_slice %314 {offsets = [0, 0], sizes = [8, 128], strides = [1, 1]} : vector<8x384xf32> to vector<8x128xf32>
    %316 = vector.extract_strided_slice %314 {offsets = [0, 128], sizes = [8, 128], strides = [1, 1]} : vector<8x384xf32> to vector<8x128xf32>
    %317 = vector.extract_strided_slice %314 {offsets = [0, 256], sizes = [8, 128], strides = [1, 1]} : vector<8x384xf32> to vector<8x128xf32>
    %318 = vector.extract_strided_slice %308 {offsets = [0, 384], sizes = [8, 128], strides = [1, 1]} : vector<8x512xf32> to vector<8x128xf32>
    %319 = math.tanh %318 : vector<8x128xf32>
    %320 = arith.mulf %316, %259 : vector<8x128xf32>
    %321 = arith.mulf %315, %319 : vector<8x128xf32>
    %322 = arith.addf %320, %321 : vector<8x128xf32>
    %cst_168 = arith.constant -3.000000e+00 : f32
    %cst_169 = arith.constant 3.000000e+00 : f32
    %323 = vector.broadcast %cst_168 : f32 to vector<8x128xf32>
    %324 = arith.maximumf %323, %322 : vector<8x128xf32>
    %325 = vector.broadcast %cst_169 : f32 to vector<8x128xf32>
    %326 = arith.minimumf %325, %324 : vector<8x128xf32>
    %327 = math.tanh %326 : vector<8x128xf32>
    %328 = arith.mulf %317, %327 : vector<8x128xf32>
    %329 = arith.truncf %328 : vector<8x128xf32> to vector<8x128xbf16>
    %cst_170 = arith.constant dense<0.000000e+00> : vector<8x128xf32>
    %330 = tpu.matmul %329, %3, %cst_170 {dimension_numbers = #tpu.dot_dimension_numbers<[1], [0], [0], [1], [0, 0, 1, 1], [], []>} : vector<8x128xbf16>, vector<128x128xbf16>, vector<8x128xf32> -> vector<8x128xf32>
    %cst_171 = arith.constant -3.000000e+00 : f32
    %cst_172 = arith.constant 3.000000e+00 : f32
    %331 = vector.broadcast %cst_171 : f32 to vector<8x128xf32>
    %332 = arith.maximumf %331, %330 : vector<8x128xf32>
    %333 = vector.broadcast %cst_172 : f32 to vector<8x128xf32>
    %334 = arith.minimumf %333, %332 : vector<8x128xf32>
    %c0_i32_173 = arith.constant 0 : i32
    %335 = arith.cmpi eq, %arg0, %c0_i32_173 : i32
    %c7_i32_174 = arith.constant 7 : i32
    %336 = arith.subi %c7_i32_174, %c4_i32 : i32
    %337 = arith.select %335, %c4_i32, %336 : i32
    %c0_175 = arith.constant 0 : index
    %338 = arith.index_cast %337 : i32 to index
    %c0_176 = arith.constant 0 : index
    %c0_177 = arith.constant 0 : index
    %339 = vector.load %arg4[%c0_175, %338, %c0_176, %c0_177] : memref<1x8x8x128xf32, #tpu.memory_space<vmem>>, vector<1x1x8x128xf32>
    %340 = vector.shape_cast %339 : vector<1x1x8x128xf32> to vector<8x128xf32>
    %341 = arith.addf %334, %340 : vector<8x128xf32>
    %c0_i32_178 = arith.constant 0 : i32
    %342 = arith.cmpi eq, %arg0, %c0_i32_178 : i32
    %c7_i32_179 = arith.constant 7 : i32
    %343 = arith.subi %c7_i32_179, %c4_i32 : i32
    %344 = arith.select %342, %c4_i32, %343 : i32
    %c0_180 = arith.constant 0 : index
    %345 = arith.index_cast %344 : i32 to index
    %c0_181 = arith.constant 0 : index
    %c0_182 = arith.constant 0 : index
    %346 = vector.load %arg5[%c0_180, %345, %c0_181, %c0_182] : memref<1x8x8x128xf32, #tpu.memory_space<vmem>>, vector<1x1x8x128xf32>
    %347 = vector.shape_cast %346 : vector<1x1x8x128xf32> to vector<8x128xf32>
    %348 = vector.shape_cast %341 : vector<8x128xf32> to vector<1x1x8x128xf32>
    tpu.vector_store %arg5[%c0_180, %345, %c0_181, %c0_182], %348 {strides = array<i32>} : memref<1x8x8x128xf32, #tpu.memory_space<vmem>>, vector<1x1x8x128xf32>,
    %c5_i32 = arith.constant 5 : i32
    %c2_i32_183 = arith.constant 2 : i32
    %c0_i32_184 = arith.constant 0 : i32
    %349 = arith.cmpi eq, %c2_i32_183, %c0_i32_184 : i32
    %c1_i32_185 = arith.constant 1 : i32
    %350 = arith.select %349, %c1_i32_185, %c2_i32_183 : i32
    %351 = arith.remsi %c5_i32, %350 : i32
    %c0_i32_186 = arith.constant 0 : i32
    %352 = arith.cmpi ne, %351, %c0_i32_186 : i32
    %c0_i32_187 = arith.constant 0 : i32
    %353 = arith.cmpi slt, %351, %c0_i32_187 : i32
    %c0_i32_188 = arith.constant 0 : i32
    %354 = arith.cmpi slt, %350, %c0_i32_188 : i32
    %355 = arith.xori %353, %354 : i1
    %356 = arith.andi %355, %352 : i1
    %357 = arith.addi %351, %350 : i32
    %358 = arith.select %356, %357, %351 : i32
    %c0_i32_189 = arith.constant 0 : i32
    %c0_i32_190 = arith.constant 0 : i32
    %c0_i32_191 = arith.constant 0 : i32
    %c0_i32_192 = arith.constant 0 : i32
    %359 = tpu.memref_slice %arg1[%c0_i32_189, %c0_i32_190, %c0_i32_191, %c0_i32_192] : memref<2x8x8x512xbf16, #tpu.memory_space<any>> -> memref<1x1x8x512xbf16, #tpu.memory_space<any>>
    %360 = tpu.memref_squeeze %359 : memref<1x1x8x512xbf16, #tpu.memory_space<any>> -> memref<8x512xbf16, #tpu.memory_space<any>>
    %c0_i32_193 = arith.constant 0 : i32
    %c0_i32_194 = arith.constant 0 : i32
    %361 = tpu.memref_slice %arg6[%358, %c0_i32_193, %c0_i32_194] : memref<2x8x512xbf16, #tpu.memory_space<vmem>> -> memref<1x8x512xbf16, #tpu.memory_space<vmem>>
    %362 = tpu.memref_squeeze %361 : memref<1x8x512xbf16, #tpu.memory_space<vmem>> -> memref<8x512xbf16, #tpu.memory_space<vmem>>
    %363 = tpu.memref_slice %arg7[%358] : memref<2x!tpu.dma_semaphore, #tpu.memory_space<semaphore_mem>> -> memref<1x!tpu.dma_semaphore, #tpu.memory_space<semaphore_mem>>
    %364 = tpu.memref_squeeze %363 : memref<1x!tpu.dma_semaphore, #tpu.memory_space<semaphore_mem>> -> memref<!tpu.dma_semaphore, #tpu.memory_space<semaphore_mem>>
    tpu.wait_dma2 semaphore(%364 : memref<!tpu.dma_semaphore, #tpu.memory_space<semaphore_mem>>) src(%360 : memref<8x512xbf16, #tpu.memory_space<any>>) dst(%362 : memref<8x512xbf16, #tpu.memory_space<vmem>>)
    %c1_i32_195 = arith.constant 1 : i32
    %365 = arith.addi %c5_i32, %c1_i32_195 : i32
    %c8_i32_196 = arith.constant 8 : i32
    %366 = arith.cmpi slt, %365, %c8_i32_196 : i32
    %367 = arith.extui %366 : i1 to i32
    %c0_i32_197 = arith.constant 0 : i32
    %368 = arith.cmpi ne, %367, %c0_i32_197 : i32
    scf.if %368 {
      %c1_i32_287 = arith.constant 1 : i32
      %550 = arith.addi %c5_i32, %c1_i32_287 : i32
      %c1_i32_288 = arith.constant 1 : i32
      %551 = arith.subi %c1_i32_288, %358 : i32
      %c0_i32_289 = arith.constant 0 : i32
      %552 = arith.cmpi eq, %arg0, %c0_i32_289 : i32
      %c7_i32_290 = arith.constant 7 : i32
      %553 = arith.subi %c7_i32_290, %550 : i32
      %554 = arith.select %552, %550, %553 : i32
      %c0_i32_291 = arith.constant 0 : i32
      %c0_i32_292 = arith.constant 0 : i32
      %555 = tpu.memref_slice %arg1[%arg0, %554, %c0_i32_291, %c0_i32_292] : memref<2x8x8x512xbf16, #tpu.memory_space<any>> -> memref<1x1x8x512xbf16, #tpu.memory_space<any>>
      %556 = tpu.memref_squeeze %555 : memref<1x1x8x512xbf16, #tpu.memory_space<any>> -> memref<8x512xbf16, #tpu.memory_space<any>>
      %c0_i32_293 = arith.constant 0 : i32
      %c0_i32_294 = arith.constant 0 : i32
      %557 = tpu.memref_slice %arg6[%551, %c0_i32_293, %c0_i32_294] : memref<2x8x512xbf16, #tpu.memory_space<vmem>> -> memref<1x8x512xbf16, #tpu.memory_space<vmem>>
      %558 = tpu.memref_squeeze %557 : memref<1x8x512xbf16, #tpu.memory_space<vmem>> -> memref<8x512xbf16, #tpu.memory_space<vmem>>
      %559 = tpu.memref_slice %arg7[%551] : memref<2x!tpu.dma_semaphore, #tpu.memory_space<semaphore_mem>> -> memref<1x!tpu.dma_semaphore, #tpu.memory_space<semaphore_mem>>
      %560 = tpu.memref_squeeze %559 : memref<1x!tpu.dma_semaphore, #tpu.memory_space<semaphore_mem>> -> memref<!tpu.dma_semaphore, #tpu.memory_space<semaphore_mem>>
      tpu.enqueue_dma source(%556 : memref<8x512xbf16, #tpu.memory_space<any>>) target(%558 : memref<8x512xbf16, #tpu.memory_space<vmem>>) target_semaphore(%560 : memref<!tpu.dma_semaphore, #tpu.memory_space<semaphore_mem>>)
    } else {
    }
    %369 = arith.index_cast %358 : i32 to index
    %c0_198 = arith.constant 0 : index
    %c0_199 = arith.constant 0 : index
    %370 = vector.load %arg6[%369, %c0_198, %c0_199] : memref<2x8x512xbf16, #tpu.memory_space<vmem>>, vector<1x8x512xbf16>
    %371 = vector.shape_cast %370 : vector<1x8x512xbf16> to vector<8x512xbf16>
    %372 = arith.extf %371 : vector<8x512xbf16> to vector<8x512xf32>
    %373 = arith.truncf %334 : vector<8x128xf32> to vector<8x128xbf16>
    %cst_200 = arith.constant dense<0.000000e+00> : vector<8x512xf32>
    %374 = tpu.matmul %373, %1, %cst_200 {dimension_numbers = #tpu.dot_dimension_numbers<[1], [0], [0], [1], [0, 0, 1, 1], [], []>} : vector<8x128xbf16>, vector<128x512xbf16>, vector<8x512xf32> -> vector<8x512xf32>
    %375 = arith.addf %372, %374 : vector<8x512xf32>
    %376 = vector.extract_strided_slice %375 {offsets = [0, 0], sizes = [8, 384], strides = [1, 1]} : vector<8x512xf32> to vector<8x384xf32>
    %377 = arith.negf %376 : vector<8x384xf32>
    %378 = math.exp %377 : vector<8x384xf32>
    %cst_201 = arith.constant 1.000000e+00 : f32
    %379 = vector.broadcast %cst_201 : f32 to vector<8x384xf32>
    %380 = arith.addf %379, %378 : vector<8x384xf32>
    %381 = arith.divf %379, %380 : vector<8x384xf32>
    %382 = vector.extract_strided_slice %381 {offsets = [0, 0], sizes = [8, 128], strides = [1, 1]} : vector<8x384xf32> to vector<8x128xf32>
    %383 = vector.extract_strided_slice %381 {offsets = [0, 128], sizes = [8, 128], strides = [1, 1]} : vector<8x384xf32> to vector<8x128xf32>
    %384 = vector.extract_strided_slice %381 {offsets = [0, 256], sizes = [8, 128], strides = [1, 1]} : vector<8x384xf32> to vector<8x128xf32>
    %385 = vector.extract_strided_slice %375 {offsets = [0, 384], sizes = [8, 128], strides = [1, 1]} : vector<8x512xf32> to vector<8x128xf32>
    %386 = math.tanh %385 : vector<8x128xf32>
    %387 = arith.mulf %383, %326 : vector<8x128xf32>
    %388 = arith.mulf %382, %386 : vector<8x128xf32>
    %389 = arith.addf %387, %388 : vector<8x128xf32>
    %cst_202 = arith.constant -3.000000e+00 : f32
    %cst_203 = arith.constant 3.000000e+00 : f32
    %390 = vector.broadcast %cst_202 : f32 to vector<8x128xf32>
    %391 = arith.maximumf %390, %389 : vector<8x128xf32>
    %392 = vector.broadcast %cst_203 : f32 to vector<8x128xf32>
    %393 = arith.minimumf %392, %391 : vector<8x128xf32>
    %394 = math.tanh %393 : vector<8x128xf32>
    %395 = arith.mulf %384, %394 : vector<8x128xf32>
    %396 = arith.truncf %395 : vector<8x128xf32> to vector<8x128xbf16>
    %cst_204 = arith.constant dense<0.000000e+00> : vector<8x128xf32>
    %397 = tpu.matmul %396, %3, %cst_204 {dimension_numbers = #tpu.dot_dimension_numbers<[1], [0], [0], [1], [0, 0, 1, 1], [], []>} : vector<8x128xbf16>, vector<128x128xbf16>, vector<8x128xf32> -> vector<8x128xf32>
    %cst_205 = arith.constant -3.000000e+00 : f32
    %cst_206 = arith.constant 3.000000e+00 : f32
    %398 = vector.broadcast %cst_205 : f32 to vector<8x128xf32>
    %399 = arith.maximumf %398, %397 : vector<8x128xf32>
    %400 = vector.broadcast %cst_206 : f32 to vector<8x128xf32>
    %401 = arith.minimumf %400, %399 : vector<8x128xf32>
    %c0_i32_207 = arith.constant 0 : i32
    %402 = arith.cmpi eq, %arg0, %c0_i32_207 : i32
    %c7_i32_208 = arith.constant 7 : i32
    %403 = arith.subi %c7_i32_208, %c5_i32 : i32
    %404 = arith.select %402, %c5_i32, %403 : i32
    %c0_209 = arith.constant 0 : index
    %405 = arith.index_cast %404 : i32 to index
    %c0_210 = arith.constant 0 : index
    %c0_211 = arith.constant 0 : index
    %406 = vector.load %arg4[%c0_209, %405, %c0_210, %c0_211] : memref<1x8x8x128xf32, #tpu.memory_space<vmem>>, vector<1x1x8x128xf32>
    %407 = vector.shape_cast %406 : vector<1x1x8x128xf32> to vector<8x128xf32>
    %408 = arith.addf %401, %407 : vector<8x128xf32>
    %c0_i32_212 = arith.constant 0 : i32
    %409 = arith.cmpi eq, %arg0, %c0_i32_212 : i32
    %c7_i32_213 = arith.constant 7 : i32
    %410 = arith.subi %c7_i32_213, %c5_i32 : i32
    %411 = arith.select %409, %c5_i32, %410 : i32
    %c0_214 = arith.constant 0 : index
    %412 = arith.index_cast %411 : i32 to index
    %c0_215 = arith.constant 0 : index
    %c0_216 = arith.constant 0 : index
    %413 = vector.load %arg5[%c0_214, %412, %c0_215, %c0_216] : memref<1x8x8x128xf32, #tpu.memory_space<vmem>>, vector<1x1x8x128xf32>
    %414 = vector.shape_cast %413 : vector<1x1x8x128xf32> to vector<8x128xf32>
    %415 = vector.shape_cast %408 : vector<8x128xf32> to vector<1x1x8x128xf32>
    tpu.vector_store %arg5[%c0_214, %412, %c0_215, %c0_216], %415 {strides = array<i32>} : memref<1x8x8x128xf32, #tpu.memory_space<vmem>>, vector<1x1x8x128xf32>,
    %c6_i32 = arith.constant 6 : i32
    %c2_i32_217 = arith.constant 2 : i32
    %c0_i32_218 = arith.constant 0 : i32
    %416 = arith.cmpi eq, %c2_i32_217, %c0_i32_218 : i32
    %c1_i32_219 = arith.constant 1 : i32
    %417 = arith.select %416, %c1_i32_219, %c2_i32_217 : i32
    %418 = arith.remsi %c6_i32, %417 : i32
    %c0_i32_220 = arith.constant 0 : i32
    %419 = arith.cmpi ne, %418, %c0_i32_220 : i32
    %c0_i32_221 = arith.constant 0 : i32
    %420 = arith.cmpi slt, %418, %c0_i32_221 : i32
    %c0_i32_222 = arith.constant 0 : i32
    %421 = arith.cmpi slt, %417, %c0_i32_222 : i32
    %422 = arith.xori %420, %421 : i1
    %423 = arith.andi %422, %419 : i1
    %424 = arith.addi %418, %417 : i32
    %425 = arith.select %423, %424, %418 : i32
    %c0_i32_223 = arith.constant 0 : i32
    %c0_i32_224 = arith.constant 0 : i32
    %c0_i32_225 = arith.constant 0 : i32
    %c0_i32_226 = arith.constant 0 : i32
    %426 = tpu.memref_slice %arg1[%c0_i32_223, %c0_i32_224, %c0_i32_225, %c0_i32_226] : memref<2x8x8x512xbf16, #tpu.memory_space<any>> -> memref<1x1x8x512xbf16, #tpu.memory_space<any>>
    %427 = tpu.memref_squeeze %426 : memref<1x1x8x512xbf16, #tpu.memory_space<any>> -> memref<8x512xbf16, #tpu.memory_space<any>>
    %c0_i32_227 = arith.constant 0 : i32
    %c0_i32_228 = arith.constant 0 : i32
    %428 = tpu.memref_slice %arg6[%425, %c0_i32_227, %c0_i32_228] : memref<2x8x512xbf16, #tpu.memory_space<vmem>> -> memref<1x8x512xbf16, #tpu.memory_space<vmem>>
    %429 = tpu.memref_squeeze %428 : memref<1x8x512xbf16, #tpu.memory_space<vmem>> -> memref<8x512xbf16, #tpu.memory_space<vmem>>
    %430 = tpu.memref_slice %arg7[%425] : memref<2x!tpu.dma_semaphore, #tpu.memory_space<semaphore_mem>> -> memref<1x!tpu.dma_semaphore, #tpu.memory_space<semaphore_mem>>
    %431 = tpu.memref_squeeze %430 : memref<1x!tpu.dma_semaphore, #tpu.memory_space<semaphore_mem>> -> memref<!tpu.dma_semaphore, #tpu.memory_space<semaphore_mem>>
    tpu.wait_dma2 semaphore(%431 : memref<!tpu.dma_semaphore, #tpu.memory_space<semaphore_mem>>) src(%427 : memref<8x512xbf16, #tpu.memory_space<any>>) dst(%429 : memref<8x512xbf16, #tpu.memory_space<vmem>>)
    %c1_i32_229 = arith.constant 1 : i32
    %432 = arith.addi %c6_i32, %c1_i32_229 : i32
    %c8_i32_230 = arith.constant 8 : i32
    %433 = arith.cmpi slt, %432, %c8_i32_230 : i32
    %434 = arith.extui %433 : i1 to i32
    %c0_i32_231 = arith.constant 0 : i32
    %435 = arith.cmpi ne, %434, %c0_i32_231 : i32
    scf.if %435 {
      %c1_i32_287 = arith.constant 1 : i32
      %550 = arith.addi %c6_i32, %c1_i32_287 : i32
      %c1_i32_288 = arith.constant 1 : i32
      %551 = arith.subi %c1_i32_288, %425 : i32
      %c0_i32_289 = arith.constant 0 : i32
      %552 = arith.cmpi eq, %arg0, %c0_i32_289 : i32
      %c7_i32_290 = arith.constant 7 : i32
      %553 = arith.subi %c7_i32_290, %550 : i32
      %554 = arith.select %552, %550, %553 : i32
      %c0_i32_291 = arith.constant 0 : i32
      %c0_i32_292 = arith.constant 0 : i32
      %555 = tpu.memref_slice %arg1[%arg0, %554, %c0_i32_291, %c0_i32_292] : memref<2x8x8x512xbf16, #tpu.memory_space<any>> -> memref<1x1x8x512xbf16, #tpu.memory_space<any>>
      %556 = tpu.memref_squeeze %555 : memref<1x1x8x512xbf16, #tpu.memory_space<any>> -> memref<8x512xbf16, #tpu.memory_space<any>>
      %c0_i32_293 = arith.constant 0 : i32
      %c0_i32_294 = arith.constant 0 : i32
      %557 = tpu.memref_slice %arg6[%551, %c0_i32_293, %c0_i32_294] : memref<2x8x512xbf16, #tpu.memory_space<vmem>> -> memref<1x8x512xbf16, #tpu.memory_space<vmem>>
      %558 = tpu.memref_squeeze %557 : memref<1x8x512xbf16, #tpu.memory_space<vmem>> -> memref<8x512xbf16, #tpu.memory_space<vmem>>
      %559 = tpu.memref_slice %arg7[%551] : memref<2x!tpu.dma_semaphore, #tpu.memory_space<semaphore_mem>> -> memref<1x!tpu.dma_semaphore, #tpu.memory_space<semaphore_mem>>
      %560 = tpu.memref_squeeze %559 : memref<1x!tpu.dma_semaphore, #tpu.memory_space<semaphore_mem>> -> memref<!tpu.dma_semaphore, #tpu.memory_space<semaphore_mem>>
      tpu.enqueue_dma source(%556 : memref<8x512xbf16, #tpu.memory_space<any>>) target(%558 : memref<8x512xbf16, #tpu.memory_space<vmem>>) target_semaphore(%560 : memref<!tpu.dma_semaphore, #tpu.memory_space<semaphore_mem>>)
    } else {
    }
    %436 = arith.index_cast %425 : i32 to index
    %c0_232 = arith.constant 0 : index
    %c0_233 = arith.constant 0 : index
    %437 = vector.load %arg6[%436, %c0_232, %c0_233] : memref<2x8x512xbf16, #tpu.memory_space<vmem>>, vector<1x8x512xbf16>
    %438 = vector.shape_cast %437 : vector<1x8x512xbf16> to vector<8x512xbf16>
    %439 = arith.extf %438 : vector<8x512xbf16> to vector<8x512xf32>
    %440 = arith.truncf %401 : vector<8x128xf32> to vector<8x128xbf16>
    %cst_234 = arith.constant dense<0.000000e+00> : vector<8x512xf32>
    %441 = tpu.matmul %440, %1, %cst_234 {dimension_numbers = #tpu.dot_dimension_numbers<[1], [0], [0], [1], [0, 0, 1, 1], [], []>} : vector<8x128xbf16>, vector<128x512xbf16>, vector<8x512xf32> -> vector<8x512xf32>
    %442 = arith.addf %439, %441 : vector<8x512xf32>
    %443 = vector.extract_strided_slice %442 {offsets = [0, 0], sizes = [8, 384], strides = [1, 1]} : vector<8x512xf32> to vector<8x384xf32>
    %444 = arith.negf %443 : vector<8x384xf32>
    %445 = math.exp %444 : vector<8x384xf32>
    %cst_235 = arith.constant 1.000000e+00 : f32
    %446 = vector.broadcast %cst_235 : f32 to vector<8x384xf32>
    %447 = arith.addf %446, %445 : vector<8x384xf32>
    %448 = arith.divf %446, %447 : vector<8x384xf32>
    %449 = vector.extract_strided_slice %448 {offsets = [0, 0], sizes = [8, 128], strides = [1, 1]} : vector<8x384xf32> to vector<8x128xf32>
    %450 = vector.extract_strided_slice %448 {offsets = [0, 128], sizes = [8, 128], strides = [1, 1]} : vector<8x384xf32> to vector<8x128xf32>
    %451 = vector.extract_strided_slice %448 {offsets = [0, 256], sizes = [8, 128], strides = [1, 1]} : vector<8x384xf32> to vector<8x128xf32>
    %452 = vector.extract_strided_slice %442 {offsets = [0, 384], sizes = [8, 128], strides = [1, 1]} : vector<8x512xf32> to vector<8x128xf32>
    %453 = math.tanh %452 : vector<8x128xf32>
    %454 = arith.mulf %450, %393 : vector<8x128xf32>
    %455 = arith.mulf %449, %453 : vector<8x128xf32>
    %456 = arith.addf %454, %455 : vector<8x128xf32>
    %cst_236 = arith.constant -3.000000e+00 : f32
    %cst_237 = arith.constant 3.000000e+00 : f32
    %457 = vector.broadcast %cst_236 : f32 to vector<8x128xf32>
    %458 = arith.maximumf %457, %456 : vector<8x128xf32>
    %459 = vector.broadcast %cst_237 : f32 to vector<8x128xf32>
    %460 = arith.minimumf %459, %458 : vector<8x128xf32>
    %461 = math.tanh %460 : vector<8x128xf32>
    %462 = arith.mulf %451, %461 : vector<8x128xf32>
    %463 = arith.truncf %462 : vector<8x128xf32> to vector<8x128xbf16>
    %cst_238 = arith.constant dense<0.000000e+00> : vector<8x128xf32>
    %464 = tpu.matmul %463, %3, %cst_238 {dimension_numbers = #tpu.dot_dimension_numbers<[1], [0], [0], [1], [0, 0, 1, 1], [], []>} : vector<8x128xbf16>, vector<128x128xbf16>, vector<8x128xf32> -> vector<8x128xf32>
    %cst_239 = arith.constant -3.000000e+00 : f32
    %cst_240 = arith.constant 3.000000e+00 : f32
    %465 = vector.broadcast %cst_239 : f32 to vector<8x128xf32>
    %466 = arith.maximumf %465, %464 : vector<8x128xf32>
    %467 = vector.broadcast %cst_240 : f32 to vector<8x128xf32>
    %468 = arith.minimumf %467, %466 : vector<8x128xf32>
    %c0_i32_241 = arith.constant 0 : i32
    %469 = arith.cmpi eq, %arg0, %c0_i32_241 : i32
    %c7_i32_242 = arith.constant 7 : i32
    %470 = arith.subi %c7_i32_242, %c6_i32 : i32
    %471 = arith.select %469, %c6_i32, %470 : i32
    %c0_243 = arith.constant 0 : index
    %472 = arith.index_cast %471 : i32 to index
    %c0_244 = arith.constant 0 : index
    %c0_245 = arith.constant 0 : index
    %473 = vector.load %arg4[%c0_243, %472, %c0_244, %c0_245] : memref<1x8x8x128xf32, #tpu.memory_space<vmem>>, vector<1x1x8x128xf32>
    %474 = vector.shape_cast %473 : vector<1x1x8x128xf32> to vector<8x128xf32>
    %475 = arith.addf %468, %474 : vector<8x128xf32>
    %c0_i32_246 = arith.constant 0 : i32
    %476 = arith.cmpi eq, %arg0, %c0_i32_246 : i32
    %c7_i32_247 = arith.constant 7 : i32
    %477 = arith.subi %c7_i32_247, %c6_i32 : i32
    %478 = arith.select %476, %c6_i32, %477 : i32
    %c0_248 = arith.constant 0 : index
    %479 = arith.index_cast %478 : i32 to index
    %c0_249 = arith.constant 0 : index
    %c0_250 = arith.constant 0 : index
    %480 = vector.load %arg5[%c0_248, %479, %c0_249, %c0_250] : memref<1x8x8x128xf32, #tpu.memory_space<vmem>>, vector<1x1x8x128xf32>
    %481 = vector.shape_cast %480 : vector<1x1x8x128xf32> to vector<8x128xf32>
    %482 = vector.shape_cast %475 : vector<8x128xf32> to vector<1x1x8x128xf32>
    tpu.vector_store %arg5[%c0_248, %479, %c0_249, %c0_250], %482 {strides = array<i32>} : memref<1x8x8x128xf32, #tpu.memory_space<vmem>>, vector<1x1x8x128xf32>,
    %c7_i32_251 = arith.constant 7 : i32
    %c2_i32_252 = arith.constant 2 : i32
    %c0_i32_253 = arith.constant 0 : i32
    %483 = arith.cmpi eq, %c2_i32_252, %c0_i32_253 : i32
    %c1_i32_254 = arith.constant 1 : i32
    %484 = arith.select %483, %c1_i32_254, %c2_i32_252 : i32
    %485 = arith.remsi %c7_i32_251, %484 : i32
    %c0_i32_255 = arith.constant 0 : i32
    %486 = arith.cmpi ne, %485, %c0_i32_255 : i32
    %c0_i32_256 = arith.constant 0 : i32
    %487 = arith.cmpi slt, %485, %c0_i32_256 : i32
    %c0_i32_257 = arith.constant 0 : i32
    %488 = arith.cmpi slt, %484, %c0_i32_257 : i32
    %489 = arith.xori %487, %488 : i1
    %490 = arith.andi %489, %486 : i1
    %491 = arith.addi %485, %484 : i32
    %492 = arith.select %490, %491, %485 : i32
    %c0_i32_258 = arith.constant 0 : i32
    %c0_i32_259 = arith.constant 0 : i32
    %c0_i32_260 = arith.constant 0 : i32
    %c0_i32_261 = arith.constant 0 : i32
    %493 = tpu.memref_slice %arg1[%c0_i32_258, %c0_i32_259, %c0_i32_260, %c0_i32_261] : memref<2x8x8x512xbf16, #tpu.memory_space<any>> -> memref<1x1x8x512xbf16, #tpu.memory_space<any>>
    %494 = tpu.memref_squeeze %493 : memref<1x1x8x512xbf16, #tpu.memory_space<any>> -> memref<8x512xbf16, #tpu.memory_space<any>>
    %c0_i32_262 = arith.constant 0 : i32
    %c0_i32_263 = arith.constant 0 : i32
    %495 = tpu.memref_slice %arg6[%492, %c0_i32_262, %c0_i32_263] : memref<2x8x512xbf16, #tpu.memory_space<vmem>> -> memref<1x8x512xbf16, #tpu.memory_space<vmem>>
    %496 = tpu.memref_squeeze %495 : memref<1x8x512xbf16, #tpu.memory_space<vmem>> -> memref<8x512xbf16, #tpu.memory_space<vmem>>
    %497 = tpu.memref_slice %arg7[%492] : memref<2x!tpu.dma_semaphore, #tpu.memory_space<semaphore_mem>> -> memref<1x!tpu.dma_semaphore, #tpu.memory_space<semaphore_mem>>
    %498 = tpu.memref_squeeze %497 : memref<1x!tpu.dma_semaphore, #tpu.memory_space<semaphore_mem>> -> memref<!tpu.dma_semaphore, #tpu.memory_space<semaphore_mem>>
    tpu.wait_dma2 semaphore(%498 : memref<!tpu.dma_semaphore, #tpu.memory_space<semaphore_mem>>) src(%494 : memref<8x512xbf16, #tpu.memory_space<any>>) dst(%496 : memref<8x512xbf16, #tpu.memory_space<vmem>>)
    %c1_i32_264 = arith.constant 1 : i32
    %499 = arith.addi %c7_i32_251, %c1_i32_264 : i32
    %c8_i32_265 = arith.constant 8 : i32
    %500 = arith.cmpi slt, %499, %c8_i32_265 : i32
    %501 = arith.extui %500 : i1 to i32
    %c0_i32_266 = arith.constant 0 : i32
    %502 = arith.cmpi ne, %501, %c0_i32_266 : i32
    scf.if %502 {
      %c1_i32_287 = arith.constant 1 : i32
      %550 = arith.addi %c7_i32_251, %c1_i32_287 : i32
      %c1_i32_288 = arith.constant 1 : i32
      %551 = arith.subi %c1_i32_288, %492 : i32
      %c0_i32_289 = arith.constant 0 : i32
      %552 = arith.cmpi eq, %arg0, %c0_i32_289 : i32
      %c7_i32_290 = arith.constant 7 : i32
      %553 = arith.subi %c7_i32_290, %550 : i32
      %554 = arith.select %552, %550, %553 : i32
      %c0_i32_291 = arith.constant 0 : i32
      %c0_i32_292 = arith.constant 0 : i32
      %555 = tpu.memref_slice %arg1[%arg0, %554, %c0_i32_291, %c0_i32_292] : memref<2x8x8x512xbf16, #tpu.memory_space<any>> -> memref<1x1x8x512xbf16, #tpu.memory_space<any>>
      %556 = tpu.memref_squeeze %555 : memref<1x1x8x512xbf16, #tpu.memory_space<any>> -> memref<8x512xbf16, #tpu.memory_space<any>>
      %c0_i32_293 = arith.constant 0 : i32
      %c0_i32_294 = arith.constant 0 : i32
      %557 = tpu.memref_slice %arg6[%551, %c0_i32_293, %c0_i32_294] : memref<2x8x512xbf16, #tpu.memory_space<vmem>> -> memref<1x8x512xbf16, #tpu.memory_space<vmem>>
      %558 = tpu.memref_squeeze %557 : memref<1x8x512xbf16, #tpu.memory_space<vmem>> -> memref<8x512xbf16, #tpu.memory_space<vmem>>
      %559 = tpu.memref_slice %arg7[%551] : memref<2x!tpu.dma_semaphore, #tpu.memory_space<semaphore_mem>> -> memref<1x!tpu.dma_semaphore, #tpu.memory_space<semaphore_mem>>
      %560 = tpu.memref_squeeze %559 : memref<1x!tpu.dma_semaphore, #tpu.memory_space<semaphore_mem>> -> memref<!tpu.dma_semaphore, #tpu.memory_space<semaphore_mem>>
      tpu.enqueue_dma source(%556 : memref<8x512xbf16, #tpu.memory_space<any>>) target(%558 : memref<8x512xbf16, #tpu.memory_space<vmem>>) target_semaphore(%560 : memref<!tpu.dma_semaphore, #tpu.memory_space<semaphore_mem>>)
    } else {
    }
    %503 = arith.index_cast %492 : i32 to index
    %c0_267 = arith.constant 0 : index
    %c0_268 = arith.constant 0 : index
    %504 = vector.load %arg6[%503, %c0_267, %c0_268] : memref<2x8x512xbf16, #tpu.memory_space<vmem>>, vector<1x8x512xbf16>
    %505 = vector.shape_cast %504 : vector<1x8x512xbf16> to vector<8x512xbf16>
    %506 = arith.extf %505 : vector<8x512xbf16> to vector<8x512xf32>
    %507 = arith.truncf %468 : vector<8x128xf32> to vector<8x128xbf16>
    %cst_269 = arith.constant dense<0.000000e+00> : vector<8x512xf32>
    %508 = tpu.matmul %507, %1, %cst_269 {dimension_numbers = #tpu.dot_dimension_numbers<[1], [0], [0], [1], [0, 0, 1, 1], [], []>} : vector<8x128xbf16>, vector<128x512xbf16>, vector<8x512xf32> -> vector<8x512xf32>
    %509 = arith.addf %506, %508 : vector<8x512xf32>
    %510 = vector.extract_strided_slice %509 {offsets = [0, 0], sizes = [8, 384], strides = [1, 1]} : vector<8x512xf32> to vector<8x384xf32>
    %511 = arith.negf %510 : vector<8x384xf32>
    %512 = math.exp %511 : vector<8x384xf32>
    %cst_270 = arith.constant 1.000000e+00 : f32
    %513 = vector.broadcast %cst_270 : f32 to vector<8x384xf32>
    %514 = arith.addf %513, %512 : vector<8x384xf32>
    %515 = arith.divf %513, %514 : vector<8x384xf32>
    %516 = vector.extract_strided_slice %515 {offsets = [0, 0], sizes = [8, 128], strides = [1, 1]} : vector<8x384xf32> to vector<8x128xf32>
    %517 = vector.extract_strided_slice %515 {offsets = [0, 128], sizes = [8, 128], strides = [1, 1]} : vector<8x384xf32> to vector<8x128xf32>
    %518 = vector.extract_strided_slice %515 {offsets = [0, 256], sizes = [8, 128], strides = [1, 1]} : vector<8x384xf32> to vector<8x128xf32>
    %519 = vector.extract_strided_slice %509 {offsets = [0, 384], sizes = [8, 128], strides = [1, 1]} : vector<8x512xf32> to vector<8x128xf32>
    %520 = math.tanh %519 : vector<8x128xf32>
    %521 = arith.mulf %517, %460 : vector<8x128xf32>
    %522 = arith.mulf %516, %520 : vector<8x128xf32>
    %523 = arith.addf %521, %522 : vector<8x128xf32>
    %cst_271 = arith.constant -3.000000e+00 : f32
    %cst_272 = arith.constant 3.000000e+00 : f32
    %524 = vector.broadcast %cst_271 : f32 to vector<8x128xf32>
    %525 = arith.maximumf %524, %523 : vector<8x128xf32>
    %526 = vector.broadcast %cst_272 : f32 to vector<8x128xf32>
    %527 = arith.minimumf %526, %525 : vector<8x128xf32>
    %528 = math.tanh %527 : vector<8x128xf32>
    %529 = arith.mulf %518, %528 : vector<8x128xf32>
    %530 = arith.truncf %529 : vector<8x128xf32> to vector<8x128xbf16>
    %cst_273 = arith.constant dense<0.000000e+00> : vector<8x128xf32>
    %531 = tpu.matmul %530, %3, %cst_273 {dimension_numbers = #tpu.dot_dimension_numbers<[1], [0], [0], [1], [0, 0, 1, 1], [], []>} : vector<8x128xbf16>, vector<128x128xbf16>, vector<8x128xf32> -> vector<8x128xf32>
    %cst_274 = arith.constant -3.000000e+00 : f32
    %cst_275 = arith.constant 3.000000e+00 : f32
    %532 = vector.broadcast %cst_274 : f32 to vector<8x128xf32>
    %533 = arith.maximumf %532, %531 : vector<8x128xf32>
    %534 = vector.broadcast %cst_275 : f32 to vector<8x128xf32>
    %535 = arith.minimumf %534, %533 : vector<8x128xf32>
    %c0_i32_276 = arith.constant 0 : i32
    %536 = arith.cmpi eq, %arg0, %c0_i32_276 : i32
    %c7_i32_277 = arith.constant 7 : i32
    %537 = arith.subi %c7_i32_277, %c7_i32_251 : i32
    %538 = arith.select %536, %c7_i32_251, %537 : i32
    %c0_278 = arith.constant 0 : index
    %539 = arith.index_cast %538 : i32 to index
    %c0_279 = arith.constant 0 : index
    %c0_280 = arith.constant 0 : index
    %540 = vector.load %arg4[%c0_278, %539, %c0_279, %c0_280] : memref<1x8x8x128xf32, #tpu.memory_space<vmem>>, vector<1x1x8x128xf32>
    %541 = vector.shape_cast %540 : vector<1x1x8x128xf32> to vector<8x128xf32>
    %542 = arith.addf %535, %541 : vector<8x128xf32>
    %c0_i32_281 = arith.constant 0 : i32
    %543 = arith.cmpi eq, %arg0, %c0_i32_281 : i32
    %c7_i32_282 = arith.constant 7 : i32
    %544 = arith.subi %c7_i32_282, %c7_i32_251 : i32
    %545 = arith.select %543, %c7_i32_251, %544 : i32
    %c0_283 = arith.constant 0 : index
    %546 = arith.index_cast %545 : i32 to index
    %c0_284 = arith.constant 0 : index
    %c0_285 = arith.constant 0 : index
    %547 = vector.load %arg5[%c0_283, %546, %c0_284, %c0_285] : memref<1x8x8x128xf32, #tpu.memory_space<vmem>>, vector<1x1x8x128xf32>
    %548 = vector.shape_cast %547 : vector<1x1x8x128xf32> to vector<8x128xf32>
    %549 = vector.shape_cast %542 : vector<8x128xf32> to vector<1x1x8x128xf32>
    tpu.vector_store %arg5[%c0_283, %546, %c0_284, %c0_285], %549 {strides = array<i32>} : memref<1x8x8x128xf32, #tpu.memory_space<vmem>>, vector<1x1x8x128xf32>,
    %c8_i32_286 = arith.constant 8 : i32
    return
  }
  func.func @transform_1(%arg0: i32) -> (i32, i32, i32) {
    %c0_i32 = arith.constant 0 : i32
    %c0_i32_0 = arith.constant 0 : i32
    %c0_i32_1 = arith.constant 0 : i32
    return %arg0, %c0_i32, %c0_i32_0 : i32, i32, i32
  }
  func.func @transform_2(%arg0: i32) -> (i32, i32, i32) {
    %c0_i32 = arith.constant 0 : i32
    %c0_i32_0 = arith.constant 0 : i32
    %c0_i32_1 = arith.constant 0 : i32
    return %arg0, %c0_i32, %c0_i32_0 : i32, i32, i32
  }
  func.func @transform_3(%arg0: i32) -> (i32, i32, i32, i32) {
    %c0_i32 = arith.constant 0 : i32
    %c0_i32_0 = arith.constant 0 : i32
    %c0_i32_1 = arith.constant 0 : i32
    %c0_i32_2 = arith.constant 0 : i32
    return %arg0, %c0_i32, %c0_i32_0, %c0_i32_1 : i32, i32, i32, i32
  }
  func.func @transform_4(%arg0: i32) -> (i32, i32, i32, i32) {
    %c0_i32 = arith.constant 0 : i32
    %c0_i32_0 = arith.constant 0 : i32
    %c0_i32_1 = arith.constant 0 : i32
    %c0_i32_2 = arith.constant 0 : i32
    return %arg0, %c0_i32, %c0_i32_0, %c0_i32_1 : i32, i32, i32, i32
  }
}

module attributes {stable_mosaic.version = 11 : i64} {
  func.func @kernel(%arg0: i32, %arg1: memref<4xf32, #tpu.memory_space<smem>>, %arg2: memref<8x8x128xf32, #tpu.memory_space<vmem>>, %arg3: memref<2x8x8x128xf32, #tpu.memory_space<vmem>>, %arg4: memref<2x8x8x128xf32, #tpu.memory_space<vmem>>, %arg5: memref<8x8x256xf32, #tpu.memory_space<vmem>>) attributes {dimension_semantics = [#tpu.dimension_semantics<parallel>], iteration_bounds = array<i64: 1>, scalar_prefetch = 0 : i64, scratch_operands = 0 : i64, tpu.core_type = #tpu.core_type<tc>, window_params = [{transform_indices = @transform_0, window_bounds = array<i64: 4>}, {transform_indices = @transform_1, window_bounds = array<i64: 8, 8, 128>}, {transform_indices = @transform_2, window_bounds = array<i64: 2, 8, 8, 128>}, {transform_indices = @transform_3, window_bounds = array<i64: 2, 8, 8, 128>}, {transform_indices = @transform_4, window_bounds = array<i64: 8, 8, 256>}]} {
    %c0 = arith.constant 0 : index
    %c0_0 = arith.constant 0 : index
    %c0_1 = arith.constant 0 : index
    %0 = vector.load %arg2[%c0, %c0_0, %c0_1] : memref<8x8x128xf32, #tpu.memory_space<vmem>>, vector<8x8x128xf32>
    %c0_2 = arith.constant 0 : index
    %1 = memref.load %arg1[%c0_2] : memref<4xf32, #tpu.memory_space<smem>>
    %2 = vector.broadcast %1 : f32 to vector<8x8x128xf32>
    %3 = arith.mulf %2, %0 : vector<8x8x128xf32>
    %c0_3 = arith.constant 0 : index
    %4 = memref.load %arg1[%c0_3] : memref<4xf32, #tpu.memory_space<smem>>
    %5 = vector.broadcast %4 : f32 to vector<8x8x128xf32>
    %6 = arith.mulf %5, %0 : vector<8x8x128xf32>
    %c1 = arith.constant 1 : index
    %7 = memref.load %arg1[%c1] : memref<4xf32, #tpu.memory_space<smem>>
    %c0_4 = arith.constant 0 : index
    %c0_5 = arith.constant 0 : index
    %c0_6 = arith.constant 0 : index
    %c0_7 = arith.constant 0 : index
    %8 = vector.load %arg3[%c0_4, %c0_5, %c0_6, %c0_7] : memref<2x8x8x128xf32, #tpu.memory_space<vmem>>, vector<1x8x8x128xf32>
    %9 = vector.shape_cast %8 : vector<1x8x8x128xf32> to vector<8x8x128xf32>
    %10 = vector.broadcast %7 : f32 to vector<8x8x128xf32>
    %11 = arith.mulf %10, %9 : vector<8x8x128xf32>
    %12 = arith.addf %3, %11 : vector<8x8x128xf32>
    %c1_8 = arith.constant 1 : index
    %13 = memref.load %arg1[%c1_8] : memref<4xf32, #tpu.memory_space<smem>>
    %c1_9 = arith.constant 1 : index
    %c0_10 = arith.constant 0 : index
    %c0_11 = arith.constant 0 : index
    %c0_12 = arith.constant 0 : index
    %14 = vector.load %arg3[%c1_9, %c0_10, %c0_11, %c0_12] : memref<2x8x8x128xf32, #tpu.memory_space<vmem>>, vector<1x8x8x128xf32>
    %15 = vector.shape_cast %14 : vector<1x8x8x128xf32> to vector<8x8x128xf32>
    %16 = vector.broadcast %13 : f32 to vector<8x8x128xf32>
    %17 = arith.mulf %16, %15 : vector<8x8x128xf32>
    %18 = arith.addf %6, %17 : vector<8x8x128xf32>
    %c2 = arith.constant 2 : index
    %19 = memref.load %arg1[%c2] : memref<4xf32, #tpu.memory_space<smem>>
    %c0_13 = arith.constant 0 : index
    %c0_14 = arith.constant 0 : index
    %c0_15 = arith.constant 0 : index
    %c0_16 = arith.constant 0 : index
    %20 = vector.load %arg4[%c0_13, %c0_14, %c0_15, %c0_16] : memref<2x8x8x128xf32, #tpu.memory_space<vmem>>, vector<1x8x8x128xf32>
    %21 = vector.shape_cast %20 : vector<1x8x8x128xf32> to vector<8x8x128xf32>
    %22 = vector.broadcast %19 : f32 to vector<8x8x128xf32>
    %23 = arith.mulf %22, %21 : vector<8x8x128xf32>
    %24 = arith.addf %12, %23 : vector<8x8x128xf32>
    %c2_17 = arith.constant 2 : index
    %25 = memref.load %arg1[%c2_17] : memref<4xf32, #tpu.memory_space<smem>>
    %c1_18 = arith.constant 1 : index
    %c0_19 = arith.constant 0 : index
    %c0_20 = arith.constant 0 : index
    %c0_21 = arith.constant 0 : index
    %26 = vector.load %arg4[%c1_18, %c0_19, %c0_20, %c0_21] : memref<2x8x8x128xf32, #tpu.memory_space<vmem>>, vector<1x8x8x128xf32>
    %27 = vector.shape_cast %26 : vector<1x8x8x128xf32> to vector<8x8x128xf32>
    %28 = vector.broadcast %25 : f32 to vector<8x8x128xf32>
    %29 = arith.mulf %28, %27 : vector<8x8x128xf32>
    %30 = arith.addf %18, %29 : vector<8x8x128xf32>
    %c3 = arith.constant 3 : index
    %31 = memref.load %arg1[%c3] : memref<4xf32, #tpu.memory_space<smem>>
    %32 = tpu.concatenate %24, %30 in 2 : vector<8x8x128xf32>, vector<8x8x128xf32> -> vector<8x8x256xf32>
    %33 = vector.broadcast %31 : f32 to vector<8x8x256xf32>
    %34 = arith.mulf %33, %32 : vector<8x8x256xf32>
    %35 = tpu.transpose %34, [1, 0, 2] : vector<8x8x256xf32> -> vector<8x8x256xf32>
    %c0_22 = arith.constant 0 : index
    %c0_23 = arith.constant 0 : index
    %c0_24 = arith.constant 0 : index
    %36 = vector.load %arg5[%c0_22, %c0_23, %c0_24] : memref<8x8x256xf32, #tpu.memory_space<vmem>>, vector<8x8x256xf32>
    tpu.vector_store %arg5[%c0_22, %c0_23, %c0_24], %35 {strides = array<i32>} : memref<8x8x256xf32, #tpu.memory_space<vmem>>, vector<8x8x256xf32>,
    return
  }
  func.func @transform_0(%arg0: i32) -> i32 {
    %c0_i32 = arith.constant 0 : i32
    %c0_i32_0 = arith.constant 0 : i32
    return %c0_i32 : i32
  }
  func.func @transform_1(%arg0: i32) -> (i32, i32, i32) {
    %c0_i32 = arith.constant 0 : i32
    %c0_i32_0 = arith.constant 0 : i32
    %c0_i32_1 = arith.constant 0 : i32
    return %arg0, %c0_i32, %c0_i32_0 : i32, i32, i32
  }
  func.func @transform_2(%arg0: i32) -> (i32, i32, i32, i32) {
    %c0_i32 = arith.constant 0 : i32
    %c0_i32_0 = arith.constant 0 : i32
    %c0_i32_1 = arith.constant 0 : i32
    %c0_i32_2 = arith.constant 0 : i32
    return %c0_i32, %arg0, %c0_i32_0, %c0_i32_1 : i32, i32, i32, i32
  }
  func.func @transform_3(%arg0: i32) -> (i32, i32, i32, i32) {
    %c0_i32 = arith.constant 0 : i32
    %c0_i32_0 = arith.constant 0 : i32
    %c0_i32_1 = arith.constant 0 : i32
    %c0_i32_2 = arith.constant 0 : i32
    return %c0_i32, %arg0, %c0_i32_0, %c0_i32_1 : i32, i32, i32, i32
  }
  func.func @transform_4(%arg0: i32) -> (i32, i32, i32) {
    %c0_i32 = arith.constant 0 : i32
    %c0_i32_0 = arith.constant 0 : i32
    %c0_i32_1 = arith.constant 0 : i32
    return %c0_i32, %arg0, %c0_i32_0 : i32, i32, i32
  }
}

</mosaic_0001>

<bundles_post_ra>
// kernel: a_call__.7
= control target key start
LH: loop header
LB: loop body
LE: loop exit
PB: predicated region body
PF: predicated region fallthrough
CT: control target
= control target key end

     0   :  { %v1273_v1 = vmov 0   ;;  %s1754_s1 = inlined_call_operand.vmem [shape: bf16[2,128,512], index: 1, kind: input, shape index: {}]   ;;  %s1755_s0 = inlined_call_operand.vmem [shape: f32[2,64,128], index: 0, kind: input, shape index: {}]   ;;  %s1756_s2 = inlined_call_operand.vmem [shape: f32[2,1,512], index: 2, kind: input, shape index: {}]   ;;  %s1757_s3 = inlined_call_operand.vmem [shape: bf16[2,64,512], index: 3, kind: output, shape index: {}]  }
   0x1   :  { %v1177_v0 = vld [vmem:[%s1754_s1 + $0x4] ss:$16 sps:$4 sm:$0xff]   ;;  %286 = vmatprep.mubr.bf16.mxu0 %v1273_v1  ;;  %359 = vmatprep.mubr.bf16.mxu1 %v1273_v1  ;;  %v1179_v2 = vld [vmem:[%s1754_s1 + $0xc] ss:$16 sps:$4 sm:$0xff]   ;;  %v1181_v3 = vld [vmem:[%s1754_s1] ss:$16 sps:$4 sm:$0xff]  }
   0x2   :  { %254 = vmatprep.subr.bf16.mxu0 %v1177_v0  ;;  %v1182_v4 = vld [vmem:[%s1754_s1 + $0x8] ss:$16 sps:$4 sm:$0xff]   ;;  %327 = vmatprep.subr.bf16.mxu1 %v1179_v2  ;;  %v1183_v5 = vld [vmem:[%s1754_s1 + $0x24] ss:$16 sps:$4 sm:$0xff]   ;;  %v1185_v6 = vld [vmem:[%s1754_s1 + $0x2c] ss:$16 sps:$4 sm:$0xff]  }
   0x3   :  { %255 = vmatpush1.bf16.msra.mxu0 %v1181_v3  ;;  %328 = vmatpush1.bf16.msra.mxu1 %v1182_v4  ;;  %v1187_v7 = vld [vmem:[%s1754_s1 + $0x20] ss:$16 sps:$4 sm:$0xff]   ;;  %v1188_v8 = vld [vmem:[%s1754_s1 + $0x28] ss:$16 sps:$4 sm:$0xff]   ;;  %v1189_v9 = vld [vmem:[%s1754_s1 + $0x44] ss:$16 sps:$4 sm:$0xff]  }
   0x4   :  { %256 = vmatprep.subr.bf16.mxu0 %v1183_v5  ;;  %329 = vmatprep.subr.bf16.mxu1 %v1185_v6  ;;  %v1191_v10 = vld [vmem:[%s1754_s1 + $0x4c] ss:$16 sps:$4 sm:$0xff]   ;;  %v1193_v11 = vld [vmem:[%s1754_s1 + $0x40] ss:$16 sps:$4 sm:$0xff]   ;;  %v1194_v12 = vld [vmem:[%s1754_s1 + $0x48] ss:$16 sps:$4 sm:$0xff]  }
   0x5   :  { %v1195_v13 = vld [vmem:[%s1754_s1 + $0x64] ss:$16 sps:$4 sm:$0xff]   ;;  %v1197_v14 = vld [vmem:[%s1754_s1 + $0x6c] ss:$16 sps:$4 sm:$0xff]   ;;  %v1199_v15 = vld [vmem:[%s1754_s1 + $0x60] ss:$16 sps:$4 sm:$0xff]  }
   0x6   :  { %v1200_v16 = vld [vmem:[%s1754_s1 + $0x68] ss:$16 sps:$4 sm:$0xff]   ;;  %v1201_v17 = vld [vmem:[%s1754_s1 + $0x84] ss:$16 sps:$4 sm:$0xff]   ;;  %v1203_v18 = vld [vmem:[%s1754_s1 + $0x8c] ss:$16 sps:$4 sm:$0xff]  }
   0x7   :  { %257 = vmatpush1.bf16.msra.mxu0 %v1187_v7  ;;  %330 = vmatpush1.bf16.msra.mxu1 %v1188_v8  ;;  %v1205_v19 = vld [vmem:[%s1754_s1 + $0x80] ss:$16 sps:$4 sm:$0xff]   ;;  %v1206_v20 = vld [vmem:[%s1754_s1 + $0x88] ss:$16 sps:$4 sm:$0xff]   ;;  %v1207_v21 = vld [vmem:[%s1754_s1 + $0xa4] ss:$16 sps:$4 sm:$0xff]  }
   0x8   :  { %258 = vmatprep.subr.bf16.mxu0 %v1189_v9  ;;  %331 = vmatprep.subr.bf16.mxu1 %v1191_v10  ;;  %v1209_v22 = vld [vmem:[%s1754_s1 + $0xac] ss:$16 sps:$4 sm:$0xff]   ;;  %v1211_v23 = vld [vmem:[%s1754_s1 + $0xa0] ss:$16 sps:$4 sm:$0xff]   ;;  %v1212_v24 = vld [vmem:[%s1754_s1 + $0xa8] ss:$16 sps:$4 sm:$0xff]  }
   0x9   :  { %v1213_v25 = vld [vmem:[%s1754_s1 + $0xc4] ss:$16 sps:$4 sm:$0xff]   ;;  %v1215_v26 = vld [vmem:[%s1754_s1 + $0xcc] ss:$16 sps:$4 sm:$0xff]   ;;  %v1217_v27 = vld [vmem:[%s1754_s1 + $0xc0] ss:$16 sps:$4 sm:$0xff]  }
   0xa   :  { %v1218_v28 = vld [vmem:[%s1754_s1 + $0xc8] ss:$16 sps:$4 sm:$0xff]   ;;  %v1219_v29 = vld [vmem:[%s1754_s1 + $0xe4] ss:$16 sps:$4 sm:$0xff]   ;;  %v1221_v30 = vld [vmem:[%s1754_s1 + $0xec] ss:$16 sps:$4 sm:$0xff]  }
   0xb   :  { %259 = vmatpush1.bf16.msra.mxu0 %v1193_v11  ;;  %332 = vmatpush1.bf16.msra.mxu1 %v1194_v12  ;;  %v1223_v31 = vld [vmem:[%s1754_s1 + $0xe0] ss:$16 sps:$4 sm:$0xff]   ;;  %v1224_v32 = vld [vmem:[%s1754_s1 + $0xe8] ss:$16 sps:$4 sm:$0xff]   ;;  %v1227_v35 = vld [vmem:[%s1754_s1 + $0x104] ss:$16 sps:$4 sm:$0xff]  }
   0xc   :  { %260 = vmatprep.subr.bf16.mxu0 %v1195_v13  ;;  %333 = vmatprep.subr.bf16.mxu1 %v1197_v14  ;;  %v15_v33 = vld [vmem:[%s1755_s0] sm:$0xff]  ;;  %v16_v34 = vld [vmem:[%s1755_s0 + $0x8] sm:$0xff]  ;;  %v17_v44 = vld [vmem:[%s1755_s0 + $0x10] sm:$0xff] }
   0xd   :  { %v1230_v36 = vld [vmem:[%s1754_s1 + $0x10c] ss:$16 sps:$4 sm:$0xff]   ;;  %v23_v37 = vpack.c.bf16 %v16_v34, %v15_v33  ;;  %v1225_v38 = vld [vmem:[%s1754_s1 + $0x100] ss:$16 sps:$4 sm:$0xff]   ;;  %v1228_v39 = vld [vmem:[%s1754_s1 + $0x108] ss:$16 sps:$4 sm:$0xff]  }
   0xe   :  { %v1233_v40 = vld [vmem:[%s1754_s1 + $0x124] ss:$16 sps:$4 sm:$0xff]   ;;  %v1236_v41 = vld [vmem:[%s1754_s1 + $0x12c] ss:$16 sps:$4 sm:$0xff]   ;;  %v1231_v42 = vld [vmem:[%s1754_s1 + $0x120] ss:$16 sps:$4 sm:$0xff]  }
   0xf   :  { %261 = vmatpush1.bf16.msra.mxu0 %v1199_v15  ;;  %334 = vmatpush1.bf16.msra.mxu1 %v1200_v16  ;;  %v1234_v43 = vld [vmem:[%s1754_s1 + $0x128] ss:$16 sps:$4 sm:$0xff]   ;;  %v1239_v46 = vld [vmem:[%s1754_s1 + $0x144] ss:$16 sps:$4 sm:$0xff]   ;;  %v1242_v47 = vld [vmem:[%s1754_s1 + $0x14c] ss:$16 sps:$4 sm:$0xff]  }
  0x10   :  { %262 = vmatprep.subr.bf16.mxu0 %v1201_v17  ;;  %335 = vmatprep.subr.bf16.mxu1 %v1203_v18  ;;  %v18_v45 = vld [vmem:[%s1755_s0 + $0x18] sm:$0xff]  ;;  %v1237_v49 = vld [vmem:[%s1754_s1 + $0x140] ss:$16 sps:$4 sm:$0xff]   ;;  %v1245_v51 = vld [vmem:[%s1754_s1 + $0x164] ss:$16 sps:$4 sm:$0xff]  }
  0x11   :  { %v24_v48 = vpack.c.bf16 %v18_v45, %v17_v44  ;;  %v1240_v50 = vld [vmem:[%s1754_s1 + $0x148] ss:$16 sps:$4 sm:$0xff]   ;;  %v1248_v52 = vld [vmem:[%s1754_s1 + $0x16c] ss:$16 sps:$4 sm:$0xff]   ;;  %v1243_v53 = vld [vmem:[%s1754_s1 + $0x160] ss:$16 sps:$4 sm:$0xff]  }
  0x12   :  { %v1246_v54 = vld [vmem:[%s1754_s1 + $0x168] ss:$16 sps:$4 sm:$0xff]   ;;  %v19_v55 = vld [vmem:[%s1755_s0 + $0x20] sm:$0xff]  ;;  %v1254_v58 = vld [vmem:[%s1754_s1 + $0x18c] ss:$16 sps:$4 sm:$0xff]  }
  0x13   :  { %263 = vmatpush1.bf16.msra.mxu0 %v1205_v19  ;;  %336 = vmatpush1.bf16.msra.mxu1 %v1206_v20  ;;  %v20_v56 = vld [vmem:[%s1755_s0 + $0x28] sm:$0xff]  ;;  %v1251_v57 = vld [vmem:[%s1754_s1 + $0x184] ss:$16 sps:$4 sm:$0xff]   ;;  %v1249_v60 = vld [vmem:[%s1754_s1 + $0x180] ss:$16 sps:$4 sm:$0xff]  }
  0x14   :  { %264 = vmatprep.subr.bf16.mxu0 %v1207_v21  ;;  %337 = vmatprep.subr.bf16.mxu1 %v1209_v22  ;;  %v25_v59 = vpack.c.bf16 %v20_v56, %v19_v55  ;;  %v1252_v61 = vld [vmem:[%s1754_s1 + $0x188] ss:$16 sps:$4 sm:$0xff]   ;;  %v1257_v62 = vld [vmem:[%s1754_s1 + $0x1a4] ss:$16 sps:$4 sm:$0xff]   ;;  %v1260_v63 = vld [vmem:[%s1754_s1 + $0x1ac] ss:$16 sps:$4 sm:$0xff]  }
  0x15   :  { %v1255_v0 = vld [vmem:[%s1754_s1 + $0x1a0] ss:$16 sps:$4 sm:$0xff]   ;;  %v1258_v2 = vld [vmem:[%s1754_s1 + $0x1a8] ss:$16 sps:$4 sm:$0xff]   ;;  %v1263_v5 = vld [vmem:[%s1754_s1 + $0x1c4] ss:$16 sps:$4 sm:$0xff]  }
  0x16   :  { %v21_v3 = vld [vmem:[%s1755_s0 + $0x30] sm:$0xff]  ;;  %v22_v4 = vld [vmem:[%s1755_s0 + $0x38] sm:$0xff]  ;;  %v991_v14 = vld [vmem:[%s1755_s0 + $0x40] sm:$0xff] }
  0x17   :  { %265 = vmatpush1.bf16.msra.mxu0 %v1211_v23  ;;  %338 = vmatpush1.bf16.msra.mxu1 %v1212_v24  ;;  %v1266_v6 = vld [vmem:[%s1754_s1 + $0x1cc] ss:$16 sps:$4 sm:$0xff]   ;;  %v26_v7 = vpack.c.bf16 %v22_v4, %v21_v3  ;;  %v1261_v8 = vld [vmem:[%s1754_s1 + $0x1c0] ss:$16 sps:$4 sm:$0xff]   ;;  %v1264_v9 = vld [vmem:[%s1754_s1 + $0x1c8] ss:$16 sps:$4 sm:$0xff]  }
  0x18   :  { %266 = vmatprep.subr.bf16.mxu0 %v1213_v25  ;;  %339 = vmatprep.subr.bf16.mxu1 %v1215_v26  ;;  %v1269_v10 = vld [vmem:[%s1754_s1 + $0x1e4] ss:$16 sps:$4 sm:$0xff]   ;;  %v1272_v11 = vld [vmem:[%s1754_s1 + $0x1ec] ss:$16 sps:$4 sm:$0xff]   ;;  %v1267_v12 = vld [vmem:[%s1754_s1 + $0x1e0] ss:$16 sps:$4 sm:$0xff]   ;;  %v74_v26 = vlaneseq }
  0x19   :  { %v1270_v13 = vld [vmem:[%s1754_s1 + $0x1e8] ss:$16 sps:$4 sm:$0xff]   ;;  %v993_v17 = vld [vmem:[%s1755_s0 + $0x50] sm:$0xff]  ;;  %v995_v20 = vld [vmem:[%s1755_s0 + $0x60] sm:$0xff] }
  0x1a   :  { %v992_v15 = vld [vmem:[%s1755_s0 + $0x48] sm:$0xff]  ;;  %v994_v18 = vld [vmem:[%s1755_s0 + $0x58] sm:$0xff]  ;;  %v997_v23 = vld [vmem:[%s1755_s0 + $0x70] sm:$0xff] }
  0x1b   :  { %267 = vmatpush1.bf16.msra.mxu0 %v1217_v27  ;;  %340 = vmatpush1.bf16.msra.mxu1 %v1218_v28  ;;  %v36_v16 = vpack.c.bf16 %v992_v15, %v991_v14  ;;  %v37_v19 = vpack.c.bf16 %v994_v18, %v993_v17  ;;  %v996_v21 = vld [vmem:[%s1755_s0 + $0x68] sm:$0xff]  ;;  %v998_v24 = vld [vmem:[%s1755_s0 + $0x78] sm:$0xff]  ;;  %v1550_v27 = vshrl.u32 %v74_v26, 7 }
  0x1c   :  { %268 = vmatprep.subr.bf16.mxu0 %v1219_v29  ;;  %341 = vmatprep.subr.bf16.mxu1 %v1221_v30  ;;  %v38_v22 = vpack.c.bf16 %v996_v21, %v995_v20  ;;  %v39_v25 = vpack.c.bf16 %v998_v24, %v997_v23 }
  0x1d   :  { %v76_v28 = vsub.s32 0, %v1550_v27  ;;  %v84_v29 = vsub.s32 2, %v1550_v27  ;;  %v80_v30 = vsub.s32 1, %v1550_v27 }
  0x1f   :  { %269 = vmatpush1.bf16.msra.mxu0 %v1223_v31  ;;  %342 = vmatpush1.bf16.msra.mxu1 %v1224_v32  ;;  %v88_v31 = vsub.s32 3, %v1550_v27 }
  0x20   :  { %616 = vmatprep.subr.bf16.mxu0 %v1227_v35  ;;  %689 = vmatprep.subr.bf16.mxu1 %v1230_v36 }
  0x22   :  { %287 = vmatmul.mubr.bf16.vlgmr.msra.gmra.mrb[0].mxu0 %v23_v37  ;;  %360 = vmatmul.mubr.bf16.vlgmr.msra.gmra.mrb[0].mxu1 %v23_v37 }
  0x23   :  { %617 = vmatpush1.bf16.msra.mxu0 %v1225_v38  ;;  %690 = vmatpush1.bf16.msra.mxu1 %v1228_v39 }
  0x24   :  { %618 = vmatprep.subr.bf16.mxu0 %v1233_v40  ;;  %691 = vmatprep.subr.bf16.mxu1 %v1236_v41 }
  0x25   :  { %296 = vmatprep.mubr.bf16.mxu0 %v1273_v1  ;;  %369 = vmatprep.mubr.bf16.mxu1 %v1273_v1 }
  0x27   :  { %619 = vmatpush1.bf16.msra.mxu0 %v1231_v42  ;;  %692 = vmatpush1.bf16.msra.mxu1 %v1234_v43 }
  0x28   :  { %620 = vmatprep.subr.bf16.mxu0 %v1239_v46  ;;  %693 = vmatprep.subr.bf16.mxu1 %v1242_v47 }
  0x2a   :  { %297 = vmatmul.mubr.bf16.gmra.mrb[4].mxu0 %v24_v48  ;;  %370 = vmatmul.mubr.bf16.gmra.mrb[4].mxu1 %v24_v48 }
  0x2b   :  { %621 = vmatpush1.bf16.msra.mxu0 %v1237_v49  ;;  %694 = vmatpush1.bf16.msra.mxu1 %v1240_v50 }
  0x2c   :  { %622 = vmatprep.subr.bf16.mxu0 %v1245_v51  ;;  %695 = vmatprep.subr.bf16.mxu1 %v1248_v52 }
  0x2d   :  { %306 = vmatprep.mubr.bf16.mxu0 %v1273_v1  ;;  %379 = vmatprep.mubr.bf16.mxu1 %v1273_v1 }
  0x2f   :  { %623 = vmatpush1.bf16.msra.mxu0 %v1243_v53  ;;  %696 = vmatpush1.bf16.msra.mxu1 %v1246_v54 }
  0x30   :  { %624 = vmatprep.subr.bf16.mxu0 %v1251_v57  ;;  %697 = vmatprep.subr.bf16.mxu1 %v1254_v58 }
  0x32   :  { %307 = vmatmul.mubr.bf16.gmra.mrb[8].mxu0 %v25_v59  ;;  %380 = vmatmul.mubr.bf16.gmra.mrb[8].mxu1 %v25_v59 }
  0x33   :  { %625 = vmatpush1.bf16.msra.mxu0 %v1249_v60  ;;  %698 = vmatpush1.bf16.msra.mxu1 %v1252_v61 }
  0x34   :  { %626 = vmatprep.subr.bf16.mxu0 %v1257_v62  ;;  %699 = vmatprep.subr.bf16.mxu1 %v1260_v63 }
  0x35   :  { %316 = vmatprep.mubr.bf16.mxu0 %v1273_v1  ;;  %389 = vmatprep.mubr.bf16.mxu1 %v1273_v1 }
  0x37   :  { %627 = vmatpush1.bf16.msra.mxu0 %v1255_v0  ;;  %700 = vmatpush1.bf16.msra.mxu1 %v1258_v2 }
  0x38   :  { %628 = vmatprep.subr.bf16.mxu0 %v1263_v5  ;;  %701 = vmatprep.subr.bf16.mxu1 %v1266_v6 }
  0x3a   :  { %317 = vmatmul.mubr.bf16.gmra.mrb[12].mxu0 %v26_v7  ;;  %390 = vmatmul.mubr.bf16.gmra.mrb[12].mxu1 %v26_v7 }
  0x3b   :  { %629 = vmatpush1.bf16.msra.mxu0 %v1261_v8  ;;  %702 = vmatpush1.bf16.msra.mxu1 %v1264_v9 }
  0x3c   :  { %630 = vmatprep.subr.bf16.mxu0 %v1269_v10  ;;  %703 = vmatprep.subr.bf16.mxu1 %v1272_v11 }
  0x3d   :  { %648 = vmatprep.mubr.bf16.mxu0 %v1273_v1  ;;  %721 = vmatprep.mubr.bf16.mxu1 %v1273_v1 }
  0x3f   :  { %631 = vmatpush1.bf16.msra.mxu0 %v1267_v12  ;;  %704 = vmatpush1.bf16.msra.mxu1 %v1270_v13 }
  0x42   :  { %649 = vmatmul.mubr.bf16.vlgmr.msra.gmra.mrb[16].mxu0 %v36_v16  ;;  %722 = vmatmul.mubr.bf16.vlgmr.msra.gmra.mrb[16].mxu1 %v36_v16 }
  0x43   :  { %658 = vmatprep.mubr.bf16.mxu0 %v1273_v1  ;;  %731 = vmatprep.mubr.bf16.mxu1 %v1273_v1 }
  0x4a   :  { %659 = vmatmul.mubr.bf16.gmra.mrb[20].mxu0 %v37_v19  ;;  %732 = vmatmul.mubr.bf16.gmra.mrb[20].mxu1 %v37_v19 }
  0x4b   :  { %668 = vmatprep.mubr.bf16.mxu0 %v1273_v1  ;;  %741 = vmatprep.mubr.bf16.mxu1 %v1273_v1 }
  0x52   :  { %669 = vmatmul.mubr.bf16.gmra.mrb[24].mxu0 %v38_v22  ;;  %742 = vmatmul.mubr.bf16.gmra.mrb[24].mxu1 %v38_v22 }
  0x53   :  { %678 = vmatprep.mubr.bf16.mxu0 %v1273_v1  ;;  %751 = vmatprep.mubr.bf16.mxu1 %v1273_v1  ;;  %v72_v1 = vld [vmem:[%s1756_s2] sm:$0xf] }
  0x54   :  { %v1561_v32 = vrot.slane %v72_v1, %v76_v28  ;;  %v1565_v33 = vrot.slane %v72_v1, %v84_v29  ;;  %v1569_v34 = vrot.slane %v72_v1, %v80_v30  ;;  %v1573_v35 = vrot.slane %v72_v1, %v88_v31 }
  0x5a   :  { %679 = vmatmul.mubr.bf16.gmra.mrb[28].mxu0 %v39_v25  ;;  %752 = vmatmul.mubr.bf16.gmra.mrb[28].mxu1 %v39_v25 }
  0xf5   :  { %v288_v36 = vpop.f32.mrb[0].mxu0  ;;  %v361_v37 = vpop.f32.mrb[0].mxu1 }
  0xf6   :  { %v289_v38 = vadd.f32 %v288_v36, %v1561_v32  ;;  %v362_v39 = vadd.f32 %v361_v37, %v1565_v33  ;;  %v290_v40 = vpop.f32.mrb[1].mxu0  ;;  %v363_v41 = vpop.f32.mrb[1].mxu1 }
  0xf7   :  { %v291_v42 = vadd.f32 %v290_v40, %v1569_v34  ;;  %v364_v43 = vadd.f32 %v363_v41, %v1573_v35  ;;  %v292_v44 = vpop.f32.mrb[2].mxu0  ;;  %v365_v45 = vpop.f32.mrb[2].mxu1 }
  0xf8   :  { %v293_v46 = vadd.f32 %v292_v44, %v1561_v32  ;;  %v366_v47 = vadd.f32 %v365_v45, %v1565_v33  ;;  %v294_v48 = vpop.f32.mrb[3].mxu0  ;;  %v367_v49 = vpop.f32.mrb[3].mxu1 }
  0xf9   :  { %v1144_v50 = vpack.c.bf16 %v291_v42, %v289_v38  ;;  %v1145_v51 = vpack.c.bf16 %v364_v43, %v362_v39  ;;  %v295_v52 = vadd.f32 %v294_v48, %v1569_v34  ;;  %v368_v53 = vadd.f32 %v367_v49, %v1573_v35 }
  0xfb   :  { %858 = vst [vmem:[%s1757_s3] sm:$0xff] %v1144_v50  ;;  %859 = vst [vmem:[%s1757_s3 + $0x8] sm:$0xff] %v1145_v51  ;;  %v1146_v54 = vpack.c.bf16 %v295_v52, %v293_v46  ;;  %v1147_v55 = vpack.c.bf16 %v368_v53, %v366_v47  ;;  %v1063_v51 = vld [vmem:[%s1756_s2 + $0x4] sm:$0xf] }
  0xfd   :  { %860 = vst [vmem:[%s1757_s3 + $0x10] sm:$0xff] %v1146_v54  ;;  %861 = vst [vmem:[%s1757_s3 + $0x18] sm:$0xff] %v1147_v55  ;;  %v298_v56 = vpop.f32.mrb[4].mxu0  ;;  %v371_v57 = vpop.f32.mrb[4].mxu1 }
  0xfe   :  { %v299_v58 = vadd.f32 %v298_v56, %v1561_v32  ;;  %v372_v59 = vadd.f32 %v371_v57, %v1565_v33  ;;  %v300_v60 = vpop.f32.mrb[5].mxu0  ;;  %v373_v61 = vpop.f32.mrb[5].mxu1 }
  0xff   :  { %v301_v62 = vadd.f32 %v300_v60, %v1569_v34  ;;  %v374_v63 = vadd.f32 %v373_v61, %v1573_v35  ;;  %v302_v0 = vpop.f32.mrb[6].mxu0  ;;  %v375_v2 = vpop.f32.mrb[6].mxu1  ;;  %v1648_v60 = vrot.slane %v1063_v51, %v76_v28  ;;  %v1652_v61 = vrot.slane %v1063_v51, %v84_v29 }
 0x100   :  { %v303_v3 = vadd.f32 %v302_v0, %v1561_v32  ;;  %v376_v4 = vadd.f32 %v375_v2, %v1565_v33  ;;  %v304_v5 = vpop.f32.mrb[7].mxu0  ;;  %v377_v6 = vpop.f32.mrb[7].mxu1  ;;  %v1666_v28 = vrot.slane %v1063_v51, %v88_v31 }
 0x101   :  { %v1148_v7 = vpack.c.bf16 %v301_v62, %v299_v58  ;;  %v1149_v8 = vpack.c.bf16 %v374_v63, %v372_v59  ;;  %v305_v9 = vadd.f32 %v304_v5, %v1569_v34  ;;  %v378_v10 = vadd.f32 %v377_v6, %v1573_v35 }
 0x103   :  { %862 = vst [vmem:[%s1757_s3 + $0x20] sm:$0xff] %v1148_v7  ;;  %863 = vst [vmem:[%s1757_s3 + $0x28] sm:$0xff] %v1149_v8  ;;  %v1150_v11 = vpack.c.bf16 %v305_v9, %v303_v3  ;;  %v1151_v12 = vpack.c.bf16 %v378_v10, %v376_v4 }
 0x105   :  { %864 = vst [vmem:[%s1757_s3 + $0x30] sm:$0xff] %v1150_v11  ;;  %865 = vst [vmem:[%s1757_s3 + $0x38] sm:$0xff] %v1151_v12  ;;  %v308_v13 = vpop.f32.mrb[8].mxu0  ;;  %v381_v14 = vpop.f32.mrb[8].mxu1 }
 0x106   :  { %v309_v15 = vadd.f32 %v308_v13, %v1561_v32  ;;  %v382_v16 = vadd.f32 %v381_v14, %v1565_v33  ;;  %v310_v17 = vpop.f32.mrb[9].mxu0  ;;  %v383_v18 = vpop.f32.mrb[9].mxu1 }
 0x107   :  { %v311_v19 = vadd.f32 %v310_v17, %v1569_v34  ;;  %v384_v20 = vadd.f32 %v383_v18, %v1573_v35  ;;  %v312_v21 = vpop.f32.mrb[10].mxu0  ;;  %v385_v22 = vpop.f32.mrb[10].mxu1 }
 0x108   :  { %v313_v23 = vadd.f32 %v312_v21, %v1561_v32  ;;  %v386_v24 = vadd.f32 %v385_v22, %v1565_v33  ;;  %v314_v25 = vpop.f32.mrb[11].mxu0  ;;  %v387_v26 = vpop.f32.mrb[11].mxu1 }
 0x109   :  { %v1152_v1 = vpack.c.bf16 %v311_v19, %v309_v15  ;;  %v1153_v36 = vpack.c.bf16 %v384_v20, %v382_v16  ;;  %v315_v37 = vadd.f32 %v314_v25, %v1569_v34  ;;  %v388_v38 = vadd.f32 %v387_v26, %v1573_v35 }
 0x10b   :  { %866 = vst [vmem:[%s1757_s3 + $0x40] sm:$0xff] %v1152_v1  ;;  %867 = vst [vmem:[%s1757_s3 + $0x48] sm:$0xff] %v1153_v36  ;;  %v1154_v39 = vpack.c.bf16 %v315_v37, %v313_v23  ;;  %v1155_v40 = vpack.c.bf16 %v388_v38, %v386_v24 }
 0x10d   :  { %868 = vst [vmem:[%s1757_s3 + $0x50] sm:$0xff] %v1154_v39  ;;  %869 = vst [vmem:[%s1757_s3 + $0x58] sm:$0xff] %v1155_v40  ;;  %v318_v41 = vpop.f32.mrb[12].mxu0  ;;  %v391_v42 = vpop.f32.mrb[12].mxu1 }
 0x10e   :  { %v319_v43 = vadd.f32 %v318_v41, %v1561_v32  ;;  %v392_v44 = vadd.f32 %v391_v42, %v1565_v33  ;;  %v320_v45 = vpop.f32.mrb[13].mxu0  ;;  %v393_v46 = vpop.f32.mrb[13].mxu1 }
 0x10f   :  { %v321_v47 = vadd.f32 %v320_v45, %v1569_v34  ;;  %v394_v48 = vadd.f32 %v393_v46, %v1573_v35  ;;  %v322_v49 = vpop.f32.mrb[14].mxu0  ;;  %v395_v50 = vpop.f32.mrb[14].mxu1 }
 0x110   :  { %v323_v52 = vadd.f32 %v322_v49, %v1561_v32  ;;  %v396_v53 = vadd.f32 %v395_v50, %v1565_v33  ;;  %v324_v54 = vpop.f32.mrb[15].mxu0  ;;  %v397_v55 = vpop.f32.mrb[15].mxu1 }
 0x111   :  { %v1156_v56 = vpack.c.bf16 %v321_v47, %v319_v43  ;;  %v1157_v57 = vpack.c.bf16 %v394_v48, %v392_v44  ;;  %v325_v58 = vadd.f32 %v324_v54, %v1569_v34  ;;  %v398_v59 = vadd.f32 %v397_v55, %v1573_v35 }
 0x112   :  { %v1662_v34 = vrot.slane %v1063_v51, %v80_v30 }
 0x113   :  { %870 = vst [vmem:[%s1757_s3 + $0x60] sm:$0xff] %v1156_v56  ;;  %871 = vst [vmem:[%s1757_s3 + $0x68] sm:$0xff] %v1157_v57  ;;  %v1158_v32 = vpack.c.bf16 %v325_v58, %v323_v52  ;;  %v1159_v33 = vpack.c.bf16 %v398_v59, %v396_v53 }
 0x115   :  { %872 = vst [vmem:[%s1757_s3 + $0x70] sm:$0xff] %v1158_v32  ;;  %873 = vst [vmem:[%s1757_s3 + $0x78] sm:$0xff] %v1159_v33  ;;  %v650_v29 = vpop.f32.mrb[16].mxu0  ;;  %v723_v35 = vpop.f32.mrb[16].mxu1 }
 0x116   :  { %v651_v62 = vadd.f32 %v650_v29, %v1648_v60  ;;  %v724_v63 = vadd.f32 %v723_v35, %v1652_v61  ;;  %v652_v30 = vpop.f32.mrb[17].mxu0  ;;  %v725_v0 = vpop.f32.mrb[17].mxu1 }
 0x117   :  { %v653_v27 = vadd.f32 %v652_v30, %v1662_v34  ;;  %v726_v31 = vadd.f32 %v725_v0, %v1666_v28  ;;  %v654_v2 = vpop.f32.mrb[18].mxu0  ;;  %v727_v3 = vpop.f32.mrb[18].mxu1 }
 0x118   :  { %v655_v4 = vadd.f32 %v654_v2, %v1648_v60  ;;  %v728_v5 = vadd.f32 %v727_v3, %v1652_v61  ;;  %v656_v6 = vpop.f32.mrb[19].mxu0  ;;  %v729_v7 = vpop.f32.mrb[19].mxu1 }
 0x119   :  { %v1160_v8 = vpack.c.bf16 %v653_v27, %v651_v62  ;;  %v1161_v9 = vpack.c.bf16 %v726_v31, %v724_v63  ;;  %v657_v10 = vadd.f32 %v656_v6, %v1662_v34  ;;  %v730_v11 = vadd.f32 %v729_v7, %v1666_v28 }
 0x11b   :  { %1128 = vst [vmem:[%s1757_s3 + $0x80] sm:$0xff] %v1160_v8  ;;  %1129 = vst [vmem:[%s1757_s3 + $0x88] sm:$0xff] %v1161_v9  ;;  %v1162_v12 = vpack.c.bf16 %v657_v10, %v655_v4  ;;  %v1163_v13 = vpack.c.bf16 %v730_v11, %v728_v5 }
 0x11d   :  { %1130 = vst [vmem:[%s1757_s3 + $0x90] sm:$0xff] %v1162_v12  ;;  %1131 = vst [vmem:[%s1757_s3 + $0x98] sm:$0xff] %v1163_v13  ;;  %v660_v14 = vpop.f32.mrb[20].mxu0  ;;  %v733_v15 = vpop.f32.mrb[20].mxu1 }
 0x11e   :  { %v661_v16 = vadd.f32 %v660_v14, %v1648_v60  ;;  %v734_v17 = vadd.f32 %v733_v15, %v1652_v61  ;;  %v662_v18 = vpop.f32.mrb[21].mxu0  ;;  %v735_v19 = vpop.f32.mrb[21].mxu1 }
 0x11f   :  { %v663_v20 = vadd.f32 %v662_v18, %v1662_v34  ;;  %v736_v21 = vadd.f32 %v735_v19, %v1666_v28  ;;  %v664_v22 = vpop.f32.mrb[22].mxu0  ;;  %v737_v23 = vpop.f32.mrb[22].mxu1 }
 0x120   :  { %v665_v24 = vadd.f32 %v664_v22, %v1648_v60  ;;  %v738_v25 = vadd.f32 %v737_v23, %v1652_v61  ;;  %v666_v26 = vpop.f32.mrb[23].mxu0  ;;  %v739_v1 = vpop.f32.mrb[23].mxu1 }
 0x121   :  { %v1164_v36 = vpack.c.bf16 %v663_v20, %v661_v16  ;;  %v1165_v37 = vpack.c.bf16 %v736_v21, %v734_v17  ;;  %v667_v38 = vadd.f32 %v666_v26, %v1662_v34  ;;  %v740_v39 = vadd.f32 %v739_v1, %v1666_v28 }
 0x123   :  { %1132 = vst [vmem:[%s1757_s3 + $0xa0] sm:$0xff] %v1164_v36  ;;  %1133 = vst [vmem:[%s1757_s3 + $0xa8] sm:$0xff] %v1165_v37  ;;  %v1166_v40 = vpack.c.bf16 %v667_v38, %v665_v24  ;;  %v1167_v41 = vpack.c.bf16 %v740_v39, %v738_v25 }
 0x125   :  { %1134 = vst [vmem:[%s1757_s3 + $0xb0] sm:$0xff] %v1166_v40  ;;  %1135 = vst [vmem:[%s1757_s3 + $0xb8] sm:$0xff] %v1167_v41  ;;  %v670_v42 = vpop.f32.mrb[24].mxu0  ;;  %v743_v43 = vpop.f32.mrb[24].mxu1 }
 0x126   :  { %v671_v44 = vadd.f32 %v670_v42, %v1648_v60  ;;  %v744_v45 = vadd.f32 %v743_v43, %v1652_v61  ;;  %v672_v46 = vpop.f32.mrb[25].mxu0  ;;  %v745_v47 = vpop.f32.mrb[25].mxu1 }
 0x127   :  { %v673_v48 = vadd.f32 %v672_v46, %v1662_v34  ;;  %v746_v49 = vadd.f32 %v745_v47, %v1666_v28  ;;  %v674_v50 = vpop.f32.mrb[26].mxu0  ;;  %v747_v51 = vpop.f32.mrb[26].mxu1 }
 0x128   :  { %v675_v52 = vadd.f32 %v674_v50, %v1648_v60  ;;  %v748_v53 = vadd.f32 %v747_v51, %v1652_v61  ;;  %v676_v54 = vpop.f32.mrb[27].mxu0  ;;  %v749_v55 = vpop.f32.mrb[27].mxu1 }
 0x129   :  { %v1168_v56 = vpack.c.bf16 %v673_v48, %v671_v44  ;;  %v1169_v57 = vpack.c.bf16 %v746_v49, %v744_v45  ;;  %v677_v58 = vadd.f32 %v676_v54, %v1662_v34  ;;  %v750_v59 = vadd.f32 %v749_v55, %v1666_v28 }
 0x12b   :  { %1136 = vst [vmem:[%s1757_s3 + $0xc0] sm:$0xff] %v1168_v56  ;;  %1137 = vst [vmem:[%s1757_s3 + $0xc8] sm:$0xff] %v1169_v57  ;;  %v1170_v32 = vpack.c.bf16 %v677_v58, %v675_v52  ;;  %v1171_v33 = vpack.c.bf16 %v750_v59, %v748_v53 }
 0x12d   :  { %1138 = vst [vmem:[%s1757_s3 + $0xd0] sm:$0xff] %v1170_v32  ;;  %1139 = vst [vmem:[%s1757_s3 + $0xd8] sm:$0xff] %v1171_v33  ;;  %v680_v29 = vpop.f32.mrb[28].mxu0  ;;  %v753_v35 = vpop.f32.mrb[28].mxu1 }
 0x12e   :  { %v681_v62 = vadd.f32 %v680_v29, %v1648_v60  ;;  %v754_v63 = vadd.f32 %v753_v35, %v1652_v61  ;;  %v682_v30 = vpop.f32.mrb[29].mxu0  ;;  %v755_v0 = vpop.f32.mrb[29].mxu1 }
 0x12f   :  { %v683_v27 = vadd.f32 %v682_v30, %v1662_v34  ;;  %v756_v31 = vadd.f32 %v755_v0, %v1666_v28  ;;  %v684_v2 = vpop.f32.mrb[30].mxu0  ;;  %v757_v3 = vpop.f32.mrb[30].mxu1 }
 0x130   :  { %v685_v4 = vadd.f32 %v684_v2, %v1648_v60  ;;  %v758_v5 = vadd.f32 %v757_v3, %v1652_v61  ;;  %v686_v6 = vpop.f32.mrb[31].mxu0  ;;  %v759_v7 = vpop.f32.mrb[31].mxu1 }
 0x131   :  { %v1172_v8 = vpack.c.bf16 %v683_v27, %v681_v62  ;;  %v1173_v9 = vpack.c.bf16 %v756_v31, %v754_v63  ;;  %v687_v10 = vadd.f32 %v686_v6, %v1662_v34  ;;  %v760_v11 = vadd.f32 %v759_v7, %v1666_v28 }
 0x133   :  { %1140 = vst [vmem:[%s1757_s3 + $0xe0] sm:$0xff] %v1172_v8  ;;  %1141 = vst [vmem:[%s1757_s3 + $0xe8] sm:$0xff] %v1173_v9  ;;  %v1174_v12 = vpack.c.bf16 %v687_v10, %v685_v4  ;;  %v1175_v60 = vpack.c.bf16 %v760_v11, %v758_v5 }
 0x135   :  { %1142 = vst [vmem:[%s1757_s3 + $0xf0] sm:$0xff] %v1174_v12  ;;  %1143 = vst [vmem:[%s1757_s3 + $0xf8] sm:$0xff] %v1175_v60 }

// kernel: a_call__.5
= control target key start
LH: loop header
LB: loop body
LE: loop exit
PB: predicated region body
PF: predicated region fallthrough
CT: control target
= control target key end

     0   :  { %v1252_v1 = vmov 0   ;;  %s1721_s1 = inlined_call_operand.vmem [shape: bf16[2,128,512], index: 1, kind: input, shape index: {}]   ;;  %s1722_s0 = inlined_call_operand.vmem [shape: f32[64,128], index: 0, kind: input, shape index: {}]   ;;  %s1723_s2 = inlined_call_operand.vmem [shape: f32[2,1,512], index: 2, kind: input, shape index: {}]   ;;  %s1724_s3 = inlined_call_operand.vmem [shape: bf16[2,64,512], index: 3, kind: output, shape index: {}]  }
   0x1   :  { %v1156_v0 = vld [vmem:[%s1721_s1 + $0x4] ss:$16 sps:$4 sm:$0xff]   ;;  %273 = vmatprep.mubr.bf16.mxu0 %v1252_v1  ;;  %346 = vmatprep.mubr.bf16.mxu1 %v1252_v1  ;;  %v1158_v2 = vld [vmem:[%s1721_s1 + $0xc] ss:$16 sps:$4 sm:$0xff]   ;;  %v1160_v3 = vld [vmem:[%s1721_s1] ss:$16 sps:$4 sm:$0xff]  }
   0x2   :  { %241 = vmatprep.subr.bf16.mxu0 %v1156_v0  ;;  %v1161_v4 = vld [vmem:[%s1721_s1 + $0x8] ss:$16 sps:$4 sm:$0xff]   ;;  %314 = vmatprep.subr.bf16.mxu1 %v1158_v2  ;;  %v1162_v5 = vld [vmem:[%s1721_s1 + $0x24] ss:$16 sps:$4 sm:$0xff]   ;;  %v1164_v6 = vld [vmem:[%s1721_s1 + $0x2c] ss:$16 sps:$4 sm:$0xff]  }
   0x3   :  { %242 = vmatpush1.bf16.msra.mxu0 %v1160_v3  ;;  %315 = vmatpush1.bf16.msra.mxu1 %v1161_v4  ;;  %v1166_v7 = vld [vmem:[%s1721_s1 + $0x20] ss:$16 sps:$4 sm:$0xff]   ;;  %v1167_v8 = vld [vmem:[%s1721_s1 + $0x28] ss:$16 sps:$4 sm:$0xff]   ;;  %v1168_v9 = vld [vmem:[%s1721_s1 + $0x44] ss:$16 sps:$4 sm:$0xff]  }
   0x4   :  { %243 = vmatprep.subr.bf16.mxu0 %v1162_v5  ;;  %316 = vmatprep.subr.bf16.mxu1 %v1164_v6  ;;  %v1170_v10 = vld [vmem:[%s1721_s1 + $0x4c] ss:$16 sps:$4 sm:$0xff]   ;;  %v1172_v11 = vld [vmem:[%s1721_s1 + $0x40] ss:$16 sps:$4 sm:$0xff]   ;;  %v1173_v12 = vld [vmem:[%s1721_s1 + $0x48] ss:$16 sps:$4 sm:$0xff]  }
   0x5   :  { %v1174_v13 = vld [vmem:[%s1721_s1 + $0x64] ss:$16 sps:$4 sm:$0xff]   ;;  %v1176_v14 = vld [vmem:[%s1721_s1 + $0x6c] ss:$16 sps:$4 sm:$0xff]   ;;  %v1178_v15 = vld [vmem:[%s1721_s1 + $0x60] ss:$16 sps:$4 sm:$0xff]  }
   0x6   :  { %v1179_v16 = vld [vmem:[%s1721_s1 + $0x68] ss:$16 sps:$4 sm:$0xff]   ;;  %v1180_v17 = vld [vmem:[%s1721_s1 + $0x84] ss:$16 sps:$4 sm:$0xff]   ;;  %v1182_v18 = vld [vmem:[%s1721_s1 + $0x8c] ss:$16 sps:$4 sm:$0xff]  }
   0x7   :  { %244 = vmatpush1.bf16.msra.mxu0 %v1166_v7  ;;  %317 = vmatpush1.bf16.msra.mxu1 %v1167_v8  ;;  %v1184_v19 = vld [vmem:[%s1721_s1 + $0x80] ss:$16 sps:$4 sm:$0xff]   ;;  %v1185_v20 = vld [vmem:[%s1721_s1 + $0x88] ss:$16 sps:$4 sm:$0xff]   ;;  %v1186_v21 = vld [vmem:[%s1721_s1 + $0xa4] ss:$16 sps:$4 sm:$0xff]  }
   0x8   :  { %245 = vmatprep.subr.bf16.mxu0 %v1168_v9  ;;  %318 = vmatprep.subr.bf16.mxu1 %v1170_v10  ;;  %v1188_v22 = vld [vmem:[%s1721_s1 + $0xac] ss:$16 sps:$4 sm:$0xff]   ;;  %v1190_v23 = vld [vmem:[%s1721_s1 + $0xa0] ss:$16 sps:$4 sm:$0xff]   ;;  %v1191_v24 = vld [vmem:[%s1721_s1 + $0xa8] ss:$16 sps:$4 sm:$0xff]  }
   0x9   :  { %v1192_v25 = vld [vmem:[%s1721_s1 + $0xc4] ss:$16 sps:$4 sm:$0xff]   ;;  %v1194_v26 = vld [vmem:[%s1721_s1 + $0xcc] ss:$16 sps:$4 sm:$0xff]   ;;  %v1196_v27 = vld [vmem:[%s1721_s1 + $0xc0] ss:$16 sps:$4 sm:$0xff]  }
   0xa   :  { %v1197_v28 = vld [vmem:[%s1721_s1 + $0xc8] ss:$16 sps:$4 sm:$0xff]   ;;  %v1198_v29 = vld [vmem:[%s1721_s1 + $0xe4] ss:$16 sps:$4 sm:$0xff]   ;;  %v1200_v30 = vld [vmem:[%s1721_s1 + $0xec] ss:$16 sps:$4 sm:$0xff]  }
   0xb   :  { %246 = vmatpush1.bf16.msra.mxu0 %v1172_v11  ;;  %319 = vmatpush1.bf16.msra.mxu1 %v1173_v12  ;;  %v1202_v31 = vld [vmem:[%s1721_s1 + $0xe0] ss:$16 sps:$4 sm:$0xff]   ;;  %v1203_v32 = vld [vmem:[%s1721_s1 + $0xe8] ss:$16 sps:$4 sm:$0xff]   ;;  %v1206_v35 = vld [vmem:[%s1721_s1 + $0x104] ss:$16 sps:$4 sm:$0xff]  }
   0xc   :  { %247 = vmatprep.subr.bf16.mxu0 %v1174_v13  ;;  %320 = vmatprep.subr.bf16.mxu1 %v1176_v14  ;;  %v15_v33 = vld [vmem:[%s1722_s0] sm:$0xff]  ;;  %v16_v34 = vld [vmem:[%s1722_s0 + $0x8] sm:$0xff]  ;;  %v17_v44 = vld [vmem:[%s1722_s0 + $0x10] sm:$0xff]  ;;  %v61_v14 = vlaneseq }
   0xd   :  { %v1209_v36 = vld [vmem:[%s1721_s1 + $0x10c] ss:$16 sps:$4 sm:$0xff]   ;;  %v1383_v37 = vpack.c.bf16 %v16_v34, %v15_v33  ;;  %v1204_v38 = vld [vmem:[%s1721_s1 + $0x100] ss:$16 sps:$4 sm:$0xff]   ;;  %v1207_v39 = vld [vmem:[%s1721_s1 + $0x108] ss:$16 sps:$4 sm:$0xff]  }
   0xe   :  { %v1212_v40 = vld [vmem:[%s1721_s1 + $0x124] ss:$16 sps:$4 sm:$0xff]   ;;  %v1215_v41 = vld [vmem:[%s1721_s1 + $0x12c] ss:$16 sps:$4 sm:$0xff]   ;;  %v1210_v42 = vld [vmem:[%s1721_s1 + $0x120] ss:$16 sps:$4 sm:$0xff]  }
   0xf   :  { %248 = vmatpush1.bf16.msra.mxu0 %v1178_v15  ;;  %321 = vmatpush1.bf16.msra.mxu1 %v1179_v16  ;;  %v1213_v43 = vld [vmem:[%s1721_s1 + $0x128] ss:$16 sps:$4 sm:$0xff]   ;;  %v1218_v46 = vld [vmem:[%s1721_s1 + $0x144] ss:$16 sps:$4 sm:$0xff]   ;;  %v1221_v47 = vld [vmem:[%s1721_s1 + $0x14c] ss:$16 sps:$4 sm:$0xff]  }
  0x10   :  { %249 = vmatprep.subr.bf16.mxu0 %v1180_v17  ;;  %322 = vmatprep.subr.bf16.mxu1 %v1182_v18  ;;  %v18_v45 = vld [vmem:[%s1722_s0 + $0x18] sm:$0xff]  ;;  %v1216_v49 = vld [vmem:[%s1721_s1 + $0x140] ss:$16 sps:$4 sm:$0xff]   ;;  %v1224_v51 = vld [vmem:[%s1721_s1 + $0x164] ss:$16 sps:$4 sm:$0xff]   ;;  %v1517_v15 = vshrl.u32 %v61_v14, 7 }
  0x11   :  { %v1419_v48 = vpack.c.bf16 %v18_v45, %v17_v44  ;;  %v1219_v50 = vld [vmem:[%s1721_s1 + $0x148] ss:$16 sps:$4 sm:$0xff]   ;;  %v1227_v52 = vld [vmem:[%s1721_s1 + $0x16c] ss:$16 sps:$4 sm:$0xff]   ;;  %v1222_v53 = vld [vmem:[%s1721_s1 + $0x160] ss:$16 sps:$4 sm:$0xff]  }
  0x12   :  { %v1225_v54 = vld [vmem:[%s1721_s1 + $0x168] ss:$16 sps:$4 sm:$0xff]   ;;  %v19_v55 = vld [vmem:[%s1722_s0 + $0x20] sm:$0xff]  ;;  %v1233_v58 = vld [vmem:[%s1721_s1 + $0x18c] ss:$16 sps:$4 sm:$0xff]   ;;  %v63_v16 = vsub.s32 0, %v1517_v15 }
  0x13   :  { %250 = vmatpush1.bf16.msra.mxu0 %v1184_v19  ;;  %323 = vmatpush1.bf16.msra.mxu1 %v1185_v20  ;;  %v20_v56 = vld [vmem:[%s1722_s0 + $0x28] sm:$0xff]  ;;  %v1230_v57 = vld [vmem:[%s1721_s1 + $0x184] ss:$16 sps:$4 sm:$0xff]   ;;  %v1228_v60 = vld [vmem:[%s1721_s1 + $0x180] ss:$16 sps:$4 sm:$0xff]   ;;  %v71_v17 = vsub.s32 2, %v1517_v15 }
  0x14   :  { %251 = vmatprep.subr.bf16.mxu0 %v1186_v21  ;;  %324 = vmatprep.subr.bf16.mxu1 %v1188_v22  ;;  %v25_v59 = vpack.c.bf16 %v20_v56, %v19_v55  ;;  %v1231_v61 = vld [vmem:[%s1721_s1 + $0x188] ss:$16 sps:$4 sm:$0xff]   ;;  %v1236_v62 = vld [vmem:[%s1721_s1 + $0x1a4] ss:$16 sps:$4 sm:$0xff]   ;;  %v1239_v63 = vld [vmem:[%s1721_s1 + $0x1ac] ss:$16 sps:$4 sm:$0xff]  }
  0x15   :  { %v1234_v0 = vld [vmem:[%s1721_s1 + $0x1a0] ss:$16 sps:$4 sm:$0xff]   ;;  %v1237_v2 = vld [vmem:[%s1721_s1 + $0x1a8] ss:$16 sps:$4 sm:$0xff]   ;;  %v1242_v5 = vld [vmem:[%s1721_s1 + $0x1c4] ss:$16 sps:$4 sm:$0xff]  }
  0x16   :  { %v21_v3 = vld [vmem:[%s1722_s0 + $0x30] sm:$0xff]  ;;  %v22_v4 = vld [vmem:[%s1722_s0 + $0x38] sm:$0xff]  ;;  %v59_v18 = vld [vmem:[%s1723_s2] sm:$0xf]  ;;  %v67_v19 = vsub.s32 1, %v1517_v15  ;;  %v75_v20 = vsub.s32 3, %v1517_v15 }
  0x17   :  { %252 = vmatpush1.bf16.msra.mxu0 %v1190_v23  ;;  %325 = vmatpush1.bf16.msra.mxu1 %v1191_v24  ;;  %v1245_v6 = vld [vmem:[%s1721_s1 + $0x1cc] ss:$16 sps:$4 sm:$0xff]   ;;  %v26_v7 = vpack.c.bf16 %v22_v4, %v21_v3  ;;  %v1240_v8 = vld [vmem:[%s1721_s1 + $0x1c0] ss:$16 sps:$4 sm:$0xff]   ;;  %v1243_v9 = vld [vmem:[%s1721_s1 + $0x1c8] ss:$16 sps:$4 sm:$0xff]   ;;  %v1532_v21 = vrot.slane %v59_v18, %v71_v17 }
  0x18   :  { %253 = vmatprep.subr.bf16.mxu0 %v1192_v25  ;;  %326 = vmatprep.subr.bf16.mxu1 %v1194_v26  ;;  %v1248_v10 = vld [vmem:[%s1721_s1 + $0x1e4] ss:$16 sps:$4 sm:$0xff]   ;;  %v1251_v11 = vld [vmem:[%s1721_s1 + $0x1ec] ss:$16 sps:$4 sm:$0xff]   ;;  %v1246_v12 = vld [vmem:[%s1721_s1 + $0x1e0] ss:$16 sps:$4 sm:$0xff]   ;;  %v1536_v22 = vrot.slane %v59_v18, %v67_v19  ;;  %v1540_v23 = vrot.slane %v59_v18, %v75_v20 }
  0x19   :  { %v1249_v13 = vld [vmem:[%s1721_s1 + $0x1e8] ss:$16 sps:$4 sm:$0xff]  }
  0x1b   :  { %254 = vmatpush1.bf16.msra.mxu0 %v1196_v27  ;;  %327 = vmatpush1.bf16.msra.mxu1 %v1197_v28 }
  0x1c   :  { %255 = vmatprep.subr.bf16.mxu0 %v1198_v29  ;;  %328 = vmatprep.subr.bf16.mxu1 %v1200_v30 }
  0x1f   :  { %256 = vmatpush1.bf16.msra.mxu0 %v1202_v31  ;;  %329 = vmatpush1.bf16.msra.mxu1 %v1203_v32 }
  0x20   :  { %603 = vmatprep.subr.bf16.mxu0 %v1206_v35  ;;  %676 = vmatprep.subr.bf16.mxu1 %v1209_v36 }
  0x22   :  { %274 = vmatmul.mubr.bf16.vlgmr.msra.gmra.mrb[0].mxu0 %v1383_v37  ;;  %347 = vmatmul.mubr.bf16.vlgmr.msra.gmra.mrb[0].mxu1 %v1383_v37 }
  0x23   :  { %604 = vmatpush1.bf16.msra.mxu0 %v1204_v38  ;;  %677 = vmatpush1.bf16.msra.mxu1 %v1207_v39 }
  0x24   :  { %605 = vmatprep.subr.bf16.mxu0 %v1212_v40  ;;  %678 = vmatprep.subr.bf16.mxu1 %v1215_v41 }
  0x25   :  { %283 = vmatprep.mubr.bf16.mxu0 %v1252_v1  ;;  %356 = vmatprep.mubr.bf16.mxu1 %v1252_v1 }
  0x27   :  { %606 = vmatpush1.bf16.msra.mxu0 %v1210_v42  ;;  %679 = vmatpush1.bf16.msra.mxu1 %v1213_v43 }
  0x28   :  { %607 = vmatprep.subr.bf16.mxu0 %v1218_v46  ;;  %680 = vmatprep.subr.bf16.mxu1 %v1221_v47 }
  0x2a   :  { %284 = vmatmul.mubr.bf16.gmra.mrb[4].mxu0 %v1419_v48  ;;  %357 = vmatmul.mubr.bf16.gmra.mrb[4].mxu1 %v1419_v48 }
  0x2b   :  { %608 = vmatpush1.bf16.msra.mxu0 %v1216_v49  ;;  %681 = vmatpush1.bf16.msra.mxu1 %v1219_v50 }
  0x2c   :  { %609 = vmatprep.subr.bf16.mxu0 %v1224_v51  ;;  %682 = vmatprep.subr.bf16.mxu1 %v1227_v52 }
  0x2d   :  { %293 = vmatprep.mubr.bf16.mxu0 %v1252_v1  ;;  %366 = vmatprep.mubr.bf16.mxu1 %v1252_v1 }
  0x2f   :  { %610 = vmatpush1.bf16.msra.mxu0 %v1222_v53  ;;  %683 = vmatpush1.bf16.msra.mxu1 %v1225_v54 }
  0x30   :  { %611 = vmatprep.subr.bf16.mxu0 %v1230_v57  ;;  %684 = vmatprep.subr.bf16.mxu1 %v1233_v58 }
  0x32   :  { %294 = vmatmul.mubr.bf16.gmra.mrb[8].mxu0 %v25_v59  ;;  %367 = vmatmul.mubr.bf16.gmra.mrb[8].mxu1 %v25_v59 }
  0x33   :  { %612 = vmatpush1.bf16.msra.mxu0 %v1228_v60  ;;  %685 = vmatpush1.bf16.msra.mxu1 %v1231_v61 }
  0x34   :  { %613 = vmatprep.subr.bf16.mxu0 %v1236_v62  ;;  %686 = vmatprep.subr.bf16.mxu1 %v1239_v63 }
  0x35   :  { %303 = vmatprep.mubr.bf16.mxu0 %v1252_v1  ;;  %376 = vmatprep.mubr.bf16.mxu1 %v1252_v1 }
  0x37   :  { %614 = vmatpush1.bf16.msra.mxu0 %v1234_v0  ;;  %687 = vmatpush1.bf16.msra.mxu1 %v1237_v2 }
  0x38   :  { %615 = vmatprep.subr.bf16.mxu0 %v1242_v5  ;;  %688 = vmatprep.subr.bf16.mxu1 %v1245_v6 }
  0x3a   :  { %304 = vmatmul.mubr.bf16.gmra.mrb[12].mxu0 %v26_v7  ;;  %377 = vmatmul.mubr.bf16.gmra.mrb[12].mxu1 %v26_v7 }
  0x3b   :  { %616 = vmatpush1.bf16.msra.mxu0 %v1240_v8  ;;  %689 = vmatpush1.bf16.msra.mxu1 %v1243_v9 }
  0x3c   :  { %617 = vmatprep.subr.bf16.mxu0 %v1248_v10  ;;  %690 = vmatprep.subr.bf16.mxu1 %v1251_v11 }
  0x3d   :  { %635 = vmatprep.mubr.bf16.mxu0 %v1252_v1  ;;  %708 = vmatprep.mubr.bf16.mxu1 %v1252_v1 }
  0x3f   :  { %618 = vmatpush1.bf16.msra.mxu0 %v1246_v12  ;;  %691 = vmatpush1.bf16.msra.mxu1 %v1249_v13 }
  0x42   :  { %636 = vmatmul.mubr.bf16.vlgmr.msra.gmra.mrb[16].mxu0 %v1383_v37  ;;  %709 = vmatmul.mubr.bf16.vlgmr.msra.gmra.mrb[16].mxu1 %v1383_v37 }
  0x43   :  { %645 = vmatprep.mubr.bf16.mxu0 %v1252_v1  ;;  %718 = vmatprep.mubr.bf16.mxu1 %v1252_v1 }
  0x4a   :  { %646 = vmatmul.mubr.bf16.gmra.mrb[20].mxu0 %v1419_v48  ;;  %719 = vmatmul.mubr.bf16.gmra.mrb[20].mxu1 %v1419_v48 }
  0x4b   :  { %655 = vmatprep.mubr.bf16.mxu0 %v1252_v1  ;;  %728 = vmatprep.mubr.bf16.mxu1 %v1252_v1 }
  0x52   :  { %656 = vmatmul.mubr.bf16.gmra.mrb[24].mxu0 %v25_v59  ;;  %729 = vmatmul.mubr.bf16.gmra.mrb[24].mxu1 %v25_v59 }
  0x53   :  { %665 = vmatprep.mubr.bf16.mxu0 %v1252_v1  ;;  %738 = vmatprep.mubr.bf16.mxu1 %v1252_v1  ;;  %v1528_v1 = vrot.slane %v59_v18, %v63_v16 }
  0x5a   :  { %666 = vmatmul.mubr.bf16.gmra.mrb[28].mxu0 %v26_v7  ;;  %739 = vmatmul.mubr.bf16.gmra.mrb[28].mxu1 %v26_v7 }
  0xf5   :  { %v275_v24 = vpop.f32.mrb[0].mxu0  ;;  %v348_v25 = vpop.f32.mrb[0].mxu1 }
  0xf6   :  { %v276_v26 = vadd.f32 %v275_v24, %v1528_v1  ;;  %v349_v27 = vadd.f32 %v348_v25, %v1532_v21  ;;  %v277_v28 = vpop.f32.mrb[1].mxu0  ;;  %v350_v29 = vpop.f32.mrb[1].mxu1 }
  0xf7   :  { %v278_v30 = vadd.f32 %v277_v28, %v1536_v22  ;;  %v351_v31 = vadd.f32 %v350_v29, %v1540_v23  ;;  %v279_v32 = vpop.f32.mrb[2].mxu0  ;;  %v352_v33 = vpop.f32.mrb[2].mxu1 }
  0xf8   :  { %v280_v34 = vadd.f32 %v279_v32, %v1528_v1  ;;  %v353_v35 = vadd.f32 %v352_v33, %v1532_v21  ;;  %v281_v36 = vpop.f32.mrb[3].mxu0  ;;  %v354_v37 = vpop.f32.mrb[3].mxu1 }
  0xf9   :  { %v1123_v38 = vpack.c.bf16 %v278_v30, %v276_v26  ;;  %v1124_v39 = vpack.c.bf16 %v351_v31, %v349_v27  ;;  %v282_v40 = vadd.f32 %v281_v36, %v1536_v22  ;;  %v355_v41 = vadd.f32 %v354_v37, %v1540_v23 }
  0xfb   :  { %845 = vst [vmem:[%s1724_s3] sm:$0xff] %v1123_v38  ;;  %846 = vst [vmem:[%s1724_s3 + $0x8] sm:$0xff] %v1124_v39  ;;  %v1125_v42 = vpack.c.bf16 %v282_v40, %v280_v34  ;;  %v1126_v43 = vpack.c.bf16 %v355_v41, %v353_v35  ;;  %v1042_v39 = vld [vmem:[%s1723_s2 + $0x4] sm:$0xf] }
  0xfd   :  { %847 = vst [vmem:[%s1724_s3 + $0x10] sm:$0xff] %v1125_v42  ;;  %848 = vst [vmem:[%s1724_s3 + $0x18] sm:$0xff] %v1126_v43  ;;  %v285_v44 = vpop.f32.mrb[4].mxu0  ;;  %v358_v45 = vpop.f32.mrb[4].mxu1 }
  0xfe   :  { %v286_v46 = vadd.f32 %v285_v44, %v1528_v1  ;;  %v359_v47 = vadd.f32 %v358_v45, %v1532_v21  ;;  %v287_v48 = vpop.f32.mrb[5].mxu0  ;;  %v360_v49 = vpop.f32.mrb[5].mxu1 }
  0xff   :  { %v288_v50 = vadd.f32 %v287_v48, %v1536_v22  ;;  %v361_v51 = vadd.f32 %v360_v49, %v1540_v23  ;;  %v289_v52 = vpop.f32.mrb[6].mxu0  ;;  %v362_v53 = vpop.f32.mrb[6].mxu1  ;;  %v1615_v48 = vrot.slane %v1042_v39, %v63_v16  ;;  %v1619_v49 = vrot.slane %v1042_v39, %v71_v17 }
 0x100   :  { %v290_v54 = vadd.f32 %v289_v52, %v1528_v1  ;;  %v363_v55 = vadd.f32 %v362_v53, %v1532_v21  ;;  %v291_v56 = vpop.f32.mrb[7].mxu0  ;;  %v364_v57 = vpop.f32.mrb[7].mxu1  ;;  %v1633_v16 = vrot.slane %v1042_v39, %v75_v20 }
 0x101   :  { %v1127_v58 = vpack.c.bf16 %v288_v50, %v286_v46  ;;  %v1128_v59 = vpack.c.bf16 %v361_v51, %v359_v47  ;;  %v292_v60 = vadd.f32 %v291_v56, %v1536_v22  ;;  %v365_v61 = vadd.f32 %v364_v57, %v1540_v23 }
 0x103   :  { %849 = vst [vmem:[%s1724_s3 + $0x20] sm:$0xff] %v1127_v58  ;;  %850 = vst [vmem:[%s1724_s3 + $0x28] sm:$0xff] %v1128_v59  ;;  %v1129_v62 = vpack.c.bf16 %v292_v60, %v290_v54  ;;  %v1130_v63 = vpack.c.bf16 %v365_v61, %v363_v55 }
 0x105   :  { %851 = vst [vmem:[%s1724_s3 + $0x30] sm:$0xff] %v1129_v62  ;;  %852 = vst [vmem:[%s1724_s3 + $0x38] sm:$0xff] %v1130_v63  ;;  %v295_v0 = vpop.f32.mrb[8].mxu0  ;;  %v368_v2 = vpop.f32.mrb[8].mxu1 }
 0x106   :  { %v296_v3 = vadd.f32 %v295_v0, %v1528_v1  ;;  %v369_v4 = vadd.f32 %v368_v2, %v1532_v21  ;;  %v297_v5 = vpop.f32.mrb[9].mxu0  ;;  %v370_v6 = vpop.f32.mrb[9].mxu1 }
 0x107   :  { %v298_v7 = vadd.f32 %v297_v5, %v1536_v22  ;;  %v371_v8 = vadd.f32 %v370_v6, %v1540_v23  ;;  %v299_v9 = vpop.f32.mrb[10].mxu0  ;;  %v372_v10 = vpop.f32.mrb[10].mxu1 }
 0x108   :  { %v300_v11 = vadd.f32 %v299_v9, %v1528_v1  ;;  %v373_v12 = vadd.f32 %v372_v10, %v1532_v21  ;;  %v301_v13 = vpop.f32.mrb[11].mxu0  ;;  %v374_v14 = vpop.f32.mrb[11].mxu1 }
 0x109   :  { %v1131_v18 = vpack.c.bf16 %v298_v7, %v296_v3  ;;  %v1132_v24 = vpack.c.bf16 %v371_v8, %v369_v4  ;;  %v302_v25 = vadd.f32 %v301_v13, %v1536_v22  ;;  %v375_v26 = vadd.f32 %v374_v14, %v1540_v23 }
 0x10b   :  { %853 = vst [vmem:[%s1724_s3 + $0x40] sm:$0xff] %v1131_v18  ;;  %854 = vst [vmem:[%s1724_s3 + $0x48] sm:$0xff] %v1132_v24  ;;  %v1133_v27 = vpack.c.bf16 %v302_v25, %v300_v11  ;;  %v1134_v28 = vpack.c.bf16 %v375_v26, %v373_v12 }
 0x10d   :  { %855 = vst [vmem:[%s1724_s3 + $0x50] sm:$0xff] %v1133_v27  ;;  %856 = vst [vmem:[%s1724_s3 + $0x58] sm:$0xff] %v1134_v28  ;;  %v305_v29 = vpop.f32.mrb[12].mxu0  ;;  %v378_v30 = vpop.f32.mrb[12].mxu1 }
 0x10e   :  { %v306_v31 = vadd.f32 %v305_v29, %v1528_v1  ;;  %v379_v32 = vadd.f32 %v378_v30, %v1532_v21  ;;  %v307_v33 = vpop.f32.mrb[13].mxu0  ;;  %v380_v34 = vpop.f32.mrb[13].mxu1 }
 0x10f   :  { %v308_v35 = vadd.f32 %v307_v33, %v1536_v22  ;;  %v381_v36 = vadd.f32 %v380_v34, %v1540_v23  ;;  %v309_v37 = vpop.f32.mrb[14].mxu0  ;;  %v382_v38 = vpop.f32.mrb[14].mxu1 }
 0x110   :  { %v310_v40 = vadd.f32 %v309_v37, %v1528_v1  ;;  %v383_v41 = vadd.f32 %v382_v38, %v1532_v21  ;;  %v311_v42 = vpop.f32.mrb[15].mxu0  ;;  %v384_v43 = vpop.f32.mrb[15].mxu1 }
 0x111   :  { %v1135_v44 = vpack.c.bf16 %v308_v35, %v306_v31  ;;  %v1136_v45 = vpack.c.bf16 %v381_v36, %v379_v32  ;;  %v312_v46 = vadd.f32 %v311_v42, %v1536_v22  ;;  %v385_v47 = vadd.f32 %v384_v43, %v1540_v23 }
 0x112   :  { %v1629_v22 = vrot.slane %v1042_v39, %v67_v19 }
 0x113   :  { %857 = vst [vmem:[%s1724_s3 + $0x60] sm:$0xff] %v1135_v44  ;;  %858 = vst [vmem:[%s1724_s3 + $0x68] sm:$0xff] %v1136_v45  ;;  %v1137_v1 = vpack.c.bf16 %v312_v46, %v310_v40  ;;  %v1138_v21 = vpack.c.bf16 %v385_v47, %v383_v41 }
 0x115   :  { %859 = vst [vmem:[%s1724_s3 + $0x70] sm:$0xff] %v1137_v1  ;;  %860 = vst [vmem:[%s1724_s3 + $0x78] sm:$0xff] %v1138_v21  ;;  %v637_v17 = vpop.f32.mrb[16].mxu0  ;;  %v710_v23 = vpop.f32.mrb[16].mxu1 }
 0x116   :  { %v638_v50 = vadd.f32 %v637_v17, %v1615_v48  ;;  %v711_v51 = vadd.f32 %v710_v23, %v1619_v49  ;;  %v639_v19 = vpop.f32.mrb[17].mxu0  ;;  %v712_v52 = vpop.f32.mrb[17].mxu1 }
 0x117   :  { %v640_v15 = vadd.f32 %v639_v19, %v1629_v22  ;;  %v713_v20 = vadd.f32 %v712_v52, %v1633_v16  ;;  %v641_v53 = vpop.f32.mrb[18].mxu0  ;;  %v714_v54 = vpop.f32.mrb[18].mxu1 }
 0x118   :  { %v642_v55 = vadd.f32 %v641_v53, %v1615_v48  ;;  %v715_v56 = vadd.f32 %v714_v54, %v1619_v49  ;;  %v643_v57 = vpop.f32.mrb[19].mxu0  ;;  %v716_v58 = vpop.f32.mrb[19].mxu1 }
 0x119   :  { %v1139_v59 = vpack.c.bf16 %v640_v15, %v638_v50  ;;  %v1140_v60 = vpack.c.bf16 %v713_v20, %v711_v51  ;;  %v644_v61 = vadd.f32 %v643_v57, %v1629_v22  ;;  %v717_v62 = vadd.f32 %v716_v58, %v1633_v16 }
 0x11b   :  { %1107 = vst [vmem:[%s1724_s3 + $0x80] sm:$0xff] %v1139_v59  ;;  %1108 = vst [vmem:[%s1724_s3 + $0x88] sm:$0xff] %v1140_v60  ;;  %v1141_v63 = vpack.c.bf16 %v644_v61, %v642_v55  ;;  %v1142_v0 = vpack.c.bf16 %v717_v62, %v715_v56 }
 0x11d   :  { %1109 = vst [vmem:[%s1724_s3 + $0x90] sm:$0xff] %v1141_v63  ;;  %1110 = vst [vmem:[%s1724_s3 + $0x98] sm:$0xff] %v1142_v0  ;;  %v647_v2 = vpop.f32.mrb[20].mxu0  ;;  %v720_v3 = vpop.f32.mrb[20].mxu1 }
 0x11e   :  { %v648_v4 = vadd.f32 %v647_v2, %v1615_v48  ;;  %v721_v5 = vadd.f32 %v720_v3, %v1619_v49  ;;  %v649_v6 = vpop.f32.mrb[21].mxu0  ;;  %v722_v7 = vpop.f32.mrb[21].mxu1 }
 0x11f   :  { %v650_v8 = vadd.f32 %v649_v6, %v1629_v22  ;;  %v723_v9 = vadd.f32 %v722_v7, %v1633_v16  ;;  %v651_v10 = vpop.f32.mrb[22].mxu0  ;;  %v724_v11 = vpop.f32.mrb[22].mxu1 }
 0x120   :  { %v652_v12 = vadd.f32 %v651_v10, %v1615_v48  ;;  %v725_v13 = vadd.f32 %v724_v11, %v1619_v49  ;;  %v653_v14 = vpop.f32.mrb[23].mxu0  ;;  %v726_v18 = vpop.f32.mrb[23].mxu1 }
 0x121   :  { %v1143_v24 = vpack.c.bf16 %v650_v8, %v648_v4  ;;  %v1144_v25 = vpack.c.bf16 %v723_v9, %v721_v5  ;;  %v654_v26 = vadd.f32 %v653_v14, %v1629_v22  ;;  %v727_v27 = vadd.f32 %v726_v18, %v1633_v16 }
 0x123   :  { %1111 = vst [vmem:[%s1724_s3 + $0xa0] sm:$0xff] %v1143_v24  ;;  %1112 = vst [vmem:[%s1724_s3 + $0xa8] sm:$0xff] %v1144_v25  ;;  %v1145_v28 = vpack.c.bf16 %v654_v26, %v652_v12  ;;  %v1146_v29 = vpack.c.bf16 %v727_v27, %v725_v13 }
 0x125   :  { %1113 = vst [vmem:[%s1724_s3 + $0xb0] sm:$0xff] %v1145_v28  ;;  %1114 = vst [vmem:[%s1724_s3 + $0xb8] sm:$0xff] %v1146_v29  ;;  %v657_v30 = vpop.f32.mrb[24].mxu0  ;;  %v730_v31 = vpop.f32.mrb[24].mxu1 }
 0x126   :  { %v658_v32 = vadd.f32 %v657_v30, %v1615_v48  ;;  %v731_v33 = vadd.f32 %v730_v31, %v1619_v49  ;;  %v659_v34 = vpop.f32.mrb[25].mxu0  ;;  %v732_v35 = vpop.f32.mrb[25].mxu1 }
 0x127   :  { %v660_v36 = vadd.f32 %v659_v34, %v1629_v22  ;;  %v733_v37 = vadd.f32 %v732_v35, %v1633_v16  ;;  %v661_v38 = vpop.f32.mrb[26].mxu0  ;;  %v734_v39 = vpop.f32.mrb[26].mxu1 }
 0x128   :  { %v662_v40 = vadd.f32 %v661_v38, %v1615_v48  ;;  %v735_v41 = vadd.f32 %v734_v39, %v1619_v49  ;;  %v663_v42 = vpop.f32.mrb[27].mxu0  ;;  %v736_v43 = vpop.f32.mrb[27].mxu1 }
 0x129   :  { %v1147_v44 = vpack.c.bf16 %v660_v36, %v658_v32  ;;  %v1148_v45 = vpack.c.bf16 %v733_v37, %v731_v33  ;;  %v664_v46 = vadd.f32 %v663_v42, %v1629_v22  ;;  %v737_v47 = vadd.f32 %v736_v43, %v1633_v16 }
 0x12b   :  { %1115 = vst [vmem:[%s1724_s3 + $0xc0] sm:$0xff] %v1147_v44  ;;  %1116 = vst [vmem:[%s1724_s3 + $0xc8] sm:$0xff] %v1148_v45  ;;  %v1149_v1 = vpack.c.bf16 %v664_v46, %v662_v40  ;;  %v1150_v21 = vpack.c.bf16 %v737_v47, %v735_v41 }
 0x12d   :  { %1117 = vst [vmem:[%s1724_s3 + $0xd0] sm:$0xff] %v1149_v1  ;;  %1118 = vst [vmem:[%s1724_s3 + $0xd8] sm:$0xff] %v1150_v21  ;;  %v667_v17 = vpop.f32.mrb[28].mxu0  ;;  %v740_v23 = vpop.f32.mrb[28].mxu1 }
 0x12e   :  { %v668_v50 = vadd.f32 %v667_v17, %v1615_v48  ;;  %v741_v51 = vadd.f32 %v740_v23, %v1619_v49  ;;  %v669_v19 = vpop.f32.mrb[29].mxu0  ;;  %v742_v52 = vpop.f32.mrb[29].mxu1 }
 0x12f   :  { %v670_v15 = vadd.f32 %v669_v19, %v1629_v22  ;;  %v743_v20 = vadd.f32 %v742_v52, %v1633_v16  ;;  %v671_v53 = vpop.f32.mrb[30].mxu0  ;;  %v744_v54 = vpop.f32.mrb[30].mxu1 }
 0x130   :  { %v672_v55 = vadd.f32 %v671_v53, %v1615_v48  ;;  %v745_v56 = vadd.f32 %v744_v54, %v1619_v49  ;;  %v673_v57 = vpop.f32.mrb[31].mxu0  ;;  %v746_v58 = vpop.f32.mrb[31].mxu1 }
 0x131   :  { %v1151_v59 = vpack.c.bf16 %v670_v15, %v668_v50  ;;  %v1152_v60 = vpack.c.bf16 %v743_v20, %v741_v51  ;;  %v674_v61 = vadd.f32 %v673_v57, %v1629_v22  ;;  %v747_v62 = vadd.f32 %v746_v58, %v1633_v16 }
 0x133   :  { %1119 = vst [vmem:[%s1724_s3 + $0xe0] sm:$0xff] %v1151_v59  ;;  %1120 = vst [vmem:[%s1724_s3 + $0xe8] sm:$0xff] %v1152_v60  ;;  %v1153_v63 = vpack.c.bf16 %v674_v61, %v672_v55  ;;  %v1154_v48 = vpack.c.bf16 %v747_v62, %v745_v56 }
 0x135   :  { %1121 = vst [vmem:[%s1724_s3 + $0xf0] sm:$0xff] %v1153_v63  ;;  %1122 = vst [vmem:[%s1724_s3 + $0xf8] sm:$0xff] %v1154_v48 }

// kernel: a_call__.6
= control target key start
LH: loop header
LB: loop body
LE: loop exit
PB: predicated region body
PF: predicated region fallthrough
CT: control target
= control target key end

     0   :  { %s2896_s12 = smov 0   ;;  %s3839_s0 = inlined_call_operand.vmem [shape: bf16[2,8,8,512], index: 0, kind: input, shape index: {}]   ;;  %s3840_s1 = inlined_call_operand.vmem [shape: bf16[2,128,512], index: 1, kind: input, shape index: {}]   ;;  %s3841_s2 = inlined_call_operand.vmem [shape: bf16[2,128,128], index: 2, kind: input, shape index: {}]   ;;  %s3842_s3 = inlined_call_operand.vmem [shape: f32[2,8,8,128], index: 3, kind: output, shape index: {}]  }
   0x1 LB: > { %s2902_s13 = sadd.s32 4294967295, %s2871_s12   ;;  %p2359_p0 = scmp.ge.s32.totalorder %s2871_s12, 1  ;;  %s2871_s12 = sphi %s2896_s12, %s13_s12  }
   0x2   : > { %p123_p1 = scmp.lt.s32.totalorder %s2871_s12, 3 }
   0x4   : > { %p124_p2 = pnand %p2359_p0, %p123_p1 }
   0x6   : > { %127 = sbr.rel (%p124_p2) target bundleno = 4173 (0x104d), region = 28 }
   0xd   : > { %p150_p3 = scmp.lt.s32.totalorder %s2902_s13, 1  ;;  %p214_p4 = scmp.eq.s32.totalorder %s2902_s13, 0 }
   0xe   : > { %s2974_s25 = sshll.u32 %s2902_s13, 5 }
   0xf   : > { %s2909_s14 = scalar_select %p150_p3, %s2902_s13, 1 }
  0x10   : > { %s2913_s15 = scalar_select %p214_p4, 0, 7 }
  0x11   : > { %s2475_s16 = sshll.u32 %s2909_s14, 8  ;;  %s2476_s17 = sshll.u32 %s2909_s14, 6 }
  0x12   : > { %s2920_s20 = scalar_lea.vmem %s3840_s1, %s2475_s16  ;;  %s2925_s23 = scalar_lea.vmem %s3842_s3, %s2476_s17 }
  0x13   : > { %v2928_v0 = vld [vmem:[%s2920_s20] sm:$0xff]  ;;  %v2931_v1 = vld [vmem:[%s2920_s20 + $0x8] sm:$0xff]  ;;  %v2934_v2 = vld [vmem:[%s2920_s20 + $0x10] sm:$0xff]  ;;  %s2366_s24 = sshll.u32 %s2913_s15, 2  ;;  %s159_s28 = scalar_lea.vmem %s3841_s2, %s2476_s17 }
  0x14   : > { %v2937_v3 = vld [vmem:[%s2920_s20 + $0x18] sm:$0xff]  ;;  %v2940_v4 = vld [vmem:[%s2920_s20 + $0x20] sm:$0xff]  ;;  %v2943_v5 = vld [vmem:[%s2920_s20 + $0x28] sm:$0xff]  ;;  %s218_s29 = sadd.s32 %s2974_s25, %s2366_s24 }
  0x15   : > { %v2946_v6 = vld [vmem:[%s2920_s20 + $0x30] sm:$0xff]  ;;  %v2949_v7 = vld [vmem:[%s2920_s20 + $0x38] sm:$0xff]  ;;  %v2952_v8 = vld [vmem:[%s2920_s20 + $0x40] sm:$0xff]  ;;  %s2368_s30 = sshll.u32 %s218_s29, 2 }
  0x16   : > { %v2955_v9 = vld [vmem:[%s2920_s20 + $0x48] sm:$0xff]  ;;  %v2958_v10 = vld [vmem:[%s2920_s20 + $0x50] sm:$0xff]  ;;  %v2961_v11 = vld [vmem:[%s2920_s20 + $0x58] sm:$0xff]  ;;  %s220_s6 = scalar_lea.vmem %s3839_s0, %s2368_s30 }
  0x17   : > { %v2964_v12 = vld [vmem:[%s2920_s20 + $0x60] sm:$0xff]  ;;  %v2967_v13 = vld [vmem:[%s2920_s20 + $0x68] sm:$0xff]  ;;  %v2970_v14 = vld [vmem:[%s2920_s20 + $0x70] sm:$0xff] }
  0x18   : > { %v2977_v15 = vld [vmem:[%s2920_s20 + $0x78] sm:$0xff]  ;;  %v2980_v16 = vld [vmem:[%s2920_s20 + $0x80] sm:$0xff]  ;;  %v2983_v17 = vld [vmem:[%s2920_s20 + $0x88] sm:$0xff] }
  0x19   : > { %v2986_v18 = vld [vmem:[%s2920_s20 + $0x90] sm:$0xff]  ;;  %v2989_v19 = vld [vmem:[%s2920_s20 + $0x98] sm:$0xff]  ;;  %v2992_v20 = vld [vmem:[%s2920_s20 + $0xa0] sm:$0xff] }
  0x1a   : > { %v2998_v21 = vld [vmem:[%s2920_s20 + $0xa8] sm:$0xff]  ;;  %v3001_v22 = vld [vmem:[%s2920_s20 + $0xb0] sm:$0xff]  ;;  %v3004_v23 = vld [vmem:[%s2920_s20 + $0xb8] sm:$0xff] }
  0x1b   : > { %v3008_v24 = vld [vmem:[%s2920_s20 + $0xc0] sm:$0xff]  ;;  %v3011_v25 = vld [vmem:[%s2920_s20 + $0xc8] sm:$0xff]  ;;  %v3014_v26 = vld [vmem:[%s2920_s20 + $0xd0] sm:$0xff] }
  0x1c   : > { %v3017_v27 = vld [vmem:[%s2920_s20 + $0xd8] sm:$0xff]  ;;  %v3020_v28 = vld [vmem:[%s2920_s20 + $0xe0] sm:$0xff]  ;;  %v3023_v29 = vld [vmem:[%s2920_s20 + $0xe8] sm:$0xff] }
  0x1d   : > { %v3026_v30 = vld [vmem:[%s2920_s20 + $0xf0] sm:$0xff]  ;;  %v3029_v31 = vld [vmem:[%s2920_s20 + $0xf8] sm:$0xff]  ;;  %v3031_v32 = vld [vmem:[%s159_s28] sm:$0xf] }
  0x1e   : > { %v3033_v33 = vld [vmem:[%s159_s28 + $0x4] sm:$0xf]  ;;  %v3035_v34 = vld [vmem:[%s159_s28 + $0x8] sm:$0xf]  ;;  %v3037_v35 = vld [vmem:[%s159_s28 + $0xc] sm:$0xf] }
  0x1f   : > { %v3039_v36 = vld [vmem:[%s159_s28 + $0x10] sm:$0xf]  ;;  %v3041_v37 = vld [vmem:[%s159_s28 + $0x14] sm:$0xf]  ;;  %v3043_v38 = vld [vmem:[%s159_s28 + $0x18] sm:$0xf] }
  0x20   : > { %v3045_v39 = vld [vmem:[%s159_s28 + $0x1c] sm:$0xf]  ;;  %v3047_v40 = vld [vmem:[%s159_s28 + $0x20] sm:$0xf]  ;;  %v3049_v41 = vld [vmem:[%s159_s28 + $0x24] sm:$0xf] }
  0x21   : > { %v3054_v42 = vld [vmem:[%s159_s28 + $0x28] sm:$0xf]  ;;  %v3056_v43 = vld [vmem:[%s159_s28 + $0x2c] sm:$0xf]  ;;  %v3058_v44 = vld [vmem:[%s159_s28 + $0x30] sm:$0xf] }
  0x22   : > { %v3060_v45 = vld [vmem:[%s159_s28 + $0x34] sm:$0xf]  ;;  %v3062_v46 = vld [vmem:[%s159_s28 + $0x38] sm:$0xf]  ;;  %v3064_v47 = vld [vmem:[%s159_s28 + $0x3c] sm:$0xf] }
  0x23   : > { %v3066_v48 = vld [vmem:[%s220_s6] sm:$0xff]  ;;  %v3068_v49 = vld [vmem:[%s220_s6 + $0x8] sm:$0xff] }
  0x24   : > { %264 = vsyncadd [#allocation3], 256 }
  0x25   : > { %2853 = dma.done.wait [#allocation3], 256 }
  0x26   : > { %2854 = vsyncadd [#allocation3], 4294967040  ;;  %s3072_s7 = scalar_select %p214_p4, 1, 6 }
  0x28   : > { %s2369_s8 = sshll.u32 %s3072_s7, 2 }
  0x29   : > { %s271_s9 = sadd.s32 %s2369_s8, %s2974_s25 }
  0x2a   : > { %s2370_s10 = sshll.u32 %s271_s9, 2 }
  0x2b   : > { %s273_s16 = scalar_lea.vmem %s3839_s0, %s2370_s10 }
  0x2c   : > { %v3079_v50 = vld [vmem:[%s273_s16] sm:$0xff]  ;;  %v3081_v51 = vld [vmem:[%s273_s16 + $0x8] sm:$0xff] }
  0x2d   : > { %319 = vsyncadd [#allocation3 + $0x1], 256  ;;  %v3085_v52 = vcombine.high %v2928_v0, %v2934_v2  ;;  %v3089_v53 = vcombine.low %v2928_v0, %v2934_v2  ;;  %v3093_v54 = vcombine.high %v2940_v4, %v2946_v6  ;;  %v3097_v55 = vcombine.high %v2931_v1, %v2937_v3  ;;  %s2416_s17 = sshll.u32 %s2913_s15, 3 }
  0x2e   : > { %v3102_v56 = vcombine.low %v2931_v1, %v2937_v3  ;;  %v3106_v57 = vcombine.high %v2943_v5, %v2949_v7  ;;  %v3111_v58 = vcombine.low %v2940_v4, %v2946_v6  ;;  %v3117_v59 = vcombine.high %v2952_v8, %v2958_v10  ;;  %s690_s18 = scalar_lea.vmem %s2925_s23, %s2416_s17 }
  0x2f   : > { %486 = vmatprep.subr.bf16.mxu0 %v3085_v52  ;;  %527 = vmatprep.subr.bf16.mxu1 %v3097_v55  ;;  %v3122_v60 = vcombine.low %v2943_v5, %v2949_v7  ;;  %v3127_v61 = vcombine.high %v2955_v9, %v2961_v11  ;;  %v3845_v62 = vmov 0   ;;  %v3133_v63 = vcombine.low %v2952_v8, %v2958_v10 }
  0x30   : > { %487 = vmatpush1.bf16.msra.mxu0 %v3089_v53  ;;  %528 = vmatpush1.bf16.msra.mxu1 %v3102_v56  ;;  %v3138_v0 = vcombine.high %v2964_v12, %v2970_v14  ;;  %v3143_v1 = vcombine.low %v2955_v9, %v2961_v11  ;;  %v3148_v2 = vcombine.high %v2967_v13, %v2977_v15  ;;  %vm2875_vm0 = vmmov 0  }
  0x31   : > { %488 = vmatprep.subr.bf16.mxu0 %v3093_v54  ;;  %529 = vmatprep.subr.bf16.mxu1 %v3106_v57  ;;  %v3154_v3 = vcombine.low %v2964_v12, %v2970_v14  ;;  %v3159_v4 = vcombine.high %v2980_v16, %v2986_v18  ;;  %v3164_v5 = vcombine.low %v2967_v13, %v2977_v15 }
  0x32   : > { %518 = vmatprep.mubr.bf16.mxu0 %v3845_v62  ;;  %559 = vmatprep.mubr.bf16.mxu1 %v3845_v62  ;;  %v3169_v6 = vcombine.high %v2983_v17, %v2989_v19  ;;  %v3174_v7 = vcombine.low %v2980_v16, %v2986_v18  ;;  %v3179_v8 = vcombine.high %v2992_v20, %v3001_v22 }
  0x33   : > { %v3184_v9 = vcombine.low %v2983_v17, %v2989_v19  ;;  %v3189_v10 = vcombine.high %v2998_v21, %v3004_v23  ;;  %v3194_v11 = vcombine.low %v2992_v20, %v3001_v22  ;;  %v3199_v12 = vcombine.high %v3008_v24, %v3014_v26 }
  0x34   : > { %489 = vmatpush1.bf16.msra.mxu0 %v3111_v58  ;;  %530 = vmatpush1.bf16.msra.mxu1 %v3122_v60  ;;  %v3204_v13 = vcombine.low %v2998_v21, %v3004_v23  ;;  %v3209_v14 = vcombine.high %v3011_v25, %v3017_v27  ;;  %v3214_v15 = vcombine.low %v3008_v24, %v3014_v26  ;;  %v3843_v22 = vmov 0.0  }
  0x35   : > { %490 = vmatprep.subr.bf16.mxu0 %v3117_v59  ;;  %531 = vmatprep.subr.bf16.mxu1 %v3127_v61  ;;  %v3219_v16 = vcombine.high %v3020_v28, %v3026_v30  ;;  %v3224_v17 = vcombine.low %v3011_v25, %v3017_v27  ;;  %v3229_v18 = vcombine.high %v3023_v29, %v3029_v31 }
  0x36   : > { %v3234_v19 = vcombine.low %v3020_v28, %v3026_v30  ;;  %v3240_v20 = vcombine.low %v3023_v29, %v3029_v31  ;;  %v3249_v21 = vcombine.low %v3031_v32, %v3033_v33  ;;  %v3256_v23 = vcombine.low %v3035_v34, %v3037_v35 }
  0x37   : > { %v3262_v24 = vcombine.low %v3039_v36, %v3041_v37  ;;  %v3268_v25 = vcombine.low %v3043_v38, %v3045_v39  ;;  %v3274_v26 = vcombine.low %v3047_v40, %v3049_v41  ;;  %v3279_v27 = vcombine.low %v3054_v42, %v3056_v43 }
  0x38   : > { %491 = vmatpush1.bf16.msra.mxu0 %v3133_v63  ;;  %532 = vmatpush1.bf16.msra.mxu1 %v3143_v1  ;;  %v3287_v28 = vcombine.low %v3058_v44, %v3060_v45  ;;  %v3293_v29 = vcombine.low %v3062_v46, %v3064_v47  ;;  %v322_v30 = vunpack.c.l.bf16 %v3066_v48  ;;  %v323_v31 = vunpack.c.h.bf16 %v3066_v48 }
  0x39   : > { %492 = vmatprep.subr.bf16.mxu0 %v3138_v0  ;;  %533 = vmatprep.subr.bf16.mxu1 %v3148_v2  ;;  %v324_v44 = vunpack.c.l.bf16 %v3068_v49  ;;  %v325_v45 = vunpack.c.h.bf16 %v3068_v49 }
  0x3c   : > { %493 = vmatpush1.bf16.msra.mxu0 %v3154_v3  ;;  %534 = vmatpush1.bf16.msra.mxu1 %v3164_v5 }
  0x3d   : > { %494 = vmatprep.subr.bf16.mxu0 %v3159_v4  ;;  %535 = vmatprep.subr.bf16.mxu1 %v3169_v6 }
  0x40   : > { %495 = vmatpush1.bf16.msra.mxu0 %v3174_v7  ;;  %536 = vmatpush1.bf16.msra.mxu1 %v3184_v9 }
  0x41   : > { %496 = vmatprep.subr.bf16.mxu0 %v3179_v8  ;;  %537 = vmatprep.subr.bf16.mxu1 %v3189_v10 }
  0x44   : > { %497 = vmatpush1.bf16.msra.mxu0 %v3194_v11  ;;  %538 = vmatpush1.bf16.msra.mxu1 %v3204_v13 }
  0x45   : > { %498 = vmatprep.subr.bf16.mxu0 %v3199_v12  ;;  %539 = vmatprep.subr.bf16.mxu1 %v3209_v14 }
  0x48   : > { %499 = vmatpush1.bf16.msra.mxu0 %v3214_v15  ;;  %540 = vmatpush1.bf16.msra.mxu1 %v3224_v17 }
  0x49   : > { %500 = vmatprep.subr.bf16.mxu0 %v3219_v16  ;;  %541 = vmatprep.subr.bf16.mxu1 %v3229_v18 }
  0x4c   : > { %501 = vmatpush1.bf16.msra.mxu0 %v3234_v19  ;;  %542 = vmatpush1.bf16.msra.mxu1 %v3240_v20 }
  0x4d   : > { %2550 = vmatprep.subr.bf16.mxu0 %v3843_v22 }
  0x4f   : > { %519 = vmatmul.mubr.bf16.vlgmr.msra.gmra.mrb[0].mxu0 %v3845_v62  ;;  %560 = vmatmul.mubr.bf16.vlgmr.msra.gmra.mrb[0].mxu1 %v3845_v62 }
  0x50   : > { %2551 = vmatpush3.bf16.msra.mxu0 %v3249_v21  ;;  %2566 = vmatprep.mubr.msk.bf16.mxu0 %vm2875_vm0, %v3843_v22 }
  0x51   : > { %2552 = vmatprep.subr.bf16.mxu0 %v3843_v22 }
  0x54   : > { %2553 = vmatpush3.bf16.msra.mxu0 %v3256_v23 }
  0x55   : > { %2554 = vmatprep.subr.bf16.mxu0 %v3843_v22 }
  0x58   : > { %2555 = vmatpush3.bf16.msra.mxu0 %v3262_v24 }
  0x59   : > { %2556 = vmatprep.subr.bf16.mxu0 %v3843_v22 }
  0x5c   : > { %2557 = vmatpush3.bf16.msra.mxu0 %v3268_v25 }
  0x5d   : > { %2558 = vmatprep.subr.bf16.mxu0 %v3843_v22 }
  0x60   : > { %2559 = vmatpush3.bf16.msra.mxu0 %v3274_v26 }
  0x61   : > { %2560 = vmatprep.subr.bf16.mxu0 %v3843_v22 }
  0x64   : > { %2561 = vmatpush3.bf16.msra.mxu0 %v3279_v27 }
  0x65   : > { %2562 = vmatprep.subr.bf16.mxu0 %v3843_v22 }
  0x68   : > { %2563 = vmatpush3.bf16.msra.mxu0 %v3287_v28 }
  0x69   : > { %2564 = vmatprep.subr.bf16.mxu0 %v3843_v22 }
  0x6c   : > { %2565 = vmatpush3.bf16.msra.mxu0 %v3293_v29 }
 0x122   : > { %v520_v32 = vpop.f32.mrb[0].mxu0  ;;  %v561_v35 = vpop.f32.mrb[0].mxu1 }
 0x123   : > { %v568_v33 = vadd.f32 %v520_v32, %v322_v30  ;;  %v522_v34 = vpop.f32.mrb[1].mxu0  ;;  %v563_v38 = vpop.f32.mrb[1].mxu1  ;;  %v570_v46 = vadd.f32 %v561_v35, %v324_v44 }
 0x124   : > { %v569_v36 = vadd.f32 %v522_v34, %v323_v31  ;;  %v524_v37 = vpop.f32.mrb[2].mxu0  ;;  %v565_v41 = vpop.f32.mrb[2].mxu1  ;;  %v571_v47 = vadd.f32 %v563_v38, %v325_v45 }
 0x125   : > { %v2403_v39 = vmul.f32 -1.442695, %v568_v33  ;;  %v525_v40 = vpop.f32.mrb[3].mxu0  ;;  %v566_v43 = vpop.f32.mrb[3].mxu1  ;;  %v2405_v48 = vmul.f32 -1.442695, %v570_v46 }
 0x126   : > { %v2404_v42 = vmul.f32 -1.442695, %v569_v36 }
 0x127   : > { %2721 = vpow2.f32 %v2403_v39 }
 0x128   : > { %2723 = vpow2.f32 %v2404_v42 }
 0x129   : > { %2725 = vtanh.f32 %v571_v47 }
 0x12a   : > { %2727 = vpow2.f32 %v2405_v48 }
 0x131   : > { %v2722_v30 = vpop.eup %2721 }
 0x132   : > { %v2724_v32 = vpop.eup %2723  ;;  %v581_v22 = vadd.f32 1.0, %v2722_v30 }
 0x133   : > { %v582_v31 = vadd.f32 1.0, %v2724_v32  ;;  %v2726_v33 = vpop.eup %2725 }
 0x134   : > { %2729 = vrcp.f32 %v581_v22  ;;  %v2728_v34 = vpop.eup %2727 }
 0x135   : > { %2731 = vrcp.f32 %v582_v31  ;;  %v583_v49 = vadd.f32 1.0, %v2728_v34 }
 0x137   : > { %2733 = vrcp.f32 %v583_v49 }
 0x13e   : > { %v2730_v36 = vpop.eup %2729 }
 0x13f   : > { %v2732_v37 = vpop.eup %2731  ;;  %v592_v39 = vmul.f32 %v2730_v36, %v2726_v33 }
 0x140   : > { %v591_v40 = vmul.f32 0.0, %v2732_v37 }
 0x141   : > { %v2734_v41 = vpop.eup %2733 }
 0x142   : > { %v3301_v35 = vadd.f32 %v592_v39, %v591_v40 }
 0x144   : > { %v3847_v38 = vclamps-f32 %v3301_v35, 3.0 }
 0x146   : > { %2735 = vtanh.f32 %v3847_v38 }
 0x150   : > { %v2736_v22 = vpop.eup %2735 }
 0x151   : > { %v597_v42 = vmul.f32 %v2736_v22, %v2734_v41 }
 0x153   : > { %v598_v43 = vpack.c.bf16 %v597_v42, %v597_v42 }
 0x155   : > { %2567 = vmatmul.mubr.bf16.vlgmr.msra.gmra.mrb[4].mxu0 %v598_v43 }
 0x228   : > { %v681_v44 = vpop.f32.mrb[4].mxu0 }
 0x229   : > { %v2415_v45 = vclamps-f32 %v681_v44, 3.0  ;;  %v2568_v46 = vpop.f32.mrb[5].mxu0 }
 0x22a   : > { %v684_v47 = vpop.f32.mrb[6].mxu0 }
 0x22b   : > { %691 = vst [vmem:[%s690_s18] sm:$0xff] %v2415_v45  ;;  %v2569_v48 = vpop.f32.mrb[7].mxu0 }
 0x22c   : > { %2855 = dma.done.wait [#allocation3 + $0x1], 256 }
 0x22d   : > { %2856 = vsyncadd [#allocation3 + $0x1], 4294967040  ;;  %s3310_s19 = scalar_select %p214_p4, 2, 5 }
 0x22f   : > { %s2417_s20 = sshll.u32 %s3310_s19, 2 }
 0x230   : > { %s696_s21 = sadd.s32 %s2417_s20, %s2974_s25 }
 0x231   : > { %s2418_s22 = sshll.u32 %s696_s21, 2 }
 0x232   : > { %s698_s26 = scalar_lea.vmem %s3839_s0, %s2418_s22 }
 0x233   : > { %v3317_v30 = vld [vmem:[%s698_s26] sm:$0xff]  ;;  %v3319_v32 = vld [vmem:[%s698_s26 + $0x8] sm:$0xff] }
 0x234   : > { %3864 = vst [vmem:[#allocation20_spill] sm:$0xff] %v3319_v32 }
 0x235   : > { %742 = vsyncadd [#allocation3], 256  ;;  %750 = vmatprep.subr.bf16.mxu1 %v3085_v52  ;;  %791 = vmatprep.subr.bf16.mxu0 %v3097_v55  ;;  %v749_v31 = vpack.c.bf16 %v2415_v45, %v2415_v45  ;;  %v3865_v33 = vmov 0.0   ;;  %v745_v34 = vunpack.c.l.bf16 %v3079_v50  ;;  %v746_v36 = vunpack.c.h.bf16 %v3079_v50  ;;  %s2424_s27 = sshll.u32 %s3072_s7, 3 }
 0x236   : > { %751 = vmatpush1.bf16.msra.mxu1 %v3089_v53  ;;  %792 = vmatpush1.bf16.msra.mxu0 %v3102_v56  ;;  %v747_v48 = vunpack.c.l.bf16 %v3081_v51  ;;  %s906_s28 = scalar_lea.vmem %s2925_s23, %s2424_s27 }
 0x237   : > { %752 = vmatprep.subr.bf16.mxu1 %v3093_v54  ;;  %793 = vmatprep.subr.bf16.mxu0 %v3106_v57 }
 0x238   : > { %782 = vmatprep.mubr.bf16.mxu1 %v3845_v62  ;;  %823 = vmatprep.mubr.bf16.mxu0 %v3845_v62 }
 0x23a   : > { %753 = vmatpush1.bf16.msra.mxu1 %v3111_v58  ;;  %794 = vmatpush1.bf16.msra.mxu0 %v3122_v60 }
 0x23b   : > { %754 = vmatprep.subr.bf16.mxu1 %v3117_v59  ;;  %795 = vmatprep.subr.bf16.mxu0 %v3127_v61 }
 0x23e   : > { %755 = vmatpush1.bf16.msra.mxu1 %v3133_v63  ;;  %796 = vmatpush1.bf16.msra.mxu0 %v3143_v1 }
 0x23f   : > { %756 = vmatprep.subr.bf16.mxu1 %v3138_v0  ;;  %797 = vmatprep.subr.bf16.mxu0 %v3148_v2 }
 0x242   : > { %757 = vmatpush1.bf16.msra.mxu1 %v3154_v3  ;;  %798 = vmatpush1.bf16.msra.mxu0 %v3164_v5 }
 0x243   : > { %758 = vmatprep.subr.bf16.mxu1 %v3159_v4  ;;  %799 = vmatprep.subr.bf16.mxu0 %v3169_v6 }
 0x246   : > { %759 = vmatpush1.bf16.msra.mxu1 %v3174_v7  ;;  %800 = vmatpush1.bf16.msra.mxu0 %v3184_v9 }
 0x247   : > { %760 = vmatprep.subr.bf16.mxu1 %v3179_v8  ;;  %801 = vmatprep.subr.bf16.mxu0 %v3189_v10 }
 0x24a   : > { %761 = vmatpush1.bf16.msra.mxu1 %v3194_v11  ;;  %802 = vmatpush1.bf16.msra.mxu0 %v3204_v13 }
 0x24b   : > { %762 = vmatprep.subr.bf16.mxu1 %v3199_v12  ;;  %803 = vmatprep.subr.bf16.mxu0 %v3209_v14 }
 0x24e   : > { %763 = vmatpush1.bf16.msra.mxu1 %v3214_v15  ;;  %804 = vmatpush1.bf16.msra.mxu0 %v3224_v17 }
 0x24f   : > { %764 = vmatprep.subr.bf16.mxu1 %v3219_v16  ;;  %805 = vmatprep.subr.bf16.mxu0 %v3229_v18 }
 0x252   : > { %765 = vmatpush1.bf16.msra.mxu1 %v3234_v19  ;;  %806 = vmatpush1.bf16.msra.mxu0 %v3240_v20 }
 0x253   : > { %2570 = vmatprep.subr.bf16.mxu1 %v3865_v33 }
 0x255   : > { %783 = vmatmul.mubr.bf16.vlgmr.msra.gmra.mrb[4].mxu1 %v749_v31  ;;  %824 = vmatmul.mubr.bf16.vlgmr.msra.gmra.mrb[8].mxu0 %v749_v31  ;;  %v748_v31 = vunpack.c.h.bf16 %v3081_v51  ;;  %v3866_v51 = vclamps-f32 %v3301_v35, 3.0 }
 0x256   : > { %2571 = vmatpush3.bf16.msra.mxu1 %v3249_v21  ;;  %2586 = vmatprep.mubr.msk.bf16.mxu1 %vm2875_vm0, %v3865_v33 }
 0x257   : > { %2572 = vmatprep.subr.bf16.mxu1 %v3865_v33 }
 0x25a   : > { %2573 = vmatpush3.bf16.msra.mxu1 %v3256_v23 }
 0x25b   : > { %2574 = vmatprep.subr.bf16.mxu1 %v3865_v33 }
 0x25e   : > { %2575 = vmatpush3.bf16.msra.mxu1 %v3262_v24 }
 0x25f   : > { %2576 = vmatprep.subr.bf16.mxu1 %v3865_v33 }
 0x262   : > { %2577 = vmatpush3.bf16.msra.mxu1 %v3268_v25 }
 0x263   : > { %2578 = vmatprep.subr.bf16.mxu1 %v3865_v33 }
 0x266   : > { %2579 = vmatpush3.bf16.msra.mxu1 %v3274_v26 }
 0x267   : > { %2580 = vmatprep.subr.bf16.mxu1 %v3865_v33 }
 0x26a   : > { %2581 = vmatpush3.bf16.msra.mxu1 %v3279_v27 }
 0x26b   : > { %2582 = vmatprep.subr.bf16.mxu1 %v3865_v33 }
 0x26e   : > { %2583 = vmatpush3.bf16.msra.mxu1 %v3287_v28 }
 0x26f   : > { %2584 = vmatprep.subr.bf16.mxu1 %v3865_v33 }
 0x272   : > { %2585 = vmatpush3.bf16.msra.mxu1 %v3293_v29 }
 0x328   : > { %v784_v37 = vpop.f32.mrb[4].mxu1  ;;  %v825_v39 = vpop.f32.mrb[8].mxu0 }
 0x329   : > { %v832_v40 = vadd.f32 %v784_v37, %v745_v34  ;;  %v786_v49 = vpop.f32.mrb[5].mxu1  ;;  %v827_v41 = vpop.f32.mrb[9].mxu0  ;;  %v834_v62 = vadd.f32 %v825_v39, %v747_v48 }
 0x32a   : > { %v833_v22 = vadd.f32 %v786_v49, %v746_v36  ;;  %v788_v42 = vpop.f32.mrb[6].mxu1  ;;  %v829_v43 = vpop.f32.mrb[10].mxu0  ;;  %v835_v50 = vadd.f32 %v827_v41, %v748_v31 }
 0x32b   : > { %v2419_v44 = vmul.f32 -1.442695, %v832_v40  ;;  %v789_v45 = vpop.f32.mrb[7].mxu1  ;;  %v830_v46 = vpop.f32.mrb[11].mxu0  ;;  %v2421_v38 = vmul.f32 -1.442695, %v834_v62 }
 0x32c   : > { %v2420_v47 = vmul.f32 -1.442695, %v833_v22 }
 0x32d   : > { %2737 = vpow2.f32 %v2419_v44 }
 0x32e   : > { %2739 = vpow2.f32 %v2420_v47 }
 0x32f   : > { %2741 = vtanh.f32 %v835_v50 }
 0x330   : > { %2743 = vpow2.f32 %v2421_v38 }
 0x337   : > { %v2738_v32 = vpop.eup %2737 }
 0x338   : > { %v2740_v34 = vpop.eup %2739  ;;  %v845_v37 = vadd.f32 1.0, %v2738_v32 }
 0x339   : > { %v846_v36 = vadd.f32 1.0, %v2740_v34  ;;  %v2742_v40 = vpop.eup %2741 }
 0x33a   : > { %2745 = vrcp.f32 %v845_v37  ;;  %v2744_v49 = vpop.eup %2743 }
 0x33b   : > { %2747 = vrcp.f32 %v846_v36  ;;  %v847_v41 = vadd.f32 1.0, %v2744_v49 }
 0x33d   : > { %2749 = vrcp.f32 %v847_v41 }
 0x344   : > { %v2746_v22 = vpop.eup %2745 }
 0x345   : > { %v2748_v42 = vpop.eup %2747  ;;  %v856_v43 = vmul.f32 %v2746_v22, %v2742_v40 }
 0x346   : > { %v855_v39 = vmul.f32 %v2748_v42, %v3866_v51 }
 0x347   : > { %v2750_v38 = vpop.eup %2749 }
 0x348   : > { %v3379_v62 = vadd.f32 %v856_v43, %v855_v39 }
 0x34a   : > { %v3849_v32 = vclamps-f32 %v3379_v62, 3.0 }
 0x34c   : > { %2751 = vtanh.f32 %v3849_v32 }
 0x356   : > { %v2752_v44 = vpop.eup %2751 }
 0x357   : > { %v861_v45 = vmul.f32 %v2752_v44, %v2750_v38 }
 0x359   : > { %v862_v46 = vpack.c.bf16 %v861_v45, %v861_v45 }
 0x35b   : > { %2587 = vmatmul.mubr.bf16.vlgmr.msra.gmra.mrb[8].mxu1 %v862_v46 }
 0x42e   : > { %v897_v47 = vpop.f32.mrb[8].mxu1 }
 0x42f   : > { %v2423_v48 = vclamps-f32 %v897_v47, 3.0  ;;  %v2588_v35 = vpop.f32.mrb[9].mxu1 }
 0x430   : > { %v900_v31 = vpop.f32.mrb[10].mxu1 }
 0x431   : > { %907 = vst [vmem:[%s906_s28] sm:$0xff] %v2423_v48  ;;  %v2589_v50 = vpop.f32.mrb[11].mxu1 }
 0x432   : > { %2857 = dma.done.wait [#allocation3], 256 }
 0x433   : > { %2858 = vsyncadd [#allocation3], 4294967040  ;;  %s3388_s29 = scalar_select %p214_p4, 3, 4 }
 0x435   : > { %s2425_s30 = sshll.u32 %s3388_s29, 2 }
 0x436   : > { %s912_s4 = sadd.s32 %s2425_s30, %s2974_s25 }
 0x437   : > { %s2426_s5 = sshll.u32 %s912_s4, 2 }
 0x438   : > { %s914_s8 = scalar_lea.vmem %s3839_s0, %s2426_s5 }
 0x439   : > { %v3395_v34 = vld [vmem:[%s914_s8] sm:$0xff]  ;;  %v3397_v37 = vld [vmem:[%s914_s8 + $0x8] sm:$0xff] }
 0x43a   : > { %3867 = vst [vmem:[#allocation21_spill] sm:$0xff] %v3395_v34  ;;  %3868 = vst [vmem:[#allocation22_spill] sm:$0xff] %v3397_v37 }
 0x43b   : > { %958 = vsyncadd [#allocation3 + $0x1], 256  ;;  %966 = vmatprep.subr.bf16.mxu0 %v3085_v52  ;;  %1007 = vmatprep.subr.bf16.mxu1 %v3097_v55  ;;  %v3869_v36 = vmov 0   ;;  %v965_v40 = vpack.c.bf16 %v2423_v48, %v2423_v48  ;;  %v961_v49 = vunpack.c.l.bf16 %v3317_v30  ;;  %v962_v22 = vunpack.c.h.bf16 %v3317_v30  ;;  %v3870_v31 = vld [vmem:[#allocation20_spill] sm:$0xff]  ;;  %s2432_s9 = sshll.u32 %s3310_s19, 3 }
 0x43c   : > { %967 = vmatpush1.bf16.msra.mxu0 %v3089_v53  ;;  %1008 = vmatpush1.bf16.msra.mxu1 %v3102_v56  ;;  %v963_v50 = vunpack.c.l.bf16 %v3870_v31  ;;  %s1122_s10 = scalar_lea.vmem %s2925_s23, %s2432_s9 }
 0x43d   : > { %968 = vmatprep.subr.bf16.mxu0 %v3093_v54  ;;  %1009 = vmatprep.subr.bf16.mxu1 %v3106_v57 }
 0x43e   : > { %998 = vmatprep.mubr.bf16.mxu0 %v3869_v36  ;;  %1039 = vmatprep.mubr.bf16.mxu1 %v3869_v36 }
 0x440   : > { %969 = vmatpush1.bf16.msra.mxu0 %v3111_v58  ;;  %1010 = vmatpush1.bf16.msra.mxu1 %v3122_v60 }
 0x441   : > { %970 = vmatprep.subr.bf16.mxu0 %v3117_v59  ;;  %1011 = vmatprep.subr.bf16.mxu1 %v3127_v61 }
 0x444   : > { %971 = vmatpush1.bf16.msra.mxu0 %v3133_v63  ;;  %1012 = vmatpush1.bf16.msra.mxu1 %v3143_v1 }
 0x445   : > { %972 = vmatprep.subr.bf16.mxu0 %v3138_v0  ;;  %1013 = vmatprep.subr.bf16.mxu1 %v3148_v2 }
 0x448   : > { %973 = vmatpush1.bf16.msra.mxu0 %v3154_v3  ;;  %1014 = vmatpush1.bf16.msra.mxu1 %v3164_v5 }
 0x449   : > { %974 = vmatprep.subr.bf16.mxu0 %v3159_v4  ;;  %1015 = vmatprep.subr.bf16.mxu1 %v3169_v6 }
 0x44c   : > { %975 = vmatpush1.bf16.msra.mxu0 %v3174_v7  ;;  %1016 = vmatpush1.bf16.msra.mxu1 %v3184_v9 }
 0x44d   : > { %976 = vmatprep.subr.bf16.mxu0 %v3179_v8  ;;  %1017 = vmatprep.subr.bf16.mxu1 %v3189_v10 }
 0x450   : > { %977 = vmatpush1.bf16.msra.mxu0 %v3194_v11  ;;  %1018 = vmatpush1.bf16.msra.mxu1 %v3204_v13 }
 0x451   : > { %978 = vmatprep.subr.bf16.mxu0 %v3199_v12  ;;  %1019 = vmatprep.subr.bf16.mxu1 %v3209_v14 }
 0x454   : > { %979 = vmatpush1.bf16.msra.mxu0 %v3214_v15  ;;  %1020 = vmatpush1.bf16.msra.mxu1 %v3224_v17 }
 0x455   : > { %980 = vmatprep.subr.bf16.mxu0 %v3219_v16  ;;  %1021 = vmatprep.subr.bf16.mxu1 %v3229_v18 }
 0x458   : > { %981 = vmatpush1.bf16.msra.mxu0 %v3234_v19  ;;  %1022 = vmatpush1.bf16.msra.mxu1 %v3240_v20 }
 0x459   : > { %2590 = vmatprep.subr.bf16.mxu0 %v3865_v33 }
 0x45b   : > { %999 = vmatmul.mubr.bf16.vlgmr.msra.gmra.mrb[12].mxu0 %v965_v40  ;;  %1040 = vmatmul.mubr.bf16.vlgmr.msra.gmra.mrb[12].mxu1 %v965_v40  ;;  %v964_v40 = vunpack.c.h.bf16 %v3870_v31 }
 0x45c   : > { %2591 = vmatpush3.bf16.msra.mxu0 %v3249_v21  ;;  %2606 = vmatprep.mubr.msk.bf16.mxu0 %vm2875_vm0, %v3865_v33 }
 0x45d   : > { %2592 = vmatprep.subr.bf16.mxu0 %v3865_v33 }
 0x460   : > { %2593 = vmatpush3.bf16.msra.mxu0 %v3256_v23 }
 0x461   : > { %2594 = vmatprep.subr.bf16.mxu0 %v3865_v33 }
 0x464   : > { %2595 = vmatpush3.bf16.msra.mxu0 %v3262_v24 }
 0x465   : > { %2596 = vmatprep.subr.bf16.mxu0 %v3865_v33 }
 0x468   : > { %2597 = vmatpush3.bf16.msra.mxu0 %v3268_v25 }
 0x469   : > { %2598 = vmatprep.subr.bf16.mxu0 %v3865_v33 }
 0x46c   : > { %2599 = vmatpush3.bf16.msra.mxu0 %v3274_v26 }
 0x46d   : > { %2600 = vmatprep.subr.bf16.mxu0 %v3865_v33 }
 0x470   : > { %2601 = vmatpush3.bf16.msra.mxu0 %v3279_v27 }
 0x471   : > { %2602 = vmatprep.subr.bf16.mxu0 %v3865_v33 }
 0x474   : > { %2603 = vmatpush3.bf16.msra.mxu0 %v3287_v28 }
 0x475   : > { %2604 = vmatprep.subr.bf16.mxu0 %v3865_v33 }
 0x478   : > { %2605 = vmatpush3.bf16.msra.mxu0 %v3293_v29 }
 0x52e   : > { %v1000_v42 = vpop.f32.mrb[12].mxu0  ;;  %v1041_v43 = vpop.f32.mrb[12].mxu1 }
 0x52f   : > { %v1048_v51 = vadd.f32 %v1000_v42, %v961_v49  ;;  %v1002_v39 = vpop.f32.mrb[13].mxu0  ;;  %v1043_v41 = vpop.f32.mrb[13].mxu1  ;;  %v1050_v32 = vadd.f32 %v1041_v43, %v963_v50 }
 0x530   : > { %v1049_v38 = vadd.f32 %v1002_v39, %v962_v22  ;;  %v1004_v44 = vpop.f32.mrb[14].mxu0  ;;  %v1045_v45 = vpop.f32.mrb[14].mxu1  ;;  %v1051_v30 = vadd.f32 %v1043_v41, %v964_v40 }
 0x531   : > { %v2427_v46 = vmul.f32 -1.442695, %v1048_v51  ;;  %v1005_v47 = vpop.f32.mrb[15].mxu0  ;;  %v1046_v48 = vpop.f32.mrb[15].mxu1  ;;  %v2429_v37 = vmul.f32 -1.442695, %v1050_v32 }
 0x532   : > { %v2428_v35 = vmul.f32 -1.442695, %v1049_v38 }
 0x533   : > { %2753 = vpow2.f32 %v2427_v46  ;;  %v3871_v46 = vclamps-f32 %v3379_v62, 3.0 }
 0x534   : > { %2755 = vpow2.f32 %v2428_v35 }
 0x535   : > { %2757 = vtanh.f32 %v1051_v30 }
 0x536   : > { %2759 = vpow2.f32 %v2429_v37 }
 0x53d   : > { %v2754_v34 = vpop.eup %2753 }
 0x53e   : > { %v2756_v49 = vpop.eup %2755  ;;  %v1061_v42 = vadd.f32 1.0, %v2754_v34 }
 0x53f   : > { %v1062_v22 = vadd.f32 1.0, %v2756_v49  ;;  %v2758_v51 = vpop.eup %2757 }
 0x540   : > { %2761 = vrcp.f32 %v1061_v42  ;;  %v2760_v39 = vpop.eup %2759 }
 0x541   : > { %2763 = vrcp.f32 %v1062_v22  ;;  %v1063_v41 = vadd.f32 1.0, %v2760_v39 }
 0x543   : > { %2765 = vrcp.f32 %v1063_v41 }
 0x54a   : > { %v2762_v38 = vpop.eup %2761 }
 0x54b   : > { %v2764_v44 = vpop.eup %2763  ;;  %v1072_v45 = vmul.f32 %v2762_v38, %v2758_v51 }
 0x54c   : > { %v1071_v43 = vmul.f32 %v2764_v44, %v3871_v46 }
 0x54d   : > { %v2766_v37 = vpop.eup %2765 }
 0x54e   : > { %v3457_v32 = vadd.f32 %v1072_v45, %v1071_v43 }
 0x550   : > { %v3852_v34 = vclamps-f32 %v3457_v32, 3.0 }
 0x552   : > { %2767 = vtanh.f32 %v3852_v34 }
 0x55c   : > { %v2768_v47 = vpop.eup %2767 }
 0x55d   : > { %v1077_v48 = vmul.f32 %v2768_v47, %v2766_v37 }
 0x55f   : > { %v1078_v35 = vpack.c.bf16 %v1077_v48, %v1077_v48 }
 0x561   : > { %2607 = vmatmul.mubr.bf16.vlgmr.msra.gmra.mrb[16].mxu0 %v1078_v35 }
 0x634   : > { %v1113_v31 = vpop.f32.mrb[16].mxu0 }
 0x635   : > { %v2431_v50 = vclamps-f32 %v1113_v31, 3.0  ;;  %v2608_v62 = vpop.f32.mrb[17].mxu0 }
 0x636   : > { %v1116_v40 = vpop.f32.mrb[18].mxu0 }
 0x637   : > { %1123 = vst [vmem:[%s1122_s10] sm:$0xff] %v2431_v50  ;;  %v2609_v30 = vpop.f32.mrb[19].mxu0 }
 0x638   : > { %2859 = dma.done.wait [#allocation3 + $0x1], 256 }
 0x639   : > { %2860 = vsyncadd [#allocation3 + $0x1], 4294967040  ;;  %s3466_s11 = scalar_select %p214_p4, 4, 3 }
 0x63b   : > { %s2433_s14 = sshll.u32 %s3466_s11, 2 }
 0x63c   : > { %s1128_s16 = sadd.s32 %s2433_s14, %s2974_s25 }
 0x63d   : > { %s2434_s17 = sshll.u32 %s1128_s16, 2 }
 0x63e   : > { %s1130_s20 = scalar_lea.vmem %s3839_s0, %s2434_s17 }
 0x63f   : > { %v3473_v49 = vld [vmem:[%s1130_s20] sm:$0xff]  ;;  %v3475_v42 = vld [vmem:[%s1130_s20 + $0x8] sm:$0xff] }
 0x640   : > { %3872 = vst [vmem:[#allocation20_spill] sm:$0xff] %v3473_v49  ;;  %3873 = vst [vmem:[#allocation23_spill] sm:$0xff] %v3475_v42 }
 0x641   : > { %1174 = vsyncadd [#allocation3], 256  ;;  %1182 = vmatprep.subr.bf16.mxu1 %v3085_v52  ;;  %1223 = vmatprep.subr.bf16.mxu0 %v3097_v55  ;;  %v1181_v22 = vpack.c.bf16 %v2431_v50, %v2431_v50  ;;  %v3874_v51 = vld [vmem:[#allocation21_spill] sm:$0xff]  ;;  %v3875_v40 = vld [vmem:[#allocation22_spill] sm:$0xff]  ;;  %s2440_s21 = sshll.u32 %s3388_s29, 3 }
 0x642   : > { %1183 = vmatpush1.bf16.msra.mxu1 %v3089_v53  ;;  %1224 = vmatpush1.bf16.msra.mxu0 %v3102_v56  ;;  %v1177_v39 = vunpack.c.l.bf16 %v3874_v51  ;;  %v1178_v38 = vunpack.c.h.bf16 %v3874_v51  ;;  %v1179_v30 = vunpack.c.l.bf16 %v3875_v40  ;;  %s1338_s22 = scalar_lea.vmem %s2925_s23, %s2440_s21 }
 0x643   : > { %1184 = vmatprep.subr.bf16.mxu1 %v3093_v54  ;;  %1225 = vmatprep.subr.bf16.mxu0 %v3106_v57 }
 0x644   : > { %1214 = vmatprep.mubr.bf16.mxu1 %v3869_v36  ;;  %1255 = vmatprep.mubr.bf16.mxu0 %v3869_v36 }
 0x646   : > { %1185 = vmatpush1.bf16.msra.mxu1 %v3111_v58  ;;  %1226 = vmatpush1.bf16.msra.mxu0 %v3122_v60 }
 0x647   : > { %1186 = vmatprep.subr.bf16.mxu1 %v3117_v59  ;;  %1227 = vmatprep.subr.bf16.mxu0 %v3127_v61 }
 0x64a   : > { %1187 = vmatpush1.bf16.msra.mxu1 %v3133_v63  ;;  %1228 = vmatpush1.bf16.msra.mxu0 %v3143_v1 }
 0x64b   : > { %1188 = vmatprep.subr.bf16.mxu1 %v3138_v0  ;;  %1229 = vmatprep.subr.bf16.mxu0 %v3148_v2 }
 0x64e   : > { %1189 = vmatpush1.bf16.msra.mxu1 %v3154_v3  ;;  %1230 = vmatpush1.bf16.msra.mxu0 %v3164_v5 }
 0x64f   : > { %1190 = vmatprep.subr.bf16.mxu1 %v3159_v4  ;;  %1231 = vmatprep.subr.bf16.mxu0 %v3169_v6 }
 0x652   : > { %1191 = vmatpush1.bf16.msra.mxu1 %v3174_v7  ;;  %1232 = vmatpush1.bf16.msra.mxu0 %v3184_v9 }
 0x653   : > { %1192 = vmatprep.subr.bf16.mxu1 %v3179_v8  ;;  %1233 = vmatprep.subr.bf16.mxu0 %v3189_v10 }
 0x656   : > { %1193 = vmatpush1.bf16.msra.mxu1 %v3194_v11  ;;  %1234 = vmatpush1.bf16.msra.mxu0 %v3204_v13 }
 0x657   : > { %1194 = vmatprep.subr.bf16.mxu1 %v3199_v12  ;;  %1235 = vmatprep.subr.bf16.mxu0 %v3209_v14 }
 0x65a   : > { %1195 = vmatpush1.bf16.msra.mxu1 %v3214_v15  ;;  %1236 = vmatpush1.bf16.msra.mxu0 %v3224_v17 }
 0x65b   : > { %1196 = vmatprep.subr.bf16.mxu1 %v3219_v16  ;;  %1237 = vmatprep.subr.bf16.mxu0 %v3229_v18 }
 0x65e   : > { %1197 = vmatpush1.bf16.msra.mxu1 %v3234_v19  ;;  %1238 = vmatpush1.bf16.msra.mxu0 %v3240_v20 }
 0x65f   : > { %2610 = vmatprep.subr.bf16.mxu1 %v3865_v33 }
 0x661   : > { %1215 = vmatmul.mubr.bf16.vlgmr.msra.gmra.mrb[16].mxu1 %v1181_v22  ;;  %1256 = vmatmul.mubr.bf16.vlgmr.msra.gmra.mrb[20].mxu0 %v1181_v22  ;;  %v1180_v22 = vunpack.c.h.bf16 %v3875_v40 }
 0x662   : > { %2611 = vmatpush3.bf16.msra.mxu1 %v3249_v21  ;;  %2626 = vmatprep.mubr.msk.bf16.mxu1 %vm2875_vm0, %v3865_v33 }
 0x663   : > { %2612 = vmatprep.subr.bf16.mxu1 %v3865_v33 }
 0x666   : > { %2613 = vmatpush3.bf16.msra.mxu1 %v3256_v23 }
 0x667   : > { %2614 = vmatprep.subr.bf16.mxu1 %v3865_v33 }
 0x66a   : > { %2615 = vmatpush3.bf16.msra.mxu1 %v3262_v24 }
 0x66b   : > { %2616 = vmatprep.subr.bf16.mxu1 %v3865_v33 }
 0x66e   : > { %2617 = vmatpush3.bf16.msra.mxu1 %v3268_v25 }
 0x66f   : > { %2618 = vmatprep.subr.bf16.mxu1 %v3865_v33 }
 0x672   : > { %2619 = vmatpush3.bf16.msra.mxu1 %v3274_v26 }
 0x673   : > { %2620 = vmatprep.subr.bf16.mxu1 %v3865_v33 }
 0x676   : > { %2621 = vmatpush3.bf16.msra.mxu1 %v3279_v27 }
 0x677   : > { %2622 = vmatprep.subr.bf16.mxu1 %v3865_v33 }
 0x67a   : > { %2623 = vmatpush3.bf16.msra.mxu1 %v3287_v28 }
 0x67b   : > { %2624 = vmatprep.subr.bf16.mxu1 %v3865_v33 }
 0x67e   : > { %2625 = vmatpush3.bf16.msra.mxu1 %v3293_v29 }
 0x734   : > { %v1216_v44 = vpop.f32.mrb[16].mxu1  ;;  %v1257_v45 = vpop.f32.mrb[20].mxu0 }
 0x735   : > { %v1264_v46 = vadd.f32 %v1216_v44, %v1177_v39  ;;  %v1218_v43 = vpop.f32.mrb[17].mxu1  ;;  %v1259_v41 = vpop.f32.mrb[21].mxu0  ;;  %v1266_v34 = vadd.f32 %v1257_v45, %v1179_v30 }
 0x736   : > { %v1265_v37 = vadd.f32 %v1218_v43, %v1178_v38  ;;  %v1220_v47 = vpop.f32.mrb[18].mxu1  ;;  %v1261_v48 = vpop.f32.mrb[22].mxu0  ;;  %v1267_v51 = vadd.f32 %v1259_v41, %v1180_v22 }
 0x737   : > { %v2435_v35 = vmul.f32 -1.442695, %v1264_v46  ;;  %v1221_v31 = vpop.f32.mrb[19].mxu1  ;;  %v1262_v50 = vpop.f32.mrb[23].mxu0  ;;  %v2437_v42 = vmul.f32 -1.442695, %v1266_v34 }
 0x738   : > { %v2436_v62 = vmul.f32 -1.442695, %v1265_v37 }
 0x739   : > { %2769 = vpow2.f32 %v2435_v35  ;;  %v3876_v35 = vclamps-f32 %v3457_v32, 3.0 }
 0x73a   : > { %2771 = vpow2.f32 %v2436_v62 }
 0x73b   : > { %2773 = vtanh.f32 %v1267_v51 }
 0x73c   : > { %2775 = vpow2.f32 %v2437_v42 }
 0x743   : > { %v2770_v49 = vpop.eup %2769 }
 0x744   : > { %v2772_v39 = vpop.eup %2771  ;;  %v1277_v44 = vadd.f32 1.0, %v2770_v49 }
 0x745   : > { %v1278_v38 = vadd.f32 1.0, %v2772_v39  ;;  %v2774_v46 = vpop.eup %2773 }
 0x746   : > { %2777 = vrcp.f32 %v1277_v44  ;;  %v2776_v43 = vpop.eup %2775 }
 0x747   : > { %2779 = vrcp.f32 %v1278_v38  ;;  %v1279_v41 = vadd.f32 1.0, %v2776_v43 }
 0x749   : > { %2781 = vrcp.f32 %v1279_v41 }
 0x750   : > { %v2778_v37 = vpop.eup %2777 }
 0x751   : > { %v2780_v47 = vpop.eup %2779  ;;  %v1288_v48 = vmul.f32 %v2778_v37, %v2774_v46 }
 0x752   : > { %v1287_v45 = vmul.f32 %v2780_v47, %v3876_v35 }
 0x753   : > { %v2782_v42 = vpop.eup %2781 }
 0x754   : > { %v3535_v34 = vadd.f32 %v1288_v48, %v1287_v45 }
 0x756   : > { %v3855_v49 = vclamps-f32 %v3535_v34, 3.0 }
 0x758   : > { %2783 = vtanh.f32 %v3855_v49 }
 0x762   : > { %v2784_v31 = vpop.eup %2783 }
 0x763   : > { %v1293_v50 = vmul.f32 %v2784_v31, %v2782_v42 }
 0x765   : > { %v1294_v62 = vpack.c.bf16 %v1293_v50, %v1293_v50 }
 0x767   : > { %2627 = vmatmul.mubr.bf16.vlgmr.msra.gmra.mrb[20].mxu1 %v1294_v62 }
 0x83a   : > { %v1329_v40 = vpop.f32.mrb[20].mxu1 }
 0x83b   : > { %v2439_v30 = vclamps-f32 %v1329_v40, 3.0  ;;  %v2628_v32 = vpop.f32.mrb[21].mxu1 }
 0x83c   : > { %v1332_v22 = vpop.f32.mrb[22].mxu1 }
 0x83d   : > { %1339 = vst [vmem:[%s1338_s22] sm:$0xff] %v2439_v30  ;;  %v2629_v51 = vpop.f32.mrb[23].mxu1 }
 0x83e   : > { %2861 = dma.done.wait [#allocation3], 256 }
 0x83f   : > { %2862 = vsyncadd [#allocation3], 4294967040  ;;  %s3544_s24 = scalar_select %p214_p4, 5, 2 }
 0x841   : > { %s2441_s15 = sshll.u32 %s3544_s24, 2 }
 0x842   : > { %s1344_s26 = sadd.s32 %s2441_s15, %s2974_s25 }
 0x843   : > { %s2442_s27 = sshll.u32 %s1344_s26, 2 }
 0x844   : > { %s1346_s30 = scalar_lea.vmem %s3839_s0, %s2442_s27 }
 0x845   : > { %v3551_v39 = vld [vmem:[%s1346_s30] sm:$0xff]  ;;  %v3553_v44 = vld [vmem:[%s1346_s30 + $0x8] sm:$0xff] }
 0x846   : > { %3877 = vst [vmem:[#allocation21_spill] sm:$0xff] %v3551_v39  ;;  %3878 = vst [vmem:[#allocation22_spill] sm:$0xff] %v3553_v44 }
 0x847   : > { %1390 = vsyncadd [#allocation3 + $0x1], 256  ;;  %1398 = vmatprep.subr.bf16.mxu0 %v3085_v52  ;;  %1439 = vmatprep.subr.bf16.mxu1 %v3097_v55  ;;  %v1397_v38 = vpack.c.bf16 %v2439_v30, %v2439_v30  ;;  %v3879_v46 = vld [vmem:[#allocation20_spill] sm:$0xff]  ;;  %v3880_v22 = vld [vmem:[#allocation23_spill] sm:$0xff]  ;;  %s2448_s4 = sshll.u32 %s3466_s11, 3 }
 0x848   : > { %1399 = vmatpush1.bf16.msra.mxu0 %v3089_v53  ;;  %1440 = vmatpush1.bf16.msra.mxu1 %v3102_v56  ;;  %v1393_v43 = vunpack.c.l.bf16 %v3879_v46  ;;  %v1394_v37 = vunpack.c.h.bf16 %v3879_v46  ;;  %v1395_v51 = vunpack.c.l.bf16 %v3880_v22  ;;  %s1554_s5 = scalar_lea.vmem %s2925_s23, %s2448_s4 }
 0x849   : > { %1400 = vmatprep.subr.bf16.mxu0 %v3093_v54  ;;  %1441 = vmatprep.subr.bf16.mxu1 %v3106_v57 }
 0x84a   : > { %1430 = vmatprep.mubr.bf16.mxu0 %v3869_v36  ;;  %1471 = vmatprep.mubr.bf16.mxu1 %v3869_v36 }
 0x84c   : > { %1401 = vmatpush1.bf16.msra.mxu0 %v3111_v58  ;;  %1442 = vmatpush1.bf16.msra.mxu1 %v3122_v60 }
 0x84d   : > { %1402 = vmatprep.subr.bf16.mxu0 %v3117_v59  ;;  %1443 = vmatprep.subr.bf16.mxu1 %v3127_v61 }
 0x850   : > { %1403 = vmatpush1.bf16.msra.mxu0 %v3133_v63  ;;  %1444 = vmatpush1.bf16.msra.mxu1 %v3143_v1 }
 0x851   : > { %1404 = vmatprep.subr.bf16.mxu0 %v3138_v0  ;;  %1445 = vmatprep.subr.bf16.mxu1 %v3148_v2 }
 0x854   : > { %1405 = vmatpush1.bf16.msra.mxu0 %v3154_v3  ;;  %1446 = vmatpush1.bf16.msra.mxu1 %v3164_v5 }
 0x855   : > { %1406 = vmatprep.subr.bf16.mxu0 %v3159_v4  ;;  %1447 = vmatprep.subr.bf16.mxu1 %v3169_v6 }
 0x858   : > { %1407 = vmatpush1.bf16.msra.mxu0 %v3174_v7  ;;  %1448 = vmatpush1.bf16.msra.mxu1 %v3184_v9 }
 0x859   : > { %1408 = vmatprep.subr.bf16.mxu0 %v3179_v8  ;;  %1449 = vmatprep.subr.bf16.mxu1 %v3189_v10 }
 0x85c   : > { %1409 = vmatpush1.bf16.msra.mxu0 %v3194_v11  ;;  %1450 = vmatpush1.bf16.msra.mxu1 %v3204_v13 }
 0x85d   : > { %1410 = vmatprep.subr.bf16.mxu0 %v3199_v12  ;;  %1451 = vmatprep.subr.bf16.mxu1 %v3209_v14 }
 0x860   : > { %1411 = vmatpush1.bf16.msra.mxu0 %v3214_v15  ;;  %1452 = vmatpush1.bf16.msra.mxu1 %v3224_v17 }
 0x861   : > { %1412 = vmatprep.subr.bf16.mxu0 %v3219_v16  ;;  %1453 = vmatprep.subr.bf16.mxu1 %v3229_v18 }
 0x864   : > { %1413 = vmatpush1.bf16.msra.mxu0 %v3234_v19  ;;  %1454 = vmatpush1.bf16.msra.mxu1 %v3240_v20 }
 0x865   : > { %2630 = vmatprep.subr.bf16.mxu0 %v3865_v33 }
 0x867   : > { %1431 = vmatmul.mubr.bf16.vlgmr.msra.gmra.mrb[24].mxu0 %v1397_v38  ;;  %1472 = vmatmul.mubr.bf16.vlgmr.msra.gmra.mrb[24].mxu1 %v1397_v38  ;;  %v1396_v38 = vunpack.c.h.bf16 %v3880_v22 }
 0x868   : > { %2631 = vmatpush3.bf16.msra.mxu0 %v3249_v21  ;;  %2646 = vmatprep.mubr.msk.bf16.mxu0 %vm2875_vm0, %v3865_v33 }
 0x869   : > { %2632 = vmatprep.subr.bf16.mxu0 %v3865_v33 }
 0x86c   : > { %2633 = vmatpush3.bf16.msra.mxu0 %v3256_v23 }
 0x86d   : > { %2634 = vmatprep.subr.bf16.mxu0 %v3865_v33 }
 0x870   : > { %2635 = vmatpush3.bf16.msra.mxu0 %v3262_v24 }
 0x871   : > { %2636 = vmatprep.subr.bf16.mxu0 %v3865_v33 }
 0x874   : > { %2637 = vmatpush3.bf16.msra.mxu0 %v3268_v25 }
 0x875   : > { %2638 = vmatprep.subr.bf16.mxu0 %v3865_v33 }
 0x878   : > { %2639 = vmatpush3.bf16.msra.mxu0 %v3274_v26 }
 0x879   : > { %2640 = vmatprep.subr.bf16.mxu0 %v3865_v33 }
 0x87c   : > { %2641 = vmatpush3.bf16.msra.mxu0 %v3279_v27 }
 0x87d   : > { %2642 = vmatprep.subr.bf16.mxu0 %v3865_v33 }
 0x880   : > { %2643 = vmatpush3.bf16.msra.mxu0 %v3287_v28 }
 0x881   : > { %2644 = vmatprep.subr.bf16.mxu0 %v3865_v33 }
 0x884   : > { %2645 = vmatpush3.bf16.msra.mxu0 %v3293_v29 }
 0x93a   : > { %v1432_v47 = vpop.f32.mrb[24].mxu0  ;;  %v1473_v48 = vpop.f32.mrb[24].mxu1 }
 0x93b   : > { %v1480_v35 = vadd.f32 %v1432_v47, %v1393_v43  ;;  %v1434_v45 = vpop.f32.mrb[25].mxu0  ;;  %v1475_v41 = vpop.f32.mrb[25].mxu1  ;;  %v1482_v49 = vadd.f32 %v1473_v48, %v1395_v51 }
 0x93c   : > { %v1481_v42 = vadd.f32 %v1434_v45, %v1394_v37  ;;  %v1436_v31 = vpop.f32.mrb[26].mxu0  ;;  %v1477_v50 = vpop.f32.mrb[26].mxu1  ;;  %v1483_v46 = vadd.f32 %v1475_v41, %v1396_v38 }
 0x93d   : > { %v2443_v62 = vmul.f32 -1.442695, %v1480_v35  ;;  %v1437_v40 = vpop.f32.mrb[27].mxu0  ;;  %v1478_v30 = vpop.f32.mrb[27].mxu1  ;;  %v2445_v44 = vmul.f32 -1.442695, %v1482_v49 }
 0x93e   : > { %v2444_v32 = vmul.f32 -1.442695, %v1481_v42 }
 0x93f   : > { %2785 = vpow2.f32 %v2443_v62  ;;  %v3881_v62 = vclamps-f32 %v3535_v34, 3.0 }
 0x940   : > { %2787 = vpow2.f32 %v2444_v32 }
 0x941   : > { %2789 = vtanh.f32 %v1483_v46 }
 0x942   : > { %2791 = vpow2.f32 %v2445_v44 }
 0x949   : > { %v2786_v39 = vpop.eup %2785 }
 0x94a   : > { %v2788_v43 = vpop.eup %2787  ;;  %v1493_v47 = vadd.f32 1.0, %v2786_v39 }
 0x94b   : > { %v1494_v37 = vadd.f32 1.0, %v2788_v43  ;;  %v2790_v35 = vpop.eup %2789 }
 0x94c   : > { %2793 = vrcp.f32 %v1493_v47  ;;  %v2792_v45 = vpop.eup %2791 }
 0x94d   : > { %2795 = vrcp.f32 %v1494_v37  ;;  %v1495_v41 = vadd.f32 1.0, %v2792_v45 }
 0x94f   : > { %2797 = vrcp.f32 %v1495_v41 }
 0x956   : > { %v2794_v42 = vpop.eup %2793 }
 0x957   : > { %v2796_v31 = vpop.eup %2795  ;;  %v1504_v50 = vmul.f32 %v2794_v42, %v2790_v35 }
 0x958   : > { %v1503_v48 = vmul.f32 %v2796_v31, %v3881_v62 }
 0x959   : > { %v2798_v44 = vpop.eup %2797 }
 0x95a   : > { %v3613_v49 = vadd.f32 %v1504_v50, %v1503_v48 }
 0x95c   : > { %v3858_v39 = vclamps-f32 %v3613_v49, 3.0 }
 0x95e   : > { %2799 = vtanh.f32 %v3858_v39 }
 0x968   : > { %v2800_v40 = vpop.eup %2799 }
 0x969   : > { %v1509_v30 = vmul.f32 %v2800_v40, %v2798_v44 }
 0x96b   : > { %v1510_v32 = vpack.c.bf16 %v1509_v30, %v1509_v30 }
 0x96d   : > { %2647 = vmatmul.mubr.bf16.vlgmr.msra.gmra.mrb[28].mxu0 %v1510_v32 }
 0xa40   : > { %v1545_v22 = vpop.f32.mrb[28].mxu0 }
 0xa41   : > { %v2447_v51 = vclamps-f32 %v1545_v22, 3.0  ;;  %v2648_v34 = vpop.f32.mrb[29].mxu0 }
 0xa42   : > { %v1548_v38 = vpop.f32.mrb[30].mxu0 }
 0xa43   : > { %1555 = vst [vmem:[%s1554_s5] sm:$0xff] %v2447_v51  ;;  %v2649_v46 = vpop.f32.mrb[31].mxu0 }
 0xa44   : > { %2863 = dma.done.wait [#allocation3 + $0x1], 256 }
 0xa45   : > { %2864 = vsyncadd [#allocation3 + $0x1], 4294967040  ;;  %s3622_s6 = scalar_select %p214_p4, 6, 1 }
 0xa47   : > { %s2449_s7 = sshll.u32 %s3622_s6, 2 }
 0xa48   : > { %s1560_s8 = sadd.s32 %s2449_s7, %s2974_s25 }
 0xa49   : > { %s2450_s9 = sshll.u32 %s1560_s8, 2 }
 0xa4a   : > { %s1562_s14 = scalar_lea.vmem %s3839_s0, %s2450_s9 }
 0xa4b   : > { %v3629_v43 = vld [vmem:[%s1562_s14] sm:$0xff]  ;;  %v3631_v47 = vld [vmem:[%s1562_s14 + $0x8] sm:$0xff] }
 0xa4c   : > { %3882 = vst [vmem:[#allocation20_spill] sm:$0xff] %v3629_v43  ;;  %3883 = vst [vmem:[#allocation23_spill] sm:$0xff] %v3631_v47 }
 0xa4d   : > { %1606 = vsyncadd [#allocation3], 256  ;;  %1614 = vmatprep.subr.bf16.mxu1 %v3085_v52  ;;  %1655 = vmatprep.subr.bf16.mxu0 %v3097_v55  ;;  %v1613_v37 = vpack.c.bf16 %v2447_v51, %v2447_v51  ;;  %v3884_v35 = vld [vmem:[#allocation21_spill] sm:$0xff]  ;;  %v3885_v38 = vld [vmem:[#allocation22_spill] sm:$0xff]  ;;  %s2456_s16 = sshll.u32 %s3544_s24, 3 }
 0xa4e   : > { %1615 = vmatpush1.bf16.msra.mxu1 %v3089_v53  ;;  %1656 = vmatpush1.bf16.msra.mxu0 %v3102_v56  ;;  %v1609_v45 = vunpack.c.l.bf16 %v3884_v35  ;;  %v1610_v42 = vunpack.c.h.bf16 %v3884_v35  ;;  %v1611_v46 = vunpack.c.l.bf16 %v3885_v38  ;;  %s1770_s17 = scalar_lea.vmem %s2925_s23, %s2456_s16 }
 0xa4f   : > { %1616 = vmatprep.subr.bf16.mxu1 %v3093_v54  ;;  %1657 = vmatprep.subr.bf16.mxu0 %v3106_v57 }
 0xa50   : > { %1646 = vmatprep.mubr.bf16.mxu1 %v3869_v36  ;;  %1687 = vmatprep.mubr.bf16.mxu0 %v3869_v36 }
 0xa52   : > { %1617 = vmatpush1.bf16.msra.mxu1 %v3111_v58  ;;  %1658 = vmatpush1.bf16.msra.mxu0 %v3122_v60 }
 0xa53   : > { %1618 = vmatprep.subr.bf16.mxu1 %v3117_v59  ;;  %1659 = vmatprep.subr.bf16.mxu0 %v3127_v61 }
 0xa56   : > { %1619 = vmatpush1.bf16.msra.mxu1 %v3133_v63  ;;  %1660 = vmatpush1.bf16.msra.mxu0 %v3143_v1 }
 0xa57   : > { %1620 = vmatprep.subr.bf16.mxu1 %v3138_v0  ;;  %1661 = vmatprep.subr.bf16.mxu0 %v3148_v2 }
 0xa5a   : > { %1621 = vmatpush1.bf16.msra.mxu1 %v3154_v3  ;;  %1662 = vmatpush1.bf16.msra.mxu0 %v3164_v5 }
 0xa5b   : > { %1622 = vmatprep.subr.bf16.mxu1 %v3159_v4  ;;  %1663 = vmatprep.subr.bf16.mxu0 %v3169_v6 }
 0xa5e   : > { %1623 = vmatpush1.bf16.msra.mxu1 %v3174_v7  ;;  %1664 = vmatpush1.bf16.msra.mxu0 %v3184_v9 }
 0xa5f   : > { %1624 = vmatprep.subr.bf16.mxu1 %v3179_v8  ;;  %1665 = vmatprep.subr.bf16.mxu0 %v3189_v10 }
 0xa62   : > { %1625 = vmatpush1.bf16.msra.mxu1 %v3194_v11  ;;  %1666 = vmatpush1.bf16.msra.mxu0 %v3204_v13 }
 0xa63   : > { %1626 = vmatprep.subr.bf16.mxu1 %v3199_v12  ;;  %1667 = vmatprep.subr.bf16.mxu0 %v3209_v14 }
 0xa66   : > { %1627 = vmatpush1.bf16.msra.mxu1 %v3214_v15  ;;  %1668 = vmatpush1.bf16.msra.mxu0 %v3224_v17 }
 0xa67   : > { %1628 = vmatprep.subr.bf16.mxu1 %v3219_v16  ;;  %1669 = vmatprep.subr.bf16.mxu0 %v3229_v18 }
 0xa6a   : > { %1629 = vmatpush1.bf16.msra.mxu1 %v3234_v19  ;;  %1670 = vmatpush1.bf16.msra.mxu0 %v3240_v20 }
 0xa6b   : > { %2650 = vmatprep.subr.bf16.mxu1 %v3865_v33 }
 0xa6d   : > { %1647 = vmatmul.mubr.bf16.vlgmr.msra.gmra.mrb[28].mxu1 %v1613_v37  ;;  %1688 = vmatmul.mubr.bf16.vlgmr.msra.gmra.mrb[32].mxu0 %v1613_v37  ;;  %v1612_v37 = vunpack.c.h.bf16 %v3885_v38 }
 0xa6e   : > { %2651 = vmatpush3.bf16.msra.mxu1 %v3249_v21  ;;  %2666 = vmatprep.mubr.msk.bf16.mxu1 %vm2875_vm0, %v3865_v33 }
 0xa6f   : > { %2652 = vmatprep.subr.bf16.mxu1 %v3865_v33 }
 0xa72   : > { %2653 = vmatpush3.bf16.msra.mxu1 %v3256_v23 }
 0xa73   : > { %2654 = vmatprep.subr.bf16.mxu1 %v3865_v33 }
 0xa76   : > { %2655 = vmatpush3.bf16.msra.mxu1 %v3262_v24 }
 0xa77   : > { %2656 = vmatprep.subr.bf16.mxu1 %v3865_v33 }
 0xa7a   : > { %2657 = vmatpush3.bf16.msra.mxu1 %v3268_v25 }
 0xa7b   : > { %2658 = vmatprep.subr.bf16.mxu1 %v3865_v33 }
 0xa7e   : > { %2659 = vmatpush3.bf16.msra.mxu1 %v3274_v26 }
 0xa7f   : > { %2660 = vmatprep.subr.bf16.mxu1 %v3865_v33 }
 0xa82   : > { %2661 = vmatpush3.bf16.msra.mxu1 %v3279_v27 }
 0xa83   : > { %2662 = vmatprep.subr.bf16.mxu1 %v3865_v33 }
 0xa86   : > { %2663 = vmatpush3.bf16.msra.mxu1 %v3287_v28 }
 0xa87   : > { %2664 = vmatprep.subr.bf16.mxu1 %v3865_v33 }
 0xa8a   : > { %2665 = vmatpush3.bf16.msra.mxu1 %v3293_v29 }
 0xb40   : > { %v1648_v31 = vpop.f32.mrb[28].mxu1  ;;  %v1689_v50 = vpop.f32.mrb[32].mxu0 }
 0xb41   : > { %v1696_v62 = vadd.f32 %v1648_v31, %v1609_v45  ;;  %v1650_v48 = vpop.f32.mrb[29].mxu1  ;;  %v1691_v41 = vpop.f32.mrb[33].mxu0  ;;  %v1698_v39 = vadd.f32 %v1689_v50, %v1611_v46 }
 0xb42   : > { %v1697_v44 = vadd.f32 %v1650_v48, %v1610_v42  ;;  %v1652_v40 = vpop.f32.mrb[30].mxu1  ;;  %v1693_v30 = vpop.f32.mrb[34].mxu0  ;;  %v1699_v35 = vadd.f32 %v1691_v41, %v1612_v37 }
 0xb43   : > { %v2451_v32 = vmul.f32 -1.442695, %v1696_v62  ;;  %v1653_v22 = vpop.f32.mrb[31].mxu1  ;;  %v1694_v51 = vpop.f32.mrb[35].mxu0  ;;  %v2453_v47 = vmul.f32 -1.442695, %v1698_v39 }
 0xb44   : > { %v2452_v34 = vmul.f32 -1.442695, %v1697_v44 }
 0xb45   : > { %2801 = vpow2.f32 %v2451_v32  ;;  %v3886_v32 = vclamps-f32 %v3613_v49, 3.0 }
 0xb46   : > { %2803 = vpow2.f32 %v2452_v34 }
 0xb47   : > { %2805 = vtanh.f32 %v1699_v35 }
 0xb48   : > { %2807 = vpow2.f32 %v2453_v47 }
 0xb4f   : > { %v2802_v43 = vpop.eup %2801 }
 0xb50   : > { %v2804_v45 = vpop.eup %2803  ;;  %v1709_v31 = vadd.f32 1.0, %v2802_v43 }
 0xb51   : > { %v1710_v42 = vadd.f32 1.0, %v2804_v45  ;;  %v2806_v62 = vpop.eup %2805 }
 0xb52   : > { %2809 = vrcp.f32 %v1709_v31  ;;  %v2808_v48 = vpop.eup %2807 }
 0xb53   : > { %2811 = vrcp.f32 %v1710_v42  ;;  %v1711_v41 = vadd.f32 1.0, %v2808_v48 }
 0xb55   : > { %2813 = vrcp.f32 %v1711_v41 }
 0xb5c   : > { %v2810_v44 = vpop.eup %2809 }
 0xb5d   : > { %v2812_v40 = vpop.eup %2811  ;;  %v1720_v30 = vmul.f32 %v2810_v44, %v2806_v62 }
 0xb5e   : > { %v1719_v50 = vmul.f32 %v2812_v40, %v3886_v32 }
 0xb5f   : > { %v2814_v47 = vpop.eup %2813 }
 0xb60   : > { %v3691_v39 = vadd.f32 %v1720_v30, %v1719_v50 }
 0xb62   : > { %v3861_v43 = vclamps-f32 %v3691_v39, 3.0 }
 0xb64   : > { %2815 = vtanh.f32 %v3861_v43 }
 0xb6e   : > { %v2816_v22 = vpop.eup %2815 }
 0xb6f   : > { %v1725_v51 = vmul.f32 %v2816_v22, %v2814_v47 }
 0xb71   : > { %v1726_v34 = vpack.c.bf16 %v1725_v51, %v1725_v51 }
 0xb73   : > { %2667 = vmatmul.mubr.bf16.vlgmr.msra.gmra.mrb[32].mxu1 %v1726_v34 }
 0xc46   : > { %v1761_v38 = vpop.f32.mrb[32].mxu1 }
 0xc47   : > { %v2455_v46 = vclamps-f32 %v1761_v38, 3.0  ;;  %v2668_v49 = vpop.f32.mrb[33].mxu1 }
 0xc48   : > { %v1764_v37 = vpop.f32.mrb[34].mxu1 }
 0xc49   : > { %1771 = vst [vmem:[%s1770_s17] sm:$0xff] %v2455_v46  ;;  %v2669_v35 = vpop.f32.mrb[35].mxu1 }
 0xc4a   : > { %2865 = dma.done.wait [#allocation3], 256 }
 0xc4b   : > { %2866 = vsyncadd [#allocation3], 4294967040  ;;  %s3700_s18 = scalar_select %p214_p4, 7, 0 }
 0xc4d   : > { %s2457_s19 = sshll.u32 %s3700_s18, 2 }
 0xc4e   : > { %s1776_s20 = sadd.s32 %s2457_s19, %s2974_s25 }
 0xc4f   : > { %s2458_s21 = sshll.u32 %s1776_s20, 2 }
 0xc50   : > { %s1778_s15 = scalar_lea.vmem %s3839_s0, %s2458_s21 }
 0xc51   : > { %v3707_v45 = vld [vmem:[%s1778_s15] sm:$0xff]  ;;  %v3709_v31 = vld [vmem:[%s1778_s15 + $0x8] sm:$0xff] }
 0xc52   : > { %3887 = vst [vmem:[#allocation21_spill] sm:$0xff] %v3707_v45  ;;  %3888 = vst [vmem:[#allocation22_spill] sm:$0xff] %v3709_v31 }
 0xc53   : > { %1822 = vsyncadd [#allocation3 + $0x1], 256  ;;  %1830 = vmatprep.subr.bf16.mxu0 %v3085_v52  ;;  %1871 = vmatprep.subr.bf16.mxu1 %v3097_v55  ;;  %v1829_v42 = vpack.c.bf16 %v2455_v46, %v2455_v46  ;;  %v3889_v62 = vld [vmem:[#allocation20_spill] sm:$0xff]  ;;  %v3890_v37 = vld [vmem:[#allocation23_spill] sm:$0xff]  ;;  %s2464_s13 = sshll.u32 %s3622_s6, 3 }
 0xc54   : > { %1831 = vmatpush1.bf16.msra.mxu0 %v3089_v53  ;;  %1872 = vmatpush1.bf16.msra.mxu1 %v3102_v56  ;;  %v1825_v48 = vunpack.c.l.bf16 %v3889_v62  ;;  %v1826_v44 = vunpack.c.h.bf16 %v3889_v62  ;;  %v1827_v35 = vunpack.c.l.bf16 %v3890_v37  ;;  %s1986_s25 = scalar_lea.vmem %s2925_s23, %s2464_s13 }
 0xc55   : > { %1832 = vmatprep.subr.bf16.mxu0 %v3093_v54  ;;  %1873 = vmatprep.subr.bf16.mxu1 %v3106_v57 }
 0xc56   : > { %1862 = vmatprep.mubr.bf16.mxu0 %v3869_v36  ;;  %1903 = vmatprep.mubr.bf16.mxu1 %v3869_v36 }
 0xc58   : > { %1833 = vmatpush1.bf16.msra.mxu0 %v3111_v58  ;;  %1874 = vmatpush1.bf16.msra.mxu1 %v3122_v60 }
 0xc59   : > { %1834 = vmatprep.subr.bf16.mxu0 %v3117_v59  ;;  %1875 = vmatprep.subr.bf16.mxu1 %v3127_v61 }
 0xc5c   : > { %1835 = vmatpush1.bf16.msra.mxu0 %v3133_v63  ;;  %1876 = vmatpush1.bf16.msra.mxu1 %v3143_v1 }
 0xc5d   : > { %1836 = vmatprep.subr.bf16.mxu0 %v3138_v0  ;;  %1877 = vmatprep.subr.bf16.mxu1 %v3148_v2 }
 0xc60   : > { %1837 = vmatpush1.bf16.msra.mxu0 %v3154_v3  ;;  %1878 = vmatpush1.bf16.msra.mxu1 %v3164_v5 }
 0xc61   : > { %1838 = vmatprep.subr.bf16.mxu0 %v3159_v4  ;;  %1879 = vmatprep.subr.bf16.mxu1 %v3169_v6 }
 0xc64   : > { %1839 = vmatpush1.bf16.msra.mxu0 %v3174_v7  ;;  %1880 = vmatpush1.bf16.msra.mxu1 %v3184_v9 }
 0xc65   : > { %1840 = vmatprep.subr.bf16.mxu0 %v3179_v8  ;;  %1881 = vmatprep.subr.bf16.mxu1 %v3189_v10 }
 0xc68   : > { %1841 = vmatpush1.bf16.msra.mxu0 %v3194_v11  ;;  %1882 = vmatpush1.bf16.msra.mxu1 %v3204_v13 }
 0xc69   : > { %1842 = vmatprep.subr.bf16.mxu0 %v3199_v12  ;;  %1883 = vmatprep.subr.bf16.mxu1 %v3209_v14 }
 0xc6c   : > { %1843 = vmatpush1.bf16.msra.mxu0 %v3214_v15  ;;  %1884 = vmatpush1.bf16.msra.mxu1 %v3224_v17 }
 0xc6d   : > { %1844 = vmatprep.subr.bf16.mxu0 %v3219_v16  ;;  %1885 = vmatprep.subr.bf16.mxu1 %v3229_v18 }
 0xc70   : > { %1845 = vmatpush1.bf16.msra.mxu0 %v3234_v19  ;;  %1886 = vmatpush1.bf16.msra.mxu1 %v3240_v20 }
 0xc71   : > { %2670 = vmatprep.subr.bf16.mxu0 %v3865_v33  ;;  %1997 = vmatprep.subr.bf16.mxu1 %v3085_v52 }
 0xc73   : > { %1863 = vmatmul.mubr.bf16.vlgmr.msra.gmra.mrb[36].mxu0 %v1829_v42  ;;  %1904 = vmatmul.mubr.bf16.vlgmr.msra.gmra.mrb[36].mxu1 %v1829_v42  ;;  %v1828_v42 = vunpack.c.h.bf16 %v3890_v37 }
 0xc74   : > { %2671 = vmatpush3.bf16.msra.mxu0 %v3249_v21  ;;  %2686 = vmatprep.mubr.msk.bf16.mxu0 %vm2875_vm0, %v3865_v33 }
 0xc75   : > { %2672 = vmatprep.subr.bf16.mxu0 %v3865_v33 }
 0xc78   : > { %2673 = vmatpush3.bf16.msra.mxu0 %v3256_v23 }
 0xc79   : > { %2674 = vmatprep.subr.bf16.mxu0 %v3865_v33 }
 0xc7c   : > { %2675 = vmatpush3.bf16.msra.mxu0 %v3262_v24 }
 0xc7d   : > { %2676 = vmatprep.subr.bf16.mxu0 %v3865_v33 }
 0xc80   : > { %2677 = vmatpush3.bf16.msra.mxu0 %v3268_v25 }
 0xc81   : > { %2678 = vmatprep.subr.bf16.mxu0 %v3865_v33 }
 0xc84   : > { %2679 = vmatpush3.bf16.msra.mxu0 %v3274_v26 }
 0xc85   : > { %2680 = vmatprep.subr.bf16.mxu0 %v3865_v33 }
 0xc88   : > { %2681 = vmatpush3.bf16.msra.mxu0 %v3279_v27 }
 0xc89   : > { %2682 = vmatprep.subr.bf16.mxu0 %v3865_v33 }
 0xc8c   : > { %2683 = vmatpush3.bf16.msra.mxu0 %v3287_v28 }
 0xc8d   : > { %2684 = vmatprep.subr.bf16.mxu0 %v3865_v33 }
 0xc90   : > { %2685 = vmatpush3.bf16.msra.mxu0 %v3293_v29 }
 0xc91   : > { %2038 = vmatprep.subr.bf16.mxu0 %v3097_v55 }
 0xd46   : > { %v1864_v40 = vpop.f32.mrb[36].mxu0  ;;  %v1905_v30 = vpop.f32.mrb[36].mxu1 }
 0xd47   : > { %v1912_v32 = vadd.f32 %v1864_v40, %v1825_v48  ;;  %v1866_v50 = vpop.f32.mrb[37].mxu0  ;;  %v1907_v41 = vpop.f32.mrb[37].mxu1  ;;  %v1914_v43 = vadd.f32 %v1905_v30, %v1827_v35 }
 0xd48   : > { %v1913_v47 = vadd.f32 %v1866_v50, %v1826_v44  ;;  %v1868_v22 = vpop.f32.mrb[38].mxu0  ;;  %v1909_v51 = vpop.f32.mrb[38].mxu1  ;;  %v1915_v62 = vadd.f32 %v1907_v41, %v1828_v42 }
 0xd49   : > { %v2459_v34 = vmul.f32 -1.442695, %v1912_v32  ;;  %v1869_v38 = vpop.f32.mrb[39].mxu0  ;;  %v1910_v46 = vpop.f32.mrb[39].mxu1  ;;  %v2461_v31 = vmul.f32 -1.442695, %v1914_v43 }
 0xd4a   : > { %v2460_v49 = vmul.f32 -1.442695, %v1913_v47 }
 0xd4b   : > { %2817 = vpow2.f32 %v2459_v34  ;;  %v3891_v34 = vclamps-f32 %v3691_v39, 3.0 }
 0xd4c   : > { %2819 = vpow2.f32 %v2460_v49 }
 0xd4d   : > { %2821 = vtanh.f32 %v1915_v62 }
 0xd4e   : > { %2823 = vpow2.f32 %v2461_v31 }
 0xd55   : > { %v2818_v45 = vpop.eup %2817 }
 0xd56   : > { %v2820_v48 = vpop.eup %2819  ;;  %v1925_v40 = vadd.f32 1.0, %v2818_v45 }
 0xd57   : > { %v1926_v44 = vadd.f32 1.0, %v2820_v48  ;;  %v2822_v32 = vpop.eup %2821 }
 0xd58   : > { %2825 = vrcp.f32 %v1925_v40  ;;  %v2824_v50 = vpop.eup %2823 }
 0xd59   : > { %2827 = vrcp.f32 %v1926_v44  ;;  %v1927_v41 = vadd.f32 1.0, %v2824_v50 }
 0xd5b   : > { %2829 = vrcp.f32 %v1927_v41 }
 0xd62   : > { %v2826_v47 = vpop.eup %2825 }
 0xd63   : > { %v2828_v22 = vpop.eup %2827  ;;  %v1936_v51 = vmul.f32 %v2826_v47, %v2822_v32 }
 0xd64   : > { %v1935_v30 = vmul.f32 %v2828_v22, %v3891_v34 }
 0xd65   : > { %v2830_v31 = vpop.eup %2829 }
 0xd66   : > { %v3769_v43 = vadd.f32 %v1936_v51, %v1935_v30 }
 0xd68   : > { %v2462_v45 = vclamps-f32 %v3769_v43, 3.0 }
 0xd6a   : > { %2831 = vtanh.f32 %v2462_v45 }
 0xd74   : > { %v2832_v38 = vpop.eup %2831 }
 0xd75   : > { %v1941_v46 = vmul.f32 %v2832_v38, %v2830_v31 }
 0xd77   : > { %v1942_v49 = vpack.c.bf16 %v1941_v46, %v1941_v46 }
 0xd79   : > { %2687 = vmatmul.mubr.bf16.vlgmr.msra.gmra.mrb[40].mxu0 %v1942_v49 }
 0xe4c   : > { %v1977_v37 = vpop.f32.mrb[40].mxu0 }
 0xe4d   : > { %v2463_v35 = vclamps-f32 %v1977_v37, 3.0  ;;  %v2688_v39 = vpop.f32.mrb[41].mxu0 }
 0xe4e   : > { %v1980_v42 = vpop.f32.mrb[42].mxu0 }
 0xe4f   : > { %1987 = vst [vmem:[%s1986_s25] sm:$0xff] %v2463_v35  ;;  %v2689_v62 = vpop.f32.mrb[43].mxu0 }
 0xe50   : > { %2867 = dma.done.wait [#allocation3 + $0x1], 256 }
 0xe51   : > { %2868 = vsyncadd [#allocation3 + $0x1], 4294967040  ;;  %1998 = vmatpush1.bf16.msra.mxu1 %v3089_v53  ;;  %2039 = vmatpush1.bf16.msra.mxu0 %v3102_v56  ;;  %v1996_v52 = vpack.c.bf16 %v2463_v35, %v2463_v35  ;;  %v3892_v53 = vld [vmem:[#allocation21_spill] sm:$0xff]  ;;  %s2470_s26 = sshll.u32 %s3700_s18, 3 }
 0xe52   : > { %1999 = vmatprep.subr.bf16.mxu1 %v3093_v54  ;;  %2040 = vmatprep.subr.bf16.mxu0 %v3106_v57  ;;  %v1992_v54 = vunpack.c.l.bf16 %v3892_v53  ;;  %v1993_v55 = vunpack.c.h.bf16 %v3892_v53  ;;  %s2153_s27 = scalar_lea.vmem %s2925_s23, %s2470_s26 }
 0xe53   : > { %2029 = vmatprep.mubr.bf16.mxu1 %v3869_v36  ;;  %2070 = vmatprep.mubr.bf16.mxu0 %v3869_v36 }
 0xe55   : > { %2000 = vmatpush1.bf16.msra.mxu1 %v3111_v58  ;;  %2041 = vmatpush1.bf16.msra.mxu0 %v3122_v60 }
 0xe56   : > { %2001 = vmatprep.subr.bf16.mxu1 %v3117_v59  ;;  %2042 = vmatprep.subr.bf16.mxu0 %v3127_v61 }
 0xe59   : > { %2002 = vmatpush1.bf16.msra.mxu1 %v3133_v63  ;;  %2043 = vmatpush1.bf16.msra.mxu0 %v3143_v1 }
 0xe5a   : > { %2003 = vmatprep.subr.bf16.mxu1 %v3138_v0  ;;  %2044 = vmatprep.subr.bf16.mxu0 %v3148_v2 }
 0xe5d   : > { %2004 = vmatpush1.bf16.msra.mxu1 %v3154_v3  ;;  %2045 = vmatpush1.bf16.msra.mxu0 %v3164_v5  ;;  %v3893_v5 = vld [vmem:[#allocation22_spill] sm:$0xff] }
 0xe5e   : > { %2005 = vmatprep.subr.bf16.mxu1 %v3159_v4  ;;  %2046 = vmatprep.subr.bf16.mxu0 %v3169_v6  ;;  %v1994_v6 = vunpack.c.l.bf16 %v3893_v5 }
 0xe61   : > { %2006 = vmatpush1.bf16.msra.mxu1 %v3174_v7  ;;  %2047 = vmatpush1.bf16.msra.mxu0 %v3184_v9  ;;  %v1995_v7 = vunpack.c.h.bf16 %v3893_v5 }
 0xe62   : > { %2007 = vmatprep.subr.bf16.mxu1 %v3179_v8  ;;  %2048 = vmatprep.subr.bf16.mxu0 %v3189_v10 }
 0xe65   : > { %2008 = vmatpush1.bf16.msra.mxu1 %v3194_v11  ;;  %2049 = vmatpush1.bf16.msra.mxu0 %v3204_v13 }
 0xe66   : > { %2009 = vmatprep.subr.bf16.mxu1 %v3199_v12  ;;  %2050 = vmatprep.subr.bf16.mxu0 %v3209_v14 }
 0xe69   : > { %2010 = vmatpush1.bf16.msra.mxu1 %v3214_v15  ;;  %2051 = vmatpush1.bf16.msra.mxu0 %v3224_v17 }
 0xe6a   : > { %2011 = vmatprep.subr.bf16.mxu1 %v3219_v16  ;;  %2052 = vmatprep.subr.bf16.mxu0 %v3229_v18 }
 0xe6d   : > { %2012 = vmatpush1.bf16.msra.mxu1 %v3234_v19  ;;  %2053 = vmatpush1.bf16.msra.mxu0 %v3240_v20 }
 0xe6e   : > { %2690 = vmatprep.subr.bf16.mxu1 %v3865_v33 }
 0xe70   : > { %2030 = vmatmul.mubr.bf16.vlgmr.msra.gmra.mrb[40].mxu1 %v1996_v52  ;;  %2071 = vmatmul.mubr.bf16.vlgmr.msra.gmra.mrb[44].mxu0 %v1996_v52 }
 0xe71   : > { %2691 = vmatpush3.bf16.msra.mxu1 %v3249_v21  ;;  %2706 = vmatprep.mubr.msk.bf16.mxu1 %vm2875_vm0, %v3865_v33 }
 0xe72   : > { %2692 = vmatprep.subr.bf16.mxu1 %v3865_v33 }
 0xe75   : > { %2693 = vmatpush3.bf16.msra.mxu1 %v3256_v23 }
 0xe76   : > { %2694 = vmatprep.subr.bf16.mxu1 %v3865_v33 }
 0xe79   : > { %2695 = vmatpush3.bf16.msra.mxu1 %v3262_v24 }
 0xe7a   : > { %2696 = vmatprep.subr.bf16.mxu1 %v3865_v33 }
 0xe7d   : > { %2697 = vmatpush3.bf16.msra.mxu1 %v3268_v25 }
 0xe7e   : > { %2698 = vmatprep.subr.bf16.mxu1 %v3865_v33 }
 0xe81   : > { %2699 = vmatpush3.bf16.msra.mxu1 %v3274_v26 }
 0xe82   : > { %2700 = vmatprep.subr.bf16.mxu1 %v3865_v33 }
 0xe85   : > { %2701 = vmatpush3.bf16.msra.mxu1 %v3279_v27 }
 0xe86   : > { %2702 = vmatprep.subr.bf16.mxu1 %v3865_v33 }
 0xe89   : > { %2703 = vmatpush3.bf16.msra.mxu1 %v3287_v28 }
 0xe8a   : > { %2704 = vmatprep.subr.bf16.mxu1 %v3865_v33 }
 0xe8d   : > { %2705 = vmatpush3.bf16.msra.mxu1 %v3293_v29 }
 0xf43   : > { %v2031_v56 = vpop.f32.mrb[40].mxu1  ;;  %v2072_v57 = vpop.f32.mrb[44].mxu0 }
 0xf44   : > { %v2079_v58 = vadd.f32 %v2031_v56, %v1992_v54  ;;  %v2033_v59 = vpop.f32.mrb[41].mxu1  ;;  %v2074_v60 = vpop.f32.mrb[45].mxu0  ;;  %v2081_v8 = vadd.f32 %v2072_v57, %v1994_v6 }
 0xf45   : > { %v2080_v61 = vadd.f32 %v2033_v59, %v1993_v55  ;;  %v2035_v63 = vpop.f32.mrb[42].mxu1  ;;  %v2076_v0 = vpop.f32.mrb[46].mxu0  ;;  %v2082_v9 = vadd.f32 %v2074_v60, %v1995_v7 }
 0xf46   : > { %v2465_v1 = vmul.f32 -1.442695, %v2079_v58  ;;  %v2036_v2 = vpop.f32.mrb[43].mxu1  ;;  %v2077_v3 = vpop.f32.mrb[47].mxu0  ;;  %v2467_v10 = vmul.f32 -1.442695, %v2081_v8 }
 0xf47   : > { %v2466_v4 = vmul.f32 -1.442695, %v2080_v61 }
 0xf48   : > { %2833 = vpow2.f32 %v2465_v1 }
 0xf49   : > { %2835 = vpow2.f32 %v2466_v4 }
 0xf4a   : > { %2837 = vtanh.f32 %v2082_v9 }
 0xf4b   : > { %2839 = vpow2.f32 %v2467_v10 }
 0xf52   : > { %v2834_v11 = vpop.eup %2833 }
 0xf53   : > { %v2836_v12 = vpop.eup %2835  ;;  %v2092_v13 = vadd.f32 1.0, %v2834_v11 }
 0xf54   : > { %v2093_v14 = vadd.f32 1.0, %v2836_v12  ;;  %v2838_v15 = vpop.eup %2837 }
 0xf55   : > { %2841 = vrcp.f32 %v2092_v13  ;;  %v2840_v16 = vpop.eup %2839 }
 0xf56   : > { %2843 = vrcp.f32 %v2093_v14  ;;  %v2094_v21 = vadd.f32 1.0, %v2840_v16 }
 0xf58   : > { %2845 = vrcp.f32 %v2094_v21 }
 0xf5f   : > { %v2842_v17 = vpop.eup %2841 }
 0xf60   : > { %v2844_v18 = vpop.eup %2843  ;;  %v2103_v19 = vmul.f32 %v2842_v17, %v2838_v15 }
 0xf61   : > { %v2102_v20 = vmul.f32 %v2844_v18, %v2462_v45 }
 0xf62   : > { %v2846_v25 = vpop.eup %2845 }
 0xf63   : > { %v2104_v23 = vadd.f32 %v2103_v19, %v2102_v20 }
 0xf65   : > { %v2468_v24 = vclamps-f32 %v2104_v23, 3.0 }
 0xf67   : > { %2847 = vtanh.f32 %v2468_v24 }
 0xf71   : > { %v2848_v26 = vpop.eup %2847 }
 0xf72   : > { %v2108_v27 = vmul.f32 %v2848_v26, %v2846_v25 }
 0xf74   : > { %v2109_v28 = vpack.c.bf16 %v2108_v27, %v2108_v27 }
 0xf76   : > { %2707 = vmatmul.mubr.bf16.vlgmr.msra.gmra.mrb[44].mxu1 %v2109_v28 }
0x1049   : > { %v2144_v29 = vpop.f32.mrb[44].mxu1 }
0x104a   : > { %v2469_v33 = vclamps-f32 %v2144_v29, 3.0  ;;  %v2708_v36 = vpop.f32.mrb[45].mxu1 }
0x104b   : > { %v2147_v48 = vpop.f32.mrb[46].mxu1 }
0x104c   : > { %2154 = vst [vmem:[%s2153_s27] sm:$0xff] %v2469_v33  ;;  %v2709_v40 = vpop.f32.mrb[47].mxu1 }
0x104d PF: > { %s13_s12 = sadd.s32 1, %s2871_s12  }
0x104e   : > { %p10_p5 = scmp.ge.s32.totalorder %s13_s12, 4  }
0x1050   :  { %12 = sbr.rel (!%p10_p5) target bundleno = 1 (0x1), region = 416 }
0x1057   :  { %2176 = vsyncmov [#allocation3] }
0x105a   :  { %s2177_s28 = vpop.sfrf %2176 }
0x105b   :  { %p2473_p6 = scmp.ne.s32.totalorder %s2177_s28, 0 }
0x105d   :  { %2181 = shalt.err (%p2473_p6)  }
0x105e   :  { %2183 = vsyncmov [#allocation3 + $0x1] }
0x1061   :  { %s2184_s29 = vpop.sfrf %2183 }
0x1062   :  { %p2474_p7 = scmp.ne.s32.totalorder %s2184_s29, 0 }
0x1064   :  { %2188 = shalt.err (%p2474_p7)  }

// kernel: a_call__.9
= control target key start
LH: loop header
LB: loop body
LE: loop exit
PB: predicated region body
PF: predicated region fallthrough
CT: control target
= control target key end

     0   :  { %9 = vsyncpa [#allocation3], 0  ;;  %s885_s0 = inlined_call_operand.vmem [shape: f32[4], index: 0, kind: input, shape index: {}]   ;;  %s886_s1 = inlined_call_operand.vmem [shape: f32[8,8,128], index: 1, kind: input, shape index: {}]   ;;  %s887_s2 = inlined_call_operand.vmem [shape: f32[2,8,8,128], index: 2, kind: input, shape index: {}]   ;;  %s888_s3 = inlined_call_operand.vmem [shape: f32[2,8,8,128], index: 3, kind: input, shape index: {}]   ;;  %s889_s4 = inlined_call_operand.vmem [shape: f32[8,8,256], index: 4, kind: output, shape index: {}]  }
   0x1   :  { %s16_s17 = sshll.u32 %s885_s0, 4  ;;  %s17_s17 = int_to_ptr.vmem [resolvable:$true] %s16_s17 }
   0x2   :  { %s483_s18 = scalar_lea.vmem %s17_s17, 16  ;;  %p488_p1 = scmp.lt.s32.totalorder %s17_s17, %s17_s17 }
   0x3   :  { %p484_p0 = scmp.ne.s32.totalorder %s17_s17, %s483_s18  ;;  %p489_p2 = scmp.lt.s32.totalorder %s483_s18, %s483_s18 }
   0x5   :  { %p490_p3 = por %p489_p2, %p488_p1 }
   0x7   :  { %p491_p4 = pnand %p490_p3, %p484_p0 }
   0x9   :  { %494 = shalt.err (!%p491_p4)
}
   0xa   :  { %s497_s19 = smov [#allocation2]  }
   0xb   :  { %19 = dma.vmem_to_smem %s17_s17, 16, %s497_s19, [#allocation3]  }
   0xc   :  { %495 = dma.done.wait [#allocation3], 16  }
   0xd   :  { %496 = vsyncadd [#allocation3], 4294967280 }
   0xe   :  { %29 = sfence }
   0xf   :  { %s38_s20 = sld [smem:[#allocation2]]  ;;  %s528_s21 = sld [smem:[#allocation2 + $0x1]]  ;;  %v173_v0 = vlaneseq  ;;  %v30_v1 = vld [vmem:[%s886_s1] sm:$0xff]  ;;  %v31_v2 = vld [vmem:[%s886_s1 + $0x8] sm:$0xff]  ;;  %v32_v3 = vld [vmem:[%s886_s1 + $0x10] sm:$0xff] }
  0x10   :  { %s530_s22 = sld [smem:[#allocation2 + $0x2]]  ;;  %s538_s26 = sld [smem:[#allocation2 + $0x3]]  ;;  %v33_v4 = vld [vmem:[%s886_s1 + $0x18] sm:$0xff]  ;;  %v34_v5 = vld [vmem:[%s886_s1 + $0x20] sm:$0xff]  ;;  %v35_v6 = vld [vmem:[%s886_s1 + $0x28] sm:$0xff] }
  0x11   :  { %v36_v7 = vld [vmem:[%s886_s1 + $0x30] sm:$0xff]  ;;  %v37_v8 = vld [vmem:[%s886_s1 + $0x38] sm:$0xff]  ;;  %v498_v9 = vmov 1983009808   ;;  %v49_v12 = vld [vmem:[%s887_s2] sm:$0xff]  ;;  %v566_v14 = vshrl.u32 %v173_v0, 7 }
  0x12   :  { %v558_v10 = vunpack.c.l.s4 %v498_v9  ;;  %v50_v13 = vld [vmem:[%s887_s2 + $0x8] sm:$0xff]  ;;  %v499_v15 = vmov 1934713408   ;;  %v51_v21 = vld [vmem:[%s887_s2 + $0x10] sm:$0xff]  ;;  %v52_v22 = vld [vmem:[%s887_s2 + $0x18] sm:$0xff] }
  0x13   :  { %v568_v16 = vunpack.c.l.s4 %v499_v15  ;;  %v53_v23 = vld [vmem:[%s887_s2 + $0x20] sm:$0xff]  ;;  %v54_v28 = vld [vmem:[%s887_s2 + $0x28] sm:$0xff]  ;;  %v55_v29 = vld [vmem:[%s887_s2 + $0x30] sm:$0xff] }
  0x14   :  { %v56_v30 = vld [vmem:[%s887_s2 + $0x38] sm:$0xff]  ;;  %v172_v34 = vunpack.c.0.s8 %v558_v10  ;;  %v100_v39 = vld [vmem:[%s888_s3] sm:$0xff]  ;;  %v101_v40 = vld [vmem:[%s888_s3 + $0x8] sm:$0xff] }
  0x15   :  { %v39_v11 = vstv %s38_s20  ;;  %v605_v31 = vstv %s528_s21  ;;  %v102_v45 = vld [vmem:[%s888_s3 + $0x10] sm:$0xff]  ;;  %v103_v46 = vld [vmem:[%s888_s3 + $0x18] sm:$0xff] }
  0x16   :  { %v570_v17 = vmul.f32 %v39_v11, %v30_v1  ;;  %v572_v18 = vmul.f32 %v39_v11, %v31_v2  ;;  %v574_v19 = vmul.f32 %v39_v11, %v32_v3  ;;  %v576_v20 = vmul.f32 %v39_v11, %v33_v4  ;;  %v104_v47 = vld [vmem:[%s888_s3 + $0x20] sm:$0xff]  ;;  %v105_v52 = vld [vmem:[%s888_s3 + $0x28] sm:$0xff]  ;;  %v106_v53 = vld [vmem:[%s888_s3 + $0x30] sm:$0xff] }
  0x17   :  { %v587_v24 = vmul.f32 %v39_v11, %v34_v5  ;;  %v589_v25 = vmul.f32 %v39_v11, %v35_v6  ;;  %v591_v26 = vmul.f32 %v39_v11, %v36_v7  ;;  %v593_v27 = vmul.f32 %v39_v11, %v37_v8  ;;  %v107_v54 = vld [vmem:[%s888_s3 + $0x38] sm:$0xff] }
  0x18   :  { %v608_v32 = vstv %s530_s22  ;;  %v611_v33 = vstv %s538_s26  ;;  %v58_v35 = vmul.f32 %v605_v31, %v49_v12  ;;  %v59_v36 = vmul.f32 %v605_v31, %v50_v13 }
  0x19   :  { %v60_v37 = vmul.f32 %v605_v31, %v51_v21  ;;  %v61_v38 = vmul.f32 %v605_v31, %v52_v22  ;;  %v62_v41 = vmul.f32 %v605_v31, %v53_v23  ;;  %v63_v42 = vmul.f32 %v605_v31, %v54_v28  ;;  %v462_v21 = vld [vmem:[%s887_s2 + $0x40] sm:$0xff]  ;;  %v463_v22 = vld [vmem:[%s887_s2 + $0x48] sm:$0xff] }
  0x1a   :  { %v64_v43 = vmul.f32 %v605_v31, %v55_v29  ;;  %v65_v44 = vmul.f32 %v605_v31, %v56_v30  ;;  %v66_v48 = vadd.f32 %v58_v35, %v570_v17  ;;  %v67_v49 = vadd.f32 %v59_v36, %v572_v18  ;;  %v464_v35 = vld [vmem:[%s887_s2 + $0x50] sm:$0xff] }
  0x1b   :  { %v68_v50 = vadd.f32 %v60_v37, %v574_v19  ;;  %v69_v51 = vadd.f32 %v61_v38, %v576_v20  ;;  %v70_v55 = vadd.f32 %v62_v41, %v587_v24  ;;  %v71_v56 = vadd.f32 %v63_v42, %v589_v25  ;;  %v466_v41 = vld [vmem:[%s887_s2 + $0x60] sm:$0xff] }
  0x1c   :  { %v72_v57 = vadd.f32 %v64_v43, %v591_v26  ;;  %v73_v58 = vadd.f32 %v65_v44, %v593_v27  ;;  %v109_v59 = vmul.f32 %v608_v32, %v100_v39  ;;  %v110_v60 = vmul.f32 %v608_v32, %v101_v40  ;;  %v465_v40 = vld [vmem:[%s887_s2 + $0x58] sm:$0xff]  ;;  %v467_v43 = vld [vmem:[%s887_s2 + $0x68] sm:$0xff] }
  0x1d   :  { %v111_v61 = vmul.f32 %v608_v32, %v102_v45  ;;  %v112_v62 = vmul.f32 %v608_v32, %v103_v46  ;;  %v113_v63 = vmul.f32 %v608_v32, %v104_v47  ;;  %v114_v0 = vmul.f32 %v608_v32, %v105_v52  ;;  %v469_v44 = vld [vmem:[%s887_s2 + $0x78] sm:$0xff] }
  0x1e   :  { %v115_v1 = vmul.f32 %v608_v32, %v106_v53  ;;  %v116_v2 = vmul.f32 %v608_v32, %v107_v54  ;;  %v117_v3 = vadd.f32 %v109_v59, %v66_v48  ;;  %v118_v4 = vadd.f32 %v110_v60, %v67_v49  ;;  %v472_v59 = vld [vmem:[%s888_s3 + $0x48] sm:$0xff] }
  0x1f   :  { %v119_v5 = vadd.f32 %v111_v61, %v68_v50  ;;  %v120_v6 = vadd.f32 %v112_v62, %v69_v51  ;;  %v121_v7 = vadd.f32 %v113_v63, %v70_v55  ;;  %v122_v8 = vadd.f32 %v114_v0, %v71_v56  ;;  %v474_v0 = vld [vmem:[%s888_s3 + $0x58] sm:$0xff] }
  0x20   :  { %v123_v9 = vadd.f32 %v115_v1, %v72_v57  ;;  %v124_v10 = vadd.f32 %v116_v2, %v73_v58  ;;  %v663_v11 = vmul.f32 %v611_v33, %v117_v3  ;;  %v666_v12 = vmul.f32 %v611_v33, %v118_v4  ;;  %v471_v58 = vld [vmem:[%s888_s3 + $0x40] sm:$0xff]  ;;  %v476_v3 = vld [vmem:[%s888_s3 + $0x68] sm:$0xff]  ;;  %v477_v4 = vld [vmem:[%s888_s3 + $0x70] sm:$0xff] }
  0x21   :  { %v669_v13 = vmul.f32 %v611_v33, %v119_v5  ;;  %v672_v15 = vmul.f32 %v611_v33, %v120_v6  ;;  %v681_v23 = vmul.f32 %v611_v33, %v121_v7  ;;  %v684_v28 = vmul.f32 %v611_v33, %v122_v8  ;;  %v475_v1 = vld [vmem:[%s888_s3 + $0x60] sm:$0xff]  ;;  %v478_v5 = vld [vmem:[%s888_s3 + $0x78] sm:$0xff] }
  0x22   :  { %v687_v29 = vmul.f32 %v611_v33, %v123_v9  ;;  %v690_v30 = vmul.f32 %v611_v33, %v124_v10  ;;  %v698_v37 = vsub.s32 %v172_v34, %v566_v14  ;;  %v236_v39 = vunpack.c.0.s8 %v568_v16  ;;  %v468_v16 = vld [vmem:[%s887_s2 + $0x70] sm:$0xff] }
  0x23   :  { %v168_v36 = vcombine.low %v663_v11, %v669_v13  ;;  %v184_v38 = vcombine.low %v666_v12, %v672_v15  ;;  %v83_v45 = vmul.f32 %v462_v21, %v605_v31  ;;  %v84_v46 = vmul.f32 %v463_v22, %v605_v31 }
  0x24   :  { %v200_v42 = vcombine.low %v681_v23, %v687_v29  ;;  %v216_v34 = vcombine.low %v684_v28, %v690_v30  ;;  %v731_v49 = vsub.s32 %v236_v39, %v566_v14  ;;  %v85_v50 = vmul.f32 %v464_v35, %v605_v31 }
  0x25   :  { %v725_v47 = vrot.slane %v168_v36, %v698_v37  ;;  %v728_v48 = vrot.slane %v184_v38, %v698_v37  ;;  %v86_v53 = vmul.f32 %v465_v40, %v605_v31  ;;  %v87_v54 = vmul.f32 %v466_v41, %v605_v31 }
  0x26   :  { %v735_v51 = vrot.slane %v200_v42, %v698_v37  ;;  %v738_v52 = vrot.slane %v216_v34, %v698_v37  ;;  %v88_v56 = vmul.f32 %v467_v43, %v605_v31  ;;  %v89_v14 = vmul.f32 %v468_v16, %v605_v31 }
  0x27   :  { %v232_v55 = vcombine.low %v725_v47, %v728_v48  ;;  %v90_v57 = vmul.f32 %v469_v44, %v605_v31  ;;  %v91_v61 = vadd.f32 %v83_v45, %v570_v17  ;;  %v92_v62 = vadd.f32 %v84_v46, %v572_v18  ;;  %v473_v31 = vld [vmem:[%s888_s3 + $0x50] sm:$0xff] }
  0x28   :  { %v264_v60 = vcombine.low %v735_v51, %v738_v52  ;;  %v93_v63 = vadd.f32 %v85_v50, %v574_v19  ;;  %v94_v17 = vadd.f32 %v86_v53, %v576_v20  ;;  %v95_v18 = vadd.f32 %v87_v54, %v587_v24 }
  0x29   :  { %v240_v2 = vrot.slane %v232_v55, %v731_v49  ;;  %v96_v19 = vadd.f32 %v88_v56, %v589_v25  ;;  %v97_v20 = vadd.f32 %v89_v14, %v591_v26  ;;  %v98_v24 = vadd.f32 %v90_v57, %v593_v27 }
  0x2a   :  { %v272_v6 = vrot.slane %v264_v60, %v731_v49  ;;  %v134_v25 = vmul.f32 %v471_v58, %v608_v32  ;;  %v135_v7 = vmul.f32 %v472_v59, %v608_v32  ;;  %v136_v8 = vmul.f32 %v473_v31, %v608_v32 }
  0x2b   :  { %v137_v9 = vmul.f32 %v474_v0, %v608_v32  ;;  %v138_v10 = vmul.f32 %v475_v1, %v608_v32  ;;  %v139_v22 = vmul.f32 %v476_v3, %v608_v32  ;;  %v140_v35 = vmul.f32 %v477_v4, %v608_v32 }
  0x2c   :  { %v296_v21 = vcombine.low %v240_v2, %v272_v6  ;;  %v141_v36 = vmul.f32 %v478_v5, %v608_v32  ;;  %v142_v26 = vadd.f32 %v134_v25, %v91_v61  ;;  %v143_v38 = vadd.f32 %v135_v7, %v92_v62 }
  0x2d   :  { %v144_v27 = vadd.f32 %v136_v8, %v93_v63  ;;  %v145_v39 = vadd.f32 %v137_v9, %v94_v17  ;;  %v146_v40 = vadd.f32 %v138_v10, %v95_v18  ;;  %v147_v41 = vadd.f32 %v139_v22, %v96_v19 }
  0x2e   :  { %440 = vst [vmem:[%s889_s4] sm:$0xff] %v296_v21  ;;  %v148_v42 = vadd.f32 %v140_v35, %v97_v20  ;;  %v149_v34 = vadd.f32 %v141_v36, %v98_v24  ;;  %v153_v43 = vmul.f32 %v611_v33, %v142_v26  ;;  %v155_v16 = vmul.f32 %v611_v33, %v143_v38 }
  0x2f   :  { %v157_v44 = vmul.f32 %v611_v33, %v144_v27  ;;  %v159_v32 = vmul.f32 %v611_v33, %v145_v39  ;;  %v161_v45 = vmul.f32 %v611_v33, %v146_v40  ;;  %v163_v46 = vmul.f32 %v611_v33, %v147_v41 }
  0x30   :  { %v165_v50 = vmul.f32 %v611_v33, %v148_v42  ;;  %v167_v53 = vmul.f32 %v611_v33, %v149_v34  ;;  %v297_v56 = vcombine.high %v240_v2, %v272_v6  ;;  %v233_v14 = vcombine.high %v725_v47, %v728_v48 }
  0x31   :  { %v304_v54 = vcombine.low %v153_v43, %v157_v44  ;;  %v320_v55 = vcombine.low %v155_v16, %v159_v32  ;;  %v265_v59 = vcombine.high %v735_v51, %v738_v52  ;;  %v169_v60 = vcombine.high %v663_v11, %v669_v13 }
  0x32   :  { %v336_v57 = vcombine.low %v161_v45, %v165_v50  ;;  %v352_v58 = vcombine.low %v163_v46, %v167_v53  ;;  %442 = vst [vmem:[%s889_s4 + $0x10] sm:$0xff] %v297_v56  ;;  %v247_v33 = vrot.slane %v233_v14, %v731_v49  ;;  %v185_v47 = vcombine.high %v666_v12, %v672_v15 }
  0x33   :  { %v312_v61 = vrot.slane %v304_v54, %v698_v37  ;;  %v328_v62 = vrot.slane %v320_v55, %v698_v37  ;;  %v279_v52 = vrot.slane %v265_v59, %v731_v49  ;;  %v183_v11 = vrot.slane %v169_v60, %v698_v37 }
  0x34   :  { %v344_v48 = vrot.slane %v336_v57, %v698_v37  ;;  %v360_v51 = vrot.slane %v352_v58, %v698_v37  ;;  %v199_v31 = vrot.slane %v185_v47, %v698_v37  ;;  %v201_v0 = vcombine.high %v681_v23, %v687_v29 }
  0x35   :  { %v368_v13 = vcombine.low %v312_v61, %v328_v62  ;;  %v369_v63 = vcombine.high %v312_v61, %v328_v62  ;;  %v298_v2 = vcombine.low %v247_v33, %v279_v52  ;;  %v299_v18 = vcombine.high %v247_v33, %v279_v52 }
  0x36   :  { %v400_v1 = vcombine.low %v344_v48, %v360_v51  ;;  %v401_v17 = vcombine.high %v344_v48, %v360_v51  ;;  %v215_v19 = vrot.slane %v201_v0, %v698_v37  ;;  %v217_v3 = vcombine.high %v684_v28, %v690_v30 }
  0x37   :  { %v376_v12 = vrot.slane %v368_v13, %v731_v49  ;;  %v383_v15 = vrot.slane %v369_v63, %v731_v49  ;;  %444 = vst [vmem:[%s889_s4 + $0x20] sm:$0xff] %v298_v2  ;;  %446 = vst [vmem:[%s889_s4 + $0x30] sm:$0xff] %v299_v18  ;;  %v248_v29 = vcombine.low %v183_v11, %v199_v31 }
  0x38   :  { %v408_v4 = vrot.slane %v400_v1, %v731_v49  ;;  %v415_v23 = vrot.slane %v401_v17, %v731_v49  ;;  %v305_v5 = vcombine.high %v153_v43, %v157_v44  ;;  %v231_v6 = vrot.slane %v217_v3, %v698_v37 }
  0x39   :  { %v321_v20 = vcombine.high %v155_v16, %v159_v32  ;;  %v337_v24 = vcombine.high %v161_v45, %v165_v50  ;;  %v353_v25 = vcombine.high %v163_v46, %v167_v53  ;;  %v256_v9 = vrot.slane %v248_v29, %v731_v49 }
  0x3a   :  { %v432_v28 = vcombine.low %v376_v12, %v408_v4  ;;  %v433_v30 = vcombine.high %v376_v12, %v408_v4  ;;  %v434_v7 = vcombine.low %v383_v15, %v415_v23  ;;  %v435_v8 = vcombine.high %v383_v15, %v415_v23 }
  0x3b   :  { %v280_v10 = vcombine.low %v215_v19, %v231_v6  ;;  %v319_v21 = vrot.slane %v305_v5, %v698_v37  ;;  %v335_v22 = vrot.slane %v321_v20, %v698_v37  ;;  %v351_v35 = vrot.slane %v337_v24, %v698_v37 }
  0x3c   :  { %441 = vst [vmem:[%s889_s4 + $0x8] sm:$0xff] %v432_v28  ;;  %443 = vst [vmem:[%s889_s4 + $0x18] sm:$0xff] %v433_v30  ;;  %v367_v36 = vrot.slane %v353_v25, %v698_v37  ;;  %v249_v26 = vcombine.high %v183_v11, %v199_v31  ;;  %v281_v38 = vcombine.high %v215_v19, %v231_v6 }
  0x3d   :  { %445 = vst [vmem:[%s889_s4 + $0x28] sm:$0xff] %v434_v7  ;;  %447 = vst [vmem:[%s889_s4 + $0x38] sm:$0xff] %v435_v8  ;;  %v288_v27 = vrot.slane %v280_v10, %v731_v49  ;;  %v384_v39 = vcombine.low %v319_v21, %v335_v22  ;;  %v385_v40 = vcombine.high %v319_v21, %v335_v22 }
  0x3e   :  { %v416_v41 = vcombine.low %v351_v35, %v367_v36  ;;  %v263_v42 = vrot.slane %v249_v26, %v731_v49  ;;  %v295_v34 = vrot.slane %v281_v38, %v731_v49  ;;  %v417_v43 = vcombine.high %v351_v35, %v367_v36 }
  0x3f   :  { %v300_v16 = vcombine.low %v256_v9, %v288_v27  ;;  %v392_v44 = vrot.slane %v384_v39, %v731_v49  ;;  %v301_v32 = vcombine.high %v256_v9, %v288_v27  ;;  %v399_v45 = vrot.slane %v385_v40, %v731_v49 }
  0x40   :  { %v424_v37 = vrot.slane %v416_v41, %v731_v49  ;;  %v302_v46 = vcombine.low %v263_v42, %v295_v34  ;;  %v431_v50 = vrot.slane %v417_v43, %v731_v49  ;;  %v303_v53 = vcombine.high %v263_v42, %v295_v34 }
  0x41   :  { %448 = vst [vmem:[%s889_s4 + $0x40] sm:$0xff] %v300_v16  ;;  %450 = vst [vmem:[%s889_s4 + $0x50] sm:$0xff] %v301_v32 }
  0x42   :  { %v436_v54 = vcombine.low %v392_v44, %v424_v37  ;;  %v437_v55 = vcombine.high %v392_v44, %v424_v37  ;;  %452 = vst [vmem:[%s889_s4 + $0x60] sm:$0xff] %v302_v46  ;;  %v438_v56 = vcombine.low %v399_v45, %v431_v50  ;;  %454 = vst [vmem:[%s889_s4 + $0x70] sm:$0xff] %v303_v53 }
  0x43   :  { %v439_v49 = vcombine.high %v399_v45, %v431_v50 }
  0x44   :  { %449 = vst [vmem:[%s889_s4 + $0x48] sm:$0xff] %v436_v54  ;;  %451 = vst [vmem:[%s889_s4 + $0x58] sm:$0xff] %v437_v55 }
  0x45   :  { %453 = vst [vmem:[%s889_s4 + $0x68] sm:$0xff] %v438_v56  ;;  %455 = vst [vmem:[%s889_s4 + $0x78] sm:$0xff] %v439_v49 }
  0x46   :  { %460 = vsyncpa [#allocation3], 1 }

// kernel: a_call__.8
= control target key start
LH: loop header
LB: loop body
LE: loop exit
PB: predicated region body
PF: predicated region fallthrough
CT: control target
= control target key end

     0   :  { %s3003_s15 = smov 0   ;;  %s3955_s0 = inlined_call_operand.vmem [shape: bf16[2,8,8,512], index: 0, kind: input, shape index: {}]   ;;  %s3956_s1 = inlined_call_operand.vmem [shape: bf16[2,128,512], index: 1, kind: input, shape index: {}]   ;;  %s3957_s2 = inlined_call_operand.vmem [shape: bf16[2,128,128], index: 2, kind: input, shape index: {}]   ;;  %s3958_s3 = inlined_call_operand.vmem [shape: f32[2,8,8,128], index: 3, kind: input, shape index: {}]   ;;  %s3959_s4 = inlined_call_operand.vmem [shape: f32[2,8,8,128], index: 4, kind: output, shape index: {}]  }
   0x1 LB: > { %s3009_s16 = sadd.s32 4294967295, %s2973_s15   ;;  %p2458_p0 = scmp.ge.s32.totalorder %s2973_s15, 1  ;;  %s2973_s15 = sphi %s3003_s15, %s14_s15  }
   0x2   : > { %p158_p1 = scmp.lt.s32.totalorder %s2973_s15, 3 }
   0x4   : > { %p159_p2 = pnand %p2458_p0, %p158_p1 }
   0x6   : > { %162 = sbr.rel (%p159_p2) target bundleno = 4189 (0x105d), region = 32 }
   0xd   : > { %p192_p3 = scmp.lt.s32.totalorder %s3009_s16, 1  ;;  %p261_p4 = scmp.eq.s32.totalorder %s3009_s16, 0 }
   0xe   : > { %s3082_s5 = sshll.u32 %s3009_s16, 5 }
   0xf   : > { %s193_s17 = scalar_select %p192_p3, %s3009_s16, 1 }
  0x10   : > { %s3018_s18 = scalar_select %p261_p4, 0, 7 }
  0x11   : > { %s2576_s19 = sshll.u32 %s193_s17, 8  ;;  %s2577_s20 = sshll.u32 %s193_s17, 6 }
  0x12   : > { %s3023_s23 = scalar_lea.vmem %s3956_s1, %s2576_s19  ;;  %s3028_s26 = scalar_lea.vmem %s3958_s3, %s2577_s20 }
  0x13   : > { %s3033_s29 = scalar_lea.vmem %s3959_s4, %s2577_s20  ;;  %v3036_v0 = vld [vmem:[%s3023_s23] sm:$0xff]  ;;  %v3039_v1 = vld [vmem:[%s3023_s23 + $0x8] sm:$0xff]  ;;  %v3042_v2 = vld [vmem:[%s3023_s23 + $0x10] sm:$0xff]  ;;  %s2467_s30 = sshll.u32 %s3018_s18, 2 }
  0x14   : > { %v3045_v3 = vld [vmem:[%s3023_s23 + $0x18] sm:$0xff]  ;;  %v3048_v4 = vld [vmem:[%s3023_s23 + $0x20] sm:$0xff]  ;;  %v3051_v5 = vld [vmem:[%s3023_s23 + $0x28] sm:$0xff]  ;;  %s201_s8 = scalar_lea.vmem %s3957_s2, %s2577_s20  ;;  %s265_s9 = sadd.s32 %s3082_s5, %s2467_s30 }
  0x15   : > { %v3054_v6 = vld [vmem:[%s3023_s23 + $0x30] sm:$0xff]  ;;  %v3057_v7 = vld [vmem:[%s3023_s23 + $0x38] sm:$0xff]  ;;  %v3060_v8 = vld [vmem:[%s3023_s23 + $0x40] sm:$0xff]  ;;  %s2469_s10 = sshll.u32 %s265_s9, 2 }
  0x16   : > { %v3063_v9 = vld [vmem:[%s3023_s23 + $0x48] sm:$0xff]  ;;  %v3066_v10 = vld [vmem:[%s3023_s23 + $0x50] sm:$0xff]  ;;  %v3069_v11 = vld [vmem:[%s3023_s23 + $0x58] sm:$0xff]  ;;  %s267_s13 = scalar_lea.vmem %s3955_s0, %s2469_s10 }
  0x17   : > { %v3072_v12 = vld [vmem:[%s3023_s23 + $0x60] sm:$0xff]  ;;  %v3075_v13 = vld [vmem:[%s3023_s23 + $0x68] sm:$0xff]  ;;  %v3078_v14 = vld [vmem:[%s3023_s23 + $0x70] sm:$0xff] }
  0x18   : > { %v3085_v15 = vld [vmem:[%s3023_s23 + $0x78] sm:$0xff]  ;;  %v3088_v16 = vld [vmem:[%s3023_s23 + $0x80] sm:$0xff]  ;;  %v3091_v17 = vld [vmem:[%s3023_s23 + $0x88] sm:$0xff] }
  0x19   : > { %v3094_v18 = vld [vmem:[%s3023_s23 + $0x90] sm:$0xff]  ;;  %v3097_v19 = vld [vmem:[%s3023_s23 + $0x98] sm:$0xff]  ;;  %v3100_v20 = vld [vmem:[%s3023_s23 + $0xa0] sm:$0xff] }
  0x1a   : > { %v3106_v21 = vld [vmem:[%s3023_s23 + $0xa8] sm:$0xff]  ;;  %v3109_v22 = vld [vmem:[%s3023_s23 + $0xb0] sm:$0xff]  ;;  %v3112_v23 = vld [vmem:[%s3023_s23 + $0xb8] sm:$0xff] }
  0x1b   : > { %v3116_v24 = vld [vmem:[%s3023_s23 + $0xc0] sm:$0xff]  ;;  %v3119_v25 = vld [vmem:[%s3023_s23 + $0xc8] sm:$0xff]  ;;  %v3122_v26 = vld [vmem:[%s3023_s23 + $0xd0] sm:$0xff] }
  0x1c   : > { %v3125_v27 = vld [vmem:[%s3023_s23 + $0xd8] sm:$0xff]  ;;  %v3128_v28 = vld [vmem:[%s3023_s23 + $0xe0] sm:$0xff]  ;;  %v3131_v29 = vld [vmem:[%s3023_s23 + $0xe8] sm:$0xff] }
  0x1d   : > { %v3134_v30 = vld [vmem:[%s3023_s23 + $0xf0] sm:$0xff]  ;;  %v3137_v31 = vld [vmem:[%s3023_s23 + $0xf8] sm:$0xff]  ;;  %v3139_v32 = vld [vmem:[%s201_s8] sm:$0xf] }
  0x1e   : > { %v3141_v33 = vld [vmem:[%s201_s8 + $0x4] sm:$0xf]  ;;  %v3143_v34 = vld [vmem:[%s201_s8 + $0x8] sm:$0xf]  ;;  %v3145_v35 = vld [vmem:[%s201_s8 + $0xc] sm:$0xf] }
  0x1f   : > { %v3147_v36 = vld [vmem:[%s201_s8 + $0x10] sm:$0xf]  ;;  %v3149_v37 = vld [vmem:[%s201_s8 + $0x14] sm:$0xf]  ;;  %v3151_v38 = vld [vmem:[%s201_s8 + $0x18] sm:$0xf] }
  0x20   : > { %v3153_v39 = vld [vmem:[%s201_s8 + $0x1c] sm:$0xf]  ;;  %v3155_v40 = vld [vmem:[%s201_s8 + $0x20] sm:$0xf]  ;;  %v3157_v41 = vld [vmem:[%s201_s8 + $0x24] sm:$0xf] }
  0x21   : > { %v3162_v42 = vld [vmem:[%s201_s8 + $0x28] sm:$0xf]  ;;  %v3164_v43 = vld [vmem:[%s201_s8 + $0x2c] sm:$0xf]  ;;  %v3166_v44 = vld [vmem:[%s201_s8 + $0x30] sm:$0xf] }
  0x22   : > { %v3168_v45 = vld [vmem:[%s201_s8 + $0x34] sm:$0xf]  ;;  %v3170_v46 = vld [vmem:[%s201_s8 + $0x38] sm:$0xf]  ;;  %v3172_v47 = vld [vmem:[%s201_s8 + $0x3c] sm:$0xf] }
  0x23   : > { %v3174_v48 = vld [vmem:[%s267_s13] sm:$0xff]  ;;  %v3176_v49 = vld [vmem:[%s267_s13 + $0x8] sm:$0xff] }
  0x24   : > { %311 = vsyncadd [#allocation3], 256 }
  0x25   : > { %2955 = dma.done.wait [#allocation3], 256 }
  0x26   : > { %2956 = vsyncadd [#allocation3], 4294967040  ;;  %s3180_s14 = scalar_select %p261_p4, 1, 6 }
  0x28   : > { %s2470_s17 = sshll.u32 %s3180_s14, 2 }
  0x29   : > { %s318_s19 = sadd.s32 %s2470_s17, %s3082_s5 }
  0x2a   : > { %s2471_s20 = sshll.u32 %s318_s19, 2 }
  0x2b   : > { %s320_s23 = scalar_lea.vmem %s3955_s0, %s2471_s20 }
  0x2c   : > { %v3187_v50 = vld [vmem:[%s320_s23] sm:$0xff]  ;;  %v3189_v51 = vld [vmem:[%s320_s23 + $0x8] sm:$0xff] }
  0x2d   : > { %366 = vsyncadd [#allocation3 + $0x1], 256  ;;  %v3193_v52 = vcombine.high %v3036_v0, %v3042_v2  ;;  %v3197_v53 = vcombine.low %v3036_v0, %v3042_v2  ;;  %v3201_v54 = vcombine.high %v3048_v4, %v3054_v6  ;;  %v3205_v55 = vcombine.high %v3039_v1, %v3045_v3  ;;  %s2517_s24 = sshll.u32 %s3018_s18, 3 }
  0x2e   : > { %v3210_v56 = vcombine.low %v3039_v1, %v3045_v3  ;;  %v3214_v57 = vcombine.high %v3051_v5, %v3057_v7  ;;  %v3219_v58 = vcombine.low %v3048_v4, %v3054_v6  ;;  %v3225_v59 = vcombine.high %v3060_v8, %v3066_v10  ;;  %s737_s25 = scalar_lea.vmem %s3028_s26, %s2517_s24  ;;  %s740_s27 = scalar_lea.vmem %s3033_s29, %s2517_s24 }
  0x2f   : > { %533 = vmatprep.subr.bf16.mxu0 %v3193_v52  ;;  %574 = vmatprep.subr.bf16.mxu1 %v3205_v55  ;;  %v3230_v60 = vcombine.low %v3051_v5, %v3057_v7  ;;  %v3235_v61 = vcombine.high %v3063_v9, %v3069_v11  ;;  %v3962_v62 = vmov 0   ;;  %v3241_v63 = vcombine.low %v3060_v8, %v3066_v10 }
  0x30   : > { %534 = vmatpush1.bf16.msra.mxu0 %v3197_v53  ;;  %575 = vmatpush1.bf16.msra.mxu1 %v3210_v56  ;;  %v3246_v0 = vcombine.high %v3072_v12, %v3078_v14  ;;  %v3251_v1 = vcombine.low %v3063_v9, %v3069_v11  ;;  %v3256_v2 = vcombine.high %v3075_v13, %v3085_v15  ;;  %vm2977_vm0 = vmmov 0  }
  0x31   : > { %535 = vmatprep.subr.bf16.mxu0 %v3201_v54  ;;  %576 = vmatprep.subr.bf16.mxu1 %v3214_v57  ;;  %v3262_v3 = vcombine.low %v3072_v12, %v3078_v14  ;;  %v3267_v4 = vcombine.high %v3088_v16, %v3094_v18  ;;  %v3272_v5 = vcombine.low %v3075_v13, %v3085_v15 }
  0x32   : > { %565 = vmatprep.mubr.bf16.mxu0 %v3962_v62  ;;  %606 = vmatprep.mubr.bf16.mxu1 %v3962_v62  ;;  %v3277_v6 = vcombine.high %v3091_v17, %v3097_v19  ;;  %v3282_v7 = vcombine.low %v3088_v16, %v3094_v18  ;;  %v3287_v8 = vcombine.high %v3100_v20, %v3109_v22 }
  0x33   : > { %v3292_v9 = vcombine.low %v3091_v17, %v3097_v19  ;;  %v3297_v10 = vcombine.high %v3106_v21, %v3112_v23  ;;  %v3302_v11 = vcombine.low %v3100_v20, %v3109_v22  ;;  %v3307_v12 = vcombine.high %v3116_v24, %v3122_v26 }
  0x34   : > { %536 = vmatpush1.bf16.msra.mxu0 %v3219_v58  ;;  %577 = vmatpush1.bf16.msra.mxu1 %v3230_v60  ;;  %v3312_v13 = vcombine.low %v3106_v21, %v3112_v23  ;;  %v3317_v14 = vcombine.high %v3119_v25, %v3125_v27  ;;  %v3322_v15 = vcombine.low %v3116_v24, %v3122_v26  ;;  %v3960_v22 = vmov 0.0  }
  0x35   : > { %537 = vmatprep.subr.bf16.mxu0 %v3225_v59  ;;  %578 = vmatprep.subr.bf16.mxu1 %v3235_v61  ;;  %v3327_v16 = vcombine.high %v3128_v28, %v3134_v30  ;;  %v3332_v17 = vcombine.low %v3119_v25, %v3125_v27  ;;  %v3337_v18 = vcombine.high %v3131_v29, %v3137_v31 }
  0x36   : > { %v3342_v19 = vcombine.low %v3128_v28, %v3134_v30  ;;  %v3348_v20 = vcombine.low %v3131_v29, %v3137_v31  ;;  %v3357_v21 = vcombine.low %v3139_v32, %v3141_v33  ;;  %v3364_v23 = vcombine.low %v3143_v34, %v3145_v35 }
  0x37   : > { %v3370_v24 = vcombine.low %v3147_v36, %v3149_v37  ;;  %v3376_v25 = vcombine.low %v3151_v38, %v3153_v39  ;;  %v3382_v26 = vcombine.low %v3155_v40, %v3157_v41  ;;  %v3387_v27 = vcombine.low %v3162_v42, %v3164_v43 }
  0x38   : > { %538 = vmatpush1.bf16.msra.mxu0 %v3241_v63  ;;  %579 = vmatpush1.bf16.msra.mxu1 %v3251_v1  ;;  %v3395_v28 = vcombine.low %v3166_v44, %v3168_v45  ;;  %v3401_v29 = vcombine.low %v3170_v46, %v3172_v47  ;;  %v369_v30 = vunpack.c.l.bf16 %v3174_v48  ;;  %v370_v31 = vunpack.c.h.bf16 %v3174_v48 }
  0x39   : > { %539 = vmatprep.subr.bf16.mxu0 %v3246_v0  ;;  %580 = vmatprep.subr.bf16.mxu1 %v3256_v2  ;;  %v371_v44 = vunpack.c.l.bf16 %v3176_v49  ;;  %v372_v45 = vunpack.c.h.bf16 %v3176_v49 }
  0x3c   : > { %540 = vmatpush1.bf16.msra.mxu0 %v3262_v3  ;;  %581 = vmatpush1.bf16.msra.mxu1 %v3272_v5 }
  0x3d   : > { %541 = vmatprep.subr.bf16.mxu0 %v3267_v4  ;;  %582 = vmatprep.subr.bf16.mxu1 %v3277_v6 }
  0x40   : > { %542 = vmatpush1.bf16.msra.mxu0 %v3282_v7  ;;  %583 = vmatpush1.bf16.msra.mxu1 %v3292_v9 }
  0x41   : > { %543 = vmatprep.subr.bf16.mxu0 %v3287_v8  ;;  %584 = vmatprep.subr.bf16.mxu1 %v3297_v10 }
  0x44   : > { %544 = vmatpush1.bf16.msra.mxu0 %v3302_v11  ;;  %585 = vmatpush1.bf16.msra.mxu1 %v3312_v13 }
  0x45   : > { %545 = vmatprep.subr.bf16.mxu0 %v3307_v12  ;;  %586 = vmatprep.subr.bf16.mxu1 %v3317_v14 }
  0x48   : > { %546 = vmatpush1.bf16.msra.mxu0 %v3322_v15  ;;  %587 = vmatpush1.bf16.msra.mxu1 %v3332_v17 }
  0x49   : > { %547 = vmatprep.subr.bf16.mxu0 %v3327_v16  ;;  %588 = vmatprep.subr.bf16.mxu1 %v3337_v18 }
  0x4c   : > { %548 = vmatpush1.bf16.msra.mxu0 %v3342_v19  ;;  %589 = vmatpush1.bf16.msra.mxu1 %v3348_v20 }
  0x4d   : > { %2652 = vmatprep.subr.bf16.mxu0 %v3960_v22 }
  0x4f   : > { %566 = vmatmul.mubr.bf16.vlgmr.msra.gmra.mrb[0].mxu0 %v3962_v62  ;;  %607 = vmatmul.mubr.bf16.vlgmr.msra.gmra.mrb[0].mxu1 %v3962_v62 }
  0x50   : > { %2653 = vmatpush3.bf16.msra.mxu0 %v3357_v21  ;;  %2668 = vmatprep.mubr.msk.bf16.mxu0 %vm2977_vm0, %v3960_v22 }
  0x51   : > { %2654 = vmatprep.subr.bf16.mxu0 %v3960_v22 }
  0x54   : > { %2655 = vmatpush3.bf16.msra.mxu0 %v3364_v23 }
  0x55   : > { %2656 = vmatprep.subr.bf16.mxu0 %v3960_v22 }
  0x58   : > { %2657 = vmatpush3.bf16.msra.mxu0 %v3370_v24 }
  0x59   : > { %2658 = vmatprep.subr.bf16.mxu0 %v3960_v22 }
  0x5c   : > { %2659 = vmatpush3.bf16.msra.mxu0 %v3376_v25 }
  0x5d   : > { %2660 = vmatprep.subr.bf16.mxu0 %v3960_v22 }
  0x60   : > { %2661 = vmatpush3.bf16.msra.mxu0 %v3382_v26 }
  0x61   : > { %2662 = vmatprep.subr.bf16.mxu0 %v3960_v22 }
  0x64   : > { %2663 = vmatpush3.bf16.msra.mxu0 %v3387_v27 }
  0x65   : > { %2664 = vmatprep.subr.bf16.mxu0 %v3960_v22 }
  0x68   : > { %2665 = vmatpush3.bf16.msra.mxu0 %v3395_v28 }
  0x69   : > { %2666 = vmatprep.subr.bf16.mxu0 %v3960_v22 }
  0x6c   : > { %2667 = vmatpush3.bf16.msra.mxu0 %v3401_v29 }
 0x122   : > { %v567_v32 = vpop.f32.mrb[0].mxu0  ;;  %v608_v35 = vpop.f32.mrb[0].mxu1 }
 0x123   : > { %v615_v33 = vadd.f32 %v567_v32, %v369_v30  ;;  %v569_v34 = vpop.f32.mrb[1].mxu0  ;;  %v610_v38 = vpop.f32.mrb[1].mxu1  ;;  %v617_v46 = vadd.f32 %v608_v35, %v371_v44 }
 0x124   : > { %v616_v36 = vadd.f32 %v569_v34, %v370_v31  ;;  %v571_v37 = vpop.f32.mrb[2].mxu0  ;;  %v612_v41 = vpop.f32.mrb[2].mxu1  ;;  %v618_v47 = vadd.f32 %v610_v38, %v372_v45  ;;  %v738_v45 = vld [vmem:[%s737_s25] sm:$0xff] }
 0x125   : > { %v2504_v39 = vmul.f32 -1.442695, %v615_v33  ;;  %v572_v40 = vpop.f32.mrb[3].mxu0  ;;  %v613_v43 = vpop.f32.mrb[3].mxu1  ;;  %v2506_v48 = vmul.f32 -1.442695, %v617_v46 }
 0x126   : > { %v2505_v42 = vmul.f32 -1.442695, %v616_v36 }
 0x127   : > { %2823 = vpow2.f32 %v2504_v39 }
 0x128   : > { %2825 = vpow2.f32 %v2505_v42 }
 0x129   : > { %2827 = vtanh.f32 %v618_v47 }
 0x12a   : > { %2829 = vpow2.f32 %v2506_v48 }
 0x131   : > { %v2824_v30 = vpop.eup %2823 }
 0x132   : > { %v2826_v32 = vpop.eup %2825  ;;  %v628_v22 = vadd.f32 1.0, %v2824_v30 }
 0x133   : > { %v629_v31 = vadd.f32 1.0, %v2826_v32  ;;  %v2828_v33 = vpop.eup %2827 }
 0x134   : > { %2831 = vrcp.f32 %v628_v22  ;;  %v2830_v34 = vpop.eup %2829 }
 0x135   : > { %2833 = vrcp.f32 %v629_v31  ;;  %v630_v49 = vadd.f32 1.0, %v2830_v34 }
 0x137   : > { %2835 = vrcp.f32 %v630_v49 }
 0x13e   : > { %v2832_v36 = vpop.eup %2831 }
 0x13f   : > { %v2834_v37 = vpop.eup %2833  ;;  %v639_v39 = vmul.f32 %v2832_v36, %v2828_v33 }
 0x140   : > { %v638_v40 = vmul.f32 0.0, %v2834_v37 }
 0x141   : > { %v2836_v22 = vpop.eup %2835 }
 0x142   : > { %v3409_v35 = vadd.f32 %v639_v39, %v638_v40 }
 0x144   : > { %v3964_v38 = vclamps-f32 %v3409_v35, 3.0 }
 0x146   : > { %2837 = vtanh.f32 %v3964_v38 }
 0x150   : > { %v2838_v41 = vpop.eup %2837 }
 0x151   : > { %v644_v42 = vmul.f32 %v2838_v41, %v2836_v22 }
 0x153   : > { %v645_v43 = vpack.c.bf16 %v644_v42, %v644_v42 }
 0x155   : > { %2669 = vmatmul.mubr.bf16.vlgmr.msra.gmra.mrb[4].mxu0 %v645_v43 }
 0x228   : > { %v728_v44 = vpop.f32.mrb[4].mxu0 }
 0x229   : > { %v2516_v46 = vclamps-f32 %v728_v44, 3.0  ;;  %v2670_v47 = vpop.f32.mrb[5].mxu0 }
 0x22a   : > { %v731_v48 = vpop.f32.mrb[6].mxu0 }
 0x22b   : > { %v739_v30 = vadd.f32 %v2516_v46, %v738_v45  ;;  %v2671_v32 = vpop.f32.mrb[7].mxu0 }
 0x22d   : > { %741 = vst [vmem:[%s740_s27] sm:$0xff] %v739_v30 }
 0x22e   : > { %2957 = dma.done.wait [#allocation3 + $0x1], 256 }
 0x22f   : > { %2958 = vsyncadd [#allocation3 + $0x1], 4294967040  ;;  %s3419_s28 = scalar_select %p261_p4, 2, 5 }
 0x231   : > { %s2518_s30 = sshll.u32 %s3419_s28, 2 }
 0x232   : > { %s746_s18 = sadd.s32 %s2518_s30, %s3082_s5 }
 0x233   : > { %s2519_s6 = sshll.u32 %s746_s18, 2 }
 0x234   : > { %s748_s9 = scalar_lea.vmem %s3955_s0, %s2519_s6 }
 0x235   : > { %v3426_v31 = vld [vmem:[%s748_s9] sm:$0xff]  ;;  %v3428_v33 = vld [vmem:[%s748_s9 + $0x8] sm:$0xff] }
 0x236   : > { %3981 = vst [vmem:[#allocation20_spill] sm:$0xff] %v3428_v33 }
 0x237   : > { %792 = vsyncadd [#allocation3], 256  ;;  %800 = vmatprep.subr.bf16.mxu1 %v3193_v52  ;;  %841 = vmatprep.subr.bf16.mxu0 %v3205_v55  ;;  %v799_v34 = vpack.c.bf16 %v2516_v46, %v2516_v46  ;;  %v3982_v36 = vmov 0.0   ;;  %v795_v37 = vunpack.c.l.bf16 %v3187_v50  ;;  %v796_v39 = vunpack.c.h.bf16 %v3187_v50  ;;  %s2525_s10 = sshll.u32 %s3180_s14, 3 }
 0x238   : > { %801 = vmatpush1.bf16.msra.mxu1 %v3197_v53  ;;  %842 = vmatpush1.bf16.msra.mxu0 %v3210_v56  ;;  %v797_v32 = vunpack.c.l.bf16 %v3189_v51  ;;  %s956_s11 = scalar_lea.vmem %s3028_s26, %s2525_s10  ;;  %s959_s12 = scalar_lea.vmem %s3033_s29, %s2525_s10 }
 0x239   : > { %802 = vmatprep.subr.bf16.mxu1 %v3201_v54  ;;  %843 = vmatprep.subr.bf16.mxu0 %v3214_v57 }
 0x23a   : > { %832 = vmatprep.mubr.bf16.mxu1 %v3962_v62  ;;  %873 = vmatprep.mubr.bf16.mxu0 %v3962_v62 }
 0x23c   : > { %803 = vmatpush1.bf16.msra.mxu1 %v3219_v58  ;;  %844 = vmatpush1.bf16.msra.mxu0 %v3230_v60 }
 0x23d   : > { %804 = vmatprep.subr.bf16.mxu1 %v3225_v59  ;;  %845 = vmatprep.subr.bf16.mxu0 %v3235_v61 }
 0x240   : > { %805 = vmatpush1.bf16.msra.mxu1 %v3241_v63  ;;  %846 = vmatpush1.bf16.msra.mxu0 %v3251_v1 }
 0x241   : > { %806 = vmatprep.subr.bf16.mxu1 %v3246_v0  ;;  %847 = vmatprep.subr.bf16.mxu0 %v3256_v2 }
 0x244   : > { %807 = vmatpush1.bf16.msra.mxu1 %v3262_v3  ;;  %848 = vmatpush1.bf16.msra.mxu0 %v3272_v5 }
 0x245   : > { %808 = vmatprep.subr.bf16.mxu1 %v3267_v4  ;;  %849 = vmatprep.subr.bf16.mxu0 %v3277_v6 }
 0x248   : > { %809 = vmatpush1.bf16.msra.mxu1 %v3282_v7  ;;  %850 = vmatpush1.bf16.msra.mxu0 %v3292_v9 }
 0x249   : > { %810 = vmatprep.subr.bf16.mxu1 %v3287_v8  ;;  %851 = vmatprep.subr.bf16.mxu0 %v3297_v10 }
 0x24c   : > { %811 = vmatpush1.bf16.msra.mxu1 %v3302_v11  ;;  %852 = vmatpush1.bf16.msra.mxu0 %v3312_v13 }
 0x24d   : > { %812 = vmatprep.subr.bf16.mxu1 %v3307_v12  ;;  %853 = vmatprep.subr.bf16.mxu0 %v3317_v14 }
 0x250   : > { %813 = vmatpush1.bf16.msra.mxu1 %v3322_v15  ;;  %854 = vmatpush1.bf16.msra.mxu0 %v3332_v17 }
 0x251   : > { %814 = vmatprep.subr.bf16.mxu1 %v3327_v16  ;;  %855 = vmatprep.subr.bf16.mxu0 %v3337_v18 }
 0x254   : > { %815 = vmatpush1.bf16.msra.mxu1 %v3342_v19  ;;  %856 = vmatpush1.bf16.msra.mxu0 %v3348_v20 }
 0x255   : > { %2672 = vmatprep.subr.bf16.mxu1 %v3982_v36 }
 0x257   : > { %833 = vmatmul.mubr.bf16.vlgmr.msra.gmra.mrb[4].mxu1 %v799_v34  ;;  %874 = vmatmul.mubr.bf16.vlgmr.msra.gmra.mrb[8].mxu0 %v799_v34  ;;  %v798_v34 = vunpack.c.h.bf16 %v3189_v51  ;;  %v3983_v51 = vclamps-f32 %v3409_v35, 3.0  ;;  %v957_v35 = vld [vmem:[%s956_s11] sm:$0xff] }
 0x258   : > { %2673 = vmatpush3.bf16.msra.mxu1 %v3357_v21  ;;  %2688 = vmatprep.mubr.msk.bf16.mxu1 %vm2977_vm0, %v3982_v36 }
 0x259   : > { %2674 = vmatprep.subr.bf16.mxu1 %v3982_v36 }
 0x25c   : > { %2675 = vmatpush3.bf16.msra.mxu1 %v3364_v23 }
 0x25d   : > { %2676 = vmatprep.subr.bf16.mxu1 %v3982_v36 }
 0x260   : > { %2677 = vmatpush3.bf16.msra.mxu1 %v3370_v24 }
 0x261   : > { %2678 = vmatprep.subr.bf16.mxu1 %v3982_v36 }
 0x264   : > { %2679 = vmatpush3.bf16.msra.mxu1 %v3376_v25 }
 0x265   : > { %2680 = vmatprep.subr.bf16.mxu1 %v3982_v36 }
 0x268   : > { %2681 = vmatpush3.bf16.msra.mxu1 %v3382_v26 }
 0x269   : > { %2682 = vmatprep.subr.bf16.mxu1 %v3982_v36 }
 0x26c   : > { %2683 = vmatpush3.bf16.msra.mxu1 %v3387_v27 }
 0x26d   : > { %2684 = vmatprep.subr.bf16.mxu1 %v3982_v36 }
 0x270   : > { %2685 = vmatpush3.bf16.msra.mxu1 %v3395_v28 }
 0x271   : > { %2686 = vmatprep.subr.bf16.mxu1 %v3982_v36 }
 0x274   : > { %2687 = vmatpush3.bf16.msra.mxu1 %v3401_v29 }
 0x32a   : > { %v834_v40 = vpop.f32.mrb[4].mxu1  ;;  %v875_v49 = vpop.f32.mrb[8].mxu0 }
 0x32b   : > { %v882_v22 = vadd.f32 %v834_v40, %v795_v37  ;;  %v836_v41 = vpop.f32.mrb[5].mxu1  ;;  %v877_v42 = vpop.f32.mrb[9].mxu0  ;;  %v884_v62 = vadd.f32 %v875_v49, %v797_v32 }
 0x32c   : > { %v883_v43 = vadd.f32 %v836_v41, %v796_v39  ;;  %v838_v44 = vpop.f32.mrb[6].mxu1  ;;  %v879_v45 = vpop.f32.mrb[10].mxu0  ;;  %v885_v50 = vadd.f32 %v877_v42, %v798_v34 }
 0x32d   : > { %v2520_v46 = vmul.f32 -1.442695, %v882_v22  ;;  %v839_v47 = vpop.f32.mrb[7].mxu1  ;;  %v880_v48 = vpop.f32.mrb[11].mxu0  ;;  %v2522_v38 = vmul.f32 -1.442695, %v884_v62 }
 0x32e   : > { %v2521_v30 = vmul.f32 -1.442695, %v883_v43 }
 0x32f   : > { %2839 = vpow2.f32 %v2520_v46 }
 0x330   : > { %2841 = vpow2.f32 %v2521_v30 }
 0x331   : > { %2843 = vtanh.f32 %v885_v50 }
 0x332   : > { %2845 = vpow2.f32 %v2522_v38 }
 0x339   : > { %v2840_v33 = vpop.eup %2839 }
 0x33a   : > { %v2842_v37 = vpop.eup %2841  ;;  %v895_v40 = vadd.f32 1.0, %v2840_v33 }
 0x33b   : > { %v896_v39 = vadd.f32 1.0, %v2842_v37  ;;  %v2844_v22 = vpop.eup %2843 }
 0x33c   : > { %2847 = vrcp.f32 %v895_v40  ;;  %v2846_v41 = vpop.eup %2845 }
 0x33d   : > { %2849 = vrcp.f32 %v896_v39  ;;  %v897_v42 = vadd.f32 1.0, %v2846_v41 }
 0x33f   : > { %2851 = vrcp.f32 %v897_v42 }
 0x346   : > { %v2848_v43 = vpop.eup %2847 }
 0x347   : > { %v2850_v44 = vpop.eup %2849  ;;  %v906_v45 = vmul.f32 %v2848_v43, %v2844_v22 }
 0x348   : > { %v905_v49 = vmul.f32 %v2850_v44, %v3983_v51 }
 0x349   : > { %v2852_v38 = vpop.eup %2851 }
 0x34a   : > { %v3488_v62 = vadd.f32 %v906_v45, %v905_v49 }
 0x34c   : > { %v3966_v33 = vclamps-f32 %v3488_v62, 3.0 }
 0x34e   : > { %2853 = vtanh.f32 %v3966_v33 }
 0x358   : > { %v2854_v46 = vpop.eup %2853 }
 0x359   : > { %v911_v47 = vmul.f32 %v2854_v46, %v2852_v38 }
 0x35b   : > { %v912_v48 = vpack.c.bf16 %v911_v47, %v911_v47 }
 0x35d   : > { %2689 = vmatmul.mubr.bf16.vlgmr.msra.gmra.mrb[8].mxu1 %v912_v48 }
 0x430   : > { %v947_v30 = vpop.f32.mrb[8].mxu1 }
 0x431   : > { %v2524_v32 = vclamps-f32 %v947_v30, 3.0  ;;  %v2690_v34 = vpop.f32.mrb[9].mxu1 }
 0x432   : > { %v950_v50 = vpop.f32.mrb[10].mxu1 }
 0x433   : > { %v958_v37 = vadd.f32 %v2524_v32, %v957_v35  ;;  %v2691_v40 = vpop.f32.mrb[11].mxu1 }
 0x435   : > { %960 = vst [vmem:[%s959_s12] sm:$0xff] %v958_v37 }
 0x436   : > { %2959 = dma.done.wait [#allocation3], 256 }
 0x437   : > { %2960 = vsyncadd [#allocation3], 4294967040  ;;  %s3498_s13 = scalar_select %p261_p4, 3, 4 }
 0x439   : > { %s2526_s17 = sshll.u32 %s3498_s13, 2 }
 0x43a   : > { %s965_s14 = sadd.s32 %s2526_s17, %s3082_s5 }
 0x43b   : > { %s2527_s19 = sshll.u32 %s965_s14, 2 }
 0x43c   : > { %s967_s22 = scalar_lea.vmem %s3955_s0, %s2527_s19 }
 0x43d   : > { %v3505_v39 = vld [vmem:[%s967_s22] sm:$0xff]  ;;  %v3507_v22 = vld [vmem:[%s967_s22 + $0x8] sm:$0xff] }
 0x43e   : > { %3984 = vst [vmem:[#allocation21_spill] sm:$0xff] %v3505_v39  ;;  %3985 = vst [vmem:[#allocation22_spill] sm:$0xff] %v3507_v22 }
 0x43f   : > { %1011 = vsyncadd [#allocation3 + $0x1], 256  ;;  %1019 = vmatprep.subr.bf16.mxu0 %v3193_v52  ;;  %1060 = vmatprep.subr.bf16.mxu1 %v3205_v55  ;;  %v3986_v41 = vmov 0   ;;  %v1018_v43 = vpack.c.bf16 %v2524_v32, %v2524_v32  ;;  %v1014_v44 = vunpack.c.l.bf16 %v3426_v31  ;;  %v1015_v45 = vunpack.c.h.bf16 %v3426_v31  ;;  %v3987_v37 = vld [vmem:[#allocation20_spill] sm:$0xff]  ;;  %s2533_s23 = sshll.u32 %s3419_s28, 3 }
 0x440   : > { %1020 = vmatpush1.bf16.msra.mxu0 %v3197_v53  ;;  %1061 = vmatpush1.bf16.msra.mxu1 %v3210_v56  ;;  %v1016_v40 = vunpack.c.l.bf16 %v3987_v37  ;;  %s1175_s24 = scalar_lea.vmem %s3028_s26, %s2533_s23  ;;  %s1178_s25 = scalar_lea.vmem %s3033_s29, %s2533_s23 }
 0x441   : > { %1021 = vmatprep.subr.bf16.mxu0 %v3201_v54  ;;  %1062 = vmatprep.subr.bf16.mxu1 %v3214_v57 }
 0x442   : > { %1051 = vmatprep.mubr.bf16.mxu0 %v3986_v41  ;;  %1092 = vmatprep.mubr.bf16.mxu1 %v3986_v41 }
 0x444   : > { %1022 = vmatpush1.bf16.msra.mxu0 %v3219_v58  ;;  %1063 = vmatpush1.bf16.msra.mxu1 %v3230_v60 }
 0x445   : > { %1023 = vmatprep.subr.bf16.mxu0 %v3225_v59  ;;  %1064 = vmatprep.subr.bf16.mxu1 %v3235_v61 }
 0x448   : > { %1024 = vmatpush1.bf16.msra.mxu0 %v3241_v63  ;;  %1065 = vmatpush1.bf16.msra.mxu1 %v3251_v1 }
 0x449   : > { %1025 = vmatprep.subr.bf16.mxu0 %v3246_v0  ;;  %1066 = vmatprep.subr.bf16.mxu1 %v3256_v2 }
 0x44c   : > { %1026 = vmatpush1.bf16.msra.mxu0 %v3262_v3  ;;  %1067 = vmatpush1.bf16.msra.mxu1 %v3272_v5 }
 0x44d   : > { %1027 = vmatprep.subr.bf16.mxu0 %v3267_v4  ;;  %1068 = vmatprep.subr.bf16.mxu1 %v3277_v6 }
 0x450   : > { %1028 = vmatpush1.bf16.msra.mxu0 %v3282_v7  ;;  %1069 = vmatpush1.bf16.msra.mxu1 %v3292_v9 }
 0x451   : > { %1029 = vmatprep.subr.bf16.mxu0 %v3287_v8  ;;  %1070 = vmatprep.subr.bf16.mxu1 %v3297_v10 }
 0x454   : > { %1030 = vmatpush1.bf16.msra.mxu0 %v3302_v11  ;;  %1071 = vmatpush1.bf16.msra.mxu1 %v3312_v13 }
 0x455   : > { %1031 = vmatprep.subr.bf16.mxu0 %v3307_v12  ;;  %1072 = vmatprep.subr.bf16.mxu1 %v3317_v14 }
 0x458   : > { %1032 = vmatpush1.bf16.msra.mxu0 %v3322_v15  ;;  %1073 = vmatpush1.bf16.msra.mxu1 %v3332_v17 }
 0x459   : > { %1033 = vmatprep.subr.bf16.mxu0 %v3327_v16  ;;  %1074 = vmatprep.subr.bf16.mxu1 %v3337_v18 }
 0x45c   : > { %1034 = vmatpush1.bf16.msra.mxu0 %v3342_v19  ;;  %1075 = vmatpush1.bf16.msra.mxu1 %v3348_v20 }
 0x45d   : > { %2692 = vmatprep.subr.bf16.mxu0 %v3982_v36 }
 0x45f   : > { %1052 = vmatmul.mubr.bf16.vlgmr.msra.gmra.mrb[12].mxu0 %v1018_v43  ;;  %1093 = vmatmul.mubr.bf16.vlgmr.msra.gmra.mrb[12].mxu1 %v1018_v43  ;;  %v1017_v43 = vunpack.c.h.bf16 %v3987_v37 }
 0x460   : > { %2693 = vmatpush3.bf16.msra.mxu0 %v3357_v21  ;;  %2708 = vmatprep.mubr.msk.bf16.mxu0 %vm2977_vm0, %v3982_v36 }
 0x461   : > { %2694 = vmatprep.subr.bf16.mxu0 %v3982_v36 }
 0x464   : > { %2695 = vmatpush3.bf16.msra.mxu0 %v3364_v23 }
 0x465   : > { %2696 = vmatprep.subr.bf16.mxu0 %v3982_v36 }
 0x468   : > { %2697 = vmatpush3.bf16.msra.mxu0 %v3370_v24 }
 0x469   : > { %2698 = vmatprep.subr.bf16.mxu0 %v3982_v36 }
 0x46c   : > { %2699 = vmatpush3.bf16.msra.mxu0 %v3376_v25 }
 0x46d   : > { %2700 = vmatprep.subr.bf16.mxu0 %v3982_v36 }
 0x470   : > { %2701 = vmatpush3.bf16.msra.mxu0 %v3382_v26 }
 0x471   : > { %2702 = vmatprep.subr.bf16.mxu0 %v3982_v36 }
 0x474   : > { %2703 = vmatpush3.bf16.msra.mxu0 %v3387_v27 }
 0x475   : > { %2704 = vmatprep.subr.bf16.mxu0 %v3982_v36 }
 0x478   : > { %2705 = vmatpush3.bf16.msra.mxu0 %v3395_v28 }
 0x479   : > { %2706 = vmatprep.subr.bf16.mxu0 %v3982_v36 }
 0x47c   : > { %2707 = vmatpush3.bf16.msra.mxu0 %v3401_v29 }
 0x532   : > { %v1053_v51 = vpop.f32.mrb[12].mxu0  ;;  %v1094_v49 = vpop.f32.mrb[12].mxu1 }
 0x533   : > { %v1101_v42 = vadd.f32 %v1053_v51, %v1014_v44  ;;  %v1055_v38 = vpop.f32.mrb[13].mxu0  ;;  %v1096_v46 = vpop.f32.mrb[13].mxu1  ;;  %v1103_v33 = vadd.f32 %v1094_v49, %v1016_v40 }
 0x534   : > { %v1102_v47 = vadd.f32 %v1055_v38, %v1015_v45  ;;  %v1057_v48 = vpop.f32.mrb[14].mxu0  ;;  %v1098_v30 = vpop.f32.mrb[14].mxu1  ;;  %v1104_v31 = vadd.f32 %v1096_v46, %v1017_v43 }
 0x535   : > { %v2528_v35 = vmul.f32 -1.442695, %v1101_v42  ;;  %v1058_v32 = vpop.f32.mrb[15].mxu0  ;;  %v1099_v34 = vpop.f32.mrb[15].mxu1  ;;  %v2530_v22 = vmul.f32 -1.442695, %v1103_v33 }
 0x536   : > { %v2529_v50 = vmul.f32 -1.442695, %v1102_v47 }
 0x537   : > { %2855 = vpow2.f32 %v2528_v35  ;;  %v3988_v35 = vclamps-f32 %v3488_v62, 3.0  ;;  %v1176_v62 = vld [vmem:[%s1175_s24] sm:$0xff] }
 0x538   : > { %2857 = vpow2.f32 %v2529_v50 }
 0x539   : > { %2859 = vtanh.f32 %v1104_v31 }
 0x53a   : > { %2861 = vpow2.f32 %v2530_v22 }
 0x541   : > { %v2856_v39 = vpop.eup %2855 }
 0x542   : > { %v2858_v44 = vpop.eup %2857  ;;  %v1114_v51 = vadd.f32 1.0, %v2856_v39 }
 0x543   : > { %v1115_v45 = vadd.f32 1.0, %v2858_v44  ;;  %v2860_v42 = vpop.eup %2859 }
 0x544   : > { %2863 = vrcp.f32 %v1114_v51  ;;  %v2862_v38 = vpop.eup %2861 }
 0x545   : > { %2865 = vrcp.f32 %v1115_v45  ;;  %v1116_v46 = vadd.f32 1.0, %v2862_v38 }
 0x547   : > { %2867 = vrcp.f32 %v1116_v46 }
 0x54e   : > { %v2864_v47 = vpop.eup %2863 }
 0x54f   : > { %v2866_v48 = vpop.eup %2865  ;;  %v1125_v30 = vmul.f32 %v2864_v47, %v2860_v42 }
 0x550   : > { %v1124_v49 = vmul.f32 %v2866_v48, %v3988_v35 }
 0x551   : > { %v2868_v22 = vpop.eup %2867 }
 0x552   : > { %v3567_v33 = vadd.f32 %v1125_v30, %v1124_v49 }
 0x554   : > { %v3969_v39 = vclamps-f32 %v3567_v33, 3.0 }
 0x556   : > { %2869 = vtanh.f32 %v3969_v39 }
 0x560   : > { %v2870_v32 = vpop.eup %2869 }
 0x561   : > { %v1130_v34 = vmul.f32 %v2870_v32, %v2868_v22 }
 0x563   : > { %v1131_v50 = vpack.c.bf16 %v1130_v34, %v1130_v34 }
 0x565   : > { %2709 = vmatmul.mubr.bf16.vlgmr.msra.gmra.mrb[16].mxu0 %v1131_v50 }
 0x638   : > { %v1166_v37 = vpop.f32.mrb[16].mxu0 }
 0x639   : > { %v2532_v40 = vclamps-f32 %v1166_v37, 3.0  ;;  %v2710_v43 = vpop.f32.mrb[17].mxu0 }
 0x63a   : > { %v1169_v31 = vpop.f32.mrb[18].mxu0 }
 0x63b   : > { %v1177_v44 = vadd.f32 %v2532_v40, %v1176_v62  ;;  %v2711_v51 = vpop.f32.mrb[19].mxu0 }
 0x63d   : > { %1179 = vst [vmem:[%s1178_s25] sm:$0xff] %v1177_v44 }
 0x63e   : > { %2961 = dma.done.wait [#allocation3 + $0x1], 256 }
 0x63f   : > { %2962 = vsyncadd [#allocation3 + $0x1], 4294967040  ;;  %s3577_s27 = scalar_select %p261_p4, 4, 3 }
 0x641   : > { %s2534_s30 = sshll.u32 %s3577_s27, 2 }
 0x642   : > { %s1184_s28 = sadd.s32 %s2534_s30, %s3082_s5 }
 0x643   : > { %s2535_s18 = sshll.u32 %s1184_s28, 2 }
 0x644   : > { %s1186_s8 = scalar_lea.vmem %s3955_s0, %s2535_s18 }
 0x645   : > { %v3584_v45 = vld [vmem:[%s1186_s8] sm:$0xff]  ;;  %v3586_v42 = vld [vmem:[%s1186_s8 + $0x8] sm:$0xff] }
 0x646   : > { %3989 = vst [vmem:[#allocation20_spill] sm:$0xff] %v3584_v45  ;;  %3990 = vst [vmem:[#allocation23_spill] sm:$0xff] %v3586_v42 }
 0x647   : > { %1230 = vsyncadd [#allocation3], 256  ;;  %1238 = vmatprep.subr.bf16.mxu1 %v3193_v52  ;;  %1279 = vmatprep.subr.bf16.mxu0 %v3205_v55  ;;  %v1237_v38 = vpack.c.bf16 %v2532_v40, %v2532_v40  ;;  %v3991_v47 = vld [vmem:[#allocation21_spill] sm:$0xff]  ;;  %v3992_v44 = vld [vmem:[#allocation22_spill] sm:$0xff]  ;;  %s2541_s9 = sshll.u32 %s3498_s13, 3 }
 0x648   : > { %1239 = vmatpush1.bf16.msra.mxu1 %v3197_v53  ;;  %1280 = vmatpush1.bf16.msra.mxu0 %v3210_v56  ;;  %v1233_v48 = vunpack.c.l.bf16 %v3991_v47  ;;  %v1234_v30 = vunpack.c.h.bf16 %v3991_v47  ;;  %v1235_v51 = vunpack.c.l.bf16 %v3992_v44  ;;  %s1394_s10 = scalar_lea.vmem %s3028_s26, %s2541_s9  ;;  %s1397_s11 = scalar_lea.vmem %s3033_s29, %s2541_s9 }
 0x649   : > { %1240 = vmatprep.subr.bf16.mxu1 %v3201_v54  ;;  %1281 = vmatprep.subr.bf16.mxu0 %v3214_v57 }
 0x64a   : > { %1270 = vmatprep.mubr.bf16.mxu1 %v3986_v41  ;;  %1311 = vmatprep.mubr.bf16.mxu0 %v3986_v41 }
 0x64c   : > { %1241 = vmatpush1.bf16.msra.mxu1 %v3219_v58  ;;  %1282 = vmatpush1.bf16.msra.mxu0 %v3230_v60 }
 0x64d   : > { %1242 = vmatprep.subr.bf16.mxu1 %v3225_v59  ;;  %1283 = vmatprep.subr.bf16.mxu0 %v3235_v61 }
 0x650   : > { %1243 = vmatpush1.bf16.msra.mxu1 %v3241_v63  ;;  %1284 = vmatpush1.bf16.msra.mxu0 %v3251_v1 }
 0x651   : > { %1244 = vmatprep.subr.bf16.mxu1 %v3246_v0  ;;  %1285 = vmatprep.subr.bf16.mxu0 %v3256_v2 }
 0x654   : > { %1245 = vmatpush1.bf16.msra.mxu1 %v3262_v3  ;;  %1286 = vmatpush1.bf16.msra.mxu0 %v3272_v5 }
 0x655   : > { %1246 = vmatprep.subr.bf16.mxu1 %v3267_v4  ;;  %1287 = vmatprep.subr.bf16.mxu0 %v3277_v6 }
 0x658   : > { %1247 = vmatpush1.bf16.msra.mxu1 %v3282_v7  ;;  %1288 = vmatpush1.bf16.msra.mxu0 %v3292_v9 }
 0x659   : > { %1248 = vmatprep.subr.bf16.mxu1 %v3287_v8  ;;  %1289 = vmatprep.subr.bf16.mxu0 %v3297_v10 }
 0x65c   : > { %1249 = vmatpush1.bf16.msra.mxu1 %v3302_v11  ;;  %1290 = vmatpush1.bf16.msra.mxu0 %v3312_v13 }
 0x65d   : > { %1250 = vmatprep.subr.bf16.mxu1 %v3307_v12  ;;  %1291 = vmatprep.subr.bf16.mxu0 %v3317_v14 }
 0x660   : > { %1251 = vmatpush1.bf16.msra.mxu1 %v3322_v15  ;;  %1292 = vmatpush1.bf16.msra.mxu0 %v3332_v17 }
 0x661   : > { %1252 = vmatprep.subr.bf16.mxu1 %v3327_v16  ;;  %1293 = vmatprep.subr.bf16.mxu0 %v3337_v18 }
 0x664   : > { %1253 = vmatpush1.bf16.msra.mxu1 %v3342_v19  ;;  %1294 = vmatpush1.bf16.msra.mxu0 %v3348_v20 }
 0x665   : > { %2712 = vmatprep.subr.bf16.mxu1 %v3982_v36 }
 0x667   : > { %1271 = vmatmul.mubr.bf16.vlgmr.msra.gmra.mrb[16].mxu1 %v1237_v38  ;;  %1312 = vmatmul.mubr.bf16.vlgmr.msra.gmra.mrb[20].mxu0 %v1237_v38  ;;  %v1236_v38 = vunpack.c.h.bf16 %v3992_v44 }
 0x668   : > { %2713 = vmatpush3.bf16.msra.mxu1 %v3357_v21  ;;  %2728 = vmatprep.mubr.msk.bf16.mxu1 %vm2977_vm0, %v3982_v36 }
 0x669   : > { %2714 = vmatprep.subr.bf16.mxu1 %v3982_v36 }
 0x66c   : > { %2715 = vmatpush3.bf16.msra.mxu1 %v3364_v23 }
 0x66d   : > { %2716 = vmatprep.subr.bf16.mxu1 %v3982_v36 }
 0x670   : > { %2717 = vmatpush3.bf16.msra.mxu1 %v3370_v24 }
 0x671   : > { %2718 = vmatprep.subr.bf16.mxu1 %v3982_v36 }
 0x674   : > { %2719 = vmatpush3.bf16.msra.mxu1 %v3376_v25 }
 0x675   : > { %2720 = vmatprep.subr.bf16.mxu1 %v3982_v36 }
 0x678   : > { %2721 = vmatpush3.bf16.msra.mxu1 %v3382_v26 }
 0x679   : > { %2722 = vmatprep.subr.bf16.mxu1 %v3982_v36 }
 0x67c   : > { %2723 = vmatpush3.bf16.msra.mxu1 %v3387_v27 }
 0x67d   : > { %2724 = vmatprep.subr.bf16.mxu1 %v3982_v36 }
 0x680   : > { %2725 = vmatpush3.bf16.msra.mxu1 %v3395_v28 }
 0x681   : > { %2726 = vmatprep.subr.bf16.mxu1 %v3982_v36 }
 0x684   : > { %2727 = vmatpush3.bf16.msra.mxu1 %v3401_v29 }
 0x73a   : > { %v1272_v35 = vpop.f32.mrb[16].mxu1  ;;  %v1313_v49 = vpop.f32.mrb[20].mxu0 }
 0x73b   : > { %v1320_v46 = vadd.f32 %v1272_v35, %v1233_v48  ;;  %v1274_v22 = vpop.f32.mrb[17].mxu1  ;;  %v1315_v32 = vpop.f32.mrb[21].mxu0  ;;  %v1322_v39 = vadd.f32 %v1313_v49, %v1235_v51 }
 0x73c   : > { %v1321_v34 = vadd.f32 %v1274_v22, %v1234_v30  ;;  %v1276_v50 = vpop.f32.mrb[18].mxu1  ;;  %v1317_v37 = vpop.f32.mrb[22].mxu0  ;;  %v1323_v47 = vadd.f32 %v1315_v32, %v1236_v38 }
 0x73d   : > { %v2536_v62 = vmul.f32 -1.442695, %v1320_v46  ;;  %v1277_v40 = vpop.f32.mrb[19].mxu1  ;;  %v1318_v43 = vpop.f32.mrb[23].mxu0  ;;  %v2538_v42 = vmul.f32 -1.442695, %v1322_v39 }
 0x73e   : > { %v2537_v31 = vmul.f32 -1.442695, %v1321_v34 }
 0x73f   : > { %2871 = vpow2.f32 %v2536_v62  ;;  %v3993_v62 = vclamps-f32 %v3567_v33, 3.0  ;;  %v1395_v33 = vld [vmem:[%s1394_s10] sm:$0xff] }
 0x740   : > { %2873 = vpow2.f32 %v2537_v31 }
 0x741   : > { %2875 = vtanh.f32 %v1323_v47 }
 0x742   : > { %2877 = vpow2.f32 %v2538_v42 }
 0x749   : > { %v2872_v45 = vpop.eup %2871 }
 0x74a   : > { %v2874_v48 = vpop.eup %2873  ;;  %v1333_v35 = vadd.f32 1.0, %v2872_v45 }
 0x74b   : > { %v1334_v30 = vadd.f32 1.0, %v2874_v48  ;;  %v2876_v46 = vpop.eup %2875 }
 0x74c   : > { %2879 = vrcp.f32 %v1333_v35  ;;  %v2878_v22 = vpop.eup %2877 }
 0x74d   : > { %2881 = vrcp.f32 %v1334_v30  ;;  %v1335_v32 = vadd.f32 1.0, %v2878_v22 }
 0x74f   : > { %2883 = vrcp.f32 %v1335_v32 }
 0x756   : > { %v2880_v34 = vpop.eup %2879 }
 0x757   : > { %v2882_v50 = vpop.eup %2881  ;;  %v1344_v37 = vmul.f32 %v2880_v34, %v2876_v46 }
 0x758   : > { %v1343_v49 = vmul.f32 %v2882_v50, %v3993_v62 }
 0x759   : > { %v2884_v42 = vpop.eup %2883 }
 0x75a   : > { %v3646_v39 = vadd.f32 %v1344_v37, %v1343_v49 }
 0x75c   : > { %v3972_v45 = vclamps-f32 %v3646_v39, 3.0 }
 0x75e   : > { %2885 = vtanh.f32 %v3972_v45 }
 0x768   : > { %v2886_v40 = vpop.eup %2885 }
 0x769   : > { %v1349_v43 = vmul.f32 %v2886_v40, %v2884_v42 }
 0x76b   : > { %v1350_v31 = vpack.c.bf16 %v1349_v43, %v1349_v43 }
 0x76d   : > { %2729 = vmatmul.mubr.bf16.vlgmr.msra.gmra.mrb[20].mxu1 %v1350_v31 }
 0x840   : > { %v1385_v44 = vpop.f32.mrb[20].mxu1 }
 0x841   : > { %v2540_v51 = vclamps-f32 %v1385_v44, 3.0  ;;  %v2730_v38 = vpop.f32.mrb[21].mxu1 }
 0x842   : > { %v1388_v47 = vpop.f32.mrb[22].mxu1 }
 0x843   : > { %v1396_v48 = vadd.f32 %v2540_v51, %v1395_v33  ;;  %v2731_v35 = vpop.f32.mrb[23].mxu1 }
 0x845   : > { %1398 = vst [vmem:[%s1397_s11] sm:$0xff] %v1396_v48 }
 0x846   : > { %2963 = dma.done.wait [#allocation3], 256 }
 0x847   : > { %2964 = vsyncadd [#allocation3], 4294967040  ;;  %s3656_s12 = scalar_select %p261_p4, 5, 2 }
 0x849   : > { %s2542_s17 = sshll.u32 %s3656_s12, 2 }
 0x84a   : > { %s1403_s13 = sadd.s32 %s2542_s17, %s3082_s5 }
 0x84b   : > { %s2543_s14 = sshll.u32 %s1403_s13, 2 }
 0x84c   : > { %s1405_s21 = scalar_lea.vmem %s3955_s0, %s2543_s14 }
 0x84d   : > { %v3663_v30 = vld [vmem:[%s1405_s21] sm:$0xff]  ;;  %v3665_v46 = vld [vmem:[%s1405_s21 + $0x8] sm:$0xff] }
 0x84e   : > { %3994 = vst [vmem:[#allocation21_spill] sm:$0xff] %v3663_v30  ;;  %3995 = vst [vmem:[#allocation22_spill] sm:$0xff] %v3665_v46 }
 0x84f   : > { %1449 = vsyncadd [#allocation3 + $0x1], 256  ;;  %1457 = vmatprep.subr.bf16.mxu0 %v3193_v52  ;;  %1498 = vmatprep.subr.bf16.mxu1 %v3205_v55  ;;  %v1456_v22 = vpack.c.bf16 %v2540_v51, %v2540_v51  ;;  %v3996_v34 = vld [vmem:[#allocation20_spill] sm:$0xff]  ;;  %v3997_v48 = vld [vmem:[#allocation23_spill] sm:$0xff]  ;;  %s2549_s22 = sshll.u32 %s3577_s27, 3 }
 0x850   : > { %1458 = vmatpush1.bf16.msra.mxu0 %v3197_v53  ;;  %1499 = vmatpush1.bf16.msra.mxu1 %v3210_v56  ;;  %v1452_v50 = vunpack.c.l.bf16 %v3996_v34  ;;  %v1453_v37 = vunpack.c.h.bf16 %v3996_v34  ;;  %v1454_v35 = vunpack.c.l.bf16 %v3997_v48  ;;  %s1613_s23 = scalar_lea.vmem %s3028_s26, %s2549_s22  ;;  %s1616_s24 = scalar_lea.vmem %s3033_s29, %s2549_s22 }
 0x851   : > { %1459 = vmatprep.subr.bf16.mxu0 %v3201_v54  ;;  %1500 = vmatprep.subr.bf16.mxu1 %v3214_v57 }
 0x852   : > { %1489 = vmatprep.mubr.bf16.mxu0 %v3986_v41  ;;  %1530 = vmatprep.mubr.bf16.mxu1 %v3986_v41 }
 0x854   : > { %1460 = vmatpush1.bf16.msra.mxu0 %v3219_v58  ;;  %1501 = vmatpush1.bf16.msra.mxu1 %v3230_v60 }
 0x855   : > { %1461 = vmatprep.subr.bf16.mxu0 %v3225_v59  ;;  %1502 = vmatprep.subr.bf16.mxu1 %v3235_v61 }
 0x858   : > { %1462 = vmatpush1.bf16.msra.mxu0 %v3241_v63  ;;  %1503 = vmatpush1.bf16.msra.mxu1 %v3251_v1 }
 0x859   : > { %1463 = vmatprep.subr.bf16.mxu0 %v3246_v0  ;;  %1504 = vmatprep.subr.bf16.mxu1 %v3256_v2 }
 0x85c   : > { %1464 = vmatpush1.bf16.msra.mxu0 %v3262_v3  ;;  %1505 = vmatpush1.bf16.msra.mxu1 %v3272_v5 }
 0x85d   : > { %1465 = vmatprep.subr.bf16.mxu0 %v3267_v4  ;;  %1506 = vmatprep.subr.bf16.mxu1 %v3277_v6 }
 0x860   : > { %1466 = vmatpush1.bf16.msra.mxu0 %v3282_v7  ;;  %1507 = vmatpush1.bf16.msra.mxu1 %v3292_v9 }
 0x861   : > { %1467 = vmatprep.subr.bf16.mxu0 %v3287_v8  ;;  %1508 = vmatprep.subr.bf16.mxu1 %v3297_v10 }
 0x864   : > { %1468 = vmatpush1.bf16.msra.mxu0 %v3302_v11  ;;  %1509 = vmatpush1.bf16.msra.mxu1 %v3312_v13 }
 0x865   : > { %1469 = vmatprep.subr.bf16.mxu0 %v3307_v12  ;;  %1510 = vmatprep.subr.bf16.mxu1 %v3317_v14 }
 0x868   : > { %1470 = vmatpush1.bf16.msra.mxu0 %v3322_v15  ;;  %1511 = vmatpush1.bf16.msra.mxu1 %v3332_v17 }
 0x869   : > { %1471 = vmatprep.subr.bf16.mxu0 %v3327_v16  ;;  %1512 = vmatprep.subr.bf16.mxu1 %v3337_v18 }
 0x86c   : > { %1472 = vmatpush1.bf16.msra.mxu0 %v3342_v19  ;;  %1513 = vmatpush1.bf16.msra.mxu1 %v3348_v20 }
 0x86d   : > { %2732 = vmatprep.subr.bf16.mxu0 %v3982_v36 }
 0x86f   : > { %1490 = vmatmul.mubr.bf16.vlgmr.msra.gmra.mrb[24].mxu0 %v1456_v22  ;;  %1531 = vmatmul.mubr.bf16.vlgmr.msra.gmra.mrb[24].mxu1 %v1456_v22  ;;  %v1455_v22 = vunpack.c.h.bf16 %v3997_v48 }
 0x870   : > { %2733 = vmatpush3.bf16.msra.mxu0 %v3357_v21  ;;  %2748 = vmatprep.mubr.msk.bf16.mxu0 %vm2977_vm0, %v3982_v36 }
 0x871   : > { %2734 = vmatprep.subr.bf16.mxu0 %v3982_v36 }
 0x874   : > { %2735 = vmatpush3.bf16.msra.mxu0 %v3364_v23 }
 0x875   : > { %2736 = vmatprep.subr.bf16.mxu0 %v3982_v36 }
 0x878   : > { %2737 = vmatpush3.bf16.msra.mxu0 %v3370_v24 }
 0x879   : > { %2738 = vmatprep.subr.bf16.mxu0 %v3982_v36 }
 0x87c   : > { %2739 = vmatpush3.bf16.msra.mxu0 %v3376_v25 }
 0x87d   : > { %2740 = vmatprep.subr.bf16.mxu0 %v3982_v36 }
 0x880   : > { %2741 = vmatpush3.bf16.msra.mxu0 %v3382_v26 }
 0x881   : > { %2742 = vmatprep.subr.bf16.mxu0 %v3982_v36 }
 0x884   : > { %2743 = vmatpush3.bf16.msra.mxu0 %v3387_v27 }
 0x885   : > { %2744 = vmatprep.subr.bf16.mxu0 %v3982_v36 }
 0x888   : > { %2745 = vmatpush3.bf16.msra.mxu0 %v3395_v28 }
 0x889   : > { %2746 = vmatprep.subr.bf16.mxu0 %v3982_v36 }
 0x88c   : > { %2747 = vmatpush3.bf16.msra.mxu0 %v3401_v29 }
 0x942   : > { %v1491_v62 = vpop.f32.mrb[24].mxu0  ;;  %v1532_v49 = vpop.f32.mrb[24].mxu1 }
 0x943   : > { %v1539_v32 = vadd.f32 %v1491_v62, %v1452_v50  ;;  %v1493_v42 = vpop.f32.mrb[25].mxu0  ;;  %v1534_v40 = vpop.f32.mrb[25].mxu1  ;;  %v1541_v45 = vadd.f32 %v1532_v49, %v1454_v35 }
 0x944   : > { %v1540_v43 = vadd.f32 %v1493_v42, %v1453_v37  ;;  %v1495_v31 = vpop.f32.mrb[26].mxu0  ;;  %v1536_v44 = vpop.f32.mrb[26].mxu1  ;;  %v1542_v34 = vadd.f32 %v1534_v40, %v1455_v22 }
 0x945   : > { %v2544_v33 = vmul.f32 -1.442695, %v1539_v32  ;;  %v1496_v51 = vpop.f32.mrb[27].mxu0  ;;  %v1537_v38 = vpop.f32.mrb[27].mxu1  ;;  %v2546_v46 = vmul.f32 -1.442695, %v1541_v45 }
 0x946   : > { %v2545_v47 = vmul.f32 -1.442695, %v1540_v43 }
 0x947   : > { %2887 = vpow2.f32 %v2544_v33  ;;  %v3998_v33 = vclamps-f32 %v3646_v39, 3.0  ;;  %v1614_v39 = vld [vmem:[%s1613_s23] sm:$0xff] }
 0x948   : > { %2889 = vpow2.f32 %v2545_v47 }
 0x949   : > { %2891 = vtanh.f32 %v1542_v34 }
 0x94a   : > { %2893 = vpow2.f32 %v2546_v46 }
 0x951   : > { %v2888_v30 = vpop.eup %2887 }
 0x952   : > { %v2890_v50 = vpop.eup %2889  ;;  %v1552_v62 = vadd.f32 1.0, %v2888_v30 }
 0x953   : > { %v1553_v37 = vadd.f32 1.0, %v2890_v50  ;;  %v2892_v32 = vpop.eup %2891 }
 0x954   : > { %2895 = vrcp.f32 %v1552_v62  ;;  %v2894_v42 = vpop.eup %2893 }
 0x955   : > { %2897 = vrcp.f32 %v1553_v37  ;;  %v1554_v40 = vadd.f32 1.0, %v2894_v42 }
 0x957   : > { %2899 = vrcp.f32 %v1554_v40 }
 0x95e   : > { %v2896_v43 = vpop.eup %2895 }
 0x95f   : > { %v2898_v31 = vpop.eup %2897  ;;  %v1563_v44 = vmul.f32 %v2896_v43, %v2892_v32 }
 0x960   : > { %v1562_v49 = vmul.f32 %v2898_v31, %v3998_v33 }
 0x961   : > { %v2900_v46 = vpop.eup %2899 }
 0x962   : > { %v3725_v45 = vadd.f32 %v1563_v44, %v1562_v49 }
 0x964   : > { %v3975_v30 = vclamps-f32 %v3725_v45, 3.0 }
 0x966   : > { %2901 = vtanh.f32 %v3975_v30 }
 0x970   : > { %v2902_v51 = vpop.eup %2901 }
 0x971   : > { %v1568_v38 = vmul.f32 %v2902_v51, %v2900_v46 }
 0x973   : > { %v1569_v47 = vpack.c.bf16 %v1568_v38, %v1568_v38 }
 0x975   : > { %2749 = vmatmul.mubr.bf16.vlgmr.msra.gmra.mrb[28].mxu0 %v1569_v47 }
 0xa48   : > { %v1604_v48 = vpop.f32.mrb[28].mxu0 }
 0xa49   : > { %v2548_v35 = vclamps-f32 %v1604_v48, 3.0  ;;  %v2750_v22 = vpop.f32.mrb[29].mxu0 }
 0xa4a   : > { %v1607_v34 = vpop.f32.mrb[30].mxu0 }
 0xa4b   : > { %v1615_v50 = vadd.f32 %v2548_v35, %v1614_v39  ;;  %v2751_v62 = vpop.f32.mrb[31].mxu0 }
 0xa4d   : > { %1617 = vst [vmem:[%s1616_s24] sm:$0xff] %v1615_v50 }
 0xa4e   : > { %2965 = dma.done.wait [#allocation3 + $0x1], 256 }
 0xa4f   : > { %2966 = vsyncadd [#allocation3 + $0x1], 4294967040  ;;  %s3735_s25 = scalar_select %p261_p4, 6, 1 }
 0xa51   : > { %s2550_s30 = sshll.u32 %s3735_s25, 2 }
 0xa52   : > { %s1622_s27 = sadd.s32 %s2550_s30, %s3082_s5 }
 0xa53   : > { %s2551_s28 = sshll.u32 %s1622_s27, 2 }
 0xa54   : > { %s1624_s7 = scalar_lea.vmem %s3955_s0, %s2551_s28 }
 0xa55   : > { %v3742_v37 = vld [vmem:[%s1624_s7] sm:$0xff]  ;;  %v3744_v32 = vld [vmem:[%s1624_s7 + $0x8] sm:$0xff] }
 0xa56   : > { %3999 = vst [vmem:[#allocation20_spill] sm:$0xff] %v3742_v37  ;;  %4000 = vst [vmem:[#allocation23_spill] sm:$0xff] %v3744_v32 }
 0xa57   : > { %1668 = vsyncadd [#allocation3], 256  ;;  %1676 = vmatprep.subr.bf16.mxu1 %v3193_v52  ;;  %1717 = vmatprep.subr.bf16.mxu0 %v3205_v55  ;;  %v1675_v42 = vpack.c.bf16 %v2548_v35, %v2548_v35  ;;  %v4001_v43 = vld [vmem:[#allocation21_spill] sm:$0xff]  ;;  %v4002_v50 = vld [vmem:[#allocation22_spill] sm:$0xff]  ;;  %s2557_s8 = sshll.u32 %s3656_s12, 3 }
 0xa58   : > { %1677 = vmatpush1.bf16.msra.mxu1 %v3197_v53  ;;  %1718 = vmatpush1.bf16.msra.mxu0 %v3210_v56  ;;  %v1671_v31 = vunpack.c.l.bf16 %v4001_v43  ;;  %v1672_v44 = vunpack.c.h.bf16 %v4001_v43  ;;  %v1673_v62 = vunpack.c.l.bf16 %v4002_v50  ;;  %s1832_s9 = scalar_lea.vmem %s3028_s26, %s2557_s8  ;;  %s1835_s10 = scalar_lea.vmem %s3033_s29, %s2557_s8 }
 0xa59   : > { %1678 = vmatprep.subr.bf16.mxu1 %v3201_v54  ;;  %1719 = vmatprep.subr.bf16.mxu0 %v3214_v57 }
 0xa5a   : > { %1708 = vmatprep.mubr.bf16.mxu1 %v3986_v41  ;;  %1749 = vmatprep.mubr.bf16.mxu0 %v3986_v41 }
 0xa5c   : > { %1679 = vmatpush1.bf16.msra.mxu1 %v3219_v58  ;;  %1720 = vmatpush1.bf16.msra.mxu0 %v3230_v60 }
 0xa5d   : > { %1680 = vmatprep.subr.bf16.mxu1 %v3225_v59  ;;  %1721 = vmatprep.subr.bf16.mxu0 %v3235_v61 }
 0xa60   : > { %1681 = vmatpush1.bf16.msra.mxu1 %v3241_v63  ;;  %1722 = vmatpush1.bf16.msra.mxu0 %v3251_v1 }
 0xa61   : > { %1682 = vmatprep.subr.bf16.mxu1 %v3246_v0  ;;  %1723 = vmatprep.subr.bf16.mxu0 %v3256_v2 }
 0xa64   : > { %1683 = vmatpush1.bf16.msra.mxu1 %v3262_v3  ;;  %1724 = vmatpush1.bf16.msra.mxu0 %v3272_v5 }
 0xa65   : > { %1684 = vmatprep.subr.bf16.mxu1 %v3267_v4  ;;  %1725 = vmatprep.subr.bf16.mxu0 %v3277_v6 }
 0xa68   : > { %1685 = vmatpush1.bf16.msra.mxu1 %v3282_v7  ;;  %1726 = vmatpush1.bf16.msra.mxu0 %v3292_v9 }
 0xa69   : > { %1686 = vmatprep.subr.bf16.mxu1 %v3287_v8  ;;  %1727 = vmatprep.subr.bf16.mxu0 %v3297_v10 }
 0xa6c   : > { %1687 = vmatpush1.bf16.msra.mxu1 %v3302_v11  ;;  %1728 = vmatpush1.bf16.msra.mxu0 %v3312_v13 }
 0xa6d   : > { %1688 = vmatprep.subr.bf16.mxu1 %v3307_v12  ;;  %1729 = vmatprep.subr.bf16.mxu0 %v3317_v14 }
 0xa70   : > { %1689 = vmatpush1.bf16.msra.mxu1 %v3322_v15  ;;  %1730 = vmatpush1.bf16.msra.mxu0 %v3332_v17 }
 0xa71   : > { %1690 = vmatprep.subr.bf16.mxu1 %v3327_v16  ;;  %1731 = vmatprep.subr.bf16.mxu0 %v3337_v18 }
 0xa74   : > { %1691 = vmatpush1.bf16.msra.mxu1 %v3342_v19  ;;  %1732 = vmatpush1.bf16.msra.mxu0 %v3348_v20 }
 0xa75   : > { %2752 = vmatprep.subr.bf16.mxu1 %v3982_v36 }
 0xa77   : > { %1709 = vmatmul.mubr.bf16.vlgmr.msra.gmra.mrb[28].mxu1 %v1675_v42  ;;  %1750 = vmatmul.mubr.bf16.vlgmr.msra.gmra.mrb[32].mxu0 %v1675_v42  ;;  %v1674_v42 = vunpack.c.h.bf16 %v4002_v50 }
 0xa78   : > { %2753 = vmatpush3.bf16.msra.mxu1 %v3357_v21  ;;  %2768 = vmatprep.mubr.msk.bf16.mxu1 %vm2977_vm0, %v3982_v36 }
 0xa79   : > { %2754 = vmatprep.subr.bf16.mxu1 %v3982_v36 }
 0xa7c   : > { %2755 = vmatpush3.bf16.msra.mxu1 %v3364_v23 }
 0xa7d   : > { %2756 = vmatprep.subr.bf16.mxu1 %v3982_v36 }
 0xa80   : > { %2757 = vmatpush3.bf16.msra.mxu1 %v3370_v24 }
 0xa81   : > { %2758 = vmatprep.subr.bf16.mxu1 %v3982_v36 }
 0xa84   : > { %2759 = vmatpush3.bf16.msra.mxu1 %v3376_v25 }
 0xa85   : > { %2760 = vmatprep.subr.bf16.mxu1 %v3982_v36 }
 0xa88   : > { %2761 = vmatpush3.bf16.msra.mxu1 %v3382_v26 }
 0xa89   : > { %2762 = vmatprep.subr.bf16.mxu1 %v3982_v36 }
 0xa8c   : > { %2763 = vmatpush3.bf16.msra.mxu1 %v3387_v27 }
 0xa8d   : > { %2764 = vmatprep.subr.bf16.mxu1 %v3982_v36 }
 0xa90   : > { %2765 = vmatpush3.bf16.msra.mxu1 %v3395_v28 }
 0xa91   : > { %2766 = vmatprep.subr.bf16.mxu1 %v3982_v36 }
 0xa94   : > { %2767 = vmatpush3.bf16.msra.mxu1 %v3401_v29 }
 0xb4a   : > { %v1710_v33 = vpop.f32.mrb[28].mxu1  ;;  %v1751_v49 = vpop.f32.mrb[32].mxu0 }
 0xb4b   : > { %v1758_v40 = vadd.f32 %v1710_v33, %v1671_v31  ;;  %v1712_v46 = vpop.f32.mrb[29].mxu1  ;;  %v1753_v51 = vpop.f32.mrb[33].mxu0  ;;  %v1760_v30 = vadd.f32 %v1751_v49, %v1673_v62 }
 0xb4c   : > { %v1759_v38 = vadd.f32 %v1712_v46, %v1672_v44  ;;  %v1714_v47 = vpop.f32.mrb[30].mxu1  ;;  %v1755_v48 = vpop.f32.mrb[34].mxu0  ;;  %v1761_v43 = vadd.f32 %v1753_v51, %v1674_v42 }
 0xb4d   : > { %v2552_v39 = vmul.f32 -1.442695, %v1758_v40  ;;  %v1715_v35 = vpop.f32.mrb[31].mxu1  ;;  %v1756_v22 = vpop.f32.mrb[35].mxu0  ;;  %v2554_v32 = vmul.f32 -1.442695, %v1760_v30 }
 0xb4e   : > { %v2553_v34 = vmul.f32 -1.442695, %v1759_v38 }
 0xb4f   : > { %2903 = vpow2.f32 %v2552_v39  ;;  %v4003_v39 = vclamps-f32 %v3725_v45, 3.0  ;;  %v1833_v45 = vld [vmem:[%s1832_s9] sm:$0xff] }
 0xb50   : > { %2905 = vpow2.f32 %v2553_v34 }
 0xb51   : > { %2907 = vtanh.f32 %v1761_v43 }
 0xb52   : > { %2909 = vpow2.f32 %v2554_v32 }
 0xb59   : > { %v2904_v37 = vpop.eup %2903 }
 0xb5a   : > { %v2906_v31 = vpop.eup %2905  ;;  %v1771_v33 = vadd.f32 1.0, %v2904_v37 }
 0xb5b   : > { %v1772_v44 = vadd.f32 1.0, %v2906_v31  ;;  %v2908_v40 = vpop.eup %2907 }
 0xb5c   : > { %2911 = vrcp.f32 %v1771_v33  ;;  %v2910_v46 = vpop.eup %2909 }
 0xb5d   : > { %2913 = vrcp.f32 %v1772_v44  ;;  %v1773_v51 = vadd.f32 1.0, %v2910_v46 }
 0xb5f   : > { %2915 = vrcp.f32 %v1773_v51 }
 0xb66   : > { %v2912_v38 = vpop.eup %2911 }
 0xb67   : > { %v2914_v47 = vpop.eup %2913  ;;  %v1782_v48 = vmul.f32 %v2912_v38, %v2908_v40 }
 0xb68   : > { %v1781_v49 = vmul.f32 %v2914_v47, %v4003_v39 }
 0xb69   : > { %v2916_v32 = vpop.eup %2915 }
 0xb6a   : > { %v3804_v30 = vadd.f32 %v1782_v48, %v1781_v49 }
 0xb6c   : > { %v3978_v37 = vclamps-f32 %v3804_v30, 3.0 }
 0xb6e   : > { %2917 = vtanh.f32 %v3978_v37 }
 0xb78   : > { %v2918_v35 = vpop.eup %2917 }
 0xb79   : > { %v1787_v22 = vmul.f32 %v2918_v35, %v2916_v32 }
 0xb7b   : > { %v1788_v34 = vpack.c.bf16 %v1787_v22, %v1787_v22 }
 0xb7d   : > { %2769 = vmatmul.mubr.bf16.vlgmr.msra.gmra.mrb[32].mxu1 %v1788_v34 }
 0xc50   : > { %v1823_v50 = vpop.f32.mrb[32].mxu1 }
 0xc51   : > { %v2556_v62 = vclamps-f32 %v1823_v50, 3.0  ;;  %v2770_v42 = vpop.f32.mrb[33].mxu1 }
 0xc52   : > { %v1826_v43 = vpop.f32.mrb[34].mxu1 }
 0xc53   : > { %v1834_v31 = vadd.f32 %v2556_v62, %v1833_v45  ;;  %v2771_v33 = vpop.f32.mrb[35].mxu1 }
 0xc55   : > { %1836 = vst [vmem:[%s1835_s10] sm:$0xff] %v1834_v31 }
 0xc56   : > { %2967 = dma.done.wait [#allocation3], 256 }
 0xc57   : > { %2968 = vsyncadd [#allocation3], 4294967040  ;;  %s3814_s11 = scalar_select %p261_p4, 7, 0 }
 0xc59   : > { %s2558_s17 = sshll.u32 %s3814_s11, 2 }
 0xc5a   : > { %s1841_s12 = sadd.s32 %s2558_s17, %s3082_s5 }
 0xc5b   : > { %s2559_s13 = sshll.u32 %s1841_s12, 2 }
 0xc5c   : > { %s1843_s20 = scalar_lea.vmem %s3955_s0, %s2559_s13 }
 0xc5d   : > { %v3821_v44 = vld [vmem:[%s1843_s20] sm:$0xff]  ;;  %v3823_v40 = vld [vmem:[%s1843_s20 + $0x8] sm:$0xff] }
 0xc5e   : > { %4004 = vst [vmem:[#allocation21_spill] sm:$0xff] %v3821_v44  ;;  %4005 = vst [vmem:[#allocation22_spill] sm:$0xff] %v3823_v40 }
 0xc5f   : > { %1887 = vsyncadd [#allocation3 + $0x1], 256  ;;  %1895 = vmatprep.subr.bf16.mxu0 %v3193_v52  ;;  %1936 = vmatprep.subr.bf16.mxu1 %v3205_v55  ;;  %v1894_v46 = vpack.c.bf16 %v2556_v62, %v2556_v62  ;;  %v4006_v38 = vld [vmem:[#allocation20_spill] sm:$0xff]  ;;  %v4007_v31 = vld [vmem:[#allocation23_spill] sm:$0xff]  ;;  %s2565_s16 = sshll.u32 %s3735_s25, 3 }
 0xc60   : > { %1896 = vmatpush1.bf16.msra.mxu0 %v3197_v53  ;;  %1937 = vmatpush1.bf16.msra.mxu1 %v3210_v56  ;;  %v1890_v47 = vunpack.c.l.bf16 %v4006_v38  ;;  %v1891_v48 = vunpack.c.h.bf16 %v4006_v38  ;;  %v1892_v33 = vunpack.c.l.bf16 %v4007_v31  ;;  %s2051_s5 = scalar_lea.vmem %s3028_s26, %s2565_s16  ;;  %s2054_s21 = scalar_lea.vmem %s3033_s29, %s2565_s16 }
 0xc61   : > { %1897 = vmatprep.subr.bf16.mxu0 %v3201_v54  ;;  %1938 = vmatprep.subr.bf16.mxu1 %v3214_v57 }
 0xc62   : > { %1927 = vmatprep.mubr.bf16.mxu0 %v3986_v41  ;;  %1968 = vmatprep.mubr.bf16.mxu1 %v3986_v41 }
 0xc64   : > { %1898 = vmatpush1.bf16.msra.mxu0 %v3219_v58  ;;  %1939 = vmatpush1.bf16.msra.mxu1 %v3230_v60 }
 0xc65   : > { %1899 = vmatprep.subr.bf16.mxu0 %v3225_v59  ;;  %1940 = vmatprep.subr.bf16.mxu1 %v3235_v61 }
 0xc68   : > { %1900 = vmatpush1.bf16.msra.mxu0 %v3241_v63  ;;  %1941 = vmatpush1.bf16.msra.mxu1 %v3251_v1 }
 0xc69   : > { %1901 = vmatprep.subr.bf16.mxu0 %v3246_v0  ;;  %1942 = vmatprep.subr.bf16.mxu1 %v3256_v2 }
 0xc6c   : > { %1902 = vmatpush1.bf16.msra.mxu0 %v3262_v3  ;;  %1943 = vmatpush1.bf16.msra.mxu1 %v3272_v5 }
 0xc6d   : > { %1903 = vmatprep.subr.bf16.mxu0 %v3267_v4  ;;  %1944 = vmatprep.subr.bf16.mxu1 %v3277_v6 }
 0xc70   : > { %1904 = vmatpush1.bf16.msra.mxu0 %v3282_v7  ;;  %1945 = vmatpush1.bf16.msra.mxu1 %v3292_v9 }
 0xc71   : > { %1905 = vmatprep.subr.bf16.mxu0 %v3287_v8  ;;  %1946 = vmatprep.subr.bf16.mxu1 %v3297_v10 }
 0xc74   : > { %1906 = vmatpush1.bf16.msra.mxu0 %v3302_v11  ;;  %1947 = vmatpush1.bf16.msra.mxu1 %v3312_v13 }
 0xc75   : > { %1907 = vmatprep.subr.bf16.mxu0 %v3307_v12  ;;  %1948 = vmatprep.subr.bf16.mxu1 %v3317_v14 }
 0xc78   : > { %1908 = vmatpush1.bf16.msra.mxu0 %v3322_v15  ;;  %1949 = vmatpush1.bf16.msra.mxu1 %v3332_v17 }
 0xc79   : > { %1909 = vmatprep.subr.bf16.mxu0 %v3327_v16  ;;  %1950 = vmatprep.subr.bf16.mxu1 %v3337_v18 }
 0xc7c   : > { %1910 = vmatpush1.bf16.msra.mxu0 %v3342_v19  ;;  %1951 = vmatpush1.bf16.msra.mxu1 %v3348_v20 }
 0xc7d   : > { %2772 = vmatprep.subr.bf16.mxu0 %v3982_v36  ;;  %2065 = vmatprep.subr.bf16.mxu1 %v3193_v52 }
 0xc7f   : > { %1928 = vmatmul.mubr.bf16.vlgmr.msra.gmra.mrb[36].mxu0 %v1894_v46  ;;  %1969 = vmatmul.mubr.bf16.vlgmr.msra.gmra.mrb[36].mxu1 %v1894_v46  ;;  %v1893_v46 = vunpack.c.h.bf16 %v4007_v31 }
 0xc80   : > { %2773 = vmatpush3.bf16.msra.mxu0 %v3357_v21  ;;  %2788 = vmatprep.mubr.msk.bf16.mxu0 %vm2977_vm0, %v3982_v36 }
 0xc81   : > { %2774 = vmatprep.subr.bf16.mxu0 %v3982_v36 }
 0xc84   : > { %2775 = vmatpush3.bf16.msra.mxu0 %v3364_v23 }
 0xc85   : > { %2776 = vmatprep.subr.bf16.mxu0 %v3982_v36 }
 0xc88   : > { %2777 = vmatpush3.bf16.msra.mxu0 %v3370_v24 }
 0xc89   : > { %2778 = vmatprep.subr.bf16.mxu0 %v3982_v36 }
 0xc8c   : > { %2779 = vmatpush3.bf16.msra.mxu0 %v3376_v25 }
 0xc8d   : > { %2780 = vmatprep.subr.bf16.mxu0 %v3982_v36 }
 0xc90   : > { %2781 = vmatpush3.bf16.msra.mxu0 %v3382_v26 }
 0xc91   : > { %2782 = vmatprep.subr.bf16.mxu0 %v3982_v36 }
 0xc94   : > { %2783 = vmatpush3.bf16.msra.mxu0 %v3387_v27 }
 0xc95   : > { %2784 = vmatprep.subr.bf16.mxu0 %v3982_v36 }
 0xc98   : > { %2785 = vmatpush3.bf16.msra.mxu0 %v3395_v28 }
 0xc99   : > { %2786 = vmatprep.subr.bf16.mxu0 %v3982_v36 }
 0xc9c   : > { %2787 = vmatpush3.bf16.msra.mxu0 %v3401_v29 }
 0xc9d   : > { %2106 = vmatprep.subr.bf16.mxu0 %v3205_v55 }
 0xd52   : > { %v1929_v39 = vpop.f32.mrb[36].mxu0  ;;  %v1970_v49 = vpop.f32.mrb[36].mxu1 }
 0xd53   : > { %v1977_v51 = vadd.f32 %v1929_v39, %v1890_v47  ;;  %v1931_v32 = vpop.f32.mrb[37].mxu0  ;;  %v1972_v35 = vpop.f32.mrb[37].mxu1  ;;  %v1979_v37 = vadd.f32 %v1970_v49, %v1892_v33 }
 0xd54   : > { %v1978_v22 = vadd.f32 %v1931_v32, %v1891_v48  ;;  %v1933_v34 = vpop.f32.mrb[38].mxu0  ;;  %v1974_v50 = vpop.f32.mrb[38].mxu1  ;;  %v1980_v38 = vadd.f32 %v1972_v35, %v1893_v46 }
 0xd55   : > { %v2560_v45 = vmul.f32 -1.442695, %v1977_v51  ;;  %v1934_v62 = vpop.f32.mrb[39].mxu0  ;;  %v1975_v42 = vpop.f32.mrb[39].mxu1  ;;  %v2562_v40 = vmul.f32 -1.442695, %v1979_v37 }
 0xd56   : > { %v2561_v43 = vmul.f32 -1.442695, %v1978_v22 }
 0xd57   : > { %2919 = vpow2.f32 %v2560_v45  ;;  %v4008_v45 = vclamps-f32 %v3804_v30, 3.0  ;;  %v2052_v30 = vld [vmem:[%s2051_s5] sm:$0xff] }
 0xd58   : > { %2921 = vpow2.f32 %v2561_v43 }
 0xd59   : > { %2923 = vtanh.f32 %v1980_v38 }
 0xd5a   : > { %2925 = vpow2.f32 %v2562_v40 }
 0xd61   : > { %v2920_v44 = vpop.eup %2919 }
 0xd62   : > { %v2922_v47 = vpop.eup %2921  ;;  %v1990_v39 = vadd.f32 1.0, %v2920_v44 }
 0xd63   : > { %v1991_v48 = vadd.f32 1.0, %v2922_v47  ;;  %v2924_v51 = vpop.eup %2923 }
 0xd64   : > { %2927 = vrcp.f32 %v1990_v39  ;;  %v2926_v32 = vpop.eup %2925 }
 0xd65   : > { %2929 = vrcp.f32 %v1991_v48  ;;  %v1992_v35 = vadd.f32 1.0, %v2926_v32 }
 0xd67   : > { %2931 = vrcp.f32 %v1992_v35 }
 0xd6e   : > { %v2928_v22 = vpop.eup %2927 }
 0xd6f   : > { %v2930_v34 = vpop.eup %2929  ;;  %v2001_v50 = vmul.f32 %v2928_v22, %v2924_v51 }
 0xd70   : > { %v2000_v49 = vmul.f32 %v2930_v34, %v4008_v45 }
 0xd71   : > { %v2932_v40 = vpop.eup %2931 }
 0xd72   : > { %v3883_v37 = vadd.f32 %v2001_v50, %v2000_v49 }
 0xd74   : > { %v2563_v44 = vclamps-f32 %v3883_v37, 3.0 }
 0xd76   : > { %2933 = vtanh.f32 %v2563_v44 }
 0xd80   : > { %v2934_v62 = vpop.eup %2933 }
 0xd81   : > { %v2006_v42 = vmul.f32 %v2934_v62, %v2932_v40 }
 0xd83   : > { %v2007_v43 = vpack.c.bf16 %v2006_v42, %v2006_v42 }
 0xd85   : > { %2789 = vmatmul.mubr.bf16.vlgmr.msra.gmra.mrb[40].mxu0 %v2007_v43 }
 0xe58   : > { %v2042_v31 = vpop.f32.mrb[40].mxu0 }
 0xe59   : > { %v2564_v33 = vclamps-f32 %v2042_v31, 3.0  ;;  %v2790_v46 = vpop.f32.mrb[41].mxu0 }
 0xe5a   : > { %v2045_v38 = vpop.f32.mrb[42].mxu0 }
 0xe5b   : > { %v2053_v47 = vadd.f32 %v2564_v33, %v2052_v30  ;;  %v2791_v39 = vpop.f32.mrb[43].mxu0 }
 0xe5d   : > { %2055 = vst [vmem:[%s2054_s21] sm:$0xff] %v2053_v47 }
 0xe5e   : > { %2969 = dma.done.wait [#allocation3 + $0x1], 256 }
 0xe5f   : > { %2970 = vsyncadd [#allocation3 + $0x1], 4294967040  ;;  %2066 = vmatpush1.bf16.msra.mxu1 %v3197_v53  ;;  %2107 = vmatpush1.bf16.msra.mxu0 %v3210_v56  ;;  %v2064_v52 = vpack.c.bf16 %v2564_v33, %v2564_v33  ;;  %v4009_v53 = vld [vmem:[#allocation21_spill] sm:$0xff]  ;;  %s2571_s22 = sshll.u32 %s3814_s11, 3 }
 0xe60   : > { %2067 = vmatprep.subr.bf16.mxu1 %v3201_v54  ;;  %2108 = vmatprep.subr.bf16.mxu0 %v3214_v57  ;;  %v2060_v54 = vunpack.c.l.bf16 %v4009_v53  ;;  %v2061_v55 = vunpack.c.h.bf16 %v4009_v53  ;;  %s2221_s23 = scalar_lea.vmem %s3028_s26, %s2571_s22  ;;  %s2224_s24 = scalar_lea.vmem %s3033_s29, %s2571_s22 }
 0xe61   : > { %2097 = vmatprep.mubr.bf16.mxu1 %v3986_v41  ;;  %2138 = vmatprep.mubr.bf16.mxu0 %v3986_v41 }
 0xe63   : > { %2068 = vmatpush1.bf16.msra.mxu1 %v3219_v58  ;;  %2109 = vmatpush1.bf16.msra.mxu0 %v3230_v60 }
 0xe64   : > { %2069 = vmatprep.subr.bf16.mxu1 %v3225_v59  ;;  %2110 = vmatprep.subr.bf16.mxu0 %v3235_v61 }
 0xe67   : > { %2070 = vmatpush1.bf16.msra.mxu1 %v3241_v63  ;;  %2111 = vmatpush1.bf16.msra.mxu0 %v3251_v1 }
 0xe68   : > { %2071 = vmatprep.subr.bf16.mxu1 %v3246_v0  ;;  %2112 = vmatprep.subr.bf16.mxu0 %v3256_v2 }
 0xe6b   : > { %2072 = vmatpush1.bf16.msra.mxu1 %v3262_v3  ;;  %2113 = vmatpush1.bf16.msra.mxu0 %v3272_v5  ;;  %v4010_v5 = vld [vmem:[#allocation22_spill] sm:$0xff] }
 0xe6c   : > { %2073 = vmatprep.subr.bf16.mxu1 %v3267_v4  ;;  %2114 = vmatprep.subr.bf16.mxu0 %v3277_v6  ;;  %v2062_v6 = vunpack.c.l.bf16 %v4010_v5 }
 0xe6f   : > { %2074 = vmatpush1.bf16.msra.mxu1 %v3282_v7  ;;  %2115 = vmatpush1.bf16.msra.mxu0 %v3292_v9  ;;  %v2063_v7 = vunpack.c.h.bf16 %v4010_v5 }
 0xe70   : > { %2075 = vmatprep.subr.bf16.mxu1 %v3287_v8  ;;  %2116 = vmatprep.subr.bf16.mxu0 %v3297_v10 }
 0xe73   : > { %2076 = vmatpush1.bf16.msra.mxu1 %v3302_v11  ;;  %2117 = vmatpush1.bf16.msra.mxu0 %v3312_v13 }
 0xe74   : > { %2077 = vmatprep.subr.bf16.mxu1 %v3307_v12  ;;  %2118 = vmatprep.subr.bf16.mxu0 %v3317_v14 }
 0xe77   : > { %2078 = vmatpush1.bf16.msra.mxu1 %v3322_v15  ;;  %2119 = vmatpush1.bf16.msra.mxu0 %v3332_v17 }
 0xe78   : > { %2079 = vmatprep.subr.bf16.mxu1 %v3327_v16  ;;  %2120 = vmatprep.subr.bf16.mxu0 %v3337_v18 }
 0xe7b   : > { %2080 = vmatpush1.bf16.msra.mxu1 %v3342_v19  ;;  %2121 = vmatpush1.bf16.msra.mxu0 %v3348_v20 }
 0xe7c   : > { %2792 = vmatprep.subr.bf16.mxu1 %v3982_v36 }
 0xe7e   : > { %2098 = vmatmul.mubr.bf16.vlgmr.msra.gmra.mrb[40].mxu1 %v2064_v52  ;;  %2139 = vmatmul.mubr.bf16.vlgmr.msra.gmra.mrb[44].mxu0 %v2064_v52 }
 0xe7f   : > { %2793 = vmatpush3.bf16.msra.mxu1 %v3357_v21  ;;  %2808 = vmatprep.mubr.msk.bf16.mxu1 %vm2977_vm0, %v3982_v36 }
 0xe80   : > { %2794 = vmatprep.subr.bf16.mxu1 %v3982_v36 }
 0xe83   : > { %2795 = vmatpush3.bf16.msra.mxu1 %v3364_v23 }
 0xe84   : > { %2796 = vmatprep.subr.bf16.mxu1 %v3982_v36 }
 0xe87   : > { %2797 = vmatpush3.bf16.msra.mxu1 %v3370_v24 }
 0xe88   : > { %2798 = vmatprep.subr.bf16.mxu1 %v3982_v36 }
 0xe8b   : > { %2799 = vmatpush3.bf16.msra.mxu1 %v3376_v25 }
 0xe8c   : > { %2800 = vmatprep.subr.bf16.mxu1 %v3982_v36 }
 0xe8f   : > { %2801 = vmatpush3.bf16.msra.mxu1 %v3382_v26 }
 0xe90   : > { %2802 = vmatprep.subr.bf16.mxu1 %v3982_v36 }
 0xe93   : > { %2803 = vmatpush3.bf16.msra.mxu1 %v3387_v27 }
 0xe94   : > { %2804 = vmatprep.subr.bf16.mxu1 %v3982_v36 }
 0xe97   : > { %2805 = vmatpush3.bf16.msra.mxu1 %v3395_v28 }
 0xe98   : > { %2806 = vmatprep.subr.bf16.mxu1 %v3982_v36  ;;  %v2222_v36 = vld [vmem:[%s2221_s23] sm:$0xff] }
 0xe9b   : > { %2807 = vmatpush3.bf16.msra.mxu1 %v3401_v29 }
 0xf51   : > { %v2099_v56 = vpop.f32.mrb[40].mxu1  ;;  %v2140_v57 = vpop.f32.mrb[44].mxu0 }
 0xf52   : > { %v2147_v58 = vadd.f32 %v2099_v56, %v2060_v54  ;;  %v2101_v59 = vpop.f32.mrb[41].mxu1  ;;  %v2142_v60 = vpop.f32.mrb[45].mxu0  ;;  %v2149_v8 = vadd.f32 %v2140_v57, %v2062_v6 }
 0xf53   : > { %v2148_v61 = vadd.f32 %v2101_v59, %v2061_v55  ;;  %v2103_v63 = vpop.f32.mrb[42].mxu1  ;;  %v2144_v0 = vpop.f32.mrb[46].mxu0  ;;  %v2150_v9 = vadd.f32 %v2142_v60, %v2063_v7 }
 0xf54   : > { %v2566_v1 = vmul.f32 -1.442695, %v2147_v58  ;;  %v2104_v2 = vpop.f32.mrb[43].mxu1  ;;  %v2145_v3 = vpop.f32.mrb[47].mxu0  ;;  %v2568_v10 = vmul.f32 -1.442695, %v2149_v8 }
 0xf55   : > { %v2567_v4 = vmul.f32 -1.442695, %v2148_v61 }
 0xf56   : > { %2935 = vpow2.f32 %v2566_v1 }
 0xf57   : > { %2937 = vpow2.f32 %v2567_v4 }
 0xf58   : > { %2939 = vtanh.f32 %v2150_v9 }
 0xf59   : > { %2941 = vpow2.f32 %v2568_v10 }
 0xf60   : > { %v2936_v11 = vpop.eup %2935 }
 0xf61   : > { %v2938_v12 = vpop.eup %2937  ;;  %v2160_v13 = vadd.f32 1.0, %v2936_v11 }
 0xf62   : > { %v2161_v14 = vadd.f32 1.0, %v2938_v12  ;;  %v2940_v15 = vpop.eup %2939 }
 0xf63   : > { %2943 = vrcp.f32 %v2160_v13  ;;  %v2942_v16 = vpop.eup %2941 }
 0xf64   : > { %2945 = vrcp.f32 %v2161_v14  ;;  %v2162_v21 = vadd.f32 1.0, %v2942_v16 }
 0xf66   : > { %2947 = vrcp.f32 %v2162_v21 }
 0xf6d   : > { %v2944_v17 = vpop.eup %2943 }
 0xf6e   : > { %v2946_v18 = vpop.eup %2945  ;;  %v2171_v19 = vmul.f32 %v2944_v17, %v2940_v15 }
 0xf6f   : > { %v2170_v20 = vmul.f32 %v2946_v18, %v2563_v44 }
 0xf70   : > { %v2948_v25 = vpop.eup %2947 }
 0xf71   : > { %v2172_v23 = vadd.f32 %v2171_v19, %v2170_v20 }
 0xf73   : > { %v2569_v24 = vclamps-f32 %v2172_v23, 3.0 }
 0xf75   : > { %2949 = vtanh.f32 %v2569_v24 }
 0xf7f   : > { %v2950_v26 = vpop.eup %2949 }
 0xf80   : > { %v2176_v27 = vmul.f32 %v2950_v26, %v2948_v25 }
 0xf82   : > { %v2177_v28 = vpack.c.bf16 %v2176_v27, %v2176_v27 }
 0xf84   : > { %2809 = vmatmul.mubr.bf16.vlgmr.msra.gmra.mrb[44].mxu1 %v2177_v28 }
0x1057   : > { %v2212_v29 = vpop.f32.mrb[44].mxu1 }
0x1058   : > { %v2570_v41 = vclamps-f32 %v2212_v29, 3.0  ;;  %v2810_v48 = vpop.f32.mrb[45].mxu1 }
0x1059   : > { %v2215_v51 = vpop.f32.mrb[46].mxu1 }
0x105a   : > { %v2223_v32 = vadd.f32 %v2570_v41, %v2222_v36  ;;  %v2811_v22 = vpop.f32.mrb[47].mxu1 }
0x105c   : > { %2225 = vst [vmem:[%s2224_s24] sm:$0xff] %v2223_v32 }
0x105d PF: > { %s14_s15 = sadd.s32 1, %s2973_s15  }
0x105e   : > { %p11_p5 = scmp.ge.s32.totalorder %s14_s15, 4  }
0x1060   :  { %13 = sbr.rel (!%p11_p5) target bundleno = 1 (0x1), region = 431 }
0x1067   :  { %2247 = vsyncmov [#allocation3] }
0x106a   :  { %s2248_s25 = vpop.sfrf %2247 }
0x106b   :  { %p2574_p6 = scmp.ne.s32.totalorder %s2248_s25, 0 }
0x106d   :  { %2252 = shalt.err (%p2574_p6)  }
0x106e   :  { %2254 = vsyncmov [#allocation3 + $0x1] }
0x1071   :  { %s2255_s26 = vpop.sfrf %2254 }
0x1072   :  { %p2575_p7 = scmp.ne.s32.totalorder %s2255_s26, 0 }
0x1074   :  { %2259 = shalt.err (%p2575_p7)  }

</bundles_post_ra>
